<compile_context>
chip_gen: v5e
topology: v5e:2x2
jax: 0.10.0
libtpu: 0.0.40
codegen_flags: <defaults>
</compile_context>

<pallas_src>
import functools

import jax
import jax.numpy as jnp
import numpy as np
from jax.experimental import pallas as pl
from jax.experimental.pallas import tpu as pltpu

F32 = jnp.float32
EPS = 1e-5
PREC = jax.lax.Precision.HIGHEST
VMEM_SPEC = pl.BlockSpec(memory_space=pltpu.MemorySpace.VMEM)


# ---------------------------------------------------------------------------
# Host-side (eager, once-per-model) weight re-layout: ConvTranspose2d -> dense
# matrices acting on the per-sample flat activation  a[n, (y*W + x)*C + c].
# ---------------------------------------------------------------------------
def _stem_matrix(w_pt):
    # ConvTranspose2d(nz, C, 4, 1, 0) weight [nz, C, 4, 4]:
    #   out[n, c, ky, kx] = sum_i z[n, i] * w[i, c, ky, kx]
    # -> [nz, 16*C] with columns ordered ((ky*4 + kx), c)  (spatial-major).
    nz, c = int(w_pt.shape[0]), int(w_pt.shape[1])
    return jnp.transpose(w_pt.astype(F32), (0, 2, 3, 1)).reshape(nz, 16 * c)


@functools.lru_cache(maxsize=None)
def _upconv_layout(cin, cout, hin, win, kh=4, kw=4, stride=2, pad=1):
    # Static (numpy) gather index + mask mapping the flattened PyTorch weight
    # [Cin, Cout, kH, kW] onto the dense matrix
    #   M[(iy*Win+ix)*Cin + ci, (oy*Wout+ox)*Cout + co]
    # with  oy = s*iy - p + ky,  ox = s*ix - p + kx  (zero padding and the
    # stride-2 sub-pixel interleave are absorbed into the column order).
    hout, wout = stride * hin, stride * win
    iy, ix, ky, kx, ci, co = np.meshgrid(
        np.arange(hin), np.arange(win), np.arange(kh), np.arange(kw),
        np.arange(cin), np.arange(cout), indexing="ij")
    oy = stride * iy - pad + ky
    ox = stride * ix - pad + kx
    valid = (oy >= 0) & (oy < hout) & (ox >= 0) & (ox < wout)
    rows = ((iy * win + ix) * cin + ci)[valid]
    cols = ((oy * wout + ox) * cout + co)[valid]
    widx = ((((ci * cout) + co) * kh + ky) * kw + kx)[valid]
    nrow, ncol = hin * win * cin, hout * wout * cout
    # Each (row, col) must receive at most one weight tap, otherwise the
    # gather formulation would drop contributions (holds for k=4, s=2, p=1).
    flat_rc = rows.astype(np.int64) * ncol + cols
    assert np.unique(flat_rc).size == flat_rc.size, "overlapping taps -> need scatter-add"
    idx = np.zeros((nrow, ncol), np.int32)
    msk = np.zeros((nrow, ncol), np.float32)
    idx[rows, cols] = widx
    msk[rows, cols] = 1.0
    return idx, msk


def _upconv_matrix(w_pt, hin, win):
    cin, cout = int(w_pt.shape[0]), int(w_pt.shape[1])
    idx, msk = _upconv_layout(cin, cout, hin, win)
    # One gather + one multiply (static index/mask) — no on-device scatter.
    return w_pt.astype(F32).reshape(-1)[idx] * jnp.asarray(msk)


def _chan_mats(spatial, c):
    # 0/1 matrices for per-channel reduce / broadcast over the flat
    # (spatial-major, channel-minor) layout:
    #   R  [S*C, C]  flat -> per-channel sum;   R^T  [C, S*C]  channel -> flat.
    r = np.tile(np.eye(c, dtype=np.float32), (spatial, 1))
    return jnp.asarray(r), jnp.asarray(r.T)


# ---------------------------------------------------------------------------
# The single fused kernel.
# ---------------------------------------------------------------------------
def _make_decoder_kernel(n_mid, counts):
    # counts[i] = N * H_i * W_i  (elements per channel) for BN layer i.

    def bn_relu(a, r, rt, gb, inv_cnt):
        # a: [N, S*C] flat activation; training-mode BatchNorm (biased var,
        # eps=1e-5) + ReLU.  Only TWO MXU dots per BN layer:
        #   1) stacked reduce   [2, S*C] @ [S*C, C] -> [sum; sum_sq] per channel
        #   2) stacked broadcast [2, C] @ [C, S*C]  -> [scale; shift] flat
        mom = jnp.concatenate([jnp.sum(a, axis=0, keepdims=True),
                               jnp.sum(a * a, axis=0, keepdims=True)], axis=0)
        stats = jnp.dot(mom, r, preferred_element_type=F32, precision=PREC) * inv_cnt
        mean, ex2 = stats[0:1], stats[1:2]                       # [1, C] each
        scale = gb[0:1] * jax.lax.rsqrt((ex2 - mean * mean) + EPS)
        shift = gb[1:2] - mean * scale
        ss = jnp.dot(jnp.concatenate([scale, shift], axis=0), rt,
                     preferred_element_type=F32, precision=PREC)  # [2, S*C]
        return jnp.maximum(a * ss[0:1] + ss[1:2], 0.0)

    def kernel(*refs):
        out_ref = refs[-1]
        z_ref, w0_ref, r0_ref, rt0_ref, gb0_ref = refs[:5]
        # Stem: one lane-dense matmul  [N, nz] @ [nz, 16*C0].
        a = jnp.dot(z_ref[...], w0_ref[...],
                    preferred_element_type=F32, precision=PREC)
        a = bn_relu(a, r0_ref[...], rt0_ref[...], gb0_ref[...], 1.0 / counts[0])
        # Mid up-conv layers: one matmul each (pad + interleave baked in).
        for li in range(n_mid):
            m_ref, r_ref, rt_ref, gb_ref = refs[5 + 4 * li: 9 + 4 * li]
            a = jnp.dot(a, m_ref[...], preferred_element_type=F32, precision=PREC)
            a = bn_relu(a, r_ref[...], rt_ref[...], gb_ref[...],
                        1.0 / counts[li + 1])
        # Final up-conv + tanh; single lane-dense store, row-major (y*W + x).
        mf_ref = refs[5 + 4 * n_mid]
        out_ref[...] = jnp.tanh(
            jnp.dot(a, mf_ref[...], preferred_element_type=F32, precision=PREC))

    return kernel


# ---------------------------------------------------------------------------
# prepare (once, eager) + apply (jit-friendly, just the fused pallas_call).
# ---------------------------------------------------------------------------
def prepare_decoder(params, isize):
    """Lower weights to flat dense matrices ONCE, outside the per-call path."""
    # Dense-matrix lowering is sized for small decoders: isize <= 32 keeps the
    # whole-array-resident footprint under ~20 MiB (fits v7x's 64 MiB VMEM and
    # v5e/v6e once vmem_limit_bytes is raised above the 16/32 MiB defaults).
    assert isize % 16 == 0 and isize <= 32, "fused dense path sized for small decoders"
    c0 = int(params["stem_w"].shape[1])
    r0, rt0 = _chan_mats(16, c0)
    flat = [_stem_matrix(params["stem_w"]), r0, rt0,
            jnp.stack([params["stem_g"], params["stem_b"]]).astype(F32)]
    spatials = [16]
    csize = 4
    for layer in params["mid"]:
        cout = int(layer["w"].shape[1])
        m = _upconv_matrix(layer["w"], csize, csize)
        csize *= 2
        r, rt = _chan_mats(csize * csize, cout)
        flat += [m, r, rt, jnp.stack([layer["g"], layer["b"]]).astype(F32)]
        spatials.append(csize * csize)
    flat.append(_upconv_matrix(params["final_w"], csize, csize))
    assert 2 * csize == isize
    meta = dict(n_mid=len(params["mid"]), spatials=tuple(spatials), isize=isize)
    return tuple(flat), meta


def dc_decoder_apply(z_nchw, flat, *, n_mid, spatials, isize):
    # z: [N, nz, 1, 1] (NCHW) -> image [N, 1, isize, isize] (NCHW).
    # Single no-grid pallas_call; all intermediates live in VMEM/vregs, one
    # lane-dense store (last dim = isize^2, a multiple of 128).  No batch grid:
    # training-mode BN statistics are over the full batch, so splitting N
    # across grid steps / TensorCores would change semantics.
    n = z_nchw.shape[0]
    z2d = z_nchw[:, :, 0, 0].astype(F32)
    args = (z2d,) + tuple(flat)
    counts = tuple(n * s for s in spatials)

    # Advisory cost estimate so XLA can overlap this tiny kernel.
    flops = 2 * n * flat[0].shape[0] * flat[0].shape[1]              # stem
    trans = n * isize * isize                                        # tanh
    for li in range(n_mid):
        m = flat[4 + 4 * li]
        flops += 2 * n * m.shape[0] * m.shape[1]
    mf = flat[4 + 4 * n_mid]
    flops += 2 * n * mf.shape[0] * mf.shape[1]
    for r in [flat[1]] + [flat[5 + 4 * li] for li in range(n_mid)]:  # BN dots
        flops += 8 * r.shape[0] * r.shape[1]
        trans += r.shape[1]                                          # rsqrt

    total_bytes = sum(int(np.prod(a.shape)) * a.dtype.itemsize for a in args)
    total_bytes += n * isize * isize * 4
    # Whole-array VMEM residency (no grid => no double buffering) + headroom.
    vmem_limit = min(int(2 * total_bytes) + (16 << 20), 96 << 20)

    kernel = _make_decoder_kernel(n_mid, counts)
    out_flat = pl.pallas_call(
        kernel,
        out_shape=jax.ShapeDtypeStruct((n, isize * isize), F32),
        in_specs=[VMEM_SPEC] * len(args),
        out_specs=VMEM_SPEC,
        compiler_params=pltpu.CompilerParams(vmem_limit_bytes=vmem_limit),
        cost_estimate=pl.CostEstimate(flops=int(flops),
                                      transcendentals=int(trans),
                                      bytes_accessed=int(total_bytes)),
    )(*args)
    return out_flat.reshape(n, 1, isize, isize)


def dc_decoder_forward(z_nchw, params, isize):
    # Convenience wrapper; prefer prepare_decoder(...) once + jit of the apply.
    flat, meta = prepare_decoder(params, isize)
    return dc_decoder_apply(z_nchw, flat, **meta)


# ---------------------------------------------------------------------------
# Deterministic parameter init (same shapes as DCDecoder.__init__).
# ---------------------------------------------------------------------------
def init_params(key, nz, ngf, isize):
    assert isize % 16 == 0
    cngf, tisize = ngf // 2, 4
    while tisize != isize:
        cngf *= 2
        tisize *= 2
    keys = iter(jax.random.split(key, 16))
    params = {
        "stem_w": 0.1 * jax.random.normal(next(keys), (nz, cngf, 4, 4), F32),
        "stem_g": jnp.ones((cngf,), F32),
        "stem_b": jnp.zeros((cngf,), F32),
        "mid": [],
    }
    csize = 4
    while csize < isize // 2:
        params["mid"].append(dict(
            w=0.1 * jax.random.normal(next(keys), (cngf, cngf // 2, 4, 4), F32),
            g=jnp.ones((cngf // 2,), F32),
            b=jnp.zeros((cngf // 2,), F32),
        ))
        cngf //= 2
        csize *= 2
    params["final_w"] = 0.1 * jax.random.normal(next(keys), (cngf, 1, 4, 4), F32)
    return params


# ---------------------------------------------------------------------------
# Pure-JAX reference (PyTorch ConvTranspose2d / training-mode BN semantics).
# ---------------------------------------------------------------------------
def _convt_ref(x, w_pt, stride, pad):
    k = w_pt.shape[2]
    w = jnp.transpose(w_pt[:, :, ::-1, ::-1], (1, 0, 2, 3))  # [Cout, Cin, kH, kW]
    return jax.lax.conv_general_dilated(
        x, w, window_strides=(1, 1),
        padding=[(k - 1 - pad, k - 1 - pad)] * 2,
        lhs_dilation=(stride, stride),
        dimension_numbers=("NCHW", "OIHW", "NCHW"),
        precision=PREC)


def _bn_relu_ref(x, g, b):
    mean = jnp.mean(x, axis=(0, 2, 3), keepdims=True)
    var = jnp.mean((x - mean) ** 2, axis=(0, 2, 3), keepdims=True)
    y = (x - mean) * jax.lax.rsqrt(var + EPS)
    return jnp.maximum(y * g.reshape(1, -1, 1, 1) + b.reshape(1, -1, 1, 1), 0.0)


def dc_decoder_ref(z, params):
    h = _convt_ref(z, params["stem_w"], 1, 0)
    h = _bn_relu_ref(h, params["stem_g"], params["stem_b"])
    for layer in params["mid"]:
        h = _convt_ref(h, layer["w"], 2, 1)
        h = _bn_relu_ref(h, layer["g"], layer["b"])
    h = _convt_ref(h, params["final_w"], 2, 1)
    return jnp.tanh(h)


if __name__ == "__main__":
    N, nz, ngf, isize = 2, 8, 8, 16
    key = jax.random.PRNGKey(0)
    kz, kp = jax.random.split(key)
    params = init_params(kp, nz, ngf, isize)
    z = jax.random.normal(kz, (N, nz, 1, 1), F32)

    # Weight -> dense-matrix lowering happens ONCE, eagerly, outside jit;
    # the jitted forward is just the single fused pallas_call.
    flat, meta = prepare_decoder(params, isize)
    fwd = jax.jit(functools.partial(dc_decoder_apply, **meta))
    out = jax.block_until_ready(fwd(z, flat))
    assert out.shape == (N, 1, isize, isize), out.shape

    ref = jax.block_until_ready(dc_decoder_ref(z, params))
    np.testing.assert_allclose(np.asarray(out), np.asarray(ref), atol=1e-3, rtol=1e-3)

    print("KERNEL_OK")
</pallas_src>

<mosaic_0001>
module attributes {stable_mosaic.version = 11 : i64} {
  func.func @kernel(%arg0: memref<2x8xf32, #tpu.memory_space<vmem>>, %arg1: memref<8x256xf32, #tpu.memory_space<vmem>>, %arg2: memref<256x16xf32, #tpu.memory_space<vmem>>, %arg3: memref<16x256xf32, #tpu.memory_space<vmem>>, %arg4: memref<2x16xf32, #tpu.memory_space<vmem>>, %arg5: memref<256x512xf32, #tpu.memory_space<vmem>>, %arg6: memref<512x8xf32, #tpu.memory_space<vmem>>, %arg7: memref<8x512xf32, #tpu.memory_space<vmem>>, %arg8: memref<2x8xf32, #tpu.memory_space<vmem>>, %arg9: memref<512x256xf32, #tpu.memory_space<vmem>>, %arg10: memref<2x256xf32, #tpu.memory_space<vmem>>) attributes {dimension_semantics = [], scalar_prefetch = 0 : i64, scratch_operands = 0 : i64, tpu.core_type = #tpu.core_type<tc>} {
    %c0 = arith.constant 0 : index
    %c0_0 = arith.constant 0 : index
    %0 = vector.load %arg0[%c0, %c0_0] : memref<2x8xf32, #tpu.memory_space<vmem>>, vector<2x8xf32>
    %c0_1 = arith.constant 0 : index
    %c0_2 = arith.constant 0 : index
    %1 = vector.load %arg1[%c0_1, %c0_2] : memref<8x256xf32, #tpu.memory_space<vmem>>, vector<8x256xf32>
    %cst = arith.constant dense<0.000000e+00> : vector<2x256xf32>
    %2 = tpu.matmul %0, %1, %cst {dimension_numbers = #tpu.dot_dimension_numbers<[1], [0], [0], [1], [0, 0, 1, 1], [], []>, precision = #tpu.contract_precision<fp32>} : vector<2x8xf32>, vector<8x256xf32>, vector<2x256xf32> -> vector<2x256xf32>
    %c0_3 = arith.constant 0 : index
    %c0_4 = arith.constant 0 : index
    %3 = vector.load %arg2[%c0_3, %c0_4] : memref<256x16xf32, #tpu.memory_space<vmem>>, vector<256x16xf32>
    %c0_5 = arith.constant 0 : index
    %c0_6 = arith.constant 0 : index
    %4 = vector.load %arg3[%c0_5, %c0_6] : memref<16x256xf32, #tpu.memory_space<vmem>>, vector<16x256xf32>
    %c0_7 = arith.constant 0 : index
    %c0_8 = arith.constant 0 : index
    %5 = vector.load %arg4[%c0_7, %c0_8] : memref<2x16xf32, #tpu.memory_space<vmem>>, vector<2x16xf32>
    %cst_9 = arith.constant dense<0.000000e+00> : vector<256xf32>
    %6 = vector.multi_reduction <add>, %2, %cst_9 [0] : vector<2x256xf32> to vector<256xf32>
    %7 = vector.shape_cast %6 : vector<256xf32> to vector<1x256xf32>
    %8 = arith.mulf %2, %2 : vector<2x256xf32>
    %cst_10 = arith.constant dense<0.000000e+00> : vector<256xf32>
    %9 = vector.multi_reduction <add>, %8, %cst_10 [0] : vector<2x256xf32> to vector<256xf32>
    %10 = vector.shape_cast %9 : vector<256xf32> to vector<1x256xf32>
    %11 = tpu.concatenate %7, %10 in 0 : vector<1x256xf32>, vector<1x256xf32> -> vector<2x256xf32>
    %cst_11 = arith.constant dense<0.000000e+00> : vector<2x16xf32>
    %12 = tpu.matmul %11, %3, %cst_11 {dimension_numbers = #tpu.dot_dimension_numbers<[1], [0], [0], [1], [0, 0, 1, 1], [], []>, precision = #tpu.contract_precision<fp32>} : vector<2x256xf32>, vector<256x16xf32>, vector<2x16xf32> -> vector<2x16xf32>
    %cst_12 = arith.constant 3.125000e-02 : f32
    %13 = vector.broadcast %cst_12 : f32 to vector<2x16xf32>
    %14 = arith.mulf %12, %13 : vector<2x16xf32>
    %15 = vector.extract_strided_slice %14 {offsets = [0, 0], sizes = [1, 16], strides = [1, 1]} : vector<2x16xf32> to vector<1x16xf32>
    %16 = vector.extract_strided_slice %14 {offsets = [1, 0], sizes = [1, 16], strides = [1, 1]} : vector<2x16xf32> to vector<1x16xf32>
    %17 = vector.extract_strided_slice %5 {offsets = [0, 0], sizes = [1, 16], strides = [1, 1]} : vector<2x16xf32> to vector<1x16xf32>
    %18 = arith.mulf %15, %15 : vector<1x16xf32>
    %19 = arith.subf %16, %18 : vector<1x16xf32>
    %cst_13 = arith.constant 9.99999974E-6 : f32
    %20 = vector.broadcast %cst_13 : f32 to vector<1x16xf32>
    %21 = arith.addf %19, %20 : vector<1x16xf32>
    %22 = math.rsqrt %21 : vector<1x16xf32>
    %23 = arith.mulf %17, %22 : vector<1x16xf32>
    %24 = vector.extract_strided_slice %5 {offsets = [1, 0], sizes = [1, 16], strides = [1, 1]} : vector<2x16xf32> to vector<1x16xf32>
    %25 = arith.mulf %15, %23 : vector<1x16xf32>
    %26 = arith.subf %24, %25 : vector<1x16xf32>
    %27 = tpu.concatenate %23, %26 in 0 : vector<1x16xf32>, vector<1x16xf32> -> vector<2x16xf32>
    %cst_14 = arith.constant dense<0.000000e+00> : vector<2x256xf32>
    %28 = tpu.matmul %27, %4, %cst_14 {dimension_numbers = #tpu.dot_dimension_numbers<[1], [0], [0], [1], [0, 0, 1, 1], [], []>, precision = #tpu.contract_precision<fp32>} : vector<2x16xf32>, vector<16x256xf32>, vector<2x256xf32> -> vector<2x256xf32>
    %29 = vector.extract_strided_slice %28 {offsets = [0, 0], sizes = [1, 256], strides = [1, 1]} : vector<2x256xf32> to vector<1x256xf32>
    %30 = vector.broadcast %29 : vector<1x256xf32> to vector<2x256xf32>
    %31 = arith.mulf %2, %30 : vector<2x256xf32>
    %32 = vector.extract_strided_slice %28 {offsets = [1, 0], sizes = [1, 256], strides = [1, 1]} : vector<2x256xf32> to vector<1x256xf32>
    %33 = vector.broadcast %32 : vector<1x256xf32> to vector<2x256xf32>
    %34 = arith.addf %31, %33 : vector<2x256xf32>
    %cst_15 = arith.constant 0.000000e+00 : f32
    %35 = vector.broadcast %cst_15 : f32 to vector<2x256xf32>
    %36 = arith.maximumf %34, %35 : vector<2x256xf32>
    %c0_16 = arith.constant 0 : index
    %c0_17 = arith.constant 0 : index
    %37 = vector.load %arg5[%c0_16, %c0_17] : memref<256x512xf32, #tpu.memory_space<vmem>>, vector<256x512xf32>
    %cst_18 = arith.constant dense<0.000000e+00> : vector<2x512xf32>
    %38 = tpu.matmul %36, %37, %cst_18 {dimension_numbers = #tpu.dot_dimension_numbers<[1], [0], [0], [1], [0, 0, 1, 1], [], []>, precision = #tpu.contract_precision<fp32>} : vector<2x256xf32>, vector<256x512xf32>, vector<2x512xf32> -> vector<2x512xf32>
    %c0_19 = arith.constant 0 : index
    %c0_20 = arith.constant 0 : index
    %39 = vector.load %arg6[%c0_19, %c0_20] : memref<512x8xf32, #tpu.memory_space<vmem>>, vector<512x8xf32>
    %c0_21 = arith.constant 0 : index
    %c0_22 = arith.constant 0 : index
    %40 = vector.load %arg7[%c0_21, %c0_22] : memref<8x512xf32, #tpu.memory_space<vmem>>, vector<8x512xf32>
    %c0_23 = arith.constant 0 : index
    %c0_24 = arith.constant 0 : index
    %41 = vector.load %arg8[%c0_23, %c0_24] : memref<2x8xf32, #tpu.memory_space<vmem>>, vector<2x8xf32>
    %cst_25 = arith.constant dense<0.000000e+00> : vector<512xf32>
    %42 = vector.multi_reduction <add>, %38, %cst_25 [0] : vector<2x512xf32> to vector<512xf32>
    %43 = vector.shape_cast %42 : vector<512xf32> to vector<1x512xf32>
    %44 = arith.mulf %38, %38 : vector<2x512xf32>
    %cst_26 = arith.constant dense<0.000000e+00> : vector<512xf32>
    %45 = vector.multi_reduction <add>, %44, %cst_26 [0] : vector<2x512xf32> to vector<512xf32>
    %46 = vector.shape_cast %45 : vector<512xf32> to vector<1x512xf32>
    %47 = tpu.concatenate %43, %46 in 0 : vector<1x512xf32>, vector<1x512xf32> -> vector<2x512xf32>
    %cst_27 = arith.constant dense<0.000000e+00> : vector<2x8xf32>
    %48 = tpu.matmul %47, %39, %cst_27 {dimension_numbers = #tpu.dot_dimension_numbers<[1], [0], [0], [1], [0, 0, 1, 1], [], []>, precision = #tpu.contract_precision<fp32>} : vector<2x512xf32>, vector<512x8xf32>, vector<2x8xf32> -> vector<2x8xf32>
    %cst_28 = arith.constant 7.812500e-03 : f32
    %49 = vector.broadcast %cst_28 : f32 to vector<2x8xf32>
    %50 = arith.mulf %48, %49 : vector<2x8xf32>
    %51 = vector.extract_strided_slice %50 {offsets = [0, 0], sizes = [1, 8], strides = [1, 1]} : vector<2x8xf32> to vector<1x8xf32>
    %52 = vector.extract_strided_slice %50 {offsets = [1, 0], sizes = [1, 8], strides = [1, 1]} : vector<2x8xf32> to vector<1x8xf32>
    %53 = vector.extract_strided_slice %41 {offsets = [0, 0], sizes = [1, 8], strides = [1, 1]} : vector<2x8xf32> to vector<1x8xf32>
    %54 = arith.mulf %51, %51 : vector<1x8xf32>
    %55 = arith.subf %52, %54 : vector<1x8xf32>
    %cst_29 = arith.constant 9.99999974E-6 : f32
    %56 = vector.broadcast %cst_29 : f32 to vector<1x8xf32>
    %57 = arith.addf %55, %56 : vector<1x8xf32>
    %58 = math.rsqrt %57 : vector<1x8xf32>
    %59 = arith.mulf %53, %58 : vector<1x8xf32>
    %60 = vector.extract_strided_slice %41 {offsets = [1, 0], sizes = [1, 8], strides = [1, 1]} : vector<2x8xf32> to vector<1x8xf32>
    %61 = arith.mulf %51, %59 : vector<1x8xf32>
    %62 = arith.subf %60, %61 : vector<1x8xf32>
    %63 = tpu.concatenate %59, %62 in 0 : vector<1x8xf32>, vector<1x8xf32> -> vector<2x8xf32>
    %cst_30 = arith.constant dense<0.000000e+00> : vector<2x512xf32>
    %64 = tpu.matmul %63, %40, %cst_30 {dimension_numbers = #tpu.dot_dimension_numbers<[1], [0], [0], [1], [0, 0, 1, 1], [], []>, precision = #tpu.contract_precision<fp32>} : vector<2x8xf32>, vector<8x512xf32>, vector<2x512xf32> -> vector<2x512xf32>
    %65 = vector.extract_strided_slice %64 {offsets = [0, 0], sizes = [1, 512], strides = [1, 1]} : vector<2x512xf32> to vector<1x512xf32>
    %66 = vector.broadcast %65 : vector<1x512xf32> to vector<2x512xf32>
    %67 = arith.mulf %38, %66 : vector<2x512xf32>
    %68 = vector.extract_strided_slice %64 {offsets = [1, 0], sizes = [1, 512], strides = [1, 1]} : vector<2x512xf32> to vector<1x512xf32>
    %69 = vector.broadcast %68 : vector<1x512xf32> to vector<2x512xf32>
    %70 = arith.addf %67, %69 : vector<2x512xf32>
    %cst_31 = arith.constant 0.000000e+00 : f32
    %71 = vector.broadcast %cst_31 : f32 to vector<2x512xf32>
    %72 = arith.maximumf %70, %71 : vector<2x512xf32>
    %c0_32 = arith.constant 0 : index
    %c0_33 = arith.constant 0 : index
    %73 = vector.load %arg9[%c0_32, %c0_33] : memref<512x256xf32, #tpu.memory_space<vmem>>, vector<512x256xf32>
    %cst_34 = arith.constant dense<0.000000e+00> : vector<2x256xf32>
    %74 = tpu.matmul %72, %73, %cst_34 {dimension_numbers = #tpu.dot_dimension_numbers<[1], [0], [0], [1], [0, 0, 1, 1], [], []>, precision = #tpu.contract_precision<fp32>} : vector<2x512xf32>, vector<512x256xf32>, vector<2x256xf32> -> vector<2x256xf32>
    %75 = math.tanh %74 : vector<2x256xf32>
    %c0_35 = arith.constant 0 : index
    %c0_36 = arith.constant 0 : index
    %76 = vector.load %arg10[%c0_35, %c0_36] : memref<2x256xf32, #tpu.memory_space<vmem>>, vector<2x256xf32>
    tpu.vector_store %arg10[%c0_35, %c0_36], %75 {strides = array<i32>} : memref<2x256xf32, #tpu.memory_space<vmem>>, vector<2x256xf32>,
    return
  }
}

</mosaic_0001>

<bundles_post_ra>
// kernel: dc_decoder_apply.1
= control target key start
LH: loop header
LB: loop body
LE: loop exit
PB: predicated region body
PF: predicated region fallthrough
CT: control target
= control target key end

     0   :  { %15 = vsyncpa [#allocation3], 0  ;;  %s15457_s0 = inlined_call_operand.vmem [shape: f32[2,8], index: 0, kind: input, shape index: {}]   ;;  %s15458_s1 = inlined_call_operand.vmem [shape: f32[8,256], index: 1, kind: input, shape index: {}]   ;;  %s15459_s2 = inlined_call_operand.vmem [shape: f32[256,16], index: 2, kind: input, shape index: {}]   ;;  %s15460_s3 = inlined_call_operand.vmem [shape: f32[16,256], index: 3, kind: input, shape index: {}]   ;;  %s15461_s4 = inlined_call_operand.vmem [shape: f32[2,16], index: 4, kind: input, shape index: {}]   ;;  %s15462_s5 = inlined_call_operand.hbm [shape: f32[256,512], index: 5, kind: input, shape index: {}]   ;;  %s15463_s6 = inlined_call_operand.vmem [shape: f32[512,8], index: 6, kind: input, shape index: {}]   ;;  %s15464_s7 = inlined_call_operand.vmem [shape: f32[8,512], index: 7, kind: input, shape index: {}]   ;;  %s15465_s8 = inlined_call_operand.vmem [shape: f32[2,8], index: 8, kind: input, shape index: {}]   ;;  %s15466_s9 = inlined_call_operand.hbm [shape: f32[512,256], index: 9, kind: input, shape index: {}]   ;;  %s15467_s10 = inlined_call_operand.vmem [shape: f32[2,256], index: 10, kind: output, shape index: {}]  }
   0x1   :  { %s31_s15 = sshll.u32 %s15462_s5, 4  ;;  %s32_s15 = int_to_ptr.hbm [resolvable:$true] %s31_s15 }
   0x2   :  { %16 = vsyncpa [#allocation5], 0  ;;  %s9401_s16 = smov [#allocation2]   ;;  %s50_s20 = sshll.u32 %s15466_s9, 4  ;;  %s51_s20 = int_to_ptr.hbm [resolvable:$true] %s50_s20 }
   0x3   :  { %s33_s17 = sshll.u32 %s9401_s16, 4  ;;  %s9402_s21 = smov 512   ;;  %s34_s17 = int_to_ptr.vmem [resolvable:$true] %s33_s17 }
   0x4   :  { %s9403_s22 = smov 32   ;;  %s9404_s23 = smov [#allocation4]  }
   0x5   :  { %39 = dma.hbm_to_vmem [thread:$0]  %s32_s15, 16384, %s34_s17, [#allocation3], %s9402_s21, %s9402_s21, %s9403_s22  }
   0x6   :  { %s52_s24 = sshll.u32 %s9404_s23, 4  ;;  %s9405_s25 = smov 256   ;;  %s53_s24 = int_to_ptr.vmem [resolvable:$true] %s52_s24 }
   0x7   :  { %s9406_s26 = smov 16  }
   0x8   :  { %58 = dma.hbm_to_vmem [thread:$0]  %s51_s20, 16384, %s53_s24, [#allocation5], %s9405_s25, %s9405_s25, %s9406_s26  }
   0x9   :  { %9397 = dma.done.wait [#allocation3], 16384  }
   0xa   :  { %9398 = vsyncadd [#allocation3], 4294950912 }
   0xb   :  { %9399 = dma.done.wait [#allocation5], 16384  }
   0xc   :  { %9400 = vsyncadd [#allocation5], 4294950912  ;;  %vm70_vm0 = vcmask 64512   ;;  %v68_v0 = vld [vmem:[%s15458_s1] sm:$0xff]  ;;  %v69_v2 = vld [vmem:[%s15458_s1 + $0x8] sm:$0xff]  ;;  %vm403_vm1 = vcmask 1041408  }
   0xd   :  { %v67_v1 = vld [vmem:[%s15457_s0] sm:$0x3]  ;;  %v89_v3 = vand.u32 4294901760, %v68_v0  ;;  %v235_v5 = vand.u32 4294901760, %v69_v2  ;;  %v381_v6 = vld [vmem:[%s15459_s2 + $0x78] sm:$0xff]  ;;  %v380_v7 = vld [vmem:[%s15459_s2 + $0x70] sm:$0xff] }
   0xe   :  { %v72_v4 = vsel %vm70_vm0, %v67_v1, 0  ;;  %v9486_v9 = vand.u32 4294901760, %v381_v6  ;;  %v379_v10 = vld [vmem:[%s15459_s2 + $0x68] sm:$0xff]  ;;  %v9491_v13 = vand.u32 4294901760, %v380_v7  ;;  %v378_v14 = vld [vmem:[%s15459_s2 + $0x60] sm:$0xff]  ;;  %v377_v20 = vld [vmem:[%s15459_s2 + $0x58] sm:$0xff] }
   0xf   :  { %v9484_v8 = vand.u32 4294901760, %v72_v4  ;;  %v116_v11 = vsub.f32 %v68_v0, %v89_v3  ;;  %166 = vmatpush.msra.mxu3 %v89_v3  ;;  %90 = vmatpush.msra.mxu0 %v89_v3  ;;  %v262_v12 = vsub.f32 %v69_v2, %v235_v5  ;;  %v9502_v19 = vand.u32 4294901760, %v379_v10  ;;  %v376_v28 = vld [vmem:[%s15459_s2 + $0x50] sm:$0xff]  ;;  %v375_v35 = vld [vmem:[%s15459_s2 + $0x48] sm:$0xff]  ;;  %v374_v39 = vld [vmem:[%s15459_s2 + $0x40] sm:$0xff] }
  0x10   :  { %v9500_v18 = vsub.f32 %v381_v6, %v9486_v9  ;;  %v9511_v22 = vand.u32 4294901760, %v378_v14  ;;  %v9514_v25 = vsub.f32 %v380_v7, %v9491_v13  ;;  %v9519_v27 = vand.u32 4294901760, %v377_v20  ;;  %v373_v44 = vld [vmem:[%s15459_s2 + $0x38] sm:$0xff]  ;;  %v372_v49 = vld [vmem:[%s15459_s2 + $0x30] sm:$0xff]  ;;  %v371_v55 = vld [vmem:[%s15459_s2 + $0x28] sm:$0xff] }
  0x11   :  { %v9497_v15 = vsub.f32 %v72_v4, %v9484_v8  ;;  %143 = vmatpush.msra.mxu2 %v116_v11  ;;  %v117_v16 = vand.u32 4294901760, %v116_v11  ;;  %v263_v17 = vand.u32 4294901760, %v262_v12  ;;  %v9526_v32 = vsub.f32 %v379_v10, %v9502_v19  ;;  %v370_v60 = vld [vmem:[%s15459_s2 + $0x20] sm:$0xff]  ;;  %v369_v2 = vld [vmem:[%s15459_s2 + $0x18] sm:$0xff] }
  0x12   :  { %v480_v31 = vand.u32 4294901760, %v9500_v18  ;;  %v9529_v34 = vsub.f32 %v378_v14, %v9511_v22  ;;  %v486_v36 = vand.u32 4294901760, %v9514_v25  ;;  %v9535_v37 = vand.u32 4294901760, %v376_v28 }
  0x13   :  { %146 = vmatmul.f32.vlgmr.msra.gmra.mxu2 %v9497_v15  ;;  %v9509_v21 = vand.u32 4294901760, %v9497_v15  ;;  %v118_v23 = vsub.f32 %v116_v11, %v117_v16  ;;  %192 = vmatpush.msrb.mxu0 %v117_v16  ;;  %v264_v24 = vsub.f32 %v262_v12, %v263_v17  ;;  %v9539_v38 = vsub.f32 %v377_v20, %v9519_v27  ;;  %v368_v11 = vld [vmem:[%s15459_s2 + $0x10] sm:$0xff]  ;;  %v367_v20 = vld [vmem:[%s15459_s2 + $0x8] sm:$0xff] }
  0x14   :  { %236 = vmatpush.msrb.mxu2 %v235_v5  ;;  %v481_v40 = vsub.f32 %v9500_v18, %v480_v31  ;;  %v492_v41 = vand.u32 4294901760, %v9526_v32  ;;  %v9548_v42 = vand.u32 4294901760, %v375_v35  ;;  %v498_v43 = vand.u32 4294901760, %v9529_v34 }
  0x15   :  { %170 = vmatmul.f32.vlgmr.msra.gmra.mxu3 %v9509_v21  ;;  %v94_v26 = vsub.f32 %v9497_v15, %v9509_v21  ;;  %v119_v29 = vand.u32 4294901760, %v118_v23  ;;  %v265_v30 = vand.u32 4294901760, %v264_v24  ;;  %v487_v45 = vsub.f32 %v9514_v25, %v486_v36 }
  0x16   :  { %338 = vmatpush.msra.mxu2 %v263_v17  ;;  %v9559_v46 = vsub.f32 %v376_v28, %v9535_v37  ;;  %v9561_v47 = vand.u32 4294901760, %v374_v39  ;;  %v504_v48 = vand.u32 4294901760, %v9539_v38  ;;  %v482_v50 = vand.u32 4294901760, %v481_v40 }
  0x17   :  { %v95_v33 = vand.u32 4294901760, %v94_v26  ;;  %120 = vmatpush.msra.mxu1 %v119_v29  ;;  %266 = vmatpush.msrb.mxu3 %v265_v30  ;;  %v493_v51 = vsub.f32 %v9526_v32, %v492_v41  ;;  %v9574_v52 = vsub.f32 %v375_v35, %v9548_v42  ;;  %v9576_v53 = vand.u32 4294901760, %v373_v44  ;;  %v366_v30 = vld [vmem:[%s15459_s2] sm:$0xff] }
  0x18   :  { %122 = vmatmul.f32.vlgmr.msra.gmra.mxu1 %v9484_v8  ;;  %v499_v54 = vsub.f32 %v9529_v34, %v498_v43  ;;  %v488_v56 = vand.u32 4294901760, %v487_v45  ;;  %v510_v57 = vand.u32 4294901760, %v9559_v46  ;;  %v9588_v58 = vsub.f32 %v374_v39, %v9561_v47 }
  0x19   :  { %96 = vmatmul.f32.vlgmr.msra.gmra.mxu0 %v95_v33  ;;  %214 = vmatpush.msrb.mxu1 %v89_v3  ;;  %v9590_v59 = vand.u32 4294901760, %v372_v49  ;;  %v505_v61 = vsub.f32 %v9539_v38, %v504_v48  ;;  %v494_v62 = vand.u32 4294901760, %v493_v51  ;;  %v516_v63 = vand.u32 4294901760, %v9574_v52 }
  0x1a   :  { %289 = vmatpush.msra.mxu0 %v262_v12  ;;  %360 = vmatpush.msra.mxu3 %v235_v5  ;;  %v9603_v0 = vsub.f32 %v373_v44, %v9576_v53  ;;  %v9605_v1 = vand.u32 4294901760, %v371_v55  ;;  %v9612_v3 = vand.u32 4294901760, %v370_v60  ;;  %v500_v4 = vand.u32 4294901760, %v499_v54 }
  0x1b   :  { %242 = vmatmul.f32.vlgmr.msrb.gmra.mxu2 %v95_v33  ;;  %312 = vmatpush.msra.mxu1 %v235_v5  ;;  %v511_v5 = vsub.f32 %v9559_v46, %v510_v57  ;;  %v522_v6 = vand.u32 4294901760, %v9588_v58  ;;  %v9620_v7 = vsub.f32 %v372_v49, %v9590_v59  ;;  %v9624_v10 = vand.u32 4294901760, %v369_v2 }
  0x1c   :  { %581 = vmatpush.msrb.mxu2 %v9500_v18  ;;  %v506_v12 = vand.u32 4294901760, %v505_v61  ;;  %v517_v14 = vsub.f32 %v9574_v52, %v516_v63  ;;  %v528_v16 = vand.u32 4294901760, %v9603_v0  ;;  %v9640_v17 = vsub.f32 %v370_v60, %v9612_v3  ;;  %v396_v18 = vld [vmem:[%s15459_s2 + $0xf0] sm:$0xff] }
  0x1d   :  { %268 = vmatmul.f32.vlgmr.msrb.gmra.mxu3 %v9484_v8  ;;  %v512_v23 = vand.u32 4294901760, %v511_v5  ;;  %v523_v24 = vsub.f32 %v9588_v58, %v522_v6  ;;  %v534_v26 = vand.u32 4294901760, %v9620_v7  ;;  %v9650_v28 = vand.u32 4294901760, %v368_v11 }
  0x1e   :  { %584 = vmatpush.msrb.mxu2 %v9514_v25  ;;  %634 = vmatpush.msrb.mxu3 %v9486_v9  ;;  %v9655_v29 = vsub.f32 %v369_v2, %v9624_v10  ;;  %v518_v33 = vand.u32 4294901760, %v517_v14  ;;  %v529_v35 = vsub.f32 %v9603_v0, %v528_v16  ;;  %v9677_v49 = vand.u32 4294901760, %v366_v30  ;;  %v395_v25 = vld [vmem:[%s15459_s2 + $0xe8] sm:$0xff] }
  0x1f   :  { %v524_v40 = vand.u32 4294901760, %v523_v24  ;;  %v535_v44 = vsub.f32 %v9620_v7, %v534_v26  ;;  %v9675_v45 = vsub.f32 %v368_v11, %v9650_v28  ;;  %vm434_vm2 = vcmask 1040384  }
  0x20   :  { %587 = vmatpush.msrb.mxu2 %v9526_v32  ;;  %636 = vmatpush.msrb.mxu3 %v9491_v13  ;;  %v552_v54 = vand.u32 4294901760, %v9655_v29  ;;  %vm1146_vm6 = vcmask 130048  }
  0x21   :  { %194 = vmatmul.f32.vlgmr.msrb.gmra.mxu0 %v9484_v8  ;;  %216 = vmatmul.f32.vlgmr.msrb.gmra.mxu1 %v9484_v8  ;;  %v558_v61 = vand.u32 4294901760, %v9675_v45 }
  0x22   :  { %483 = vmatpush.msrb.mxu1 %v482_v50  ;;  %438 = vmatpush.msrb.mxu0 %v9486_v9  ;;  %v530_v50 = vand.u32 4294901760, %v529_v35 }
  0x23   :  { %340 = vmatmul.f32.vlgmr.msra.gmra.mxu2 %v9484_v8  ;;  %638 = vmatpush.msrb.mxu3 %v9502_v19 }
  0x24   :  { %489 = vmatpush.msrb.mxu1 %v488_v56  ;;  %590 = vmatpush.msrb.mxu2 %v9529_v34  ;;  %v536_v56 = vand.u32 4294901760, %v535_v44  ;;  %v394_v34 = vld [vmem:[%s15459_s2 + $0xe0] sm:$0xff] }
  0x25   :  { %362 = vmatmul.f32.vlgmr.msra.gmra.mxu3 %v9484_v8  ;;  %440 = vmatpush.msrb.mxu0 %v9491_v13  ;;  %v9635_v8 = vsub.f32 %v371_v55, %v9605_v1 }
  0x26   :  { %495 = vmatpush.msrb.mxu1 %v494_v62  ;;  %593 = vmatpush.msrb.mxu2 %v9539_v38  ;;  %v9697_v62 = vsub.f32 %v366_v30, %v9677_v49  ;;  %v9814_v38 = vand.u32 4294901760, %v394_v34 }
  0x27   :  { %640 = vmatpush.msrb.mxu3 %v9511_v22  ;;  %442 = vmatpush.msrb.mxu0 %v9502_v19  ;;  %v540_v39 = vand.u32 4294901760, %v9635_v8 }
  0x28   :  { %501 = vmatpush.msrb.mxu1 %v500_v4  ;;  %596 = vmatpush.msrb.mxu2 %v9559_v46  ;;  %v553_v4 = vsub.f32 %v9655_v29, %v552_v54  ;;  %v570_v14 = vand.u32 4294901760, %v9697_v62 }
  0x29   :  { %292 = vmatmul.f32.vlgmr.msra.gmra.mxu0 %v9497_v15  ;;  %316 = vmatmul.f32.vlgmr.msra.gmra.mxu1 %v9509_v21  ;;  %v9665_v15 = vand.u32 4294901760, %v367_v20  ;;  %v546_v21 = vand.u32 4294901760, %v9640_v17  ;;  %v541_v51 = vsub.f32 %v9635_v8, %v540_v39 }
  0x2a   :  { %507 = vmatpush.msrb.mxu1 %v506_v12  ;;  %642 = vmatpush.msrb.mxu3 %v9519_v27  ;;  %v559_v12 = vsub.f32 %v9675_v45, %v558_v61  ;;  %v571_v30 = vsub.f32 %v9697_v62, %v570_v14 }
  0x2b   :  { %444 = vmatpush.msrb.mxu0 %v9511_v22  ;;  %599 = vmatpush.msrb.mxu2 %v9574_v52  ;;  %v9687_v55 = vsub.f32 %v367_v20, %v9665_v15  ;;  %v547_v60 = vsub.f32 %v9640_v17, %v546_v21  ;;  %v542_v2 = vand.u32 4294901760, %v541_v51  ;;  %v554_v20 = vand.u32 4294901760, %v553_v4 }
  0x2c   :  { %513 = vmatpush.msrb.mxu1 %v512_v23  ;;  %644 = vmatpush.msrb.mxu3 %v9535_v37  ;;  %v560_v24 = vand.u32 4294901760, %v559_v12  ;;  %v572_v35 = vand.u32 4294901760, %v571_v30  ;;  %v9830_v52 = vsub.f32 %v394_v34, %v9814_v38  ;;  %v386_v12 = vld [vmem:[%s15459_s2 + $0xa0] sm:$0xff] }
  0x2d   :  { %446 = vmatpush.msrb.mxu0 %v9519_v27  ;;  %602 = vmatpush.msrb.mxu2 %v9588_v58  ;;  %v564_v5 = vand.u32 4294901760, %v9687_v55  ;;  %v548_v11 = vand.u32 4294901760, %v547_v60 }
  0x2e   :  { %519 = vmatpush.msrb.mxu1 %v518_v33  ;;  %646 = vmatpush.msrb.mxu3 %v9548_v42 }
  0x2f   :  { %448 = vmatpush.msrb.mxu0 %v9535_v37  ;;  %605 = vmatpush.msrb.mxu2 %v9603_v0  ;;  %v565_v23 = vsub.f32 %v9687_v55, %v564_v5  ;;  %v839_v0 = vand.u32 4294901760, %v9830_v52 }
  0x30   :  { %525 = vmatpush.msrb.mxu1 %v524_v40  ;;  %648 = vmatpush.msrb.mxu3 %v9561_v47 }
  0x31   :  { %450 = vmatpush.msrb.mxu0 %v9548_v42  ;;  %608 = vmatpush.msrb.mxu2 %v9620_v7  ;;  %v566_v33 = vand.u32 4294901760, %v565_v23  ;;  %v9918_v23 = vand.u32 4294901760, %v386_v12 }
  0x32   :  { %531 = vmatpush.msrb.mxu1 %v530_v50  ;;  %650 = vmatpush.msrb.mxu3 %v9576_v53  ;;  %v388_v50 = vld [vmem:[%s15459_s2 + $0xb0] sm:$0xff] }
  0x33   :  { %452 = vmatpush.msrb.mxu0 %v9561_v47  ;;  %611 = vmatpush.msrb.mxu2 %v9635_v8  ;;  %v390_v8 = vld [vmem:[%s15459_s2 + $0xc0] sm:$0xff]  ;;  %v9934_v34 = vsub.f32 %v386_v12, %v9918_v23 }
  0x34   :  { %537 = vmatpush.msrb.mxu1 %v536_v56  ;;  %652 = vmatpush.msrb.mxu3 %v9590_v59 }
  0x35   :  { %454 = vmatpush.msrb.mxu0 %v9576_v53  ;;  %614 = vmatpush.msrb.mxu2 %v9640_v17 }
  0x36   :  { %543 = vmatpush.msrb.mxu1 %v542_v2  ;;  %654 = vmatpush.msrb.mxu3 %v9605_v1 }
  0x37   :  { %456 = vmatpush.msrb.mxu0 %v9590_v59  ;;  %617 = vmatpush.msrb.mxu2 %v9655_v29 }
  0x38   :  { %549 = vmatpush.msrb.mxu1 %v548_v11  ;;  %656 = vmatpush.msrb.mxu3 %v9612_v3 }
  0x39   :  { %458 = vmatpush.msrb.mxu0 %v9605_v1  ;;  %620 = vmatpush.msrb.mxu2 %v9675_v45 }
  0x3a   :  { %555 = vmatpush.msrb.mxu1 %v554_v20  ;;  %658 = vmatpush.msrb.mxu3 %v9624_v10 }
  0x3b   :  { %460 = vmatpush.msrb.mxu0 %v9612_v3  ;;  %623 = vmatpush.msrb.mxu2 %v9687_v55  ;;  %v9891_v55 = vand.u32 4294901760, %v388_v50 }
  0x3c   :  { %561 = vmatpush.msrb.mxu1 %v560_v24  ;;  %660 = vmatpush.msrb.mxu3 %v9650_v28 }
  0x3d   :  { %462 = vmatpush.msrb.mxu0 %v9624_v10  ;;  %626 = vmatpush.msrb.mxu2 %v9697_v62 }
  0x3e   :  { %567 = vmatpush.msrb.mxu1 %v566_v33  ;;  %662 = vmatpush.msrb.mxu3 %v9665_v15  ;;  %v385_v33 = vld [vmem:[%s15459_s2 + $0x98] sm:$0xff] }
  0x3f   :  { %464 = vmatpush.msrb.mxu0 %v9650_v28 }
  0x40   :  { %573 = vmatpush.msrb.mxu1 %v572_v35  ;;  %664 = vmatpush.msrb.mxu3 %v9677_v49 }
  0x41   :  { %466 = vmatpush.msrb.mxu0 %v9665_v15 }
  0x42   :  { %742 = vmatpush.msra.mxu1 %v9486_v9  ;;  %v397_v9 = vld [vmem:[%s15459_s2 + $0xf8] sm:$0xff] }
  0x43   :  { %468 = vmatpush.msrb.mxu0 %v9677_v49 }
  0x44   :  { %744 = vmatpush.msra.mxu1 %v9491_v13  ;;  %v9785_v13 = vand.u32 4294901760, %v397_v9 }
  0x45   :  { %675 = vmatpush.msra.mxu0 %v480_v31  ;;  %v9801_v31 = vand.u32 4294901760, %v395_v25 }
  0x46   :  { %746 = vmatpush.msra.mxu1 %v9502_v19  ;;  %779 = vmatpush.msra.mxu2 %v9785_v13  ;;  %v9792_v19 = vsub.f32 %v397_v9, %v9785_v13 }
  0x47   :  { %679 = vmatpush.msra.mxu0 %v486_v36 }
  0x48   :  { %748 = vmatpush.msra.mxu1 %v9511_v22  ;;  %v9794_v22 = vand.u32 4294901760, %v396_v18 }
  0x49   :  { %683 = vmatpush.msra.mxu0 %v492_v41  ;;  %v9817_v41 = vsub.f32 %v395_v25, %v9801_v31  ;;  %v9931_v25 = vand.u32 4294901760, %v385_v33 }
  0x4a   :  { %750 = vmatpush.msra.mxu1 %v9519_v27  ;;  %781 = vmatpush.msra.mxu2 %v9794_v22  ;;  %v821_v27 = vand.u32 4294901760, %v9792_v19  ;;  %v9804_v32 = vsub.f32 %v396_v18, %v9794_v22 }
  0x4b   :  { %687 = vmatpush.msra.mxu0 %v498_v43 }
  0x4c   :  { %752 = vmatpush.msra.mxu1 %v9535_v37  ;;  %v822_v36 = vsub.f32 %v9792_v19, %v821_v27  ;;  %783 = vmatpush.msra.mxu2 %v9801_v31  ;;  %v827_v37 = vand.u32 4294901760, %v9804_v32 }
  0x4d   :  { %691 = vmatpush.msra.mxu0 %v504_v48 }
  0x4e   :  { %754 = vmatpush.msra.mxu1 %v9548_v42  ;;  %v393_v42 = vld [vmem:[%s15459_s2 + $0xd8] sm:$0xff]  ;;  %v823_v43 = vand.u32 4294901760, %v822_v36  ;;  %v828_v46 = vsub.f32 %v9804_v32, %v827_v37  ;;  %785 = vmatpush.msra.mxu2 %v9814_v38  ;;  %v384_v36 = vld [vmem:[%s15459_s2 + $0x90] sm:$0xff] }
  0x4f   :  { %695 = vmatpush.msra.mxu0 %v510_v57  ;;  %v9827_v48 = vand.u32 4294901760, %v393_v42 }
  0x50   :  { %756 = vmatpush.msra.mxu1 %v9561_v47  ;;  %v833_v47 = vand.u32 4294901760, %v9817_v41  ;;  %824 = vmatpush.msra.mxu3 %v823_v43  ;;  %v829_v57 = vand.u32 4294901760, %v828_v46  ;;  %v9943_v46 = vand.u32 4294901760, %v384_v36 }
  0x51   :  { %699 = vmatpush.msra.mxu0 %v516_v63  ;;  %787 = vmatpush.msra.mxu2 %v9827_v48  ;;  %v9842_v63 = vsub.f32 %v393_v42, %v9827_v48 }
  0x52   :  { %758 = vmatpush.msra.mxu1 %v9576_v53  ;;  %v392_v53 = vld [vmem:[%s15459_s2 + $0xd0] sm:$0xff]  ;;  %v834_v58 = vsub.f32 %v9817_v41, %v833_v47  ;;  %830 = vmatpush.msra.mxu3 %v829_v57  ;;  %v15472_v57 = vand.u32 4294901760, %v9934_v34 }
  0x53   :  { %703 = vmatpush.msra.mxu0 %v522_v6  ;;  %v845_v6 = vand.u32 4294901760, %v9842_v63 }
  0x54   :  { %760 = vmatpush.msra.mxu1 %v9590_v59  ;;  %v9839_v59 = vand.u32 4294901760, %v392_v53 }
  0x55   :  { %707 = vmatpush.msra.mxu0 %v528_v16  ;;  %v840_v16 = vsub.f32 %v9830_v52, %v839_v0  ;;  %v846_v17 = vsub.f32 %v9842_v63, %v845_v6 }
  0x56   :  { %762 = vmatpush.msra.mxu1 %v9605_v1  ;;  %v391_v1 = vld [vmem:[%s15459_s2 + $0xc8] sm:$0xff]  ;;  %789 = vmatpush.msra.mxu2 %v9839_v59 }
  0x57   :  { %711 = vmatpush.msra.mxu0 %v534_v26  ;;  %v9850_v7 = vand.u32 4294901760, %v391_v1 }
  0x58   :  { %764 = vmatpush.msra.mxu1 %v9612_v3  ;;  %v835_v3 = vand.u32 4294901760, %v834_v58  ;;  %v383_v58 = vld [vmem:[%s15459_s2 + $0x88] sm:$0xff] }
  0x59   :  { %715 = vmatpush.msra.mxu0 %v540_v39  ;;  %791 = vmatpush.msra.mxu2 %v9850_v7  ;;  %v9869_v29 = vsub.f32 %v391_v1, %v9850_v7  ;;  %v841_v39 = vand.u32 4294901760, %v840_v16  ;;  %v9954_v16 = vand.u32 4294901760, %v383_v58 }
  0x5a   :  { %766 = vmatpush.msra.mxu1 %v9624_v10  ;;  %v9853_v10 = vsub.f32 %v392_v53, %v9839_v59  ;;  %836 = vmatpush.msra.mxu3 %v835_v3  ;;  %v9946_v53 = vsub.f32 %v385_v33, %v9931_v25 }
  0x5b   :  { %719 = vmatpush.msra.mxu0 %v546_v21  ;;  %v847_v21 = vand.u32 4294901760, %v846_v17  ;;  %v857_v44 = vand.u32 4294901760, %v9869_v29  ;;  %v888_v17 = vsub.f32 %v9934_v34, %v15472_v57 }
  0x5c   :  { %768 = vmatpush.msra.mxu1 %v9650_v28  ;;  %v851_v26 = vand.u32 4294901760, %v9853_v10  ;;  %v9866_v28 = vand.u32 4294901760, %v390_v8  ;;  %842 = vmatpush.msra.mxu3 %v841_v39  ;;  %v15471_v3 = vand.u32 4294901760, %v9946_v53 }
  0x5d   :  { %723 = vmatpush.msra.mxu0 %v552_v54  ;;  %v858_v54 = vsub.f32 %v9869_v29, %v857_v44 }
  0x5e   :  { %770 = vmatpush.msra.mxu1 %v9665_v15  ;;  %v389_v15 = vld [vmem:[%s15459_s2 + $0xb8] sm:$0xff]  ;;  %v852_v40 = vsub.f32 %v9853_v10, %v851_v26  ;;  %793 = vmatpush.msra.mxu2 %v9866_v28  ;;  %v894_v39 = vsub.f32 %v9946_v53, %v15471_v3 }
  0x5f   :  { %727 = vmatpush.msra.mxu0 %v558_v61  ;;  %v9879_v45 = vand.u32 4294901760, %v389_v15  ;;  %848 = vmatpush.msra.mxu3 %v847_v21  ;;  %v387_v61 = vld [vmem:[%s15459_s2 + $0xa8] sm:$0xff]  ;;  %v859_v62 = vand.u32 4294901760, %v858_v54  ;;  %v382_v21 = vld [vmem:[%s15459_s2 + $0x80] sm:$0xff] }
  0x60   :  { %772 = vmatpush.msra.mxu1 %v9677_v49  ;;  %v9882_v49 = vsub.f32 %v390_v8, %v9866_v28  ;;  %v853_v51 = vand.u32 4294901760, %v852_v40  ;;  %v9902_v4 = vand.u32 4294901760, %v387_v61  ;;  %v9957_v8 = vsub.f32 %v384_v36, %v9943_v46 }
  0x61   :  { %731 = vmatpush.msra.mxu0 %v564_v5  ;;  %795 = vmatpush.msra.mxu2 %v9879_v45  ;;  %v9894_v56 = vsub.f32 %v389_v15, %v9879_v45  ;;  %v9905_v5 = vsub.f32 %v388_v50, %v9891_v55  ;;  %v889_v40 = vand.u32 4294901760, %v888_v17  ;;  %v9970_v50 = vand.u32 4294901760, %v382_v21 }
  0x62   :  { %v863_v60 = vand.u32 4294901760, %v9882_v49  ;;  %854 = vmatpush.msra.mxu3 %v853_v51  ;;  %v9921_v24 = vsub.f32 %v387_v61, %v9902_v4  ;;  %v15470_v15 = vand.u32 4294901760, %v9957_v8  ;;  %v9973_v51 = vsub.f32 %v383_v58, %v9954_v16 }
  0x63   :  { %735 = vmatpush.msra.mxu0 %v570_v14  ;;  %797 = vmatpush.msra.mxu2 %v9891_v55  ;;  %v15475_v2 = vand.u32 4294901760, %v9894_v56  ;;  %v15474_v20 = vand.u32 4294901760, %v9905_v5  ;;  %v895_v54 = vand.u32 4294901760, %v894_v39 }
  0x64   :  { %v864_v11 = vsub.f32 %v9882_v49, %v863_v60  ;;  %860 = vmatpush.msra.mxu3 %v859_v62  ;;  %v15473_v18 = vand.u32 4294901760, %v9921_v24  ;;  %v900_v61 = vsub.f32 %v9957_v8, %v15470_v15  ;;  %v15469_v62 = vand.u32 4294901760, %v9973_v51 }
  0x65   :  { %v870_v14 = vsub.f32 %v9894_v56, %v15475_v2  ;;  %799 = vmatpush.msra.mxu2 %v9902_v4  ;;  %v876_v9 = vsub.f32 %v9905_v5, %v15474_v20 }
  0x66   :  { %v865_v30 = vand.u32 4294901760, %v864_v11  ;;  %v882_v43 = vsub.f32 %v9921_v24, %v15473_v18  ;;  %v9981_v11 = vsub.f32 %v382_v21, %v9970_v50  ;;  %v901_v12 = vand.u32 4294901760, %v900_v61 }
  0x67   :  { %v871_v35 = vand.u32 4294901760, %v870_v14  ;;  %801 = vmatpush.msra.mxu2 %v9918_v23  ;;  %v877_v42 = vand.u32 4294901760, %v876_v9  ;;  %v906_v14 = vsub.f32 %v9973_v51, %v15469_v62 }
  0x68   :  { %866 = vmatpush.msra.mxu3 %v865_v30  ;;  %v883_v1 = vand.u32 4294901760, %v882_v43  ;;  %v15468_v30 = vand.u32 4294901760, %v9981_v11 }
  0x69   :  { %803 = vmatpush.msra.mxu2 %v9931_v25  ;;  %v907_v33 = vand.u32 4294901760, %v906_v14 }
  0x6a   :  { %872 = vmatpush.msra.mxu3 %v871_v35  ;;  %v912_v35 = vsub.f32 %v9981_v11, %v15468_v30 }
  0x6b   :  { %805 = vmatpush.msra.mxu2 %v9943_v46 }
  0x6c   :  { %878 = vmatpush.msra.mxu3 %v877_v42  ;;  %v913_v58 = vand.u32 4294901760, %v912_v35 }
  0x6d   :  { %807 = vmatpush.msra.mxu2 %v9954_v16 }
  0x6e   :  { %884 = vmatpush.msra.mxu3 %v883_v1 }
  0x6f   :  { %809 = vmatpush.msra.mxu2 %v9970_v50 }
  0x70   :  { %890 = vmatpush.msra.mxu3 %v889_v40 }
  0x72   :  { %896 = vmatpush.msra.mxu3 %v895_v54 }
  0x74   :  { %902 = vmatpush.msra.mxu3 %v901_v12 }
  0x76   :  { %908 = vmatpush.msra.mxu3 %v907_v33 }
  0x78   :  { %914 = vmatpush.msra.mxu3 %v913_v58 }
  0x95   :  { %v123_v36 = vpop.f32.mrf.mxu1 }
  0x96   :  { %v97_v9 = vpop.f32.mrf.mxu0  ;;  %v147_v43 = vpop.f32.mrf.mxu2 }
  0x97   :  { %v124_v42 = vadd.f32 %v123_v36, %v97_v9 }
  0x98   :  { %v171_v1 = vpop.f32.mrf.mxu3 }
  0x99   :  { %v148_v17 = vadd.f32 %v147_v43, %v124_v42 }
  0x9b   :  { %v172_v39 = vadd.f32 %v171_v1, %v148_v17 }
  0x9e   :  { %v195_v21 = vpop.f32.mrf.mxu0  ;;  %v217_v40 = vpop.f32.mrf.mxu1 }
  0x9f   :  { %v196_v54 = vadd.f32 %v195_v21, %v172_v39  ;;  %v243_v61 = vpop.f32.mrf.mxu2 }
  0xa0   :  { %v269_v12 = vpop.f32.mrf.mxu3 }
  0xa1   :  { %v9990_v14 = vadd.f32 %v217_v40, %v196_v54  ;;  %v270_v33 = vadd.f32 %v269_v12, %v243_v61 }
  0xa3   :  { %v404_v30 = vsel %vm403_vm1, %v9990_v14, 0.0  ;;  %v418_v9 = vmul.f32 %v9990_v14, %v9990_v14 }
  0xa4   :  { %v405_v35 = vrot.slane %v404_v30, 4 }
  0xa5   :  { %v420_v36 = vsel %vm403_vm1, %v418_v9, 0.0 }
  0xa6   :  { %v406_v42 = vadd.f32 %v405_v35, %v404_v30  ;;  %v421_v43 = vrot.slane %v420_v36, 4  ;;  %v293_v58 = vpop.f32.mrf.mxu0  ;;  %v317_v1 = vpop.f32.mrf.mxu1 }
  0xa7   :  { %v294_v17 = vadd.f32 %v293_v58, %v270_v33  ;;  %v341_v62 = vpop.f32.mrf.mxu2 }
  0xa8   :  { %v407_v39 = vrot.slane %v406_v42, 2  ;;  %v422_v21 = vadd.f32 %v421_v43, %v420_v36  ;;  %v363_v3 = vpop.f32.mrf.mxu3 }
  0xa9   :  { %v318_v40 = vadd.f32 %v317_v1, %v294_v17 }
  0xaa   :  { %v408_v54 = vadd.f32 %v407_v39, %v406_v42  ;;  %v423_v15 = vrot.slane %v422_v21, 2 }
  0xab   :  { %v342_v57 = vadd.f32 %v341_v62, %v318_v40 }
  0xac   :  { %v409_v18 = vrot.slane %v408_v54, 1  ;;  %v424_v20 = vadd.f32 %v423_v15, %v422_v21 }
  0xad   :  { %v9997_v2 = vadd.f32 %v363_v3, %v342_v57 }
  0xae   :  { %v425_v61 = vrot.slane %v424_v20, 1  ;;  %v410_v9 = vadd.f32 %v409_v18, %v408_v54 }
  0xaf   :  { %v411_v30 = vsel %vm403_vm1, %v9997_v2, 0.0  ;;  %v419_v12 = vmul.f32 %v9997_v2, %v9997_v2 }
  0xb0   :  { %v412_v33 = vrot.slane %v411_v30, 4  ;;  %v426_v35 = vadd.f32 %v425_v61, %v424_v20 }
  0xb1   :  { %v427_v36 = vsel %vm403_vm1, %v419_v12, 0.0 }
  0xb2   :  { %v413_v42 = vadd.f32 %v412_v33, %v411_v30  ;;  %v428_v43 = vrot.slane %v427_v36, 4  ;;  %v435_v62 = vsel %vm434_vm2, %v410_v9, %v426_v35 }
  0xb3   :  { %v469_v15 = vand.u32 4294901760, %v435_v62 }
  0xb4   :  { %v414_v57 = vrot.slane %v413_v42, 2  ;;  %v429_v3 = vadd.f32 %v428_v43, %v427_v36 }
  0xb5   :  { %575 = vmatmul.f32.vlgmr.msrb.gmra.mxu1 %v469_v15  ;;  %v470_v58 = vsub.f32 %v435_v62, %v469_v15 }
  0xb6   :  { %v415_v1 = vadd.f32 %v414_v57, %v413_v42  ;;  %v430_v17 = vrot.slane %v429_v3, 2  ;;  %975 = vmatpush.msrb.mxu1 %v9785_v13 }
  0xb7   :  { %629 = vmatmul.f32.vlgmr.msrb.gmra.mxu2 %v470_v58  ;;  %v471_v39 = vand.u32 4294901760, %v470_v58 }
  0xb8   :  { %v416_v18 = vrot.slane %v415_v1, 1  ;;  %v431_v21 = vadd.f32 %v430_v17, %v429_v3  ;;  %977 = vmatpush.msrb.mxu1 %v9794_v22  ;;  %1016 = vmatpush.msrb.mxu2 %v821_v27 }
  0xb9   :  { %668 = vmatmul.f32.vlgmr.msrb.gmra.mxu3 %v471_v39  ;;  %v472_v20 = vsub.f32 %v470_v58, %v471_v39  ;;  %v401_v39 = vld [vmem:[%s15460_s3 + $0x18] sm:$0xff] }
  0xba   :  { %v417_v40 = vadd.f32 %v416_v18, %v415_v1  ;;  %v432_v54 = vrot.slane %v431_v21, 1  ;;  %979 = vmatpush.msrb.mxu1 %v9801_v31  ;;  %1020 = vmatpush.msrb.mxu2 %v827_v37  ;;  %v15734_v37 = vand.u32 4294901760, %v9894_v56  ;;  %v10095_v18 = vand.u32 4294901760, %v401_v39 }
  0xbb   :  { %1083 = vmatpush.msrb.mxu3 %v9785_v13  ;;  %v473_v61 = vand.u32 4294901760, %v472_v20 }
  0xbc   :  { %981 = vmatpush.msrb.mxu1 %v9814_v38  ;;  %1024 = vmatpush.msrb.mxu2 %v833_v47  ;;  %v433_v30 = vadd.f32 %v432_v54, %v431_v21  ;;  %v15737_v47 = vand.u32 4294901760, %v9934_v34  ;;  %v399_v21 = vld [vmem:[%s15460_s3 + $0x8] sm:$0xff]  ;;  %v10102_v20 = vsub.f32 %v401_v39, %v10095_v18 }
  0xbd   :  { %1085 = vmatpush.msrb.mxu3 %v9794_v22  ;;  %474 = vmatmul.f32.vlgmr.msrb.gmra.mxu0 %v473_v61 }
  0xbe   :  { %774 = vmatmul.f32.vlgmr.msra.gmra.mxu1 %v469_v15  ;;  %922 = vmatpush.msrb.mxu0 %v9792_v19  ;;  %v436_v27 = vsel %vm434_vm2, %v417_v40, %v433_v30  ;;  %v10104_v40 = vand.u32 4294901760, %v399_v21  ;;  %v1352_v54 = vand.u32 4294901760, %v10102_v20 }
  0xbf   :  { %983 = vmatpush.msrb.mxu1 %v9827_v48  ;;  %1028 = vmatpush.msrb.mxu2 %v839_v0  ;;  %v810_v13 = vand.u32 4294901760, %v436_v27 }
  0xc0   :  { %1087 = vmatpush.msrb.mxu3 %v9801_v31  ;;  %925 = vmatpush.msrb.mxu0 %v9804_v32  ;;  %v10109_v61 = vsub.f32 %v399_v21, %v10104_v40 }
  0xc1   :  { %985 = vmatpush.msrb.mxu1 %v9839_v59  ;;  %1032 = vmatpush.msrb.mxu2 %v845_v6  ;;  %v811_v22 = vsub.f32 %v436_v27, %v810_v13  ;;  %v1353_v27 = vsub.f32 %v10102_v20, %v1352_v54 }
  0xc2   :  { %1089 = vmatpush.msrb.mxu3 %v9814_v38  ;;  %928 = vmatpush.msrb.mxu0 %v9817_v41  ;;  %v15735_v38 = vand.u32 4294901760, %v9905_v5  ;;  %v15736_v41 = vand.u32 4294901760, %v9921_v24 }
  0xc3   :  { %916 = vmatmul.f32.vlgmr.msra.gmra.mxu3 %v810_v13  ;;  %987 = vmatpush.msrb.mxu1 %v9850_v7  ;;  %v812_v19 = vand.u32 4294901760, %v811_v22 }
  0xc4   :  { %1036 = vmatpush.msrb.mxu2 %v851_v26  ;;  %1091 = vmatpush.msrb.mxu3 %v9827_v48  ;;  %v15738_v48 = vand.u32 4294901760, %v9946_v53 }
  0xc5   :  { %931 = vmatpush.msrb.mxu0 %v9830_v52  ;;  %989 = vmatpush.msrb.mxu1 %v9866_v28  ;;  %v813_v31 = vsub.f32 %v811_v22, %v812_v19  ;;  %v15739_v52 = vand.u32 4294901760, %v9957_v8 }
  0xc6   :  { %1040 = vmatpush.msrb.mxu2 %v857_v44  ;;  %1093 = vmatpush.msrb.mxu3 %v9839_v59  ;;  %v15740_v59 = vand.u32 4294901760, %v9973_v51 }
  0xc7   :  { %737 = vmatmul.f32.vlgmr.msra.gmra.mxu0 %v469_v15  ;;  %991 = vmatpush.msrb.mxu1 %v9879_v45  ;;  %v814_v32 = vand.u32 4294901760, %v813_v31 }
  0xc8   :  { %934 = vmatpush.msrb.mxu0 %v9842_v63  ;;  %1044 = vmatpush.msrb.mxu2 %v863_v60  ;;  %v15741_v63 = vand.u32 4294901760, %v9981_v11 }
  0xc9   :  { %1095 = vmatpush.msrb.mxu3 %v9850_v7  ;;  %993 = vmatpush.msrb.mxu1 %v9891_v55 }
  0xca   :  { %937 = vmatpush.msrb.mxu0 %v9853_v10  ;;  %1048 = vmatpush.msrb.mxu2 %v15734_v37 }
  0xcb   :  { %1097 = vmatpush.msrb.mxu3 %v9866_v28  ;;  %815 = vmatmul.f32.vlgmr.msra.gmra.mxu2 %v814_v32 }
  0xcc   :  { %940 = vmatpush.msrb.mxu0 %v9869_v29  ;;  %995 = vmatpush.msrb.mxu1 %v9902_v4 }
  0xcd   :  { %1052 = vmatpush.msrb.mxu2 %v15735_v38  ;;  %1099 = vmatpush.msrb.mxu3 %v9879_v45 }
  0xce   :  { %943 = vmatpush.msrb.mxu0 %v9882_v49  ;;  %997 = vmatpush.msrb.mxu1 %v9918_v23 }
  0xcf   :  { %1056 = vmatpush.msrb.mxu2 %v15736_v41  ;;  %1101 = vmatpush.msrb.mxu3 %v9891_v55 }
  0xd0   :  { %946 = vmatpush.msrb.mxu0 %v9894_v56  ;;  %999 = vmatpush.msrb.mxu1 %v9931_v25 }
  0xd1   :  { %1060 = vmatpush.msrb.mxu2 %v15737_v47  ;;  %1103 = vmatpush.msrb.mxu3 %v9902_v4 }
  0xd2   :  { %949 = vmatpush.msrb.mxu0 %v9905_v5  ;;  %1001 = vmatpush.msrb.mxu1 %v9943_v46 }
  0xd3   :  { %1064 = vmatpush.msrb.mxu2 %v15738_v48  ;;  %1105 = vmatpush.msrb.mxu3 %v9918_v23  ;;  %v402_v48 = vld [vmem:[%s15461_s4] sm:$0x3] }
  0xd4   :  { %952 = vmatpush.msrb.mxu0 %v9921_v24  ;;  %1003 = vmatpush.msrb.mxu1 %v9954_v16 }
  0xd5   :  { %1068 = vmatpush.msrb.mxu2 %v15739_v52  ;;  %1107 = vmatpush.msrb.mxu3 %v9931_v25 }
  0xd6   :  { %955 = vmatpush.msrb.mxu0 %v9934_v34  ;;  %1005 = vmatpush.msrb.mxu1 %v9970_v50 }
  0xd7   :  { %1072 = vmatpush.msrb.mxu2 %v15740_v59  ;;  %1109 = vmatpush.msrb.mxu3 %v9943_v46 }
  0xd8   :  { %1009 = vmatmul.f32.vlgmr.msrb.gmra.mxu1 %v812_v19  ;;  %958 = vmatpush.msrb.mxu0 %v9946_v53  ;;  %v1354_v19 = vand.u32 4294901760, %v1353_v27 }
  0xd9   :  { %1076 = vmatpush.msrb.mxu2 %v15741_v63  ;;  %1111 = vmatpush.msrb.mxu3 %v9954_v16 }
  0xda   :  { %1078 = vmatmul.f32.vlgmr.msrb.gmra.mxu2 %v810_v13  ;;  %961 = vmatpush.msrb.mxu0 %v9957_v8  ;;  %v400_v8 = vld [vmem:[%s15460_s3 + $0x10] sm:$0xff] }
  0xdb   :  { %1113 = vmatpush.msrb.mxu3 %v9970_v50 }
  0xdc   :  { %1115 = vmatmul.f32.vlgmr.msrb.gmra.mxu3 %v810_v13  ;;  %964 = vmatpush.msrb.mxu0 %v9973_v51  ;;  %v1164_v51 = vand.u32 4294901760, %v400_v8  ;;  %v1358_v13 = vand.u32 4294901760, %v10109_v61 }
  0xde   :  { %967 = vmatpush.msrb.mxu0 %v9981_v11  ;;  %v398_v11 = vld [vmem:[%s15460_s3] sm:$0xff]  ;;  %v1192_v9 = vsub.f32 %v400_v8, %v1164_v51  ;;  %1249 = vmatpush.msra.mxu3 %v1164_v51  ;;  %v1359_v31 = vsub.f32 %v10109_v61, %v1358_v13 }
  0xdf   :  { %970 = vmatmul.f32.vlgmr.msrb.gmra.mxu0 %v811_v22  ;;  %v1166_v33 = vand.u32 4294901760, %v398_v11 }
  0xe0   :  { %1165 = vmatpush.msra.mxu0 %v1164_v51  ;;  %v1193_v36 = vand.u32 4294901760, %v1192_v9  ;;  %1224 = vmatpush.msra.mxu2 %v1192_v9  ;;  %v1360_v37 = vand.u32 4294901760, %v1359_v31 }
  0xe1   :  { %v1198_v42 = vsub.f32 %v398_v11, %v1166_v33  ;;  %1251 = vmatpush.msra.mxu3 %v1166_v33 }
  0xe2   :  { %1167 = vmatpush.msra.mxu0 %v1166_v33  ;;  %v1194_v62 = vsub.f32 %v1192_v9, %v1193_v36 }
  0xe3   :  { %v1199_v15 = vand.u32 4294901760, %v1198_v42  ;;  %1227 = vmatpush.msra.mxu2 %v1198_v42  ;;  %1355 = vmatpush.msrb.mxu3 %v1354_v19 }
  0xe4   :  { %1276 = vmatpush.msrb.mxu0 %v1193_v36  ;;  %v1195_v3 = vand.u32 4294901760, %v1194_v62 }
  0xe5   :  { %v1200_v58 = vsub.f32 %v1198_v42, %v1199_v15  ;;  %1324 = vmatpush.msrb.mxu2 %v10095_v18  ;;  %1361 = vmatpush.msrb.mxu3 %v1360_v37  ;;  %v1510_v42 = vld [vmem:[#allocation2 + $0x100] sm:$0xff] }
  0xe6   :  { %1280 = vmatpush.msrb.mxu0 %v1199_v15  ;;  %1196 = vmatpush.msra.mxu1 %v1195_v3  ;;  %v1494_v37 = vld [vmem:[#allocation2 + $0x80] sm:$0xff] }
  0xe7   :  { %v1201_v17 = vand.u32 4294901760, %v1200_v58  ;;  %1326 = vmatpush.msrb.mxu2 %v10104_v40 }
  0xe9   :  { %1202 = vmatpush.msra.mxu1 %v1201_v17  ;;  %v10175_v17 = vand.u32 4294901760, %v1510_v42 }
  0xeb   :  { %1301 = vmatpush.msrb.mxu1 %v1164_v51 }
  0xed   :  { %1303 = vmatpush.msrb.mxu1 %v1166_v33 }
 0x132   :  { %v576_v6 = vpop.f32.mrf.mxu1 }
 0x13a   :  { %v475_v0 = vpop.f32.mrf.mxu0  ;;  %v630_v10 = vpop.f32.mrf.mxu2 }
 0x13b   :  { %v577_v7 = vadd.f32 %v576_v6, %v475_v0  ;;  %v775_v49 = vpop.f32.mrf.mxu1 }
 0x13c   :  { %v669_v28 = vpop.f32.mrf.mxu3 }
 0x13d   :  { %v631_v26 = vadd.f32 %v630_v10, %v577_v7  ;;  %v1538_v7 = vld [vmem:[#allocation2 + $0x1e0] sm:$0xff] }
 0x13e   :  { %v1534_v10 = vld [vmem:[#allocation2 + $0x1c0] sm:$0xff] }
 0x13f   :  { %v670_v44 = vadd.f32 %v669_v28, %v631_v26  ;;  %v1530_v26 = vld [vmem:[#allocation2 + $0x1a0] sm:$0xff]  ;;  %v10117_v28 = vand.u32 4294901760, %v1538_v7 }
 0x144   :  { %v738_v29 = vpop.f32.mrf.mxu0 }
 0x145   :  { %v739_v45 = vadd.f32 %v738_v29, %v670_v44  ;;  %v10119_v29 = vand.u32 4294901760, %v1534_v10  ;;  %v10121_v44 = vand.u32 4294901760, %v1530_v26 }
 0x146   :  { %v917_v4 = vpop.f32.mrf.mxu3 }
 0x147   :  { %v776_v56 = vadd.f32 %v775_v49, %v739_v45  ;;  %v1526_v45 = vld [vmem:[#allocation2 + $0x180] sm:$0xff] }
 0x14e   :  { %v816_v55 = vpop.f32.mrf.mxu2 }
 0x14f   :  { %v817_v60 = vadd.f32 %v816_v55, %v776_v56  ;;  %v10124_v55 = vsub.f32 %v1538_v7, %v10117_v28  ;;  %v10127_v56 = vsub.f32 %v1534_v10, %v10119_v29  ;;  %v1486_v10 = vld [vmem:[#allocation2 + $0x40] sm:$0xff] }
 0x151   :  { %v918_v5 = vadd.f32 %v917_v4, %v817_v60  ;;  %v10129_v60 = vand.u32 4294901760, %v1526_v45  ;;  %v1522_v4 = vld [vmem:[#allocation2 + $0x160] sm:$0xff] }
 0x153   :  { %v10142_v8 = vsub.f32 %v1526_v45, %v10129_v60 }
 0x155   :  { %v1010_v25 = vpop.f32.mrf.mxu1  ;;  %v1667_v62 = vand.u32 4294901760, %v10142_v8 }
 0x157   :  { %v1668_v27 = vsub.f32 %v10142_v8, %v1667_v62 }
 0x15c   :  { %v971_v23 = vpop.f32.mrf.mxu0 }
 0x15d   :  { %v972_v24 = vadd.f32 %v971_v23, %v918_v5  ;;  %v1079_v46 = vpop.f32.mrf.mxu2 }
 0x15f   :  { %v1011_v34 = vadd.f32 %v1010_v25, %v972_v24  ;;  %v1116_v16 = vpop.f32.mrf.mxu3  ;;  %v1649_v24 = vand.u32 4294901760, %v10124_v55  ;;  %v10134_v25 = vsub.f32 %v1530_v26, %v10121_v44 }
 0x161   :  { %v1080_v53 = vadd.f32 %v1079_v46, %v1011_v34  ;;  %v10138_v46 = vand.u32 4294901760, %v1522_v4  ;;  %v1650_v11 = vsub.f32 %v10124_v55, %v1649_v24 }
 0x163   :  { %v1117_v50 = vadd.f32 %v1116_v16, %v1080_v53  ;;  %v1518_v53 = vld [vmem:[#allocation2 + $0x140] sm:$0xff]  ;;  %v1655_v16 = vand.u32 4294901760, %v10127_v56  ;;  %v1651_v3 = vand.u32 4294901760, %v1650_v11  ;;  %v10238_v11 = vand.u32 4294901760, %v1486_v10 }
 0x164   :  { %v10153_v9 = vand.u32 4294901760, %v1518_v53 }
 0x165   :  { %v1119_v12 = vmul.f32 0.03125, %v1117_v50  ;;  %v1514_v50 = vld [vmem:[#allocation2 + $0x120] sm:$0xff] }
 0x166   :  { %v10160_v36 = vand.u32 4294901760, %v1514_v50 }
 0x167   :  { %v1120_v35 = vmul.f32 %v1119_v12, %v1119_v12 }
 0x169   :  { %v1122_v43 = vrot.slane %v1120_v35, 7  ;;  %v10158_v35 = vsub.f32 %v1522_v4, %v10138_v46 }
 0x16b   :  { %v1124_v57 = vsub.f32 %v1119_v12, %v1122_v43  ;;  %v1656_v43 = vsub.f32 %v10127_v56, %v1655_v16  ;;  %v1673_v21 = vand.u32 4294901760, %v10158_v35 }
 0x16d   :  { %v1125_v1 = vadd.f32 1e-05, %v1124_v57  ;;  %v1506_v57 = vld [vmem:[#allocation2 + $0xe0] sm:$0xff] }
 0x16f   :  { %9341 = vrsqrt.f32 %v1125_v1  ;;  %vm1132_vm4 = vweird.f32 %v1125_v1 }
 0x175   :  { %v9342_v30 = vpop.eup %9341 }
 0x176   :  { %v1127_v22 = vmul.f32 %v9342_v30, %v1125_v1  ;;  %vm1133_vm3 = vweird.f32 %v9342_v30  ;;  %v10173_v1 = vsub.f32 %v1518_v53, %v10153_v9 }
 0x177   :  { %vm1134_vm5 = vmor %vm1132_vm4, %vm1133_vm3 }
 0x178   :  { %v1128_v32 = vmul.f32 %v9342_v30, %v1127_v22  ;;  %v1498_v22 = vld [vmem:[#allocation2 + $0xa0] sm:$0xff]  ;;  %v1679_v31 = vand.u32 4294901760, %v10173_v1 }
 0x17a   :  { %v1129_v38 = vmul.f32 0.5, %v1128_v32  ;;  %v10191_v32 = vsub.f32 %v1510_v42, %v10175_v17  ;;  %v1478_v42 = vld [vmem:[#allocation2] sm:$0xff] }
 0x17c   :  { %v1130_v41 = vsub.f32 1.5, %v1129_v38  ;;  %v1674_v38 = vsub.f32 %v10158_v35, %v1673_v21 }
 0x17e   :  { %v1131_v47 = vmul.f32 %v9342_v30, %v1130_v41 }
 0x180   :  { %v1135_v52 = vsel %vm1134_vm5, %v9342_v30, %v1131_v47  ;;  %v1502_v30 = vld [vmem:[#allocation2 + $0xc0] sm:$0xff] }
 0x181   :  { %v1137_v59 = vrot.slane %v1135_v52, 1  ;;  %v10207_v52 = vand.u32 4294901760, %v1494_v37 }
 0x183   :  { %v1139_v63 = vmul.f32 %v1137_v59, %v402_v48  ;;  %v1490_v59 = vld [vmem:[#allocation2 + $0x60] sm:$0xff]  ;;  %v10230_v4 = vsub.f32 %v1494_v37, %v10207_v52 }
 0x185   :  { %v1140_v0 = vmul.f32 %v1139_v63, %v1119_v12  ;;  %v1661_v12 = vand.u32 4294901760, %v10134_v25 }
 0x187   :  { %v1142_v6 = vrot.slane %v1140_v0, 7  ;;  %v1662_v58 = vsub.f32 %v10134_v25, %v1661_v12 }
 0x189   :  { %v1144_v49 = vsub.f32 %v402_v48, %v1142_v6  ;;  %v1663_v19 = vand.u32 4294901760, %v1662_v58  ;;  %v10203_v48 = vand.u32 4294901760, %v1498_v22  ;;  %v1675_v6 = vand.u32 4294901760, %v1674_v38 }
 0x18a   :  { %v1715_v58 = vand.u32 4294901760, %v10230_v4 }
 0x18b   :  { %v1145_v5 = vsel %vm434_vm2, %v1139_v63, %v1144_v49  ;;  %v1691_v63 = vand.u32 4294901760, %v10191_v32  ;;  %v10224_v45 = vsub.f32 %v1498_v22, %v10203_v48  ;;  %v10226_v49 = vand.u32 4294901760, %v1490_v59 }
 0x18c   :  { %v1148_v23 = vsel %vm1146_vm6, %v1145_v5, 0  ;;  %v1482_v5 = vld [vmem:[#allocation2 + $0x20] sm:$0xff] }
 0x18d   :  { %v10136_v34 = vand.u32 4294901760, %v1148_v23  ;;  %v1692_v53 = vsub.f32 %v10191_v32, %v1691_v63 }
 0x18f   :  { %1204 = vmatmul.f32.vlgmr.msra.gmra.mxu1 %v10136_v34  ;;  %v10146_v51 = vsub.f32 %v1148_v23, %v10136_v34 }
 0x190   :  { %1408 = vmatpush.msra.mxu1 %v10095_v18 }
 0x191   :  { %1230 = vmatmul.f32.vlgmr.msra.gmra.mxu2 %v10146_v51  ;;  %v1170_v33 = vand.u32 4294901760, %v10146_v51 }
 0x192   :  { %1410 = vmatpush.msra.mxu1 %v10104_v40  ;;  %1435 = vmatpush.msra.mxu2 %v1352_v54  ;;  %v10179_v54 = vsub.f32 %v1514_v50, %v10160_v36 }
 0x193   :  { %1255 = vmatmul.f32.vlgmr.msra.gmra.mxu3 %v1170_v33  ;;  %v1171_v15 = vsub.f32 %v10146_v51, %v1170_v33 }
 0x194   :  { %1439 = vmatpush.msra.mxu2 %v1358_v13  ;;  %1460 = vmatpush.msra.mxu3 %v10095_v18  ;;  %v1657_v18 = vand.u32 4294901760, %v1656_v43  ;;  %v10185_v13 = vand.u32 4294901760, %v1506_v57  ;;  %v1685_v41 = vand.u32 4294901760, %v10179_v54 }
 0x195   :  { %v1172_v39 = vand.u32 4294901760, %v1171_v15  ;;  %v1709_v15 = vand.u32 4294901760, %v10224_v45 }
 0x196   :  { %1462 = vmatpush.msra.mxu3 %v10104_v40  ;;  %v10193_v40 = vand.u32 4294901760, %v1502_v30  ;;  %v10201_v47 = vsub.f32 %v1506_v57, %v10185_v13  ;;  %v1686_v7 = vsub.f32 %v10179_v54, %v1685_v41  ;;  %v10248_v57 = vsub.f32 %v1490_v59, %v10226_v49 }
 0x197   :  { %1173 = vmatmul.f32.vlgmr.msra.gmra.mxu0 %v1172_v39  ;;  %1305 = vmatmul.f32.vlgmr.msrb.gmra.mxu1 %v10136_v34  ;;  %v1710_v22 = vsub.f32 %v10224_v45, %v1709_v15 }
 0x198   :  { %1383 = vmatpush.msra.mxu0 %v10102_v20  ;;  %1652 = vmatpush.msrb.mxu1 %v1651_v3  ;;  %v1669_v20 = vand.u32 4294901760, %v1668_v27  ;;  %v10215_v0 = vsub.f32 %v1502_v30, %v10193_v40  ;;  %v1697_v26 = vand.u32 4294901760, %v10201_v47  ;;  %v10250_v3 = vand.u32 4294901760, %v1482_v5 }
 0x199   :  { %1332 = vmatmul.f32.vlgmr.msrb.gmra.mxu2 %v1172_v39  ;;  %v1693_v39 = vand.u32 4294901760, %v1692_v53  ;;  %v10262_v27 = vand.u32 4294901760, %v1478_v42 }
 0x19a   :  { %1386 = vmatpush.msra.mxu0 %v10109_v61  ;;  %1658 = vmatpush.msrb.mxu1 %v1657_v18  ;;  %v1680_v61 = vsub.f32 %v10173_v1, %v1679_v31  ;;  %v1703_v50 = vand.u32 4294901760, %v10215_v0  ;;  %v1698_v43 = vsub.f32 %v10201_v47, %v1697_v26  ;;  %v10260_v18 = vsub.f32 %v1486_v10, %v10238_v11 }
 0x19b   :  { %1363 = vmatmul.f32.vlgmr.msrb.gmra.mxu3 %v10136_v34  ;;  %1750 = vmatpush.msrb.mxu2 %v10124_v55  ;;  %v10272_v37 = vsub.f32 %v1482_v5, %v10250_v3 }
 0x19c   :  { %1664 = vmatpush.msrb.mxu1 %v1663_v19  ;;  %1803 = vmatpush.msrb.mxu3 %v10117_v28  ;;  %v1681_v23 = vand.u32 4294901760, %v1680_v61  ;;  %v1704_v30 = vsub.f32 %v10215_v0, %v1703_v50  ;;  %v1721_v19 = vand.u32 4294901760, %v10248_v57  ;;  %v1727_v59 = vand.u32 4294901760, %v10260_v18 }
 0x19d   :  { %1753 = vmatpush.msrb.mxu2 %v10127_v56  ;;  %v10282_v61 = vsub.f32 %v1478_v42, %v10262_v27 }
 0x19e   :  { %1670 = vmatpush.msrb.mxu1 %v1669_v20  ;;  %1805 = vmatpush.msrb.mxu3 %v10119_v29  ;;  %v1705_v38 = vand.u32 4294901760, %v1704_v30  ;;  %v1716_v20 = vsub.f32 %v10230_v4, %v1715_v58  ;;  %v1728_v5 = vsub.f32 %v10260_v18, %v1727_v59 }
 0x19f   :  { %1282 = vmatmul.f32.vlgmr.msrb.gmra.mxu0 %v10136_v34  ;;  %1414 = vmatmul.f32.vlgmr.msra.gmra.mxu1 %v1170_v33  ;;  %v1687_v33 = vand.u32 4294901760, %v1686_v7  ;;  %v1733_v7 = vand.u32 4294901760, %v10272_v37 }
 0x1a0   :  { %1756 = vmatpush.msrb.mxu2 %v10134_v25  ;;  %1607 = vmatpush.msrb.mxu0 %v10117_v28  ;;  %v1717_v10 = vand.u32 4294901760, %v1716_v20  ;;  %v1729_v42 = vand.u32 4294901760, %v1728_v5 }
 0x1a1   :  { %1441 = vmatmul.f32.vlgmr.msra.gmra.mxu2 %v10136_v34  ;;  %1676 = vmatpush.msrb.mxu1 %v1675_v6  ;;  %v1722_v6 = vsub.f32 %v10248_v57, %v1721_v19 }
 0x1a2   :  { %1759 = vmatpush.msrb.mxu2 %v10142_v8  ;;  %1807 = vmatpush.msrb.mxu3 %v10121_v44 }
 0x1a3   :  { %1464 = vmatmul.f32.vlgmr.msra.gmra.mxu3 %v10136_v34  ;;  %1609 = vmatpush.msrb.mxu0 %v10119_v29  ;;  %v1699_v34 = vand.u32 4294901760, %v1698_v43  ;;  %v1723_v53 = vand.u32 4294901760, %v1722_v6 }
 0x1a4   :  { %1682 = vmatpush.msrb.mxu1 %v1681_v23  ;;  %1762 = vmatpush.msrb.mxu2 %v10158_v35  ;;  %v1739_v23 = vand.u32 4294901760, %v10282_v61 }
 0x1a5   :  { %1809 = vmatpush.msrb.mxu3 %v10129_v60  ;;  %1611 = vmatpush.msrb.mxu0 %v10121_v44 }
 0x1a6   :  { %1688 = vmatpush.msrb.mxu1 %v1687_v33  ;;  %1765 = vmatpush.msrb.mxu2 %v10173_v1  ;;  %v1734_v33 = vsub.f32 %v10272_v37, %v1733_v7  ;;  %v1740_v43 = vsub.f32 %v10282_v61, %v1739_v23 }
 0x1a7   :  { %1389 = vmatmul.f32.vlgmr.msra.gmra.mxu0 %v10146_v51  ;;  %1811 = vmatpush.msrb.mxu3 %v10138_v46  ;;  %v1711_v51 = vand.u32 4294901760, %v1710_v22 }
 0x1a8   :  { %1613 = vmatpush.msrb.mxu0 %v10129_v60  ;;  %1694 = vmatpush.msrb.mxu1 %v1693_v39  ;;  %v1735_v39 = vand.u32 4294901760, %v1734_v33  ;;  %v1741_v30 = vand.u32 4294901760, %v1740_v43 }
 0x1a9   :  { %1768 = vmatpush.msrb.mxu2 %v10179_v54  ;;  %1813 = vmatpush.msrb.mxu3 %v10153_v9 }
 0x1aa   :  { %1615 = vmatpush.msrb.mxu0 %v10138_v46  ;;  %1700 = vmatpush.msrb.mxu1 %v1699_v34 }
 0x1ab   :  { %1771 = vmatpush.msrb.mxu2 %v10191_v32  ;;  %1815 = vmatpush.msrb.mxu3 %v10160_v36 }
 0x1ac   :  { %1617 = vmatpush.msrb.mxu0 %v10153_v9  ;;  %1706 = vmatpush.msrb.mxu1 %v1705_v38 }
 0x1ad   :  { %1774 = vmatpush.msrb.mxu2 %v10201_v47  ;;  %1817 = vmatpush.msrb.mxu3 %v10175_v17 }
 0x1ae   :  { %1619 = vmatpush.msrb.mxu0 %v10160_v36  ;;  %1712 = vmatpush.msrb.mxu1 %v1711_v51  ;;  %v1562_v51 = vld [vmem:[#allocation2 + $0x2a0] sm:$0xff] }
 0x1af   :  { %1777 = vmatpush.msrb.mxu2 %v10215_v0  ;;  %1819 = vmatpush.msrb.mxu3 %v10185_v13 }
 0x1b0   :  { %1621 = vmatpush.msrb.mxu0 %v10175_v17  ;;  %1718 = vmatpush.msrb.mxu1 %v1717_v10  ;;  %v10466_v10 = vand.u32 4294901760, %v1562_v51 }
 0x1b1   :  { %1780 = vmatpush.msrb.mxu2 %v10224_v45  ;;  %1821 = vmatpush.msrb.mxu3 %v10193_v40 }
 0x1b2   :  { %1623 = vmatpush.msrb.mxu0 %v10185_v13  ;;  %1724 = vmatpush.msrb.mxu1 %v1723_v53  ;;  %v1558_v53 = vld [vmem:[#allocation2 + $0x280] sm:$0xff] }
 0x1b3   :  { %1783 = vmatpush.msrb.mxu2 %v10230_v4  ;;  %1823 = vmatpush.msrb.mxu3 %v10203_v48  ;;  %v10479_v43 = vand.u32 4294901760, %v1558_v53 }
 0x1b4   :  { %1625 = vmatpush.msrb.mxu0 %v10193_v40  ;;  %1730 = vmatpush.msrb.mxu1 %v1729_v42 }
 0x1b5   :  { %1786 = vmatpush.msrb.mxu2 %v10248_v57  ;;  %1825 = vmatpush.msrb.mxu3 %v10207_v52 }
 0x1b6   :  { %1627 = vmatpush.msrb.mxu0 %v10203_v48  ;;  %1736 = vmatpush.msrb.mxu1 %v1735_v39  ;;  %v10482_v39 = vsub.f32 %v1562_v51, %v10466_v10 }
 0x1b7   :  { %1789 = vmatpush.msrb.mxu2 %v10260_v18  ;;  %1827 = vmatpush.msrb.mxu3 %v10226_v49 }
 0x1b8   :  { %1629 = vmatpush.msrb.mxu0 %v10207_v52  ;;  %1742 = vmatpush.msrb.mxu1 %v1741_v30 }
 0x1b9   :  { %1792 = vmatpush.msrb.mxu2 %v10272_v37  ;;  %1829 = vmatpush.msrb.mxu3 %v10238_v11 }
 0x1ba   :  { %1911 = vmatpush.msra.mxu1 %v10117_v28  ;;  %1631 = vmatpush.msrb.mxu0 %v10226_v49  ;;  %v1602_v28 = vld [vmem:[#allocation2 + $0x3e0] sm:$0xff] }
 0x1bb   :  { %1795 = vmatpush.msrb.mxu2 %v10282_v61  ;;  %1831 = vmatpush.msrb.mxu3 %v10250_v3 }
 0x1bc   :  { %1913 = vmatpush.msra.mxu1 %v10119_v29  ;;  %1633 = vmatpush.msrb.mxu0 %v10238_v11  ;;  %v10379_v29 = vand.u32 4294901760, %v1602_v28 }
 0x1bd   :  { %1833 = vmatpush.msrb.mxu3 %v10262_v27 }
 0x1be   :  { %1915 = vmatpush.msra.mxu1 %v10121_v44  ;;  %1635 = vmatpush.msrb.mxu0 %v10250_v3  ;;  %v1598_v44 = vld [vmem:[#allocation2 + $0x3c0] sm:$0xff]  ;;  %v10383_v55 = vsub.f32 %v1602_v28, %v10379_v29 }
 0x1bf   :  { %1948 = vmatpush.msra.mxu2 %v10379_v29  ;;  %v10385_v56 = vand.u32 4294901760, %v1598_v44  ;;  %v1554_v28 = vld [vmem:[#allocation2 + $0x260] sm:$0xff] }
 0x1c0   :  { %1917 = vmatpush.msra.mxu1 %v10129_v60  ;;  %1637 = vmatpush.msrb.mxu0 %v10262_v27  ;;  %v1594_v60 = vld [vmem:[#allocation2 + $0x3a0] sm:$0xff] }
 0x1c1   :  { %1950 = vmatpush.msra.mxu2 %v10385_v56  ;;  %v10389_v25 = vand.u32 4294901760, %v1594_v60 }
 0x1c2   :  { %1844 = vmatpush.msra.mxu0 %v1649_v24  ;;  %1919 = vmatpush.msra.mxu1 %v10138_v46  ;;  %v1990_v24 = vand.u32 4294901760, %v10383_v55  ;;  %v10392_v46 = vsub.f32 %v1598_v44, %v10385_v56 }
 0x1c3   :  { %1952 = vmatpush.msra.mxu2 %v10389_v25  ;;  %v10402_v35 = vsub.f32 %v1594_v60, %v10389_v25 }
 0x1c4   :  { %1848 = vmatpush.msra.mxu0 %v1655_v16  ;;  %1921 = vmatpush.msra.mxu1 %v10153_v9  ;;  %v1590_v16 = vld [vmem:[#allocation2 + $0x380] sm:$0xff]  ;;  %v1991_v8 = vsub.f32 %v10383_v55, %v1990_v24 }
 0x1c5   :  { %v10399_v9 = vand.u32 4294901760, %v1590_v16 }
 0x1c6   :  { %1852 = vmatpush.msra.mxu0 %v1661_v12  ;;  %1923 = vmatpush.msra.mxu1 %v10160_v36  ;;  %v1996_v12 = vand.u32 4294901760, %v10392_v46  ;;  %v1586_v36 = vld [vmem:[#allocation2 + $0x360] sm:$0xff] }
 0x1c7   :  { %1954 = vmatpush.msra.mxu2 %v10399_v9  ;;  %v10412_v54 = vsub.f32 %v1590_v16, %v10399_v9  ;;  %v15481_v16 = vand.u32 4294901760, %v10482_v39 }
 0x1c8   :  { %1856 = vmatpush.msra.mxu0 %v1667_v62  ;;  %1925 = vmatpush.msra.mxu1 %v10175_v17  ;;  %v1992_v62 = vand.u32 4294901760, %v1991_v8  ;;  %v1997_v1 = vsub.f32 %v10392_v46, %v1996_v12  ;;  %v2002_v17 = vand.u32 4294901760, %v10402_v35  ;;  %v10489_v8 = vand.u32 4294901760, %v1554_v28 }
 0x1c9   :  { %v2008_v47 = vand.u32 4294901760, %v10412_v54 }
 0x1ca   :  { %1860 = vmatpush.msra.mxu0 %v1673_v21  ;;  %1927 = vmatpush.msra.mxu1 %v10185_v13  ;;  %v10409_v21 = vand.u32 4294901760, %v1586_v36  ;;  %v1582_v13 = vld [vmem:[#allocation2 + $0x340] sm:$0xff]  ;;  %v2003_v32 = vsub.f32 %v10402_v35, %v2002_v17 }
 0x1cb   :  { %1993 = vmatpush.msra.mxu3 %v1992_v62  ;;  %v2009_v45 = vsub.f32 %v10412_v54, %v2008_v47  ;;  %v1550_v62 = vld [vmem:[#allocation2 + $0x240] sm:$0xff] }
 0x1cc   :  { %1864 = vmatpush.msra.mxu0 %v1679_v31  ;;  %1929 = vmatpush.msra.mxu1 %v10193_v40  ;;  %v1998_v31 = vand.u32 4294901760, %v1997_v1  ;;  %v10418_v40 = vand.u32 4294901760, %v1582_v13 }
 0x1cd   :  { %1956 = vmatpush.msra.mxu2 %v10409_v21  ;;  %v2010_v57 = vand.u32 4294901760, %v2009_v45 }
 0x1ce   :  { %1868 = vmatpush.msra.mxu0 %v1685_v41  ;;  %1931 = vmatpush.msra.mxu1 %v10203_v48  ;;  %v10421_v41 = vsub.f32 %v1586_v36, %v10409_v21  ;;  %v1578_v48 = vld [vmem:[#allocation2 + $0x320] sm:$0xff]  ;;  %v10492_v36 = vsub.f32 %v1558_v53, %v10479_v43 }
 0x1cf   :  { %1999 = vmatpush.msra.mxu3 %v1998_v31  ;;  %1958 = vmatpush.msra.mxu2 %v10418_v40  ;;  %v10426_v0 = vand.u32 4294901760, %v1578_v48  ;;  %v10498_v31 = vand.u32 4294901760, %v1550_v62 }
 0x1d0   :  { %1872 = vmatpush.msra.mxu0 %v1691_v63  ;;  %1933 = vmatpush.msra.mxu1 %v10207_v52  ;;  %v2004_v52 = vand.u32 4294901760, %v2003_v32  ;;  %v2014_v63 = vand.u32 4294901760, %v10421_v41  ;;  %v10501_v32 = vsub.f32 %v1554_v28, %v10489_v8 }
 0x1d1   :  { %1960 = vmatpush.msra.mxu2 %v10426_v0 }
 0x1d2   :  { %1876 = vmatpush.msra.mxu0 %v1697_v26  ;;  %1935 = vmatpush.msra.mxu1 %v10226_v49  ;;  %v10429_v26 = vsub.f32 %v1582_v13, %v10418_v40  ;;  %v1574_v49 = vld [vmem:[#allocation2 + $0x300] sm:$0xff]  ;;  %v2015_v4 = vsub.f32 %v10421_v41, %v2014_v63  ;;  %v2051_v13 = vsub.f32 %v10482_v39, %v15481_v16 }
 0x1d3   :  { %2005 = vmatpush.msra.mxu3 %v2004_v52  ;;  %v1546_v52 = vld [vmem:[#allocation2 + $0x220] sm:$0xff] }
 0x1d4   :  { %1880 = vmatpush.msra.mxu0 %v1703_v50  ;;  %1937 = vmatpush.msra.mxu1 %v10238_v11  ;;  %v2020_v50 = vand.u32 4294901760, %v10429_v26  ;;  %v10439_v11 = vand.u32 4294901760, %v1574_v49  ;;  %v2052_v45 = vand.u32 4294901760, %v2051_v13 }
 0x1d5   :  { %2011 = vmatpush.msra.mxu3 %v2010_v57  ;;  %v10509_v57 = vsub.f32 %v1550_v62, %v10498_v31 }
 0x1d6   :  { %1884 = vmatpush.msra.mxu0 %v1709_v15  ;;  %1939 = vmatpush.msra.mxu1 %v10250_v3  ;;  %v10442_v15 = vsub.f32 %v1578_v48, %v10426_v0  ;;  %v1570_v3 = vld [vmem:[#allocation2 + $0x2e0] sm:$0xff]  ;;  %v2021_v18 = vsub.f32 %v10429_v26, %v2020_v50  ;;  %v10452_v22 = vsub.f32 %v1574_v49, %v10439_v11  ;;  %v15479_v48 = vand.u32 4294901760, %v10492_v36 }
 0x1d7   :  { %1962 = vmatpush.msra.mxu2 %v10439_v11  ;;  %v10449_v34 = vand.u32 4294901760, %v1570_v3  ;;  %v15478_v49 = vand.u32 4294901760, %v10501_v32 }
 0x1d8   :  { %1888 = vmatpush.msra.mxu0 %v1715_v58  ;;  %1941 = vmatpush.msra.mxu1 %v10262_v27  ;;  %v2016_v58 = vand.u32 4294901760, %v2015_v4  ;;  %v2026_v27 = vand.u32 4294901760, %v10442_v15  ;;  %v2022_v37 = vand.u32 4294901760, %v2021_v18  ;;  %v2032_v61 = vand.u32 4294901760, %v10452_v22 }
 0x1d9   :  { %1964 = vmatpush.msra.mxu2 %v10449_v34  ;;  %v10506_v4 = vand.u32 4294901760, %v1546_v52  ;;  %v2063_v18 = vsub.f32 %v10501_v32, %v15478_v49 }
 0x1da   :  { %1892 = vmatpush.msra.mxu0 %v1721_v19  ;;  %v1566_v19 = vld [vmem:[#allocation2 + $0x2c0] sm:$0xff]  ;;  %v2027_v38 = vsub.f32 %v10442_v15, %v2026_v27  ;;  %2017 = vmatpush.msra.mxu3 %v2016_v58 }
 0x1db   :  { %v10458_v20 = vand.u32 4294901760, %v1566_v19  ;;  %v1542_v58 = vld [vmem:[#allocation2 + $0x200] sm:$0xff] }
 0x1dc   :  { %1896 = vmatpush.msra.mxu0 %v1727_v59  ;;  %v10461_v59 = vsub.f32 %v1570_v3, %v10449_v34  ;;  %v2028_v6 = vand.u32 4294901760, %v2027_v38  ;;  %2023 = vmatpush.msra.mxu3 %v2022_v37  ;;  %v2057_v3 = vsub.f32 %v10492_v36, %v15479_v48  ;;  %v10519_v37 = vand.u32 4294901760, %v1542_v58 }
 0x1dd   :  { %1966 = vmatpush.msra.mxu2 %v10458_v20  ;;  %v10469_v5 = vsub.f32 %v1566_v19, %v10458_v20  ;;  %v15477_v19 = vand.u32 4294901760, %v10509_v57  ;;  %v10522_v38 = vsub.f32 %v1546_v52, %v10506_v4 }
 0x1de   :  { %1900 = vmatpush.msra.mxu0 %v1733_v7  ;;  %v15483_v7 = vand.u32 4294901760, %v10461_v59  ;;  %2029 = vmatpush.msra.mxu3 %v2028_v6  ;;  %v2058_v51 = vand.u32 4294901760, %v2057_v3  ;;  %v2064_v6 = vand.u32 4294901760, %v2063_v18 }
 0x1df   :  { %1968 = vmatpush.msra.mxu2 %v10466_v10  ;;  %v15482_v42 = vand.u32 4294901760, %v10469_v5  ;;  %v15476_v53 = vand.u32 4294901760, %v10522_v38 }
 0x1e0   :  { %1904 = vmatpush.msra.mxu0 %v1739_v23  ;;  %v2033_v23 = vsub.f32 %v10452_v22, %v2032_v61  ;;  %v2039_v33 = vsub.f32 %v10461_v59, %v15483_v7 }
 0x1e1   :  { %v2045_v60 = vsub.f32 %v10469_v5, %v15482_v42  ;;  %1970 = vmatpush.msra.mxu2 %v10479_v43  ;;  %v2075_v28 = vsub.f32 %v10522_v38, %v15476_v53 }
 0x1e2   :  { %v2034_v30 = vand.u32 4294901760, %v2033_v23  ;;  %v2040_v44 = vand.u32 4294901760, %v2039_v33  ;;  %v2069_v23 = vsub.f32 %v10509_v57, %v15477_v19  ;;  %v10530_v33 = vsub.f32 %v1542_v58, %v10519_v37 }
 0x1e3   :  { %v2046_v1 = vand.u32 4294901760, %v2045_v60  ;;  %1972 = vmatpush.msra.mxu2 %v10489_v8  ;;  %v2076_v60 = vand.u32 4294901760, %v2075_v28 }
 0x1e4   :  { %2035 = vmatpush.msra.mxu3 %v2034_v30  ;;  %v2070_v30 = vand.u32 4294901760, %v2069_v23 }
 0x1e5   :  { %1974 = vmatpush.msra.mxu2 %v10498_v31 }
 0x1e6   :  { %2041 = vmatpush.msra.mxu3 %v2040_v44  ;;  %v15480_v44 = vand.u32 4294901760, %v10530_v33 }
 0x1e7   :  { %1976 = vmatpush.msra.mxu2 %v10506_v4 }
 0x1e8   :  { %2047 = vmatpush.msra.mxu3 %v2046_v1  ;;  %v2081_v62 = vsub.f32 %v10530_v33, %v15480_v44 }
 0x1e9   :  { %1978 = vmatpush.msra.mxu2 %v10519_v37 }
 0x1ea   :  { %2053 = vmatpush.msra.mxu3 %v2052_v45  ;;  %v2082_v1 = vand.u32 4294901760, %v2081_v62 }
 0x1ec   :  { %2059 = vmatpush.msra.mxu3 %v2058_v51 }
 0x1ee   :  { %2065 = vmatpush.msra.mxu3 %v2064_v6 }
 0x1f0   :  { %2071 = vmatpush.msra.mxu3 %v2070_v30 }
 0x1f2   :  { %2077 = vmatpush.msra.mxu3 %v2076_v60 }
 0x1f4   :  { %2083 = vmatpush.msra.mxu3 %v2082_v1 }
 0x20c   :  { %v1205_v13 = vpop.f32.mrf.mxu1 }
 0x214   :  { %v1174_v52 = vpop.f32.mrf.mxu0  ;;  %v1231_v45 = vpop.f32.mrf.mxu2 }
 0x215   :  { %v1206_v3 = vadd.f32 %v1205_v13, %v1174_v52  ;;  %v1306_v23 = vpop.f32.mrf.mxu1 }
 0x216   :  { %v1256_v58 = vpop.f32.mrf.mxu3 }
 0x217   :  { %v1232_v18 = vadd.f32 %v1231_v45, %v1206_v3 }
 0x219   :  { %v1257_v51 = vadd.f32 %v1256_v58, %v1232_v18  ;;  %v15749_v18 = vand.u32 4294901760, %v10482_v39 }
 0x21c   :  { %v1283_v53 = vpop.f32.mrf.mxu0  ;;  %v1333_v6 = vpop.f32.mrf.mxu2 }
 0x21d   :  { %v1284_v19 = vadd.f32 %v1283_v53, %v1257_v51  ;;  %v1415_v42 = vpop.f32.mrf.mxu1 }
 0x21e   :  { %v1364_v49 = vpop.f32.mrf.mxu3 }
 0x21f   :  { %v1307_v28 = vadd.f32 %v1306_v23, %v1284_v19  ;;  %v1365_v62 = vadd.f32 %v1364_v49, %v1333_v6  ;;  %v15750_v6 = vand.u32 4294901760, %v10492_v36 }
 0x221   :  { %v1468_v48 = vperm.slane %v1307_v28, 0  ;;  %v1472_v30 = vperm.slane %v1307_v28, 1 }
 0x223   :  { %v1470_v44 = vmul.f32 %v1468_v48, %v9990_v14 }
 0x224   :  { %v1390_v60 = vpop.f32.mrf.mxu0  ;;  %v1442_v52 = vpop.f32.mrf.mxu2 }
 0x225   :  { %v1474_v1 = vadd.f32 %v1472_v30, %v1470_v44  ;;  %v1391_v16 = vadd.f32 %v1390_v60, %v1365_v62  ;;  %v15751_v62 = vand.u32 4294901760, %v10501_v32 }
 0x226   :  { %v1465_v58 = vpop.f32.mrf.mxu3 }
 0x227   :  { %v1476_v7 = vmax.f32 %v1474_v1, 0.0  ;;  %v1416_v13 = vadd.f32 %v1415_v42, %v1391_v16 }
 0x229   :  { %v10540_v45 = vand.u32 4294901760, %v1476_v7  ;;  %v1443_v3 = vadd.f32 %v1442_v52, %v1416_v13  ;;  %v1507_v13 = vld [vmem:[#allocation2 + $0xe8] sm:$0xff]  ;;  %v15752_v52 = vand.u32 4294901760, %v10509_v57 }
 0x22b   :  { %v10543_v53 = vsub.f32 %v1476_v7, %v10540_v45  ;;  %v1466_v19 = vadd.f32 %v1465_v58, %v1443_v3  ;;  %1744 = vmatmul.f32.vlgmr.msrb.gmra.mxu1 %v10540_v45 }
 0x22c   :  { %2144 = vmatpush.msrb.mxu1 %v10379_v29 }
 0x22d   :  { %15742 = vst [vmem:[#allocation8_spill] sm:$0xff] %v10543_v53  ;;  %v1469_v14 = vperm.slane %v1466_v19, 0  ;;  %1798 = vmatmul.f32.vlgmr.msrb.gmra.mxu2 %v10543_v53  ;;  %v10549_v48 = vand.u32 4294901760, %v10543_v53  ;;  %v1473_v7 = vperm.slane %v1466_v19, 1 }
 0x22e   :  { %2146 = vmatpush.msrb.mxu1 %v10385_v56  ;;  %2185 = vmatpush.msrb.mxu2 %v1990_v24 }
 0x22f   :  { %15743 = vst [vmem:[#allocation9_spill] sm:$0xff] %v10549_v48  ;;  %v1471_v42 = vmul.f32 %v1469_v14, %v9997_v2  ;;  %1837 = vmatmul.f32.vlgmr.msrb.gmra.mxu3 %v10549_v48  ;;  %v1641_v16 = vsub.f32 %v10543_v53, %v10549_v48  ;;  %v10693_v14 = vand.u32 4294901760, %v1507_v13 }
 0x230   :  { %2148 = vmatpush.msrb.mxu1 %v10389_v25  ;;  %2189 = vmatpush.msrb.mxu2 %v1996_v12 }
 0x231   :  { %v1475_v49 = vadd.f32 %v1473_v7, %v1471_v42  ;;  %2252 = vmatpush.msrb.mxu3 %v10379_v29  ;;  %v10562_v44 = vand.u32 4294901760, %v1641_v16  ;;  %v15753_v42 = vand.u32 4294901760, %v10522_v38 }
 0x232   :  { %2150 = vmatpush.msrb.mxu1 %v10399_v9  ;;  %2193 = vmatpush.msrb.mxu2 %v2002_v17 }
 0x233   :  { %15744 = vst [vmem:[#allocation10_spill] sm:$0xff] %v10562_v44  ;;  %v1477_v2 = vmax.f32 %v1475_v49, 0.0  ;;  %2254 = vmatpush.msrb.mxu3 %v10385_v56  ;;  %1643 = vmatmul.f32.vlgmr.msrb.gmra.mxu0 %v10562_v44  ;;  %v1499_v49 = vld [vmem:[#allocation2 + $0xa8] sm:$0xff] }
 0x234   :  { %1943 = vmatmul.f32.vlgmr.msra.gmra.mxu1 %v10540_v45  ;;  %2091 = vmatpush.msrb.mxu0 %v10383_v55  ;;  %v1539_v55 = vld [vmem:[#allocation2 + $0x1e8] sm:$0xff] }
 0x235   :  { %v10571_v24 = vand.u32 4294901760, %v1477_v2  ;;  %2152 = vmatpush.msrb.mxu1 %v10409_v21  ;;  %2197 = vmatpush.msrb.mxu2 %v2008_v47  ;;  %v10598_v12 = vand.u32 4294901760, %v1539_v55  ;;  %v15747_v47 = vand.u32 4294901760, %v10461_v59 }
 0x236   :  { %2256 = vmatpush.msrb.mxu3 %v10389_v25  ;;  %2094 = vmatpush.msrb.mxu0 %v10392_v46  ;;  %v1535_v25 = vld [vmem:[#allocation2 + $0x1c8] sm:$0xff] }
 0x237   :  { %v10579_v29 = vsub.f32 %v1477_v2, %v10571_v24  ;;  %2154 = vmatpush.msrb.mxu1 %v10418_v40  ;;  %2201 = vmatpush.msrb.mxu2 %v2014_v63  ;;  %v10607_v17 = vand.u32 4294901760, %v1535_v25  ;;  %v1523_v63 = vld [vmem:[#allocation2 + $0x168] sm:$0xff] }
 0x238   :  { %2258 = vmatpush.msrb.mxu3 %v10399_v9  ;;  %2097 = vmatpush.msrb.mxu0 %v10402_v35  ;;  %v1531_v9 = vld [vmem:[#allocation2 + $0x1a8] sm:$0xff] }
 0x239   :  { %15745 = vst [vmem:[#allocation11_spill] sm:$0xff] %v10579_v29  ;;  %2085 = vmatmul.f32.vlgmr.msra.gmra.mxu3 %v10571_v24  ;;  %2156 = vmatpush.msrb.mxu1 %v10426_v0  ;;  %v10589_v56 = vand.u32 4294901760, %v10579_v29 }
 0x23a   :  { %2205 = vmatpush.msrb.mxu2 %v2020_v50  ;;  %2260 = vmatpush.msrb.mxu3 %v10409_v21  ;;  %v1527_v21 = vld [vmem:[#allocation2 + $0x188] sm:$0xff]  ;;  %v15748_v50 = vand.u32 4294901760, %v10469_v5 }
 0x23b   :  { %15746 = vst [vmem:[#allocation12_spill] sm:$0xff] %v10589_v56  ;;  %2100 = vmatpush.msrb.mxu0 %v10412_v54  ;;  %2158 = vmatpush.msrb.mxu1 %v10439_v11  ;;  %v1982_v46 = vsub.f32 %v10579_v29, %v10589_v56  ;;  %v10615_v54 = vsub.f32 %v1539_v55, %v10598_v12 }
 0x23c   :  { %2209 = vmatpush.msrb.mxu2 %v2026_v27  ;;  %2262 = vmatpush.msrb.mxu3 %v10418_v40  ;;  %v10617_v40 = vand.u32 4294901760, %v1531_v9  ;;  %v10638_v27 = vand.u32 4294901760, %v1523_v63 }
 0x23d   :  { %1906 = vmatmul.f32.vlgmr.msra.gmra.mxu0 %v10540_v45  ;;  %2160 = vmatpush.msrb.mxu1 %v10449_v34  ;;  %v10605_v35 = vand.u32 4294901760, %v1982_v46 }
 0x23e   :  { %2103 = vmatpush.msrb.mxu0 %v10421_v41  ;;  %2213 = vmatpush.msrb.mxu2 %v2032_v61  ;;  %v10625_v41 = vsub.f32 %v1535_v25, %v10607_v17  ;;  %v1519_v61 = vld [vmem:[#allocation2 + $0x148] sm:$0xff]  ;;  %v10661_v30 = vsub.f32 %v1523_v63, %v10638_v27 }
 0x23f   :  { %2264 = vmatpush.msrb.mxu3 %v10426_v0  ;;  %2162 = vmatpush.msrb.mxu1 %v10458_v20  ;;  %v10627_v0 = vand.u32 4294901760, %v1527_v21  ;;  %v10651_v23 = vand.u32 4294901760, %v1519_v61 }
 0x240   :  { %2106 = vmatpush.msrb.mxu0 %v10429_v26  ;;  %2217 = vmatpush.msrb.mxu2 %v15747_v47  ;;  %v15500_v26 = vand.u32 4294901760, %v10615_v54  ;;  %v15495_v58 = vand.u32 4294901760, %v10661_v30 }
 0x241   :  { %2266 = vmatpush.msrb.mxu3 %v10439_v11  ;;  %1984 = vmatmul.f32.vlgmr.msra.gmra.mxu2 %v10605_v35  ;;  %v10636_v11 = vsub.f32 %v1531_v9, %v10617_v40  ;;  %v10647_v51 = vsub.f32 %v1527_v21, %v10627_v0  ;;  %v1495_v9 = vld [vmem:[#allocation2 + $0x88] sm:$0xff]  ;;  %v10720_v21 = vand.u32 4294901760, %v1499_v49 }
 0x242   :  { %2109 = vmatpush.msrb.mxu0 %v10442_v15  ;;  %2164 = vmatpush.msrb.mxu1 %v10466_v10  ;;  %v1515_v15 = vld [vmem:[#allocation2 + $0x128] sm:$0xff]  ;;  %v2356_v25 = vsub.f32 %v10661_v30, %v15495_v58 }
 0x243   :  { %2221 = vmatpush.msrb.mxu2 %v15748_v50  ;;  %2268 = vmatpush.msrb.mxu3 %v10449_v34  ;;  %v15499_v34 = vand.u32 4294901760, %v10625_v41  ;;  %v15497_v28 = vand.u32 4294901760, %v10636_v11  ;;  %v15496_v60 = vand.u32 4294901760, %v10647_v51  ;;  %v1491_v50 = vld [vmem:[#allocation2 + $0x68] sm:$0xff] }
 0x244   :  { %2112 = vmatpush.msrb.mxu0 %v10452_v22  ;;  %2166 = vmatpush.msrb.mxu1 %v10479_v43  ;;  %v1511_v22 = vld [vmem:[#allocation2 + $0x108] sm:$0xff] }
 0x245   :  { %2225 = vmatpush.msrb.mxu2 %v15749_v18  ;;  %2270 = vmatpush.msrb.mxu3 %v10458_v20  ;;  %v2332_v20 = vsub.f32 %v10615_v54, %v15500_v26  ;;  %v10674_v1 = vand.u32 4294901760, %v1511_v22  ;;  %v2344_v3 = vsub.f32 %v10636_v11, %v15497_v28  ;;  %v2350_v7 = vsub.f32 %v10647_v51, %v15496_v60  ;;  %v1575_v58 = vld [vmem:[#allocation2 + $0x308] sm:$0xff] }
 0x246   :  { %2115 = vmatpush.msrb.mxu0 %v10461_v59  ;;  %2168 = vmatpush.msrb.mxu1 %v10489_v8  ;;  %v10663_v59 = vand.u32 4294901760, %v1515_v15  ;;  %v2357_v18 = vand.u32 4294901760, %v2356_v25 }
 0x247   :  { %2229 = vmatpush.msrb.mxu2 %v15750_v6  ;;  %2272 = vmatpush.msrb.mxu3 %v10466_v10  ;;  %v2338_v10 = vsub.f32 %v10625_v41, %v15499_v34  ;;  %v10702_v16 = vsub.f32 %v1511_v22, %v10674_v1  ;;  %v2345_v55 = vand.u32 4294901760, %v2344_v3  ;;  %v2351_v47 = vand.u32 4294901760, %v2350_v7 }
 0x248   :  { %2118 = vmatpush.msrb.mxu0 %v10469_v5  ;;  %2170 = vmatpush.msrb.mxu1 %v10498_v31  ;;  %v10679_v5 = vsub.f32 %v1519_v61, %v10651_v23  ;;  %v10689_v19 = vsub.f32 %v1515_v15, %v10663_v59  ;;  %v10732_v15 = vand.u32 4294901760, %v1495_v9  ;;  %v10742_v6 = vsub.f32 %v1499_v49, %v10720_v21 }
 0x249   :  { %2233 = vmatpush.msrb.mxu2 %v15751_v62  ;;  %2274 = vmatpush.msrb.mxu3 %v10479_v43  ;;  %v2333_v43 = vand.u32 4294901760, %v2332_v20  ;;  %v15492_v63 = vand.u32 4294901760, %v10702_v16  ;;  %v10744_v20 = vand.u32 4294901760, %v1491_v50  ;;  %v10888_v34 = vand.u32 4294901760, %v1575_v58 }
 0x24a   :  { %2121 = vmatpush.msrb.mxu0 %v10482_v39  ;;  %2172 = vmatpush.msrb.mxu1 %v10506_v4  ;;  %v1503_v39 = vld [vmem:[#allocation2 + $0xc8] sm:$0xff]  ;;  %v15493_v46 = vand.u32 4294901760, %v10689_v19 }
 0x24b   :  { %2237 = vmatpush.msrb.mxu2 %v15752_v52  ;;  %2276 = vmatpush.msrb.mxu3 %v10489_v8  ;;  %v2339_v8 = vand.u32 4294901760, %v2338_v10  ;;  %v10707_v2 = vand.u32 4294901760, %v1503_v39  ;;  %v2374_v62 = vsub.f32 %v10702_v16, %v15492_v63  ;;  %v1483_v10 = vld [vmem:[#allocation2 + $0x28] sm:$0xff]  ;;  %v10766_v7 = vsub.f32 %v1491_v50, %v10744_v20 }
 0x24c   :  { %2124 = vmatpush.msrb.mxu0 %v10492_v36  ;;  %2174 = vmatpush.msrb.mxu1 %v10519_v37  ;;  %v15494_v36 = vand.u32 4294901760, %v10679_v5  ;;  %v2368_v22 = vsub.f32 %v10689_v19, %v15493_v46  ;;  %v10768_v49 = vand.u32 4294901760, %v1483_v10 }
 0x24d   :  { %2241 = vmatpush.msrb.mxu2 %v15753_v42  ;;  %2278 = vmatpush.msrb.mxu3 %v10498_v31  ;;  %v15754_v31 = vand.u32 4294901760, %v10530_v33  ;;  %v10730_v61 = vsub.f32 %v1503_v39, %v10707_v2  ;;  %v1479_v39 = vld [vmem:[#allocation2 + $0x8] sm:$0xff] }
 0x24e   :  { %2178 = vmatmul.f32.vlgmr.msrb.gmra.mxu1 %v10589_v56  ;;  %2127 = vmatpush.msrb.mxu0 %v10501_v32  ;;  %v10718_v32 = vsub.f32 %v1507_v13, %v10693_v14 }
 0x24f   :  { %2334 = vmatpush.msra.mxu1 %v2333_v43  ;;  %2245 = vmatpush.msrb.mxu2 %v15754_v31  ;;  %v15488_v52 = vand.u32 4294901760, %v10730_v61  ;;  %v10754_v43 = vsub.f32 %v1495_v9, %v10732_v15  ;;  %v10780_v9 = vand.u32 4294901760, %v1479_v39 }
 0x250   :  { %2280 = vmatpush.msrb.mxu3 %v10506_v4  ;;  %2247 = vmatmul.f32.vlgmr.msrb.gmra.mxu2 %v10571_v24  ;;  %v2362_v4 = vsub.f32 %v10679_v5, %v15494_v36  ;;  %v1579_v36 = vld [vmem:[#allocation2 + $0x328] sm:$0xff] }
 0x251   :  { %2340 = vmatpush.msra.mxu1 %v2339_v8  ;;  %2432 = vmatpush.msra.mxu2 %v10615_v54  ;;  %v15486_v8 = vand.u32 4294901760, %v10742_v6  ;;  %v2386_v31 = vsub.f32 %v10730_v61, %v15488_v52  ;;  %v1591_v52 = vld [vmem:[#allocation2 + $0x388] sm:$0xff]  ;;  %v10875_v28 = vand.u32 4294901760, %v1579_v36 }
 0x252   :  { %2130 = vmatpush.msrb.mxu0 %v10509_v57  ;;  %2282 = vmatpush.msrb.mxu3 %v10519_v37  ;;  %v1487_v57 = vld [vmem:[#allocation2 + $0x48] sm:$0xff]  ;;  %v15490_v37 = vand.u32 4294901760, %v10718_v32  ;;  %v2363_v13 = vand.u32 4294901760, %v2362_v4  ;;  %v15485_v4 = vand.u32 4294901760, %v10766_v7 }
 0x253   :  { %2284 = vmatmul.f32.vlgmr.msrb.gmra.mxu3 %v10571_v24  ;;  %2346 = vmatpush.msra.mxu1 %v2345_v55  ;;  %v10756_v3 = vand.u32 4294901760, %v1487_v57  ;;  %v15484_v55 = vand.u32 4294901760, %v10754_v43  ;;  %v2392_v50 = vsub.f32 %v10742_v6, %v15486_v8  ;;  %v1595_v8 = vld [vmem:[#allocation2 + $0x3a8] sm:$0xff] }
 0x254   :  { %2435 = vmatpush.msra.mxu2 %v10625_v41  ;;  %2485 = vmatpush.msra.mxu3 %v10598_v12  ;;  %v2380_v42 = vsub.f32 %v10718_v32, %v15490_v37  ;;  %v1587_v37 = vld [vmem:[#allocation2 + $0x368] sm:$0xff] }
 0x255   :  { %2133 = vmatpush.msrb.mxu0 %v10522_v38  ;;  %2352 = vmatpush.msra.mxu1 %v2351_v47  ;;  %v2369_v38 = vand.u32 4294901760, %v2368_v22  ;;  %v10778_v25 = vsub.f32 %v1487_v57, %v10756_v3  ;;  %v2387_v22 = vand.u32 4294901760, %v2386_v31  ;;  %v2398_v57 = vsub.f32 %v10754_v43, %v15484_v55 }
 0x256   :  { %2438 = vmatpush.msra.mxu2 %v10636_v11  ;;  %2487 = vmatpush.msra.mxu3 %v10607_v17  ;;  %v2381_v47 = vand.u32 4294901760, %v2380_v42  ;;  %v2404_v42 = vsub.f32 %v10766_v7, %v15485_v4 }
 0x257   :  { %2136 = vmatpush.msrb.mxu0 %v10530_v33  ;;  %2358 = vmatpush.msra.mxu1 %v2357_v18  ;;  %v2375_v33 = vand.u32 4294901760, %v2374_v62  ;;  %v10790_v18 = vsub.f32 %v1483_v10, %v10768_v49  ;;  %v15487_v62 = vand.u32 4294901760, %v10778_v25  ;;  %v1603_v10 = vld [vmem:[#allocation2 + $0x3e8] sm:$0xff]  ;;  %v2399_v31 = vand.u32 4294901760, %v2398_v57 }
 0x258   :  { %2139 = vmatmul.f32.vlgmr.msrb.gmra.mxu0 %v10579_v29  ;;  %2441 = vmatpush.msra.mxu2 %v10647_v51  ;;  %v10816_v55 = vand.u32 4294901760, %v1603_v10  ;;  %v2405_v4 = vand.u32 4294901760, %v2404_v42 }
 0x259   :  { %2289 = vmatpush.msra.mxu0 %v10598_v12  ;;  %2489 = vmatpush.msra.mxu3 %v10617_v40 }
 0x25a   :  { %2364 = vmatpush.msra.mxu1 %v2363_v13  ;;  %2444 = vmatpush.msra.mxu2 %v10661_v30  ;;  %v10800_v13 = vsub.f32 %v1479_v39, %v10780_v9  ;;  %v1599_v39 = vld [vmem:[#allocation2 + $0x3c8] sm:$0xff]  ;;  %v10833_v42 = vsub.f32 %v1603_v10, %v10816_v55  ;;  %v10845_v10 = vand.u32 4294901760, %v1591_v52 }
 0x25b   :  { %2291 = vmatpush.msra.mxu0 %v10607_v17  ;;  %2491 = vmatpush.msra.mxu3 %v10627_v0  ;;  %v10824_v57 = vand.u32 4294901760, %v1599_v39 }
 0x25c   :  { %2370 = vmatpush.msra.mxu1 %v2369_v38  ;;  %2447 = vmatpush.msra.mxu2 %v10679_v5  ;;  %15755 = vst [vmem:[#allocation13_spill] sm:$0xff] %v10800_v13  ;;  %v2393_v38 = vand.u32 4294901760, %v2392_v50  ;;  %v15491_v50 = vand.u32 4294901760, %v10800_v13  ;;  %v15498_v46 = vand.u32 4294901760, %v10833_v42 }
 0x25d   :  { %2293 = vmatpush.msra.mxu0 %v10617_v40  ;;  %2493 = vmatpush.msra.mxu3 %v10638_v27 }
 0x25e   :  { %2376 = vmatpush.msra.mxu1 %v2375_v33  ;;  %2450 = vmatpush.msra.mxu2 %v10689_v19  ;;  %v15489_v33 = vand.u32 4294901760, %v10790_v18 }
 0x25f   :  { %2295 = vmatpush.msra.mxu0 %v10627_v0  ;;  %2495 = vmatpush.msra.mxu3 %v10651_v23 }
 0x260   :  { %2382 = vmatpush.msra.mxu1 %v2381_v47  ;;  %2453 = vmatpush.msra.mxu2 %v10702_v16  ;;  %v2410_v47 = vsub.f32 %v10778_v25, %v15487_v62 }
 0x261   :  { %2297 = vmatpush.msra.mxu0 %v10638_v27  ;;  %2497 = vmatpush.msra.mxu3 %v10663_v59 }
 0x262   :  { %2388 = vmatpush.msra.mxu1 %v2387_v22  ;;  %2456 = vmatpush.msra.mxu2 %v10718_v32  ;;  %v2416_v22 = vsub.f32 %v10790_v18, %v15489_v33  ;;  %v2411_v62 = vand.u32 4294901760, %v2410_v47  ;;  %v10837_v33 = vand.u32 4294901760, %v1595_v8  ;;  %v10841_v47 = vsub.f32 %v1599_v39, %v10824_v57 }
 0x263   :  { %2299 = vmatpush.msra.mxu0 %v10651_v23  ;;  %2499 = vmatpush.msra.mxu3 %v10674_v1 }
 0x264   :  { %2394 = vmatpush.msra.mxu1 %v2393_v38  ;;  %2459 = vmatpush.msra.mxu2 %v10730_v61  ;;  %v2422_v38 = vsub.f32 %v10800_v13, %v15491_v50  ;;  %v1583_v50 = vld [vmem:[#allocation2 + $0x348] sm:$0xff]  ;;  %v10854_v39 = vsub.f32 %v1595_v8, %v10837_v33  ;;  %v2673_v8 = vsub.f32 %v10833_v42, %v15498_v46 }
 0x265   :  { %2301 = vmatpush.msra.mxu0 %v10663_v59  ;;  %2501 = vmatpush.msra.mxu3 %v10693_v14  ;;  %v10899_v46 = vsub.f32 %v1579_v36, %v10875_v28  ;;  %v10912_v36 = vsub.f32 %v1575_v58, %v10888_v34 }
 0x266   :  { %2400 = vmatpush.msra.mxu1 %v2399_v31  ;;  %2462 = vmatpush.msra.mxu2 %v10742_v6  ;;  %v2417_v31 = vand.u32 4294901760, %v2416_v22  ;;  %v2423_v63 = vand.u32 4294901760, %v2422_v38  ;;  %v15501_v22 = vand.u32 4294901760, %v10841_v47  ;;  %v10863_v38 = vsub.f32 %v1591_v52, %v10845_v10  ;;  %v1571_v52 = vld [vmem:[#allocation2 + $0x2e8] sm:$0xff] }
 0x267   :  { %2303 = vmatpush.msra.mxu0 %v10674_v1  ;;  %2503 = vmatpush.msra.mxu3 %v10707_v2  ;;  %v2674_v26 = vand.u32 4294901760, %v2673_v8  ;;  %v10901_v29 = vand.u32 4294901760, %v1571_v52 }
 0x268   :  { %2406 = vmatpush.msra.mxu1 %v2405_v4  ;;  %2465 = vmatpush.msra.mxu2 %v10754_v43  ;;  %v10849_v4 = vand.u32 4294901760, %v1587_v37  ;;  %15756 = vst [vmem:[#allocation14_spill] sm:$0xff] %v10863_v38 }
 0x269   :  { %2305 = vmatpush.msra.mxu0 %v10693_v14  ;;  %2505 = vmatpush.msra.mxu3 %v10720_v21  ;;  %v10924_v58 = vsub.f32 %v1571_v52, %v10901_v29 }
 0x26a   :  { %2412 = vmatpush.msra.mxu1 %v2411_v62  ;;  %2468 = vmatpush.msra.mxu2 %v10766_v7  ;;  %v10858_v62 = vand.u32 4294901760, %v1583_v50 }
 0x26b   :  { %2307 = vmatpush.msra.mxu0 %v10707_v2  ;;  %2507 = vmatpush.msra.mxu3 %v10732_v15 }
 0x26c   :  { %2418 = vmatpush.msra.mxu1 %v2417_v31  ;;  %2471 = vmatpush.msra.mxu2 %v10778_v25  ;;  %v10870_v31 = vsub.f32 %v1587_v37, %v10849_v4  ;;  %v10883_v37 = vsub.f32 %v1583_v50, %v10858_v62 }
 0x26d   :  { %2309 = vmatpush.msra.mxu0 %v10720_v21  ;;  %2509 = vmatpush.msra.mxu3 %v10744_v20 }
 0x26e   :  { %2424 = vmatpush.msra.mxu1 %v2423_v63  ;;  %2474 = vmatpush.msra.mxu2 %v10790_v18  ;;  %15757 = vst [vmem:[#allocation15_spill] sm:$0xff] %v10870_v31  ;;  %v2679_v63 = vsub.f32 %v10841_v47, %v15501_v22  ;;  %v1567_v22 = vld [vmem:[#allocation2 + $0x2c8] sm:$0xff] }
 0x26f   :  { %2311 = vmatpush.msra.mxu0 %v10732_v15  ;;  %2511 = vmatpush.msra.mxu3 %v10756_v3  ;;  %15758 = vst [vmem:[#allocation16_spill] sm:$0xff] %v10883_v37  ;;  %v10914_v56 = vand.u32 4294901760, %v1567_v22 }
 0x270   :  { %2426 = vmatmul.f32.vlgmr.msra.gmra.mxu1 %v10540_v45  ;;  %2477 = vmatpush.msra.mxu2 %v10800_v13  ;;  %v2680_v8 = vand.u32 4294901760, %v2679_v63  ;;  %v15761_v63 = vand.u32 4294901760, %v10870_v31  ;;  %v1559_v13 = vld [vmem:[#allocation2 + $0x288] sm:$0xff] }
 0x271   :  { %2593 = vmatpush.msrb.mxu1 %v10598_v12  ;;  %2313 = vmatpush.msra.mxu0 %v10744_v20  ;;  %v15759_v12 = vand.u32 4294901760, %v10854_v39  ;;  %v10936_v52 = vsub.f32 %v1567_v22, %v10914_v56 }
 0x272   :  { %2513 = vmatpush.msra.mxu3 %v10768_v49  ;;  %2480 = vmatmul.f32.vlgmr.msra.gmra.mxu2 %v10543_v53  ;;  %v1563_v53 = vld [vmem:[#allocation2 + $0x2a8] sm:$0xff]  ;;  %v2697_v60 = vsub.f32 %v10870_v31, %v15761_v63 }
 0x273   :  { %2595 = vmatpush.msrb.mxu1 %v10607_v17  ;;  %2630 = vmatpush.msrb.mxu2 %v10816_v55  ;;  %v2685_v50 = vsub.f32 %v10854_v39, %v15759_v12  ;;  %v15760_v17 = vand.u32 4294901760, %v10863_v38  ;;  %v1555_v31 = vld [vmem:[#allocation2 + $0x268] sm:$0xff] }
 0x274   :  { %2315 = vmatpush.msra.mxu0 %v10756_v3  ;;  %2515 = vmatpush.msra.mxu3 %v10780_v9 }
 0x275   :  { %2519 = vmatmul.f32.vlgmr.msra.gmra.mxu3 %v10549_v48  ;;  %2597 = vmatpush.msrb.mxu1 %v10617_v40  ;;  %v2691_v12 = vsub.f32 %v10863_v38, %v15760_v17  ;;  %v2686_v40 = vand.u32 4294901760, %v2685_v50  ;;  %v10926_v48 = vand.u32 4294901760, %v1563_v53  ;;  %v10938_v17 = vand.u32 4294901760, %v1559_v13  ;;  %v1551_v38 = vld [vmem:[#allocation2 + $0x248] sm:$0xff] }
 0x276   :  { %2632 = vmatpush.msrb.mxu2 %v10824_v57  ;;  %2675 = vmatpush.msrb.mxu3 %v2674_v26  ;;  %v15762_v26 = vand.u32 4294901760, %v10883_v37  ;;  %v10964_v50 = vand.u32 4294901760, %v1551_v38 }
 0x277   :  { %2317 = vmatpush.msra.mxu0 %v10768_v49  ;;  %2599 = vmatpush.msrb.mxu1 %v10627_v0  ;;  %v2692_v0 = vand.u32 4294901760, %v2691_v12  ;;  %v10949_v22 = vsub.f32 %v1563_v53, %v10926_v48  ;;  %v10962_v53 = vsub.f32 %v1559_v13, %v10938_v17 }
 0x278   :  { %2634 = vmatpush.msrb.mxu2 %v10837_v33  ;;  %2681 = vmatpush.msrb.mxu3 %v2680_v8  ;;  %v2703_v63 = vsub.f32 %v10883_v37, %v15762_v26  ;;  %v2698_v8 = vand.u32 4294901760, %v2697_v60  ;;  %v15763_v26 = vand.u32 4294901760, %v10615_v54  ;;  %v10951_v37 = vand.u32 4294901760, %v1555_v31 }
 0x279   :  { %2319 = vmatpush.msra.mxu0 %v10780_v9  ;;  %2601 = vmatpush.msrb.mxu1 %v10638_v27  ;;  %v15764_v27 = vand.u32 4294901760, %v10899_v46  ;;  %v15765_v54 = vand.u32 4294901760, %v10625_v41  ;;  %v15767_v41 = vand.u32 4294901760, %v10636_v11  ;;  %v15769_v11 = vand.u32 4294901760, %v10647_v51 }
 0x27a   :  { %2325 = vmatmul.f32.vlgmr.msra.gmra.mxu0 %v10562_v44  ;;  %2636 = vmatpush.msrb.mxu2 %v10845_v10  ;;  %v2704_v60 = vand.u32 4294901760, %v2703_v63  ;;  %v1547_v44 = vld [vmem:[#allocation2 + $0x228] sm:$0xff]  ;;  %v15768_v63 = vand.u32 4294901760, %v10924_v58  ;;  %v10975_v13 = vsub.f32 %v1555_v31, %v10951_v37  ;;  %v10988_v31 = vsub.f32 %v1551_v38, %v10964_v50 }
 0x27b   :  { %2526 = vmatpush.msrb.mxu0 %v15763_v26  ;;  %2687 = vmatpush.msrb.mxu3 %v2686_v40  ;;  %v2709_v12 = vsub.f32 %v10899_v46, %v15764_v27  ;;  %v15766_v40 = vand.u32 4294901760, %v10912_v36  ;;  %v2726_v27 = vand.u32 4294901760, %v10936_v52  ;;  %v15770_v51 = vand.u32 4294901760, %v10661_v30 }
 0x27c   :  { %2603 = vmatpush.msrb.mxu1 %v10651_v23  ;;  %2638 = vmatpush.msrb.mxu2 %v10849_v4  ;;  %v15771_v38 = vand.u32 4294901760, %v10679_v5 }
 0x27d   :  { %2530 = vmatpush.msrb.mxu0 %v15765_v54  ;;  %2693 = vmatpush.msrb.mxu3 %v2692_v0  ;;  %v2715_v26 = vsub.f32 %v10912_v36, %v15766_v40  ;;  %v2710_v23 = vand.u32 4294901760, %v2709_v12  ;;  %v2721_v0 = vsub.f32 %v10924_v58, %v15768_v63  ;;  %v2732_v54 = vand.u32 4294901760, %v10949_v22  ;;  %v1543_v40 = vld [vmem:[#allocation2 + $0x208] sm:$0xff] }
 0x27e   :  { %2605 = vmatpush.msrb.mxu1 %v10663_v59  ;;  %2640 = vmatpush.msrb.mxu2 %v10858_v62  ;;  %v10979_v59 = vand.u32 4294901760, %v1547_v44  ;;  %v2727_v12 = vsub.f32 %v10936_v52, %v2726_v27  ;;  %v2744_v63 = vand.u32 4294901760, %v10975_v13 }
 0x27f   :  { %2534 = vmatpush.msrb.mxu0 %v15767_v41  ;;  %2699 = vmatpush.msrb.mxu3 %v2698_v8  ;;  %v2716_v8 = vand.u32 4294901760, %v2715_v26  ;;  %v2738_v41 = vand.u32 4294901760, %v10962_v53  ;;  %v2733_v26 = vsub.f32 %v10949_v22, %v2732_v54 }
 0x280   :  { %2607 = vmatpush.msrb.mxu1 %v10674_v1  ;;  %2642 = vmatpush.msrb.mxu2 %v10875_v28  ;;  %v10992_v1 = vand.u32 4294901760, %v1543_v40  ;;  %v2728_v30 = vand.u32 4294901760, %v2727_v12 }
 0x281   :  { %2538 = vmatpush.msrb.mxu0 %v15769_v11  ;;  %2705 = vmatpush.msrb.mxu3 %v2704_v60  ;;  %v2722_v60 = vand.u32 4294901760, %v2721_v0  ;;  %v2750_v0 = vand.u32 4294901760, %v10988_v31  ;;  %v2734_v5 = vand.u32 4294901760, %v2733_v26  ;;  %v2745_v11 = vsub.f32 %v10975_v13, %v2744_v63 }
 0x282   :  { %2609 = vmatpush.msrb.mxu1 %v10693_v14  ;;  %2644 = vmatpush.msrb.mxu2 %v10888_v34  ;;  %v11003_v14 = vsub.f32 %v1547_v44, %v10979_v59  ;;  %v15772_v44 = vand.u32 4294901760, %v10689_v19  ;;  %v15777_v26 = vand.u32 4294901760, %v10754_v43  ;;  %v15780_v43 = vand.u32 4294901760, %v10778_v25  ;;  %v15784_v25 = vld [vmem:[#allocation13_spill] sm:$0xff] }
 0x283   :  { %2542 = vmatpush.msrb.mxu0 %v15770_v51  ;;  %2711 = vmatpush.msrb.mxu3 %v2710_v23  ;;  %v2739_v23 = vsub.f32 %v10962_v53, %v2738_v41  ;;  %v2751_v19 = vsub.f32 %v10988_v31, %v2750_v0  ;;  %v2746_v51 = vand.u32 4294901760, %v2745_v11  ;;  %v15790_v11 = vld [vmem:[#allocation16_spill] sm:$0xff] }
 0x284   :  { %2611 = vmatpush.msrb.mxu1 %v10707_v2  ;;  %2646 = vmatpush.msrb.mxu2 %v10901_v29  ;;  %v11014_v2 = vsub.f32 %v1543_v40, %v10992_v1 }
 0x285   :  { %2546 = vmatpush.msrb.mxu0 %v15771_v38  ;;  %2717 = vmatpush.msrb.mxu3 %v2716_v8  ;;  %v15773_v8 = vand.u32 4294901760, %v10702_v16  ;;  %v2740_v40 = vand.u32 4294901760, %v2739_v23  ;;  %v15781_v38 = vand.u32 4294901760, %v10841_v47  ;;  %v15785_v23 = vand.u32 4294901760, %v15784_v25 }
 0x286   :  { %2613 = vmatpush.msrb.mxu1 %v10720_v21  ;;  %2648 = vmatpush.msrb.mxu2 %v10914_v56  ;;  %v2756_v21 = vand.u32 4294901760, %v11003_v14  ;;  %v2762_v12 = vand.u32 4294901760, %v11014_v2 }
 0x287   :  { %2550 = vmatpush.msrb.mxu0 %v15772_v44  ;;  %2723 = vmatpush.msrb.mxu3 %v2722_v60  ;;  %v15775_v60 = vand.u32 4294901760, %v10730_v61  ;;  %v15786_v44 = vld [vmem:[#allocation14_spill] sm:$0xff] }
 0x288   :  { %2615 = vmatpush.msrb.mxu1 %v10732_v15  ;;  %2650 = vmatpush.msrb.mxu2 %v10926_v48  ;;  %v15774_v15 = vand.u32 4294901760, %v10718_v32  ;;  %v2757_v16 = vsub.f32 %v11003_v14, %v2756_v21  ;;  %v2763_v32 = vsub.f32 %v11014_v2, %v2762_v12 }
 0x289   :  { %2554 = vmatpush.msrb.mxu0 %v15773_v8  ;;  %2729 = vmatpush.msrb.mxu3 %v2728_v30  ;;  %v15783_v30 = vand.u32 4294901760, %v10854_v39  ;;  %v15791_v8 = vand.u32 4294901760, %v15790_v11 }
 0x28a   :  { %2617 = vmatpush.msrb.mxu1 %v10744_v20  ;;  %2652 = vmatpush.msrb.mxu2 %v10938_v17  ;;  %v2752_v20 = vand.u32 4294901760, %v2751_v19  ;;  %v2758_v61 = vand.u32 4294901760, %v2757_v16 }
 0x28b   :  { %2558 = vmatpush.msrb.mxu0 %v15774_v15  ;;  %2735 = vmatpush.msrb.mxu3 %v2734_v5  ;;  %v15787_v5 = vand.u32 4294901760, %v15786_v44 }
 0x28c   :  { %2619 = vmatpush.msrb.mxu1 %v10756_v3  ;;  %2654 = vmatpush.msrb.mxu2 %v10951_v37  ;;  %v15776_v3 = vand.u32 4294901760, %v10742_v6  ;;  %v15778_v6 = vand.u32 4294901760, %v10766_v7  ;;  %v15782_v7 = vand.u32 4294901760, %v10790_v18 }
 0x28d   :  { %2562 = vmatpush.msrb.mxu0 %v15775_v60  ;;  %2741 = vmatpush.msrb.mxu3 %v2740_v40  ;;  %v1536_v40 = vld [vmem:[#allocation2 + $0x1d0] sm:$0xff] }
 0x28e   :  { %2621 = vmatpush.msrb.mxu1 %v10768_v49  ;;  %2656 = vmatpush.msrb.mxu2 %v10964_v50  ;;  %v2764_v49 = vand.u32 4294901760, %v2763_v32  ;;  %v1520_v32 = vld [vmem:[#allocation2 + $0x150] sm:$0xff] }
 0x28f   :  { %2566 = vmatpush.msrb.mxu0 %v15776_v3  ;;  %2747 = vmatpush.msrb.mxu3 %v2746_v51  ;;  %v1524_v51 = vld [vmem:[#allocation2 + $0x170] sm:$0xff] }
 0x290   :  { %2623 = vmatpush.msrb.mxu1 %v10780_v9  ;;  %2658 = vmatpush.msrb.mxu2 %v10979_v59  ;;  %v15779_v9 = vand.u32 4294901760, %v10833_v42  ;;  %v1516_v3 = vld [vmem:[#allocation2 + $0x130] sm:$0xff] }
 0x291   :  { %2570 = vmatpush.msrb.mxu0 %v15777_v26  ;;  %2753 = vmatpush.msrb.mxu3 %v2752_v20  ;;  %v11155_v26 = vand.u32 4294901760, %v1516_v3 }
 0x292   :  { %2625 = vmatmul.f32.vlgmr.msrb.gmra.mxu1 %v10540_v45  ;;  %2660 = vmatpush.msrb.mxu2 %v10992_v1 }
 0x293   :  { %2826 = vmatpush.msra.mxu1 %v10816_v55  ;;  %2574 = vmatpush.msrb.mxu0 %v15778_v6 }
 0x294   :  { %2759 = vmatpush.msrb.mxu3 %v2758_v61  ;;  %2666 = vmatmul.f32.vlgmr.msrb.gmra.mxu2 %v10605_v35  ;;  %v1512_v61 = vld [vmem:[#allocation2 + $0x110] sm:$0xff] }
 0x295   :  { %2828 = vmatpush.msra.mxu1 %v10824_v57  ;;  %2867 = vmatpush.msra.mxu2 %v15779_v9  ;;  %v11181_v9 = vsub.f32 %v1516_v3, %v11155_v26 }
 0x296   :  { %2578 = vmatpush.msrb.mxu0 %v15780_v43  ;;  %2765 = vmatpush.msrb.mxu3 %v2764_v49  ;;  %v1508_v49 = vld [vmem:[#allocation2 + $0xf0] sm:$0xff] }
 0x297   :  { %2767 = vmatmul.f32.vlgmr.msrb.gmra.mxu3 %v10571_v24  ;;  %2830 = vmatpush.msra.mxu1 %v10837_v33  ;;  %v1504_v43 = vld [vmem:[#allocation2 + $0xd0] sm:$0xff] }
 0x298   :  { %2871 = vmatpush.msra.mxu2 %v15781_v38  ;;  %2934 = vmatpush.msra.mxu3 %v10816_v55  ;;  %v15788_v55 = vld [vmem:[#allocation15_spill] sm:$0xff]  ;;  %v11200_v25 = vand.u32 4294901760, %v1504_v43 }
 0x299   :  { %2582 = vmatpush.msrb.mxu0 %v15782_v7  ;;  %2832 = vmatpush.msra.mxu1 %v10845_v10  ;;  %v15789_v18 = vand.u32 4294901760, %v15788_v55  ;;  %v1500_v7 = vld [vmem:[#allocation2 + $0xb0] sm:$0xff] }
 0x29a   :  { %2875 = vmatpush.msra.mxu2 %v15783_v30  ;;  %2936 = vmatpush.msra.mxu3 %v10824_v57  ;;  %v1540_v57 = vld [vmem:[#allocation2 + $0x1f0] sm:$0xff]  ;;  %v15795_v30 = vld [vmem:[#allocation12_spill] sm:$0xff] }
 0x29b   :  { %2586 = vmatpush.msrb.mxu0 %v15785_v23  ;;  %2834 = vmatpush.msra.mxu1 %v10849_v4  ;;  %v15528_v23 = vand.u32 4294901760, %v11181_v9 }
 0x29c   :  { %2588 = vmatmul.f32.vlgmr.msrb.gmra.mxu0 %v10540_v45  ;;  %2879 = vmatpush.msra.mxu2 %v15787_v5  ;;  %v11212_v5 = vand.u32 4294901760, %v1500_v7 }
 0x29d   :  { %2773 = vmatpush.msra.mxu0 %v10833_v42  ;;  %2938 = vmatpush.msra.mxu3 %v10837_v33  ;;  %v11092_v33 = vand.u32 4294901760, %v1540_v57  ;;  %v15792_v42 = vand.u32 4294901760, %v10899_v46 }
 0x29e   :  { %2836 = vmatpush.msra.mxu1 %v10858_v62  ;;  %2883 = vmatpush.msra.mxu2 %v15789_v18  ;;  %v1492_v18 = vld [vmem:[#allocation2 + $0x70] sm:$0xff] }
 0x29f   :  { %2776 = vmatpush.msra.mxu0 %v10841_v47  ;;  %2940 = vmatpush.msra.mxu3 %v10845_v10  ;;  %v1532_v47 = vld [vmem:[#allocation2 + $0x1b0] sm:$0xff]  ;;  %v11099_v10 = vand.u32 4294901760, %v1536_v40  ;;  %v11107_v19 = vsub.f32 %v1540_v57, %v11092_v33  ;;  %v11222_v57 = vsub.f32 %v1504_v43, %v11200_v25 }
 0x2a0   :  { %2838 = vmatpush.msra.mxu1 %v10875_v28  ;;  %2887 = vmatpush.msra.mxu2 %v15791_v8  ;;  %v11109_v15 = vand.u32 4294901760, %v1532_v47 }
 0x2a1   :  { %2779 = vmatpush.msra.mxu0 %v10854_v39  ;;  %2942 = vmatpush.msra.mxu3 %v10849_v4  ;;  %v15793_v39 = vand.u32 4294901760, %v10912_v36  ;;  %v1528_v4 = vld [vmem:[#allocation2 + $0x190] sm:$0xff]  ;;  %v11117_v16 = vsub.f32 %v1536_v40, %v11099_v10  ;;  %v3050_v40 = vsub.f32 %v11181_v9, %v15528_v23 }
 0x2a2   :  { %2840 = vmatpush.msra.mxu1 %v10888_v34  ;;  %2891 = vmatpush.msra.mxu2 %v15792_v42  ;;  %v11119_v60 = vand.u32 4294901760, %v1528_v4  ;;  %v11128_v20 = vsub.f32 %v1532_v47, %v11109_v15  ;;  %v11234_v42 = vsub.f32 %v1500_v7, %v11212_v5  ;;  %v11236_v47 = vand.u32 4294901760, %v1492_v18 }
 0x2a3   :  { %2782 = vmatpush.msra.mxu0 %v15786_v44  ;;  %2944 = vmatpush.msra.mxu3 %v10858_v62  ;;  %v15794_v62 = vand.u32 4294901760, %v10924_v58  ;;  %v1496_v44 = vld [vmem:[#allocation2 + $0x90] sm:$0xff] }
 0x2a4   :  { %2842 = vmatpush.msra.mxu1 %v10901_v29  ;;  %2895 = vmatpush.msra.mxu2 %v15793_v39 }
 0x2a5   :  { %2785 = vmatpush.msra.mxu0 %v15788_v55  ;;  %2946 = vmatpush.msra.mxu3 %v10875_v28  ;;  %v15536_v28 = vand.u32 4294901760, %v11107_v19 }
 0x2a6   :  { %2844 = vmatpush.msra.mxu1 %v10914_v56  ;;  %2899 = vmatpush.msra.mxu2 %v15794_v62 }
 0x2a7   :  { %2788 = vmatpush.msra.mxu0 %v15790_v11  ;;  %2948 = vmatpush.msra.mxu3 %v10888_v34  ;;  %v11130_v34 = vand.u32 4294901760, %v1524_v51  ;;  %v11224_v11 = vand.u32 4294901760, %v1496_v44 }
 0x2a8   :  { %2846 = vmatpush.msra.mxu1 %v10926_v48  ;;  %2903 = vmatpush.msra.mxu2 %v2726_v27  ;;  %v11144_v27 = vand.u32 4294901760, %v1520_v32 }
 0x2a9   :  { %2791 = vmatpush.msra.mxu0 %v10899_v46  ;;  %2950 = vmatpush.msra.mxu3 %v10901_v29  ;;  %v15534_v29 = vand.u32 4294901760, %v11117_v16  ;;  %v11139_v46 = vsub.f32 %v1528_v4, %v11119_v60  ;;  %v1484_v4 = vld [vmem:[#allocation2 + $0x30] sm:$0xff] }
 0x2aa   :  { %2848 = vmatpush.msra.mxu1 %v10938_v17  ;;  %2907 = vmatpush.msra.mxu2 %v2732_v54  ;;  %v11153_v54 = vsub.f32 %v1524_v51, %v11130_v34  ;;  %v15525_v51 = vand.u32 4294901760, %v11222_v57 }
 0x2ab   :  { %2794 = vmatpush.msra.mxu0 %v10912_v36  ;;  %2952 = vmatpush.msra.mxu3 %v10914_v56  ;;  %v3014_v56 = vsub.f32 %v11107_v19, %v15536_v28  ;;  %v15533_v36 = vand.u32 4294901760, %v11128_v20 }
 0x2ac   :  { %2850 = vmatpush.msra.mxu1 %v10951_v37  ;;  %2911 = vmatpush.msra.mxu2 %v2738_v41  ;;  %v11166_v41 = vand.u32 4294901760, %v1512_v61  ;;  %v15531_v6 = vand.u32 4294901760, %v11153_v54  ;;  %v3068_v43 = vsub.f32 %v11222_v57, %v15525_v51 }
 0x2ad   :  { %2797 = vmatpush.msra.mxu0 %v10924_v58  ;;  %2954 = vmatpush.msra.mxu3 %v10926_v48  ;;  %v3020_v48 = vsub.f32 %v11117_v16, %v15534_v29  ;;  %v15532_v58 = vand.u32 4294901760, %v11139_v46 }
 0x2ae   :  { %2852 = vmatpush.msra.mxu1 %v10964_v50  ;;  %2915 = vmatpush.msra.mxu2 %v2744_v63  ;;  %v11172_v63 = vsub.f32 %v1520_v32, %v11144_v27  ;;  %v11194_v38 = vsub.f32 %v1512_v61, %v11166_v41  ;;  %v11246_v32 = vsub.f32 %v1496_v44, %v11224_v11  ;;  %v1480_v61 = vld [vmem:[#allocation2 + $0x10] sm:$0xff] }
 0x2af   :  { %2800 = vmatpush.msra.mxu0 %v10936_v52  ;;  %2956 = vmatpush.msra.mxu3 %v10938_v17  ;;  %v3015_v17 = vand.u32 4294901760, %v3014_v56  ;;  %v3026_v52 = vsub.f32 %v11128_v20, %v15533_v36  ;;  %v15796_v56 = vld [vmem:[#allocation11_spill] sm:$0xff]  ;;  %v11272_v7 = vand.u32 4294901760, %v1480_v61 }
 0x2b0   :  { %2854 = vmatpush.msra.mxu1 %v10979_v59  ;;  %2919 = vmatpush.msra.mxu2 %v2750_v0  ;;  %v11186_v0 = vand.u32 4294901760, %v1508_v49  ;;  %v15527_v55 = vand.u32 4294901760, %v11194_v38 }
 0x2b1   :  { %2803 = vmatpush.msra.mxu0 %v10949_v22  ;;  %2958 = vmatpush.msra.mxu3 %v10951_v37  ;;  %v3021_v37 = vand.u32 4294901760, %v3020_v48  ;;  %v3032_v22 = vsub.f32 %v11139_v46, %v15532_v58  ;;  %v15801_v58 = vld [vmem:[#allocation8_spill] sm:$0xff] }
 0x2b2   :  { %2856 = vmatpush.msra.mxu1 %v10992_v1  ;;  %2923 = vmatpush.msra.mxu2 %v2756_v21  ;;  %v15529_v21 = vand.u32 4294901760, %v11172_v63  ;;  %v3056_v39 = vsub.f32 %v11194_v38, %v15527_v55  ;;  %v1576_v55 = vld [vmem:[#allocation2 + $0x310] sm:$0xff] }
 0x2b3   :  { %2806 = vmatpush.msra.mxu0 %v10962_v53  ;;  %2960 = vmatpush.msra.mxu3 %v10964_v50  ;;  %v3027_v50 = vand.u32 4294901760, %v3026_v52  ;;  %v3038_v53 = vsub.f32 %v11153_v54, %v15531_v6  ;;  %v11260_v52 = vand.u32 4294901760, %v1484_v4  ;;  %v11380_v6 = vand.u32 4294901760, %v1576_v55 }
 0x2b4   :  { %2860 = vmatmul.f32.vlgmr.msra.gmra.mxu1 %v15795_v30  ;;  %2927 = vmatpush.msra.mxu2 %v2762_v12  ;;  %v11210_v12 = vsub.f32 %v1508_v49, %v11186_v0  ;;  %v15524_v49 = vand.u32 4294901760, %v11234_v42  ;;  %v1560_v30 = vld [vmem:[#allocation2 + $0x290] sm:$0xff] }
 0x2b5   :  { %3016 = vmatpush.msrb.mxu1 %v3015_v17  ;;  %2809 = vmatpush.msra.mxu0 %v10975_v13  ;;  %v3033_v13 = vand.u32 4294901760, %v3032_v22  ;;  %v3039_v8 = vand.u32 4294901760, %v3038_v53  ;;  %v11258_v17 = vsub.f32 %v1492_v18, %v11236_v47  ;;  %v3069_v18 = vand.u32 4294901760, %v3068_v43 }
 0x2b6   :  { %2962 = vmatpush.msra.mxu3 %v10979_v59  ;;  %2929 = vmatmul.f32.vlgmr.msra.gmra.mxu2 %v10571_v24  ;;  %v3044_v59 = vsub.f32 %v11172_v63, %v15529_v21  ;;  %v3074_v53 = vsub.f32 %v11234_v42, %v15524_v49 }
 0x2b7   :  { %3022 = vmatpush.msrb.mxu1 %v3021_v37  ;;  %3114 = vmatpush.msrb.mxu2 %v11107_v19  ;;  %v15522_v37 = vand.u32 4294901760, %v11246_v32  ;;  %v15520_v44 = vand.u32 4294901760, %v11258_v17 }
 0x2b8   :  { %2812 = vmatpush.msra.mxu0 %v10988_v31  ;;  %2964 = vmatpush.msra.mxu3 %v10992_v1  ;;  %v1488_v31 = vld [vmem:[#allocation2 + $0x50] sm:$0xff]  ;;  %v15526_v1 = vand.u32 4294901760, %v11210_v12  ;;  %v3045_v62 = vand.u32 4294901760, %v3044_v59 }
 0x2b9   :  { %2966 = vmatmul.f32.vlgmr.msra.gmra.mxu3 %v10571_v24  ;;  %3028 = vmatpush.msrb.mxu1 %v3027_v50  ;;  %v11248_v3 = vand.u32 4294901760, %v1488_v31  ;;  %v3080_v59 = vsub.f32 %v11246_v32, %v15522_v37  ;;  %v1588_v37 = vld [vmem:[#allocation2 + $0x370] sm:$0xff] }
 0x2ba   :  { %3117 = vmatpush.msrb.mxu2 %v11117_v16  ;;  %3167 = vmatpush.msrb.mxu3 %v11092_v33  ;;  %v3062_v48 = vsub.f32 %v11210_v12, %v15526_v1  ;;  %v1580_v1 = vld [vmem:[#allocation2 + $0x330] sm:$0xff] }
 0x2bb   :  { %2815 = vmatpush.msra.mxu0 %v11003_v14  ;;  %3034 = vmatpush.msrb.mxu1 %v3033_v13  ;;  %v3051_v14 = vand.u32 4294901760, %v3050_v40  ;;  %v11270_v22 = vsub.f32 %v1488_v31, %v11248_v3  ;;  %v11282_v13 = vsub.f32 %v1484_v4, %v11260_v52  ;;  %v11292_v40 = vsub.f32 %v1480_v61, %v11272_v7  ;;  %v1604_v31 = vld [vmem:[#allocation2 + $0x3f0] sm:$0xff] }
 0x2bc   :  { %3120 = vmatpush.msrb.mxu2 %v11128_v20  ;;  %3169 = vmatpush.msrb.mxu3 %v11099_v10  ;;  %v3063_v50 = vand.u32 4294901760, %v3062_v48  ;;  %v3086_v4 = vsub.f32 %v11258_v17, %v15520_v44  ;;  %v3081_v61 = vand.u32 4294901760, %v3080_v59  ;;  %v11308_v43 = vand.u32 4294901760, %v1604_v31  ;;  %v1596_v59 = vld [vmem:[#allocation2 + $0x3b0] sm:$0xff] }
 0x2bd   :  { %2818 = vmatpush.msra.mxu0 %v11014_v2  ;;  %3040 = vmatpush.msrb.mxu1 %v3039_v8  ;;  %v3057_v2 = vand.u32 4294901760, %v3056_v39  ;;  %v15519_v8 = vand.u32 4294901760, %v11270_v22  ;;  %15797 = vst [vmem:[#allocation13_spill] sm:$0xff] %v11292_v40  ;;  %v3075_v39 = vand.u32 4294901760, %v3074_v53  ;;  %v1592_v44 = vld [vmem:[#allocation2 + $0x390] sm:$0xff]  ;;  %v11367_v21 = vand.u32 4294901760, %v1580_v1 }
 0x2be   :  { %2821 = vmatmul.f32.vlgmr.msra.gmra.mxu0 %v15796_v56  ;;  %3123 = vmatpush.msrb.mxu2 %v11139_v46 }
 0x2bf   :  { %2971 = vmatpush.msrb.mxu0 %v11092_v33  ;;  %3171 = vmatpush.msrb.mxu3 %v11109_v15  ;;  %v3092_v48 = vsub.f32 %v11270_v22, %v15519_v8 }
 0x2c0   :  { %3046 = vmatpush.msrb.mxu1 %v3045_v62  ;;  %3126 = vmatpush.msrb.mxu2 %v11153_v54  ;;  %v15521_v62 = vand.u32 4294901760, %v11282_v13 }
 0x2c1   :  { %2973 = vmatpush.msrb.mxu0 %v11099_v10  ;;  %3173 = vmatpush.msrb.mxu3 %v11119_v60  ;;  %v3093_v8 = vand.u32 4294901760, %v3092_v48 }
 0x2c2   :  { %3052 = vmatpush.msrb.mxu1 %v3051_v14  ;;  %3129 = vmatpush.msrb.mxu2 %v11172_v63  ;;  %v1600_v14 = vld [vmem:[#allocation2 + $0x3d0] sm:$0xff]  ;;  %v3098_v53 = vsub.f32 %v11282_v13, %v15521_v62  ;;  %v11329_v62 = vand.u32 4294901760, %v1596_v59 }
 0x2c3   :  { %2975 = vmatpush.msrb.mxu0 %v11109_v15  ;;  %3175 = vmatpush.msrb.mxu3 %v11130_v34 }
 0x2c4   :  { %3058 = vmatpush.msrb.mxu1 %v3057_v2  ;;  %3132 = vmatpush.msrb.mxu2 %v11181_v9  ;;  %v15523_v2 = vand.u32 4294901760, %v11292_v40 }
 0x2c5   :  { %2977 = vmatpush.msrb.mxu0 %v11119_v60  ;;  %3177 = vmatpush.msrb.mxu3 %v11144_v27 }
 0x2c6   :  { %3064 = vmatpush.msrb.mxu1 %v3063_v50  ;;  %3135 = vmatpush.msrb.mxu2 %v11194_v38  ;;  %v3087_v50 = vand.u32 4294901760, %v3086_v4  ;;  %v11325_v4 = vsub.f32 %v1604_v31, %v11308_v43  ;;  %v11337_v31 = vand.u32 4294901760, %v1592_v44 }
 0x2c7   :  { %2979 = vmatpush.msrb.mxu0 %v11130_v34  ;;  %3179 = vmatpush.msrb.mxu3 %v11155_v26 }
 0x2c8   :  { %3070 = vmatpush.msrb.mxu1 %v3069_v18  ;;  %3138 = vmatpush.msrb.mxu2 %v11210_v12  ;;  %v11316_v18 = vand.u32 4294901760, %v1600_v14  ;;  %v15530_v51 = vand.u32 4294901760, %v11325_v4 }
 0x2c9   :  { %2981 = vmatpush.msrb.mxu0 %v11144_v27  ;;  %3181 = vmatpush.msrb.mxu3 %v11166_v41 }
 0x2ca   :  { %3076 = vmatpush.msrb.mxu1 %v3075_v39  ;;  %3141 = vmatpush.msrb.mxu2 %v11222_v57  ;;  %v3104_v39 = vsub.f32 %v11292_v40, %v15523_v2  ;;  %v11333_v48 = vsub.f32 %v1600_v14, %v11316_v18  ;;  %v1584_v2 = vld [vmem:[#allocation2 + $0x350] sm:$0xff]  ;;  %v11346_v14 = vsub.f32 %v1596_v59, %v11329_v62 }
 0x2cb   :  { %2983 = vmatpush.msrb.mxu0 %v11155_v26  ;;  %3183 = vmatpush.msrb.mxu3 %v11186_v0  ;;  %v3355_v59 = vsub.f32 %v11325_v4, %v15530_v51  ;;  %v1564_v51 = vld [vmem:[#allocation2 + $0x2b0] sm:$0xff] }
 0x2cc   :  { %3082 = vmatpush.msrb.mxu1 %v3081_v61  ;;  %3144 = vmatpush.msrb.mxu2 %v11234_v42  ;;  %v3099_v61 = vand.u32 4294901760, %v3098_v53  ;;  %v3105_v49 = vand.u32 4294901760, %v3104_v39  ;;  %v15535_v53 = vand.u32 4294901760, %v11333_v48  ;;  %v11355_v39 = vsub.f32 %v1592_v44, %v11337_v31  ;;  %v1572_v44 = vld [vmem:[#allocation2 + $0x2f0] sm:$0xff] }
 0x2cd   :  { %2985 = vmatpush.msrb.mxu0 %v11166_v41  ;;  %3185 = vmatpush.msrb.mxu3 %v11200_v25  ;;  %v15537_v23 = vand.u32 4294901760, %v11346_v14  ;;  %v3356_v36 = vand.u32 4294901760, %v3355_v59  ;;  %v11393_v28 = vand.u32 4294901760, %v1572_v44 }
 0x2ce   :  { %3088 = vmatpush.msrb.mxu1 %v3087_v50  ;;  %3147 = vmatpush.msrb.mxu2 %v11246_v32  ;;  %v11341_v50 = vand.u32 4294901760, %v1588_v37  ;;  %15798 = vst [vmem:[#allocation14_spill] sm:$0xff] %v11355_v39 }
 0x2cf   :  { %2987 = vmatpush.msrb.mxu0 %v11186_v0  ;;  %3187 = vmatpush.msrb.mxu3 %v11212_v5 }
 0x2d0   :  { %3094 = vmatpush.msrb.mxu1 %v3093_v8  ;;  %3150 = vmatpush.msrb.mxu2 %v11258_v17  ;;  %v11350_v8 = vand.u32 4294901760, %v1584_v2 }
 0x2d1   :  { %2989 = vmatpush.msrb.mxu0 %v11200_v25  ;;  %3189 = vmatpush.msrb.mxu3 %v11224_v11 }
 0x2d2   :  { %3100 = vmatpush.msrb.mxu1 %v3099_v61  ;;  %3153 = vmatpush.msrb.mxu2 %v11270_v22  ;;  %v11362_v61 = vsub.f32 %v1588_v37, %v11341_v50  ;;  %v11375_v37 = vsub.f32 %v1584_v2, %v11350_v8  ;;  %v11391_v2 = vsub.f32 %v1580_v1, %v11367_v21 }
 0x2d3   :  { %2991 = vmatpush.msrb.mxu0 %v11212_v5  ;;  %3191 = vmatpush.msrb.mxu3 %v11236_v47  ;;  %v11404_v1 = vsub.f32 %v1576_v55, %v11380_v6  ;;  %v11416_v55 = vsub.f32 %v1572_v44, %v11393_v28 }
 0x2d4   :  { %3106 = vmatpush.msrb.mxu1 %v3105_v49  ;;  %3156 = vmatpush.msrb.mxu2 %v11282_v13  ;;  %15799 = vst [vmem:[#allocation15_spill] sm:$0xff] %v11362_v61  ;;  %v3361_v49 = vsub.f32 %v11333_v48, %v15535_v53  ;;  %v1568_v53 = vld [vmem:[#allocation2 + $0x2d0] sm:$0xff] }
 0x2d5   :  { %2993 = vmatpush.msrb.mxu0 %v11224_v11  ;;  %3193 = vmatpush.msrb.mxu3 %v11248_v3  ;;  %15800 = vst [vmem:[#allocation16_spill] sm:$0xff] %v11375_v37  ;;  %v11406_v56 = vand.u32 4294901760, %v1568_v53 }
 0x2d6   :  { %3108 = vmatmul.f32.vlgmr.msrb.gmra.mxu1 %v10540_v45  ;;  %3159 = vmatpush.msrb.mxu2 %v11292_v40  ;;  %v3362_v59 = vand.u32 4294901760, %v3361_v49  ;;  %v15804_v49 = vand.u32 4294901760, %v11362_v61  ;;  %v1552_v40 = vld [vmem:[#allocation2 + $0x250] sm:$0xff] }
 0x2d7   :  { %3275 = vmatpush.msra.mxu1 %v11092_v33  ;;  %2995 = vmatpush.msrb.mxu0 %v11236_v47  ;;  %v3367_v33 = vsub.f32 %v11346_v14, %v15537_v23  ;;  %v11428_v44 = vsub.f32 %v1568_v53, %v11406_v56 }
 0x2d8   :  { %3195 = vmatpush.msrb.mxu3 %v11260_v52  ;;  %3162 = vmatmul.f32.vlgmr.msrb.gmra.mxu2 %v15801_v58  ;;  %v15803_v58 = vand.u32 4294901760, %v11355_v39  ;;  %v3379_v29 = vsub.f32 %v11362_v61, %v15804_v49  ;;  %v1556_v61 = vld [vmem:[#allocation2 + $0x270] sm:$0xff] }
 0x2d9   :  { %3277 = vmatpush.msra.mxu1 %v11099_v10  ;;  %3312 = vmatpush.msra.mxu2 %v11308_v43  ;;  %v15802_v10 = vld [vmem:[#allocation9_spill] sm:$0xff] }
 0x2da   :  { %2997 = vmatpush.msrb.mxu0 %v11248_v3  ;;  %3197 = vmatpush.msrb.mxu3 %v11272_v7  ;;  %v3373_v23 = vsub.f32 %v11355_v39, %v15803_v58  ;;  %v11430_v58 = vand.u32 4294901760, %v1560_v30  ;;  %v15806_v39 = vld [vmem:[#allocation10_spill] sm:$0xff] }
 0x2db   :  { %3201 = vmatmul.f32.vlgmr.msrb.gmra.mxu3 %v15802_v10  ;;  %3279 = vmatpush.msra.mxu1 %v11109_v15  ;;  %v3368_v15 = vand.u32 4294901760, %v3367_v33  ;;  %v11418_v10 = vand.u32 4294901760, %v1564_v51  ;;  %v11456_v33 = vand.u32 4294901760, %v1552_v40 }
 0x2dc   :  { %3314 = vmatpush.msra.mxu2 %v11316_v18  ;;  %3357 = vmatpush.msra.mxu3 %v3356_v36  ;;  %v15805_v36 = vand.u32 4294901760, %v11375_v37 }
 0x2dd   :  { %2999 = vmatpush.msrb.mxu0 %v11260_v52  ;;  %3281 = vmatpush.msra.mxu1 %v11119_v60  ;;  %v3374_v60 = vand.u32 4294901760, %v3373_v23  ;;  %v11441_v53 = vsub.f32 %v1564_v51, %v11418_v10  ;;  %v11454_v51 = vsub.f32 %v1560_v30, %v11430_v58 }
 0x2de   :  { %3316 = vmatpush.msra.mxu2 %v11329_v62  ;;  %3363 = vmatpush.msra.mxu3 %v3362_v59  ;;  %v3385_v49 = vsub.f32 %v11375_v37, %v15805_v36  ;;  %v3380_v59 = vand.u32 4294901760, %v3379_v29  ;;  %v15807_v36 = vand.u32 4294901760, %v11107_v19  ;;  %v11443_v37 = vand.u32 4294901760, %v1556_v61 }
 0x2df   :  { %3001 = vmatpush.msrb.mxu0 %v11272_v7  ;;  %3283 = vmatpush.msra.mxu1 %v11130_v34  ;;  %v15808_v34 = vand.u32 4294901760, %v11391_v2  ;;  %v15809_v19 = vand.u32 4294901760, %v11117_v16  ;;  %v15811_v16 = vand.u32 4294901760, %v11128_v20  ;;  %v15813_v20 = vand.u32 4294901760, %v11139_v46 }
 0x2e0   :  { %3007 = vmatmul.f32.vlgmr.msrb.gmra.mxu0 %v15806_v39  ;;  %3318 = vmatpush.msra.mxu2 %v11337_v31  ;;  %v3386_v29 = vand.u32 4294901760, %v3385_v49  ;;  %v1548_v39 = vld [vmem:[#allocation2 + $0x230] sm:$0xff]  ;;  %v15812_v49 = vand.u32 4294901760, %v11416_v55  ;;  %v11467_v30 = vsub.f32 %v1556_v61, %v11443_v37  ;;  %v11480_v61 = vsub.f32 %v1552_v40, %v11456_v33 }
 0x2e1   :  { %3208 = vmatpush.msra.mxu0 %v15807_v36  ;;  %3369 = vmatpush.msra.mxu3 %v3368_v15  ;;  %v3391_v23 = vsub.f32 %v11391_v2, %v15808_v34  ;;  %v15810_v15 = vand.u32 4294901760, %v11404_v1  ;;  %v3408_v34 = vand.u32 4294901760, %v11428_v44  ;;  %v15814_v46 = vand.u32 4294901760, %v11153_v54 }
 0x2e2   :  { %3285 = vmatpush.msra.mxu1 %v11144_v27  ;;  %3320 = vmatpush.msra.mxu2 %v11341_v50  ;;  %v15815_v40 = vand.u32 4294901760, %v11172_v63 }
 0x2e3   :  { %3212 = vmatpush.msra.mxu0 %v15809_v19  ;;  %3375 = vmatpush.msra.mxu3 %v3374_v60  ;;  %v3397_v36 = vsub.f32 %v11404_v1, %v15810_v15  ;;  %v3392_v27 = vand.u32 4294901760, %v3391_v23  ;;  %v3403_v60 = vsub.f32 %v11416_v55, %v15812_v49  ;;  %v3414_v19 = vand.u32 4294901760, %v11441_v53  ;;  %v1544_v15 = vld [vmem:[#allocation2 + $0x210] sm:$0xff] }
 0x2e4   :  { %3287 = vmatpush.msra.mxu1 %v11155_v26  ;;  %3322 = vmatpush.msra.mxu2 %v11350_v8  ;;  %v11471_v26 = vand.u32 4294901760, %v1548_v39  ;;  %v3409_v23 = vsub.f32 %v11428_v44, %v3408_v34  ;;  %v3426_v49 = vand.u32 4294901760, %v11467_v30 }
 0x2e5   :  { %3216 = vmatpush.msra.mxu0 %v15811_v16  ;;  %3381 = vmatpush.msra.mxu3 %v3380_v59  ;;  %v3398_v59 = vand.u32 4294901760, %v3397_v36  ;;  %v3420_v16 = vand.u32 4294901760, %v11454_v51  ;;  %v3415_v36 = vsub.f32 %v11441_v53, %v3414_v19 }
 0x2e6   :  { %3289 = vmatpush.msra.mxu1 %v11166_v41  ;;  %3324 = vmatpush.msra.mxu2 %v11367_v21  ;;  %v11484_v41 = vand.u32 4294901760, %v1544_v15  ;;  %v3410_v54 = vand.u32 4294901760, %v3409_v23 }
 0x2e7   :  { %3220 = vmatpush.msra.mxu0 %v15813_v20  ;;  %3387 = vmatpush.msra.mxu3 %v3386_v29  ;;  %v3404_v29 = vand.u32 4294901760, %v3403_v60  ;;  %v3432_v60 = vand.u32 4294901760, %v11480_v61  ;;  %v3416_v63 = vand.u32 4294901760, %v3415_v36  ;;  %v3427_v20 = vsub.f32 %v11467_v30, %v3426_v49 }
 0x2e8   :  { %3291 = vmatpush.msra.mxu1 %v11186_v0  ;;  %3326 = vmatpush.msra.mxu2 %v11380_v6  ;;  %v11495_v0 = vsub.f32 %v1548_v39, %v11471_v26  ;;  %v15816_v39 = vand.u32 4294901760, %v11181_v9  ;;  %v15821_v36 = vand.u32 4294901760, %v11246_v32  ;;  %v15824_v32 = vand.u32 4294901760, %v11270_v22  ;;  %v15828_v22 = vld [vmem:[#allocation13_spill] sm:$0xff] }
 0x2e9   :  { %3224 = vmatpush.msra.mxu0 %v15814_v46  ;;  %3393 = vmatpush.msra.mxu3 %v3392_v27  ;;  %v3421_v27 = vsub.f32 %v11454_v51, %v3420_v16  ;;  %v3433_v9 = vsub.f32 %v11480_v61, %v3432_v60  ;;  %v3428_v46 = vand.u32 4294901760, %v3427_v20  ;;  %v15834_v20 = vld [vmem:[#allocation16_spill] sm:$0xff] }
 0x2ea   :  { %3293 = vmatpush.msra.mxu1 %v11200_v25  ;;  %3328 = vmatpush.msra.mxu2 %v11393_v28  ;;  %v11506_v25 = vsub.f32 %v1544_v15, %v11484_v41 }
 0x2eb   :  { %3228 = vmatpush.msra.mxu0 %v15815_v40  ;;  %3399 = vmatpush.msra.mxu3 %v3398_v59  ;;  %v15817_v59 = vand.u32 4294901760, %v11194_v38  ;;  %v3422_v15 = vand.u32 4294901760, %v3421_v27  ;;  %v15825_v40 = vand.u32 4294901760, %v11333_v48  ;;  %v15829_v27 = vand.u32 4294901760, %v15828_v22 }
 0x2ec   :  { %3295 = vmatpush.msra.mxu1 %v11212_v5  ;;  %3330 = vmatpush.msra.mxu2 %v11406_v56  ;;  %v3438_v5 = vand.u32 4294901760, %v11495_v0  ;;  %v3444_v23 = vand.u32 4294901760, %v11506_v25 }
 0x2ed   :  { %3232 = vmatpush.msra.mxu0 %v15816_v39  ;;  %3405 = vmatpush.msra.mxu3 %v3404_v29  ;;  %v15819_v29 = vand.u32 4294901760, %v11222_v57  ;;  %v15830_v39 = vld [vmem:[#allocation14_spill] sm:$0xff] }
 0x2ee   :  { %3297 = vmatpush.msra.mxu1 %v11224_v11  ;;  %3332 = vmatpush.msra.mxu2 %v11418_v10  ;;  %v15818_v11 = vand.u32 4294901760, %v11210_v12  ;;  %v3439_v38 = vsub.f32 %v11495_v0, %v3438_v5  ;;  %v3445_v12 = vsub.f32 %v11506_v25, %v3444_v23 }
 0x2ef   :  { %3236 = vmatpush.msra.mxu0 %v15817_v59  ;;  %3411 = vmatpush.msra.mxu3 %v3410_v54  ;;  %v15827_v54 = vand.u32 4294901760, %v11346_v14  ;;  %v15835_v59 = vand.u32 4294901760, %v15834_v20 }
 0x2f0   :  { %3299 = vmatpush.msra.mxu1 %v11236_v47  ;;  %3334 = vmatpush.msra.mxu2 %v11430_v58  ;;  %v3434_v47 = vand.u32 4294901760, %v3433_v9  ;;  %v3440_v57 = vand.u32 4294901760, %v3439_v38 }
 0x2f1   :  { %3240 = vmatpush.msra.mxu0 %v15818_v11  ;;  %3417 = vmatpush.msra.mxu3 %v3416_v63  ;;  %v15831_v63 = vand.u32 4294901760, %v15830_v39 }
 0x2f2   :  { %3301 = vmatpush.msra.mxu1 %v11248_v3  ;;  %3336 = vmatpush.msra.mxu2 %v11443_v37  ;;  %v15820_v3 = vand.u32 4294901760, %v11234_v42  ;;  %v15822_v42 = vand.u32 4294901760, %v11258_v17  ;;  %v15826_v17 = vand.u32 4294901760, %v11282_v13  ;;  %v15832_v13 = vld [vmem:[#allocation15_spill] sm:$0xff] }
 0x2f3   :  { %3244 = vmatpush.msra.mxu0 %v15819_v29  ;;  %3423 = vmatpush.msra.mxu3 %v3422_v15  ;;  %v1537_v15 = vld [vmem:[#allocation2 + $0x1d8] sm:$0xff] }
 0x2f4   :  { %3303 = vmatpush.msra.mxu1 %v11260_v52  ;;  %3338 = vmatpush.msra.mxu2 %v11456_v33  ;;  %v3446_v52 = vand.u32 4294901760, %v3445_v12  ;;  %v1521_v12 = vld [vmem:[#allocation2 + $0x158] sm:$0xff] }
 0x2f5   :  { %3248 = vmatpush.msra.mxu0 %v15820_v3  ;;  %3429 = vmatpush.msra.mxu3 %v3428_v46  ;;  %v1525_v46 = vld [vmem:[#allocation2 + $0x178] sm:$0xff] }
 0x2f6   :  { %3305 = vmatpush.msra.mxu1 %v11272_v7  ;;  %3340 = vmatpush.msra.mxu2 %v11471_v26  ;;  %v15823_v7 = vand.u32 4294901760, %v11325_v4  ;;  %v1517_v3 = vld [vmem:[#allocation2 + $0x138] sm:$0xff] }
 0x2f7   :  { %3252 = vmatpush.msra.mxu0 %v15821_v36  ;;  %3435 = vmatpush.msra.mxu3 %v3434_v47  ;;  %v11647_v36 = vand.u32 4294901760, %v1517_v3 }
 0x2f8   :  { %3307 = vmatmul.f32.vlgmr.msra.gmra.mxu1 %v10540_v45  ;;  %3342 = vmatpush.msra.mxu2 %v11484_v41 }
 0x2f9   :  { %3508 = vmatpush.msrb.mxu1 %v11308_v43  ;;  %3256 = vmatpush.msra.mxu0 %v15822_v42 }
 0x2fa   :  { %3441 = vmatpush.msra.mxu3 %v3440_v57  ;;  %3348 = vmatmul.f32.vlgmr.msra.gmra.mxu2 %v10605_v35  ;;  %v1513_v57 = vld [vmem:[#allocation2 + $0x118] sm:$0xff] }
 0x2fb   :  { %3510 = vmatpush.msrb.mxu1 %v11316_v18  ;;  %3549 = vmatpush.msrb.mxu2 %v15823_v7  ;;  %v11673_v7 = vsub.f32 %v1517_v3, %v11647_v36 }
 0x2fc   :  { %3260 = vmatpush.msra.mxu0 %v15824_v32  ;;  %3447 = vmatpush.msra.mxu3 %v3446_v52  ;;  %v1509_v52 = vld [vmem:[#allocation2 + $0xf8] sm:$0xff] }
 0x2fd   :  { %3449 = vmatmul.f32.vlgmr.msra.gmra.mxu3 %v10571_v24  ;;  %3512 = vmatpush.msrb.mxu1 %v11329_v62  ;;  %v1505_v32 = vld [vmem:[#allocation2 + $0xd8] sm:$0xff] }
 0x2fe   :  { %3553 = vmatpush.msrb.mxu2 %v15825_v40  ;;  %3616 = vmatpush.msrb.mxu3 %v11308_v43  ;;  %v15833_v43 = vand.u32 4294901760, %v15832_v13  ;;  %v11692_v22 = vand.u32 4294901760, %v1505_v32 }
 0x2ff   :  { %3264 = vmatpush.msra.mxu0 %v15826_v17  ;;  %3514 = vmatpush.msrb.mxu1 %v11337_v31  ;;  %v1501_v17 = vld [vmem:[#allocation2 + $0xb8] sm:$0xff] }
 0x300   :  { %3557 = vmatpush.msrb.mxu2 %v15827_v54  ;;  %3618 = vmatpush.msrb.mxu3 %v11316_v18  ;;  %v1541_v18 = vld [vmem:[#allocation2 + $0x1f8] sm:$0xff]  ;;  %v15839_v54 = vld [vmem:[#allocation12_spill] sm:$0xff] }
 0x301   :  { %3268 = vmatpush.msra.mxu0 %v15829_v27  ;;  %3516 = vmatpush.msrb.mxu1 %v11341_v50  ;;  %v15554_v27 = vand.u32 4294901760, %v11673_v7 }
 0x302   :  { %3270 = vmatmul.f32.vlgmr.msra.gmra.mxu0 %v10540_v45  ;;  %3561 = vmatpush.msrb.mxu2 %v15831_v63  ;;  %v11704_v63 = vand.u32 4294901760, %v1501_v17 }
 0x303   :  { %3455 = vmatpush.msrb.mxu0 %v11325_v4  ;;  %3620 = vmatpush.msrb.mxu3 %v11329_v62  ;;  %v11584_v62 = vand.u32 4294901760, %v1541_v18  ;;  %v15836_v4 = vand.u32 4294901760, %v11391_v2 }
 0x304   :  { %3518 = vmatpush.msrb.mxu1 %v11350_v8  ;;  %3565 = vmatpush.msrb.mxu2 %v15833_v43  ;;  %v1493_v43 = vld [vmem:[#allocation2 + $0x78] sm:$0xff] }
 0x305   :  { %3458 = vmatpush.msrb.mxu0 %v11333_v48  ;;  %3622 = vmatpush.msrb.mxu3 %v11337_v31  ;;  %v1533_v48 = vld [vmem:[#allocation2 + $0x1b8] sm:$0xff]  ;;  %v11591_v31 = vand.u32 4294901760, %v1537_v15  ;;  %v11599_v9 = vsub.f32 %v1541_v18, %v11584_v62  ;;  %v11714_v18 = vsub.f32 %v1505_v32, %v11692_v22 }
 0x306   :  { %3520 = vmatpush.msrb.mxu1 %v11367_v21  ;;  %3569 = vmatpush.msrb.mxu2 %v15835_v59  ;;  %v11601_v11 = vand.u32 4294901760, %v1533_v48 }
 0x307   :  { %3461 = vmatpush.msrb.mxu0 %v11346_v14  ;;  %3624 = vmatpush.msrb.mxu3 %v11341_v50  ;;  %v15837_v14 = vand.u32 4294901760, %v11404_v1  ;;  %v1529_v50 = vld [vmem:[#allocation2 + $0x198] sm:$0xff]  ;;  %v11609_v38 = vsub.f32 %v1537_v15, %v11591_v31  ;;  %v3732_v15 = vsub.f32 %v11673_v7, %v15554_v27 }
 0x308   :  { %3522 = vmatpush.msrb.mxu1 %v11380_v6  ;;  %3573 = vmatpush.msrb.mxu2 %v15836_v4  ;;  %v11611_v29 = vand.u32 4294901760, %v1529_v50  ;;  %v11620_v47 = vsub.f32 %v1533_v48, %v11601_v11  ;;  %v11726_v4 = vsub.f32 %v1501_v17, %v11704_v63  ;;  %v11728_v48 = vand.u32 4294901760, %v1493_v43 }
 0x309   :  { %3464 = vmatpush.msrb.mxu0 %v15830_v39  ;;  %3626 = vmatpush.msrb.mxu3 %v11350_v8  ;;  %v15838_v8 = vand.u32 4294901760, %v11416_v55  ;;  %v1497_v39 = vld [vmem:[#allocation2 + $0x98] sm:$0xff] }
 0x30a   :  { %3524 = vmatpush.msrb.mxu1 %v11393_v28  ;;  %3577 = vmatpush.msrb.mxu2 %v15837_v14 }
 0x30b   :  { %3467 = vmatpush.msrb.mxu0 %v15832_v13  ;;  %3628 = vmatpush.msrb.mxu3 %v11367_v21  ;;  %v15562_v21 = vand.u32 4294901760, %v11599_v9 }
 0x30c   :  { %3526 = vmatpush.msrb.mxu1 %v11406_v56  ;;  %3581 = vmatpush.msrb.mxu2 %v15838_v8 }
 0x30d   :  { %3470 = vmatpush.msrb.mxu0 %v15834_v20  ;;  %3630 = vmatpush.msrb.mxu3 %v11380_v6  ;;  %v11622_v6 = vand.u32 4294901760, %v1525_v46  ;;  %v11716_v20 = vand.u32 4294901760, %v1497_v39 }
 0x30e   :  { %3528 = vmatpush.msrb.mxu1 %v11418_v10  ;;  %3585 = vmatpush.msrb.mxu2 %v3408_v34  ;;  %v11636_v34 = vand.u32 4294901760, %v1521_v12 }
 0x30f   :  { %3473 = vmatpush.msrb.mxu0 %v11391_v2  ;;  %3632 = vmatpush.msrb.mxu3 %v11393_v28  ;;  %v15560_v28 = vand.u32 4294901760, %v11609_v38  ;;  %v11631_v2 = vsub.f32 %v1529_v50, %v11611_v29  ;;  %v1485_v50 = vld [vmem:[#allocation2 + $0x38] sm:$0xff] }
 0x310   :  { %3530 = vmatpush.msrb.mxu1 %v11430_v58  ;;  %3589 = vmatpush.msrb.mxu2 %v3414_v19  ;;  %v11645_v19 = vsub.f32 %v1525_v46, %v11622_v6  ;;  %v15551_v46 = vand.u32 4294901760, %v11714_v18 }
 0x311   :  { %3476 = vmatpush.msrb.mxu0 %v11404_v1  ;;  %3634 = vmatpush.msrb.mxu3 %v11406_v56  ;;  %v3696_v56 = vsub.f32 %v11599_v9, %v15562_v21  ;;  %v15559_v1 = vand.u32 4294901760, %v11620_v47 }
 0x312   :  { %3532 = vmatpush.msrb.mxu1 %v11443_v37  ;;  %3593 = vmatpush.msrb.mxu2 %v3420_v16  ;;  %v11658_v16 = vand.u32 4294901760, %v1513_v57  ;;  %v15557_v42 = vand.u32 4294901760, %v11645_v19  ;;  %v3750_v32 = vsub.f32 %v11714_v18, %v15551_v46 }
 0x313   :  { %3479 = vmatpush.msrb.mxu0 %v11416_v55  ;;  %3636 = vmatpush.msrb.mxu3 %v11418_v10  ;;  %v3702_v10 = vsub.f32 %v11609_v38, %v15560_v28  ;;  %v15558_v55 = vand.u32 4294901760, %v11631_v2  ;;  %v1565_v28 = vld [vmem:[#allocation2 + $0x2b8] sm:$0xff] }
 0x314   :  { %3534 = vmatpush.msrb.mxu1 %v11456_v33  ;;  %3597 = vmatpush.msrb.mxu2 %v3426_v49  ;;  %v11664_v49 = vsub.f32 %v1521_v12, %v11636_v34  ;;  %v11686_v40 = vsub.f32 %v1513_v57, %v11658_v16  ;;  %v11738_v12 = vsub.f32 %v1497_v39, %v11716_v20  ;;  %v1481_v57 = vld [vmem:[#allocation2 + $0x18] sm:$0xff] }
 0x315   :  { %3482 = vmatpush.msrb.mxu0 %v11428_v44  ;;  %3638 = vmatpush.msrb.mxu3 %v11430_v58  ;;  %v3697_v58 = vand.u32 4294901760, %v3696_v56  ;;  %v3708_v44 = vsub.f32 %v11620_v47, %v15559_v1  ;;  %v15840_v56 = vld [vmem:[#allocation11_spill] sm:$0xff]  ;;  %v11764_v17 = vand.u32 4294901760, %v1481_v57 }
 0x316   :  { %3536 = vmatpush.msrb.mxu1 %v11471_v26  ;;  %3601 = vmatpush.msrb.mxu2 %v3432_v60  ;;  %v11678_v60 = vand.u32 4294901760, %v1509_v52  ;;  %v15553_v13 = vand.u32 4294901760, %v11686_v40 }
 0x317   :  { %3485 = vmatpush.msrb.mxu0 %v11441_v53  ;;  %3640 = vmatpush.msrb.mxu3 %v11443_v37  ;;  %v3703_v37 = vand.u32 4294901760, %v3702_v10  ;;  %v3714_v53 = vsub.f32 %v11631_v2, %v15558_v55  ;;  %v15845_v55 = vld [vmem:[#allocation8_spill] sm:$0xff] }
 0x318   :  { %3538 = vmatpush.msrb.mxu1 %v11484_v41  ;;  %3605 = vmatpush.msrb.mxu2 %v3438_v5  ;;  %v15555_v5 = vand.u32 4294901760, %v11664_v49  ;;  %v3738_v14 = vsub.f32 %v11686_v40, %v15553_v13  ;;  %v1577_v13 = vld [vmem:[#allocation2 + $0x318] sm:$0xff] }
 0x319   :  { %3488 = vmatpush.msrb.mxu0 %v11454_v51  ;;  %3642 = vmatpush.msrb.mxu3 %v11456_v33  ;;  %v3709_v33 = vand.u32 4294901760, %v3708_v44  ;;  %v3720_v51 = vsub.f32 %v11645_v19, %v15557_v42  ;;  %v11752_v44 = vand.u32 4294901760, %v1485_v50  ;;  %v11872_v42 = vand.u32 4294901760, %v1577_v13 }
 0x31a   :  { %3542 = vmatmul.f32.vlgmr.msrb.gmra.mxu1 %v15839_v54  ;;  %3609 = vmatpush.msrb.mxu2 %v3444_v23  ;;  %v11702_v23 = vsub.f32 %v1509_v52, %v11678_v60  ;;  %v15550_v52 = vand.u32 4294901760, %v11726_v4  ;;  %v1561_v54 = vld [vmem:[#allocation2 + $0x298] sm:$0xff] }
 0x31b   :  { %3698 = vmatpush.msra.mxu1 %v3697_v58  ;;  %3491 = vmatpush.msrb.mxu0 %v11467_v30  ;;  %v3715_v30 = vand.u32 4294901760, %v3714_v53  ;;  %v3721_v59 = vand.u32 4294901760, %v3720_v51  ;;  %v11750_v58 = vsub.f32 %v1493_v43, %v11728_v48  ;;  %v3751_v43 = vand.u32 4294901760, %v3750_v32 }
 0x31c   :  { %3644 = vmatpush.msrb.mxu3 %v11471_v26  ;;  %3611 = vmatmul.f32.vlgmr.msrb.gmra.mxu2 %v10571_v24  ;;  %v3726_v26 = vsub.f32 %v11664_v49, %v15555_v5  ;;  %v3756_v51 = vsub.f32 %v11726_v4, %v15550_v52 }
 0x31d   :  { %3704 = vmatpush.msra.mxu1 %v3703_v37  ;;  %3796 = vmatpush.msra.mxu2 %v11599_v9  ;;  %v15548_v37 = vand.u32 4294901760, %v11738_v12  ;;  %v15546_v39 = vand.u32 4294901760, %v11750_v58 }
 0x31e   :  { %3494 = vmatpush.msrb.mxu0 %v11480_v61  ;;  %3646 = vmatpush.msrb.mxu3 %v11484_v41  ;;  %v1489_v61 = vld [vmem:[#allocation2 + $0x58] sm:$0xff]  ;;  %v15552_v41 = vand.u32 4294901760, %v11702_v23  ;;  %v3727_v8 = vand.u32 4294901760, %v3726_v26 }
 0x31f   :  { %3648 = vmatmul.f32.vlgmr.msrb.gmra.mxu3 %v10571_v24  ;;  %3710 = vmatpush.msra.mxu1 %v3709_v33  ;;  %v11740_v3 = vand.u32 4294901760, %v1489_v61  ;;  %v3762_v26 = vsub.f32 %v11738_v12, %v15548_v37  ;;  %v1589_v37 = vld [vmem:[#allocation2 + $0x378] sm:$0xff] }
 0x320   :  { %3799 = vmatpush.msra.mxu2 %v11609_v38  ;;  %3849 = vmatpush.msra.mxu3 %v11584_v62  ;;  %v3744_v10 = vsub.f32 %v11702_v23, %v15552_v41  ;;  %v1581_v41 = vld [vmem:[#allocation2 + $0x338] sm:$0xff] }
 0x321   :  { %3497 = vmatpush.msrb.mxu0 %v11495_v0  ;;  %3716 = vmatpush.msra.mxu1 %v3715_v30  ;;  %v3733_v0 = vand.u32 4294901760, %v3732_v15  ;;  %v11762_v53 = vsub.f32 %v1489_v61, %v11740_v3  ;;  %v11774_v30 = vsub.f32 %v1485_v50, %v11752_v44  ;;  %v11784_v15 = vsub.f32 %v1481_v57, %v11764_v17  ;;  %v1605_v61 = vld [vmem:[#allocation2 + $0x3f8] sm:$0xff] }
 0x322   :  { %3802 = vmatpush.msra.mxu2 %v11620_v47  ;;  %3851 = vmatpush.msra.mxu3 %v11591_v31  ;;  %v3745_v33 = vand.u32 4294901760, %v3744_v10  ;;  %v3768_v50 = vsub.f32 %v11750_v58, %v15546_v39  ;;  %v3763_v57 = vand.u32 4294901760, %v3762_v26  ;;  %v11800_v32 = vand.u32 4294901760, %v1605_v61  ;;  %v1597_v26 = vld [vmem:[#allocation2 + $0x3b8] sm:$0xff] }
 0x323   :  { %3500 = vmatpush.msrb.mxu0 %v11506_v25  ;;  %3722 = vmatpush.msra.mxu1 %v3721_v59  ;;  %v3739_v25 = vand.u32 4294901760, %v3738_v14  ;;  %v15545_v59 = vand.u32 4294901760, %v11762_v53  ;;  %15841 = vst [vmem:[#allocation13_spill] sm:$0xff] %v11784_v15  ;;  %v3757_v14 = vand.u32 4294901760, %v3756_v51  ;;  %v1593_v39 = vld [vmem:[#allocation2 + $0x398] sm:$0xff]  ;;  %v11859_v5 = vand.u32 4294901760, %v1581_v41 }
 0x324   :  { %3503 = vmatmul.f32.vlgmr.msrb.gmra.mxu0 %v15840_v56  ;;  %3805 = vmatpush.msra.mxu2 %v11631_v2 }
 0x325   :  { %3653 = vmatpush.msra.mxu0 %v11584_v62  ;;  %3853 = vmatpush.msra.mxu3 %v11601_v11  ;;  %v3774_v10 = vsub.f32 %v11762_v53, %v15545_v59 }
 0x326   :  { %3728 = vmatpush.msra.mxu1 %v3727_v8  ;;  %3808 = vmatpush.msra.mxu2 %v11645_v19  ;;  %v15547_v8 = vand.u32 4294901760, %v11774_v30 }
 0x327   :  { %3655 = vmatpush.msra.mxu0 %v11591_v31  ;;  %3855 = vmatpush.msra.mxu3 %v11611_v29  ;;  %v3775_v59 = vand.u32 4294901760, %v3774_v10 }
 0x328   :  { %3734 = vmatpush.msra.mxu1 %v3733_v0  ;;  %3811 = vmatpush.msra.mxu2 %v11664_v49  ;;  %v1601_v0 = vld [vmem:[#allocation2 + $0x3d8] sm:$0xff]  ;;  %v3780_v51 = vsub.f32 %v11774_v30, %v15547_v8  ;;  %v11821_v8 = vand.u32 4294901760, %v1597_v26 }
 0x329   :  { %3657 = vmatpush.msra.mxu0 %v11601_v11  ;;  %3857 = vmatpush.msra.mxu3 %v11622_v6 }
 0x32a   :  { %3740 = vmatpush.msra.mxu1 %v3739_v25  ;;  %3814 = vmatpush.msra.mxu2 %v11673_v7  ;;  %v15549_v25 = vand.u32 4294901760, %v11784_v15 }
 0x32b   :  { %3659 = vmatpush.msra.mxu0 %v11611_v29  ;;  %3859 = vmatpush.msra.mxu3 %v11636_v34 }
 0x32c   :  { %3746 = vmatpush.msra.mxu1 %v3745_v33  ;;  %3817 = vmatpush.msra.mxu2 %v11686_v40  ;;  %v3769_v33 = vand.u32 4294901760, %v3768_v50  ;;  %v11817_v50 = vsub.f32 %v1605_v61, %v11800_v32  ;;  %v11829_v61 = vand.u32 4294901760, %v1593_v39 }
 0x32d   :  { %3661 = vmatpush.msra.mxu0 %v11622_v6  ;;  %3861 = vmatpush.msra.mxu3 %v11647_v36 }
 0x32e   :  { %3752 = vmatpush.msra.mxu1 %v3751_v43  ;;  %3820 = vmatpush.msra.mxu2 %v11702_v23  ;;  %v11808_v43 = vand.u32 4294901760, %v1601_v0  ;;  %v15556_v46 = vand.u32 4294901760, %v11817_v50 }
 0x32f   :  { %3663 = vmatpush.msra.mxu0 %v11636_v34  ;;  %3863 = vmatpush.msra.mxu3 %v11658_v16 }
 0x330   :  { %3758 = vmatpush.msra.mxu1 %v3757_v14  ;;  %3823 = vmatpush.msra.mxu2 %v11714_v18  ;;  %v3786_v14 = vsub.f32 %v11784_v15, %v15549_v25  ;;  %v11825_v10 = vsub.f32 %v1601_v0, %v11808_v43  ;;  %v1585_v25 = vld [vmem:[#allocation2 + $0x358] sm:$0xff]  ;;  %v11838_v0 = vsub.f32 %v1597_v26, %v11821_v8 }
 0x331   :  { %3665 = vmatpush.msra.mxu0 %v11647_v36  ;;  %3865 = vmatpush.msra.mxu3 %v11678_v60  ;;  %v4037_v26 = vsub.f32 %v11817_v50, %v15556_v46 }
 0x332   :  { %3764 = vmatpush.msra.mxu1 %v3763_v57  ;;  %3826 = vmatpush.msra.mxu2 %v11726_v4  ;;  %v3781_v57 = vand.u32 4294901760, %v3780_v51  ;;  %v3787_v52 = vand.u32 4294901760, %v3786_v14  ;;  %v15561_v51 = vand.u32 4294901760, %v11825_v10  ;;  %v11847_v14 = vsub.f32 %v1593_v39, %v11829_v61  ;;  %v1573_v39 = vld [vmem:[#allocation2 + $0x2f8] sm:$0xff] }
 0x333   :  { %3667 = vmatpush.msra.mxu0 %v11658_v16  ;;  %3867 = vmatpush.msra.mxu3 %v11692_v22  ;;  %v15563_v27 = vand.u32 4294901760, %v11838_v0  ;;  %v4038_v1 = vand.u32 4294901760, %v4037_v26  ;;  %v11885_v21 = vand.u32 4294901760, %v1573_v39 }
 0x334   :  { %3770 = vmatpush.msra.mxu1 %v3769_v33  ;;  %3829 = vmatpush.msra.mxu2 %v11738_v12  ;;  %v11833_v33 = vand.u32 4294901760, %v1589_v37  ;;  %15842 = vst [vmem:[#allocation14_spill] sm:$0xff] %v11847_v14  ;;  %v15564_v46 = vand.u32 4294901760, %v11847_v14 }
 0x335   :  { %3669 = vmatpush.msra.mxu0 %v11678_v60  ;;  %3869 = vmatpush.msra.mxu3 %v11704_v63 }
 0x336   :  { %3776 = vmatpush.msra.mxu1 %v3775_v59  ;;  %3832 = vmatpush.msra.mxu2 %v11750_v58  ;;  %v11842_v59 = vand.u32 4294901760, %v1585_v25 }
 0x337   :  { %3671 = vmatpush.msra.mxu0 %v11692_v22  ;;  %3871 = vmatpush.msra.mxu3 %v11716_v20 }
 0x338   :  { %3782 = vmatpush.msra.mxu1 %v3781_v57  ;;  %3835 = vmatpush.msra.mxu2 %v11762_v53  ;;  %v11854_v57 = vsub.f32 %v1589_v37, %v11833_v33  ;;  %v11867_v37 = vsub.f32 %v1585_v25, %v11842_v59  ;;  %v11883_v25 = vsub.f32 %v1581_v41, %v11859_v5 }
 0x339   :  { %3673 = vmatpush.msra.mxu0 %v11704_v63  ;;  %3873 = vmatpush.msra.mxu3 %v11728_v48  ;;  %v11896_v41 = vsub.f32 %v1577_v13, %v11872_v42  ;;  %v11908_v13 = vsub.f32 %v1573_v39, %v11885_v21 }
 0x33a   :  { %3788 = vmatpush.msra.mxu1 %v3787_v52  ;;  %3838 = vmatpush.msra.mxu2 %v11774_v30  ;;  %15843 = vst [vmem:[#allocation15_spill] sm:$0xff] %v11854_v57  ;;  %v4043_v52 = vsub.f32 %v11825_v10, %v15561_v51  ;;  %v1569_v51 = vld [vmem:[#allocation2 + $0x2d8] sm:$0xff] }
 0x33b   :  { %3675 = vmatpush.msra.mxu0 %v11716_v20  ;;  %3875 = vmatpush.msra.mxu3 %v11740_v3  ;;  %15844 = vst [vmem:[#allocation16_spill] sm:$0xff] %v11867_v37  ;;  %v11898_v56 = vand.u32 4294901760, %v1569_v51 }
 0x33c   :  { %3790 = vmatmul.f32.vlgmr.msra.gmra.mxu1 %v10540_v45  ;;  %3841 = vmatpush.msra.mxu2 %v11784_v15  ;;  %v1553_v15 = vld [vmem:[#allocation2 + $0x258] sm:$0xff] }
 0x33d   :  { %3957 = vmatpush.msrb.mxu1 %v11584_v62  ;;  %3677 = vmatpush.msra.mxu0 %v11728_v48  ;;  %v4049_v62 = vsub.f32 %v11838_v0, %v15563_v27  ;;  %v4055_v27 = vsub.f32 %v11847_v14, %v15564_v46  ;;  %v11910_v46 = vand.u32 4294901760, %v1565_v28  ;;  %v11920_v39 = vsub.f32 %v1569_v51, %v11898_v56  ;;  %v15849_v14 = vld [vmem:[#allocation10_spill] sm:$0xff] }
 0x33e   :  { %3877 = vmatpush.msra.mxu3 %v11752_v44  ;;  %3844 = vmatmul.f32.vlgmr.msra.gmra.mxu2 %v15845_v55  ;;  %v4044_v55 = vand.u32 4294901760, %v4043_v52  ;;  %v15847_v52 = vand.u32 4294901760, %v11854_v57 }
 0x33f   :  { %3959 = vmatpush.msrb.mxu1 %v11591_v31  ;;  %3994 = vmatpush.msrb.mxu2 %v11800_v32  ;;  %v15846_v31 = vld [vmem:[#allocation9_spill] sm:$0xff]  ;;  %v11933_v51 = vsub.f32 %v1565_v28, %v11910_v46 }
 0x340   :  { %3679 = vmatpush.msra.mxu0 %v11740_v3  ;;  %3879 = vmatpush.msra.mxu3 %v11764_v17  ;;  %v4061_v26 = vsub.f32 %v11854_v57, %v15847_v52  ;;  %v1557_v57 = vld [vmem:[#allocation2 + $0x278] sm:$0xff] }
 0x341   :  { %3883 = vmatmul.f32.vlgmr.msra.gmra.mxu3 %v15846_v31  ;;  %3961 = vmatpush.msrb.mxu1 %v11601_v11  ;;  %v4050_v11 = vand.u32 4294901760, %v4049_v62  ;;  %v11922_v31 = vand.u32 4294901760, %v1561_v54  ;;  %v1549_v62 = vld [vmem:[#allocation2 + $0x238] sm:$0xff] }
 0x342   :  { %3996 = vmatpush.msrb.mxu2 %v11808_v43  ;;  %4039 = vmatpush.msrb.mxu3 %v4038_v1  ;;  %v15848_v1 = vand.u32 4294901760, %v11867_v37 }
 0x343   :  { %3681 = vmatpush.msra.mxu0 %v11752_v44  ;;  %3963 = vmatpush.msrb.mxu1 %v11611_v29  ;;  %v4056_v29 = vand.u32 4294901760, %v4055_v27  ;;  %v11946_v28 = vsub.f32 %v1561_v54, %v11922_v31 }
 0x344   :  { %3998 = vmatpush.msrb.mxu2 %v11821_v8  ;;  %4045 = vmatpush.msrb.mxu3 %v4044_v55  ;;  %v4067_v52 = vsub.f32 %v11867_v37, %v15848_v1  ;;  %v4062_v55 = vand.u32 4294901760, %v4061_v26  ;;  %v15850_v1 = vand.u32 4294901760, %v11599_v9  ;;  %v11935_v37 = vand.u32 4294901760, %v1557_v57 }
 0x345   :  { %3683 = vmatpush.msra.mxu0 %v11764_v17  ;;  %3965 = vmatpush.msrb.mxu1 %v11622_v6  ;;  %v15851_v6 = vand.u32 4294901760, %v11883_v25  ;;  %v15852_v9 = vand.u32 4294901760, %v11609_v38  ;;  %v15853_v26 = vand.u32 4294901760, %v11896_v41  ;;  %v15854_v38 = vand.u32 4294901760, %v11620_v47 }
 0x346   :  { %3689 = vmatmul.f32.vlgmr.msra.gmra.mxu0 %v15849_v14  ;;  %4000 = vmatpush.msrb.mxu2 %v11829_v61  ;;  %v4068_v14 = vand.u32 4294901760, %v4067_v52  ;;  %v15855_v52 = vand.u32 4294901760, %v11908_v13  ;;  %v11959_v54 = vsub.f32 %v1557_v57, %v11935_v37  ;;  %v15856_v47 = vand.u32 4294901760, %v11631_v2 }
 0x347   :  { %3890 = vmatpush.msrb.mxu0 %v15850_v1  ;;  %4051 = vmatpush.msrb.mxu3 %v4050_v11  ;;  %v4073_v27 = vsub.f32 %v11883_v25, %v15851_v6  ;;  %v4079_v11 = vsub.f32 %v11896_v41, %v15853_v26  ;;  %v11948_v6 = vand.u32 4294901760, %v1553_v15  ;;  %v1545_v26 = vld [vmem:[#allocation2 + $0x218] sm:$0xff]  ;;  %v1644_v1 = vpop.f32.mrf.mxu0  ;;  %v15858_v2 = vand.u32 4294901760, %v11645_v19 }
 0x348   :  { %3967 = vmatpush.msrb.mxu1 %v11636_v34  ;;  %4002 = vmatpush.msrb.mxu2 %v11833_v33  ;;  %v15860_v57 = vand.u32 4294901760, %v11664_v49 }
 0x349   :  { %3894 = vmatpush.msrb.mxu0 %v15852_v9  ;;  %4057 = vmatpush.msrb.mxu3 %v4056_v29  ;;  %v4074_v34 = vand.u32 4294901760, %v4073_v27  ;;  %v4085_v29 = vsub.f32 %v11908_v13, %v15855_v52  ;;  %v15857_v27 = vand.u32 4294901760, %v11920_v39  ;;  %v11972_v52 = vsub.f32 %v1553_v15, %v11948_v6  ;;  %v1745_v9 = vpop.f32.mrf.mxu1 }
 0x34a   :  { %3969 = vmatpush.msrb.mxu1 %v11647_v36  ;;  %4004 = vmatpush.msrb.mxu2 %v11842_v59  ;;  %v11963_v36 = vand.u32 4294901760, %v1549_v62  ;;  %v1746_v15 = vadd.f32 %v1745_v9, %v1644_v1  ;;  %v15862_v1 = vand.u32 4294901760, %v11673_v7 }
 0x34b   :  { %3898 = vmatpush.msrb.mxu0 %v15854_v38  ;;  %4063 = vmatpush.msrb.mxu3 %v4062_v55  ;;  %v4080_v55 = vand.u32 4294901760, %v4079_v11  ;;  %v4091_v38 = vsub.f32 %v11920_v39, %v15857_v27  ;;  %v15859_v11 = vand.u32 4294901760, %v11933_v51  ;;  %v4108_v27 = vand.u32 4294901760, %v11959_v54 }
 0x34c   :  { %3971 = vmatpush.msrb.mxu1 %v11658_v16  ;;  %4006 = vmatpush.msrb.mxu2 %v11859_v5  ;;  %v11976_v16 = vand.u32 4294901760, %v1545_v26 }
 0x34d   :  { %3902 = vmatpush.msrb.mxu0 %v15856_v47  ;;  %4069 = vmatpush.msrb.mxu3 %v4068_v14  ;;  %v4086_v14 = vand.u32 4294901760, %v4085_v29  ;;  %v4097_v47 = vsub.f32 %v11933_v51, %v15859_v11  ;;  %v4092_v19 = vand.u32 4294901760, %v4091_v38  ;;  %v4109_v9 = vsub.f32 %v11959_v54, %v4108_v27 }
 0x34e   :  { %3973 = vmatpush.msrb.mxu1 %v11678_v60  ;;  %4008 = vmatpush.msrb.mxu2 %v11872_v42  ;;  %v11987_v60 = vsub.f32 %v1549_v62, %v11963_v36  ;;  %v1799_v62 = vpop.f32.mrf.mxu2  ;;  %v15864_v11 = vand.u32 4294901760, %v11702_v23 }
 0x34f   :  { %3906 = vmatpush.msrb.mxu0 %v15858_v2  ;;  %4075 = vmatpush.msrb.mxu3 %v4074_v34  ;;  %v15861_v34 = vand.u32 4294901760, %v11946_v28  ;;  %v4114_v2 = vand.u32 4294901760, %v11972_v52  ;;  %v4098_v49 = vand.u32 4294901760, %v4097_v47 }
 0x350   :  { %3975 = vmatpush.msrb.mxu1 %v11692_v22  ;;  %4010 = vmatpush.msrb.mxu2 %v11885_v21  ;;  %v11998_v22 = vsub.f32 %v1545_v26, %v11976_v16  ;;  %v15863_v26 = vand.u32 4294901760, %v11686_v40  ;;  %v4110_v40 = vand.u32 4294901760, %v4109_v9 }
 0x351   :  { %3910 = vmatpush.msrb.mxu0 %v15860_v57  ;;  %4081 = vmatpush.msrb.mxu3 %v4080_v55  ;;  %v4103_v29 = vsub.f32 %v11946_v28, %v15861_v34  ;;  %v1800_v55 = vadd.f32 %v1799_v62, %v1746_v15  ;;  %v4115_v7 = vsub.f32 %v11972_v52, %v4114_v2  ;;  %v1838_v57 = vpop.f32.mrf.mxu3  ;;  %v1944_v47 = vpop.f32.mrf.mxu1 }
 0x352   :  { %3977 = vmatpush.msrb.mxu1 %v11704_v63  ;;  %4012 = vmatpush.msrb.mxu2 %v11898_v56  ;;  %v4120_v63 = vand.u32 4294901760, %v11987_v60 }
 0x353   :  { %3914 = vmatpush.msrb.mxu0 %v15862_v1  ;;  %4087 = vmatpush.msrb.mxu3 %v4086_v14  ;;  %v4104_v38 = vand.u32 4294901760, %v4103_v29  ;;  %v1907_v14 = vpop.f32.mrf.mxu0  ;;  %v1839_v15 = vadd.f32 %v1838_v57, %v1800_v55  ;;  %v4116_v34 = vand.u32 4294901760, %v4115_v7  ;;  %v15867_v1 = vand.u32 4294901760, %v11738_v12 }
 0x354   :  { %3979 = vmatpush.msrb.mxu1 %v11716_v20  ;;  %4014 = vmatpush.msrb.mxu2 %v11910_v46  ;;  %v4126_v20 = vand.u32 4294901760, %v11998_v22  ;;  %v15869_v12 = vand.u32 4294901760, %v11817_v50  ;;  %v15871_v57 = vand.u32 4294901760, %v11825_v10 }
 0x355   :  { %3918 = vmatpush.msrb.mxu0 %v15863_v26  ;;  %4093 = vmatpush.msrb.mxu3 %v4092_v19  ;;  %v4121_v19 = vsub.f32 %v11987_v60, %v4120_v63  ;;  %v1908_v29 = vadd.f32 %v1907_v14, %v1839_v15 }
 0x356   :  { %3981 = vmatpush.msrb.mxu1 %v11728_v48  ;;  %4016 = vmatpush.msrb.mxu2 %v11922_v31  ;;  %v15865_v48 = vand.u32 4294901760, %v11714_v18  ;;  %v4127_v23 = vsub.f32 %v11998_v22, %v4126_v20  ;;  %v1985_v62 = vpop.f32.mrf.mxu2 }
 0x357   :  { %3922 = vmatpush.msrb.mxu0 %v15864_v11  ;;  %4099 = vmatpush.msrb.mxu3 %v4098_v49  ;;  %v4122_v18 = vand.u32 4294901760, %v4121_v19  ;;  %v15873_v11 = vand.u32 4294901760, %v11838_v0 }
 0x358   :  { %3983 = vmatpush.msrb.mxu1 %v11740_v3  ;;  %4018 = vmatpush.msrb.mxu2 %v11935_v37  ;;  %v15866_v3 = vand.u32 4294901760, %v11726_v4  ;;  %v4128_v9 = vand.u32 4294901760, %v4127_v23  ;;  %v15868_v4 = vand.u32 4294901760, %v11750_v58  ;;  %v4349_v23 = vld [vmem:[%s15463_s6 + $0x78] sm:$0xff] }
 0x359   :  { %3926 = vmatpush.msrb.mxu0 %v15865_v48  ;;  %4105 = vmatpush.msrb.mxu3 %v4104_v38  ;;  %v2179_v26 = vpop.f32.mrf.mxu1  ;;  %v15870_v38 = vand.u32 4294901760, %v11762_v53 }
 0x35a   :  { %3985 = vmatpush.msrb.mxu1 %v11752_v44  ;;  %4020 = vmatpush.msrb.mxu2 %v11948_v6  ;;  %v1945_v44 = vadd.f32 %v1944_v47, %v1908_v29 }
 0x35b   :  { %3930 = vmatpush.msrb.mxu0 %v15866_v3  ;;  %4111 = vmatpush.msrb.mxu3 %v4110_v40  ;;  %v2140_v49 = vpop.f32.mrf.mxu0  ;;  %v15874_v40 = vld [vmem:[#allocation13_spill] sm:$0xff] }
 0x35c   :  { %3987 = vmatpush.msrb.mxu1 %v11764_v17  ;;  %4022 = vmatpush.msrb.mxu2 %v11963_v36  ;;  %v2086_v17 = vpop.f32.mrf.mxu3  ;;  %v1986_v55 = vadd.f32 %v1985_v62, %v1945_v44  ;;  %v15875_v47 = vand.u32 4294901760, %v15874_v40 }
 0x35d   :  { %3934 = vmatpush.msrb.mxu0 %v15867_v1  ;;  %4117 = vmatpush.msrb.mxu3 %v4116_v34  ;;  %v4347_v1 = vld [vmem:[%s15463_s6 + $0x68] sm:$0xff] }
 0x35e   :  { %3989 = vmatmul.f32.vlgmr.msrb.gmra.mxu1 %v10540_v45  ;;  %4024 = vmatpush.msrb.mxu2 %v11976_v16  ;;  %v2087_v58 = vadd.f32 %v2086_v17, %v1986_v55  ;;  %v2248_v7 = vpop.f32.mrf.mxu2  ;;  %v12105_v17 = vand.u32 4294901760, %v4347_v1 }
 0x35f   :  { %4190 = vmatpush.msra.mxu1 %v11800_v32  ;;  %3938 = vmatpush.msrb.mxu0 %v15868_v4 }
 0x360   :  { %4123 = vmatpush.msrb.mxu3 %v4122_v18  ;;  %4030 = vmatmul.f32.vlgmr.msrb.gmra.mxu2 %v10605_v35  ;;  %v15872_v35 = vand.u32 4294901760, %v11774_v30  ;;  %v2141_v14 = vadd.f32 %v2140_v49, %v2087_v58  ;;  %v15876_v30 = vld [vmem:[#allocation14_spill] sm:$0xff]  ;;  %v12082_v18 = vand.u32 4294901760, %v4349_v23  ;;  %v15883_v49 = vand.u32 4294901760, %v11896_v41 }
 0x361   :  { %4192 = vmatpush.msra.mxu1 %v11808_v43  ;;  %4231 = vmatpush.msra.mxu2 %v15869_v12  ;;  %v2427_v19 = vpop.f32.mrf.mxu1  ;;  %v4345_v12 = vld [vmem:[%s15463_s6 + $0x58] sm:$0xff] }
 0x362   :  { %3942 = vmatpush.msrb.mxu0 %v15870_v38  ;;  %4129 = vmatpush.msrb.mxu3 %v4128_v9  ;;  %v2180_v34 = vadd.f32 %v2179_v26, %v2141_v14  ;;  %v4346_v9 = vld [vmem:[%s15463_s6 + $0x60] sm:$0xff]  ;;  %v15885_v26 = vand.u32 4294901760, %v11908_v13  ;;  %v4344_v14 = vld [vmem:[%s15463_s6 + $0x50] sm:$0xff] }
 0x363   :  { %4131 = vmatmul.f32.vlgmr.msrb.gmra.mxu3 %v10571_v24  ;;  %4194 = vmatpush.msra.mxu1 %v11821_v8  ;;  %v2326_v53 = vpop.f32.mrf.mxu0  ;;  %v12120_v58 = vand.u32 4294901760, %v4346_v9 }
 0x364   :  { %4235 = vmatpush.msra.mxu2 %v15871_v57  ;;  %4298 = vmatpush.msra.mxu3 %v11800_v32  ;;  %v2285_v15 = vpop.f32.mrf.mxu3  ;;  %v15877_v32 = vand.u32 4294901760, %v15876_v30  ;;  %v2428_v48 = vadd.f32 %v2427_v19, %v2326_v53  ;;  %v15888_v19 = vand.u32 4294901760, %v11946_v28 }
 0x365   :  { %3946 = vmatpush.msrb.mxu0 %v15872_v35  ;;  %4196 = vmatpush.msra.mxu1 %v11829_v61  ;;  %v12129_v35 = vsub.f32 %v4347_v1, %v12105_v17 }
 0x366   :  { %4239 = vmatpush.msra.mxu2 %v15873_v11  ;;  %4300 = vmatpush.msra.mxu3 %v11808_v43  ;;  %v15878_v43 = vld [vmem:[#allocation15_spill] sm:$0xff] }
 0x367   :  { %3950 = vmatpush.msrb.mxu0 %v15875_v47  ;;  %4198 = vmatpush.msra.mxu1 %v11833_v33  ;;  %v15879_v29 = vand.u32 4294901760, %v15878_v43 }
 0x368   :  { %3952 = vmatmul.f32.vlgmr.msrb.gmra.mxu0 %v10540_v45  ;;  %4243 = vmatpush.msra.mxu2 %v15877_v32  ;;  %v2481_v45 = vpop.f32.mrf.mxu2  ;;  %v4342_v32 = vld [vmem:[%s15463_s6 + $0x40] sm:$0xff] }
 0x369   :  { %4137 = vmatpush.msra.mxu0 %v11817_v50  ;;  %4302 = vmatpush.msra.mxu3 %v11821_v8  ;;  %v15880_v50 = vld [vmem:[#allocation16_spill] sm:$0xff]  ;;  %v4348_v8 = vld [vmem:[%s15463_s6 + $0x70] sm:$0xff]  ;;  %v2482_v62 = vadd.f32 %v2481_v45, %v2428_v48  ;;  %v2626_v11 = vpop.f32.mrf.mxu1  ;;  %v12179_v45 = vand.u32 4294901760, %v4342_v32 }
 0x36a   :  { %4200 = vmatpush.msra.mxu1 %v11842_v59  ;;  %4247 = vmatpush.msra.mxu2 %v15879_v29  ;;  %v15881_v3 = vand.u32 4294901760, %v15880_v50  ;;  %v12092_v44 = vand.u32 4294901760, %v4348_v8 }
 0x36b   :  { %4140 = vmatpush.msra.mxu0 %v11825_v10  ;;  %4304 = vmatpush.msra.mxu3 %v11829_v61  ;;  %v2249_v10 = vadd.f32 %v2248_v7, %v2180_v34  ;;  %v15882_v61 = vand.u32 4294901760, %v11883_v25  ;;  %v15886_v7 = vand.u32 4294901760, %v11920_v39 }
 0x36c   :  { %4202 = vmatpush.msra.mxu1 %v11859_v5  ;;  %4251 = vmatpush.msra.mxu2 %v15881_v3 }
 0x36d   :  { %4143 = vmatpush.msra.mxu0 %v11838_v0  ;;  %4306 = vmatpush.msra.mxu3 %v11833_v33  ;;  %v2520_v0 = vpop.f32.mrf.mxu3  ;;  %v2589_v33 = vpop.f32.mrf.mxu0  ;;  %v12107_v55 = vadd.f32 %v2285_v15, %v2249_v10  ;;  %v12148_v15 = vsub.f32 %v4346_v9, %v12120_v58  ;;  %v4339_v9 = vld [vmem:[%s15463_s6 + $0x28] sm:$0xff] }
 0x36e   :  { %4204 = vmatpush.msra.mxu1 %v11872_v42  ;;  %4255 = vmatpush.msra.mxu2 %v15882_v61  ;;  %v2521_v4 = vadd.f32 %v2520_v0, %v2482_v62 }
 0x36f   :  { %4146 = vmatpush.msra.mxu0 %v15876_v30  ;;  %4308 = vmatpush.msra.mxu3 %v11842_v59  ;;  %v12103_v59 = vsub.f32 %v4349_v23, %v12082_v18  ;;  %15884 = vst [vmem:[#allocation8_spill] sm:$0xff] %v12107_v55  ;;  %v4431_v53 = vmul.f32 %v12107_v55, %v12107_v55  ;;  %v12153_v30 = vand.u32 4294901760, %v4344_v14  ;;  %v15585_v23 = vand.u32 4294901760, %v12148_v15 }
 0x370   :  { %4206 = vmatpush.msra.mxu1 %v11885_v21  ;;  %4259 = vmatpush.msra.mxu2 %v15883_v49  ;;  %v2590_v38 = vadd.f32 %v2589_v33, %v2521_v4  ;;  %v2667_v29 = vpop.f32.mrf.mxu2  ;;  %v12215_v49 = vsub.f32 %v4342_v32, %v12179_v45  ;;  %v15889_v4 = vld [vmem:[#allocation12_spill] sm:$0xff] }
 0x371   :  { %4149 = vmatpush.msra.mxu0 %v15878_v43  ;;  %4310 = vmatpush.msra.mxu3 %v11859_v5  ;;  %v12118_v5 = vsub.f32 %v4348_v8, %v12092_v44  ;;  %v15588_v57 = vand.u32 4294901760, %v12103_v59  ;;  %v4435_v43 = vsel %vm403_vm1, %v4431_v53, 0.0  ;;  %v4529_v33 = vsub.f32 %v12148_v15, %v15585_v23 }
 0x372   :  { %4208 = vmatpush.msra.mxu1 %v11898_v56  ;;  %4263 = vmatpush.msra.mxu2 %v15885_v26  ;;  %v2627_v40 = vadd.f32 %v2626_v11, %v2590_v38  ;;  %v4436_v10 = vrot.slane %v4435_v43, 4  ;;  %v12239_v53 = vand.u32 4294901760, %v4339_v9 }
 0x373   :  { %4152 = vmatpush.msra.mxu0 %v15880_v50  ;;  %4312 = vmatpush.msra.mxu3 %v11872_v42  ;;  %v12131_v42 = vand.u32 4294901760, %v4345_v12  ;;  %v15587_v47 = vand.u32 4294901760, %v12118_v5  ;;  %v4341_v50 = vld [vmem:[%s15463_s6 + $0x38] sm:$0xff]  ;;  %v4530_v11 = vand.u32 4294901760, %v4529_v33  ;;  %v4334_v33 = vld [vmem:[%s15463_s6] sm:$0xff] }
 0x374   :  { %4210 = vmatpush.msra.mxu1 %v11910_v46  ;;  %4267 = vmatpush.msra.mxu2 %v15886_v7 }
 0x375   :  { %4155 = vmatpush.msra.mxu0 %v11883_v25  ;;  %4314 = vmatpush.msra.mxu3 %v11885_v21  ;;  %v15887_v25 = vand.u32 4294901760, %v11933_v51  ;;  %v4343_v21 = vld [vmem:[%s15463_s6 + $0x48] sm:$0xff]  ;;  %v12165_v48 = vsub.f32 %v4345_v12, %v12131_v42  ;;  %v2768_v61 = vpop.f32.mrf.mxu3  ;;  %v2822_v1 = vpop.f32.mrf.mxu0 }
 0x376   :  { %4212 = vmatpush.msra.mxu1 %v11922_v31  ;;  %v12167_v34 = vand.u32 4294901760, %v4343_v21 }
 0x377   :  { %4271 = vmatpush.msra.mxu2 %v15887_v25  ;;  %4158 = vmatpush.msra.mxu0 %v11896_v41  ;;  %v15586_v41 = vand.u32 4294901760, %v12129_v35  ;;  %v15583_v8 = vand.u32 4294901760, %v12165_v48  ;;  %v15580_v25 = vand.u32 4294901760, %v12215_v49 }
 0x378   :  { %4316 = vmatpush.msra.mxu3 %v11898_v56  ;;  %4214 = vmatpush.msra.mxu1 %v11935_v37  ;;  %v4511_v56 = vsub.f32 %v12103_v59, %v15588_v57  ;;  %v12199_v62 = vsub.f32 %v4343_v21, %v12167_v34  ;;  %v4337_v21 = vld [vmem:[%s15463_s6 + $0x18] sm:$0xff] }
 0x379   :  { %4275 = vmatpush.msra.mxu2 %v15888_v19  ;;  %4161 = vmatpush.msra.mxu0 %v11908_v13  ;;  %v4517_v13 = vsub.f32 %v12118_v5, %v15587_v47  ;;  %v4523_v3 = vsub.f32 %v12129_v35, %v15586_v41  ;;  %v4535_v38 = vsub.f32 %v12165_v48, %v15583_v8  ;;  %v4357_v41 = vld [vmem:[%s15463_s6 + $0xb8] sm:$0xff] }
 0x37a   :  { %4318 = vmatpush.msra.mxu3 %v11910_v46  ;;  %4216 = vmatpush.msra.mxu1 %v11948_v6  ;;  %v2668_v46 = vadd.f32 %v2667_v29, %v2627_v40  ;;  %v15581_v7 = vand.u32 4294901760, %v12199_v62  ;;  %v2861_v40 = vpop.f32.mrf.mxu1 }
 0x37b   :  { %4279 = vmatpush.msra.mxu2 %v4108_v27  ;;  %4164 = vmatpush.msra.mxu0 %v11920_v39  ;;  %v4403_v27 = vsel %vm403_vm1, %v12107_v55, 0.0  ;;  %v4512_v39 = vand.u32 4294901760, %v4511_v56  ;;  %v4518_v0 = vand.u32 4294901760, %v4517_v13  ;;  %v4524_v12 = vand.u32 4294901760, %v4523_v3  ;;  %v2930_v3 = vpop.f32.mrf.mxu2 }
 0x37c   :  { %4320 = vmatpush.msra.mxu3 %v11922_v31  ;;  %4218 = vmatpush.msra.mxu1 %v11963_v36  ;;  %v12190_v31 = vsub.f32 %v4344_v14, %v12153_v30  ;;  %v4338_v14 = vld [vmem:[%s15463_s6 + $0x20] sm:$0xff]  ;;  %v4536_v29 = vand.u32 4294901760, %v4535_v38  ;;  %v12267_v13 = vsub.f32 %v4339_v9, %v12239_v53  ;;  %v15890_v9 = vld [vmem:[#allocation11_spill] sm:$0xff] }
 0x37d   :  { %4283 = vmatpush.msra.mxu2 %v4114_v2  ;;  %4167 = vmatpush.msra.mxu0 %v11933_v51  ;;  %v4340_v2 = vld [vmem:[%s15463_s6 + $0x30] sm:$0xff]  ;;  %v2769_v51 = vadd.f32 %v2768_v61, %v2668_v46  ;;  %v12254_v32 = vand.u32 4294901760, %v4338_v14 }
 0x37e   :  { %4322 = vmatpush.msra.mxu3 %v11935_v37  ;;  %4220 = vmatpush.msra.mxu1 %v11976_v16  ;;  %v12207_v37 = vand.u32 4294901760, %v4341_v50 }
 0x37f   :  { %4287 = vmatpush.msra.mxu2 %v4120_v63  ;;  %4170 = vmatpush.msra.mxu0 %v11946_v28  ;;  %v4404_v63 = vrot.slane %v4403_v27, 4  ;;  %v15582_v28 = vand.u32 4294901760, %v12190_v31  ;;  %v2823_v26 = vadd.f32 %v2822_v1, %v2769_v51  ;;  %v12282_v61 = vsub.f32 %v4338_v14, %v12254_v32  ;;  %v2967_v14 = vpop.f32.mrf.mxu3 }
 0x380   :  { %4324 = vmatpush.msra.mxu3 %v11948_v6  ;;  %4224 = vmatmul.f32.vlgmr.msra.gmra.mxu1 %v15889_v4  ;;  %v12224_v6 = vand.u32 4294901760, %v4340_v2  ;;  %v15574_v4 = vand.u32 4294901760, %v12267_v13 }
 0x381   :  { %4291 = vmatpush.msra.mxu2 %v4126_v20  ;;  %4513 = vmatpush.msrb.mxu1 %v4512_v39  ;;  %v12237_v20 = vsub.f32 %v4341_v50, %v12207_v37  ;;  %v4405_v56 = vadd.f32 %v4404_v63, %v4403_v27  ;;  %v4553_v27 = vsub.f32 %v12215_v49, %v15580_v25  ;;  %v4335_v39 = vld [vmem:[%s15463_s6 + $0x8] sm:$0xff] }
 0x382   :  { %4173 = vmatpush.msra.mxu0 %v11959_v54  ;;  %4326 = vmatpush.msra.mxu3 %v11963_v36  ;;  %v4437_v54 = vadd.f32 %v4436_v10, %v4435_v43  ;;  %v4541_v36 = vsub.f32 %v12190_v31, %v15582_v28  ;;  %v12252_v19 = vsub.f32 %v4340_v2, %v12224_v6 }
 0x383   :  { %4293 = vmatmul.f32.vlgmr.msra.gmra.mxu2 %v10571_v24  ;;  %4519 = vmatpush.msrb.mxu1 %v4518_v0  ;;  %v2862_v43 = vadd.f32 %v2861_v40, %v2823_v26  ;;  %v15579_v46 = vand.u32 4294901760, %v12237_v20  ;;  %v4406_v1 = vrot.slane %v4405_v56, 2  ;;  %v4554_v38 = vand.u32 4294901760, %v4553_v27 }
 0x384   :  { %4611 = vmatpush.msrb.mxu2 %v12103_v59  ;;  %4176 = vmatpush.msra.mxu0 %v11972_v52  ;;  %v4547_v52 = vsub.f32 %v12199_v62, %v15581_v7  ;;  %v4438_v50 = vrot.slane %v4437_v54, 2  ;;  %v4542_v2 = vand.u32 4294901760, %v4541_v36  ;;  %v15578_v10 = vand.u32 4294901760, %v12252_v19 }
 0x385   :  { %4328 = vmatpush.msra.mxu3 %v11976_v16  ;;  %4525 = vmatpush.msrb.mxu1 %v4524_v12  ;;  %v4336_v16 = vld [vmem:[%s15463_s6 + $0x10] sm:$0xff]  ;;  %v2931_v51 = vadd.f32 %v2930_v3, %v2862_v43  ;;  %v4559_v63 = vsub.f32 %v12237_v20, %v15579_v46  ;;  %v15573_v40 = vand.u32 4294901760, %v12282_v61  ;;  %v12311_v36 = vand.u32 4294901760, %v4334_v33 }
 0x386   :  { %4330 = vmatmul.f32.vlgmr.msra.gmra.mxu3 %v10571_v24  ;;  %4614 = vmatpush.msrb.mxu2 %v12118_v5  ;;  %v12269_v24 = vand.u32 4294901760, %v4337_v21  ;;  %v4548_v0 = vand.u32 4294901760, %v4547_v52  ;;  %v4439_v12 = vadd.f32 %v4438_v50, %v4437_v54  ;;  %v4407_v54 = vadd.f32 %v4406_v1, %v4405_v56  ;;  %v4360_v46 = vld [vmem:[%s15463_s6 + $0xd0] sm:$0xff] }
 0x387   :  { %4664 = vmatpush.msrb.mxu3 %v12082_v18  ;;  %4179 = vmatpush.msra.mxu0 %v11987_v60  ;;  %v12284_v60 = vand.u32 4294901760, %v4336_v16  ;;  %v12313_v43 = vadd.f32 %v2967_v14, %v2931_v51  ;;  %v4571_v52 = vsub.f32 %v12267_v13, %v15574_v4  ;;  %v4577_v3 = vsub.f32 %v12282_v61, %v15573_v40  ;;  %v4364_v14 = vld [vmem:[%s15463_s6 + $0xf0] sm:$0xff] }
 0x388   :  { %4531 = vmatpush.msrb.mxu1 %v4530_v11  ;;  %4617 = vmatpush.msrb.mxu2 %v12129_v35  ;;  %v12297_v26 = vsub.f32 %v4337_v21, %v12269_v24  ;;  %v4565_v11 = vsub.f32 %v12252_v19, %v15578_v10  ;;  %v4440_v56 = vrot.slane %v4439_v12, 1  ;;  %v12333_v1 = vsub.f32 %v4334_v33, %v12311_v36 }
 0x389   :  { %4666 = vmatpush.msrb.mxu3 %v12092_v44  ;;  %4182 = vmatpush.msra.mxu0 %v11998_v22  ;;  %v12299_v22 = vand.u32 4294901760, %v4335_v39  ;;  %v12309_v21 = vsub.f32 %v4336_v16, %v12284_v60  ;;  %15891 = vst [vmem:[#allocation9_spill] sm:$0xff] %v12313_v43  ;;  %v4432_v51 = vmul.f32 %v12313_v43, %v12313_v43 }
 0x38a   :  { %4537 = vmatpush.msrb.mxu1 %v4536_v29  ;;  %4185 = vmatmul.f32.vlgmr.msra.gmra.mxu0 %v15890_v9  ;;  %v4560_v29 = vand.u32 4294901760, %v4559_v63  ;;  %v15572_v16 = vand.u32 4294901760, %v12297_v26  ;;  %v4566_v27 = vand.u32 4294901760, %v4565_v11  ;;  %15893 = vst [vmem:[#allocation13_spill] sm:$0xff] %v12333_v1  ;;  %v4572_v9 = vand.u32 4294901760, %v4571_v52 }
 0x38b   :  { %4620 = vmatpush.msrb.mxu2 %v12148_v15  ;;  %4468 = vmatpush.msrb.mxu0 %v12082_v18  ;;  %v12323_v50 = vsub.f32 %v4335_v39, %v12299_v22  ;;  %v4408_v39 = vrot.slane %v4407_v54, 1  ;;  %v4578_v11 = vand.u32 4294901760, %v4577_v3  ;;  %v15577_v52 = vand.u32 4294901760, %v12333_v1 }
 0x38c   :  { %4668 = vmatpush.msrb.mxu3 %v12105_v17  ;;  %4543 = vmatpush.msrb.mxu1 %v4542_v2  ;;  %v15576_v2 = vand.u32 4294901760, %v12309_v21  ;;  %v4583_v33 = vsub.f32 %v12297_v26, %v15572_v16  ;;  %v4442_v4 = vsel %vm403_vm1, %v4432_v51, 0.0  ;;  %v4410_v3 = vsel %vm403_vm1, %v12313_v43, 0.0  ;;  %v4356_v43 = vld [vmem:[%s15463_s6 + $0xb0] sm:$0xff] }
 0x38d   :  { %4623 = vmatpush.msrb.mxu2 %v12165_v48  ;;  %4470 = vmatpush.msrb.mxu0 %v12092_v44  ;;  %15892 = vst [vmem:[#allocation10_spill] sm:$0xff] %v12323_v50  ;;  %v15575_v63 = vand.u32 4294901760, %v12323_v50  ;;  %v4409_v40 = vadd.f32 %v4408_v39, %v4407_v54  ;;  %v4363_v54 = vld [vmem:[%s15463_s6 + $0xe8] sm:$0xff]  ;;  %v4443_v51 = vrot.slane %v4442_v4, 4 }
 0x38e   :  { %4670 = vmatpush.msrb.mxu3 %v12120_v58  ;;  %4549 = vmatpush.msrb.mxu1 %v4548_v0  ;;  %v4365_v0 = vld [vmem:[%s15463_s6 + $0xf8] sm:$0xff] }
 0x38f   :  { %4626 = vmatpush.msrb.mxu2 %v12190_v31  ;;  %4472 = vmatpush.msrb.mxu0 %v12105_v17  ;;  %v12357_v16 = vand.u32 4294901760, %v4365_v0  ;;  %v4444_v25 = vadd.f32 %v4443_v51, %v4442_v4 }
 0x390   :  { %4672 = vmatpush.msrb.mxu3 %v12131_v42  ;;  %4555 = vmatpush.msrb.mxu1 %v4554_v38  ;;  %v4441_v38 = vadd.f32 %v4440_v56, %v4439_v12  ;;  %v4584_v12 = vand.u32 4294901760, %v4583_v33  ;;  %v4595_v56 = vsub.f32 %v12323_v50, %v15575_v63  ;;  %v4601_v33 = vsub.f32 %v12333_v1, %v15577_v52 }
 0x391   :  { %4629 = vmatpush.msrb.mxu2 %v12199_v62  ;;  %4474 = vmatpush.msrb.mxu0 %v12120_v58  ;;  %v12381_v63 = vsub.f32 %v4365_v0, %v12357_v16 }
 0x392   :  { %4674 = vmatpush.msrb.mxu3 %v12153_v30  ;;  %4561 = vmatpush.msrb.mxu1 %v4560_v29  ;;  %v4589_v29 = vsub.f32 %v12309_v21, %v15576_v2  ;;  %v4463_v39 = vsel %vm434_vm2, %v4409_v40, %v4441_v38  ;;  %v4362_v2 = vld [vmem:[%s15463_s6 + $0xe0] sm:$0xff]  ;;  %v12388_v40 = vand.u32 4294901760, %v4363_v54  ;;  %v4361_v38 = vld [vmem:[%s15463_s6 + $0xd8] sm:$0xff]  ;;  %v4596_v0 = vand.u32 4294901760, %v4595_v56 }
 0x393   :  { %4632 = vmatpush.msrb.mxu2 %v12215_v49  ;;  %4476 = vmatpush.msrb.mxu0 %v12131_v42  ;;  %v12401_v10 = vand.u32 4294901760, %v4362_v2  ;;  %v15584_v56 = vand.u32 4294901760, %v12381_v63  ;;  %v12408_v7 = vand.u32 4294901760, %v4361_v38 }
 0x394   :  { %4676 = vmatpush.msrb.mxu3 %v12167_v34  ;;  %4567 = vmatpush.msrb.mxu1 %v4566_v27  ;;  %v12366_v27 = vand.u32 4294901760, %v4364_v14 }
 0x395   :  { %4635 = vmatpush.msrb.mxu2 %v12237_v20  ;;  %4478 = vmatpush.msrb.mxu0 %v12153_v30 }
 0x396   :  { %4678 = vmatpush.msrb.mxu3 %v12179_v45  ;;  %4573 = vmatpush.msrb.mxu1 %v4572_v9  ;;  %v4590_v9 = vand.u32 4294901760, %v4589_v29  ;;  %v12394_v29 = vand.u32 4294901760, %v4463_v39  ;;  %v12397_v52 = vsub.f32 %v4364_v14, %v12366_v27  ;;  %v12413_v14 = vsub.f32 %v4363_v54, %v12388_v40 }
 0x397   :  { %4638 = vmatpush.msrb.mxu2 %v12252_v19  ;;  %4480 = vmatpush.msrb.mxu0 %v12167_v34  ;;  %v12426_v54 = vsub.f32 %v4362_v2, %v12401_v10 }
 0x398   :  { %4680 = vmatpush.msrb.mxu3 %v12207_v37  ;;  %4579 = vmatpush.msrb.mxu1 %v4578_v11  ;;  %v4411_v11 = vrot.slane %v4410_v3, 4  ;;  %15894 = vst [vmem:[#allocation14_spill] sm:$0xff] %v12413_v14  ;;  %v4500_v4 = vsub.f32 %v4463_v39, %v12394_v29  ;;  %v15589_v51 = vand.u32 4294901760, %v12397_v52  ;;  %v4852_v39 = vsub.f32 %v12381_v63, %v15584_v56 }
 0x399   :  { %4641 = vmatpush.msrb.mxu2 %v12267_v13  ;;  %4482 = vmatpush.msrb.mxu0 %v12179_v45  ;;  %15895 = vst [vmem:[#allocation15_spill] sm:$0xff] %v12426_v54 }
 0x39a   :  { %4682 = vmatpush.msrb.mxu3 %v12224_v6  ;;  %4585 = vmatpush.msrb.mxu1 %v4584_v12  ;;  %v4602_v12 = vand.u32 4294901760, %v4601_v33  ;;  %v4412_v28 = vadd.f32 %v4411_v11, %v4410_v3  ;;  %v4359_v33 = vld [vmem:[%s15463_s6 + $0xc8] sm:$0xff]  ;;  %v4445_v3 = vrot.slane %v4444_v25, 2  ;;  %v12433_v11 = vsub.f32 %v4361_v38, %v12408_v7 }
 0x39b   :  { %4644 = vmatpush.msrb.mxu2 %v12282_v61  ;;  %4484 = vmatpush.msrb.mxu0 %v12207_v37  ;;  %v4501_v56 = vand.u32 4294901760, %v4500_v4  ;;  %v4858_v38 = vsub.f32 %v12397_v52, %v15589_v51  ;;  %v4853_v51 = vand.u32 4294901760, %v4852_v39 }
 0x39c   :  { %4684 = vmatpush.msrb.mxu3 %v12239_v53  ;;  %4591 = vmatpush.msrb.mxu1 %v4590_v9  ;;  %v12418_v9 = vand.u32 4294901760, %v4360_v46  ;;  %15896 = vst [vmem:[#allocation16_spill] sm:$0xff] %v12433_v11  ;;  %v4413_v8 = vrot.slane %v4412_v28, 2  ;;  %v4446_v2 = vadd.f32 %v4445_v3, %v4444_v25  ;;  %v12472_v3 = vand.u32 4294901760, %v4357_v41 }
 0x39d   :  { %4647 = vmatpush.msrb.mxu2 %v12297_v26  ;;  %4486 = vmatpush.msrb.mxu0 %v12224_v6  ;;  %v4502_v55 = vsub.f32 %v4500_v4, %v4501_v56 }
 0x39e   :  { %4686 = vmatpush.msrb.mxu3 %v12254_v32  ;;  %4597 = vmatpush.msrb.mxu1 %v4596_v0  ;;  %v4358_v0 = vld [vmem:[%s15463_s6 + $0xc0] sm:$0xff]  ;;  %v12449_v23 = vsub.f32 %v4360_v46, %v12418_v9  ;;  %v4414_v39 = vadd.f32 %v4413_v8, %v4412_v28  ;;  %v4859_v46 = vand.u32 4294901760, %v4858_v38  ;;  %v12487_v28 = vand.u32 4294901760, %v4356_v43 }
 0x39f   :  { %4650 = vmatpush.msrb.mxu2 %v12309_v21  ;;  %4488 = vmatpush.msrb.mxu0 %v12239_v53  ;;  %v12457_v57 = vand.u32 4294901760, %v4358_v0  ;;  %v4447_v38 = vrot.slane %v4446_v2, 1 }
 0x3a0   :  { %4688 = vmatpush.msrb.mxu3 %v12269_v24  ;;  %4603 = vmatpush.msrb.mxu1 %v4602_v12  ;;  %v12441_v12 = vand.u32 4294901760, %v4359_v33  ;;  %15897 = vst [vmem:[#allocation12_spill] sm:$0xff] %v12449_v23 }
 0x3a1   :  { %4653 = vmatpush.msrb.mxu2 %v12323_v50  ;;  %4490 = vmatpush.msrb.mxu0 %v12254_v32  ;;  %v12485_v8 = vsub.f32 %v4358_v0, %v12457_v57  ;;  %v12515_v0 = vsub.f32 %v4356_v43, %v12487_v28  ;;  %v15902_v50 = vand.u32 4294901760, %v12103_v59  ;;  %v3008_v59 = vpop.f32.mrf.mxu0 }
 0x3a2   :  { %4690 = vmatpush.msrb.mxu3 %v12284_v60  ;;  %4605 = vmatmul.f32.vlgmr.msrb.gmra.mxu1 %v12394_v29  ;;  %v12470_v25 = vsub.f32 %v4359_v33, %v12441_v12  ;;  %v15899_v33 = vand.u32 4294901760, %v12426_v54 }
 0x3a3   :  { %4656 = vmatpush.msrb.mxu2 %v12333_v1  ;;  %4772 = vmatpush.msra.mxu1 %v12082_v18  ;;  %v15898_v18 = vand.u32 4294901760, %v12413_v14  ;;  %v4355_v1 = vld [vmem:[%s15463_s6 + $0xa8] sm:$0xff] }
 0x3a4   :  { %4492 = vmatpush.msrb.mxu0 %v12269_v24  ;;  %4692 = vmatpush.msrb.mxu3 %v12299_v22 }
 0x3a5   :  { %4659 = vmatmul.f32.vlgmr.msrb.gmra.mxu2 %v4500_v4  ;;  %4774 = vmatpush.msra.mxu1 %v12092_v44  ;;  %v4864_v47 = vsub.f32 %v12413_v14, %v15898_v18  ;;  %v4870_v18 = vsub.f32 %v12426_v54, %v15899_v33  ;;  %v15900_v4 = vand.u32 4294901760, %v12433_v11  ;;  %v12500_v33 = vsub.f32 %v4357_v41, %v12472_v3 }
 0x3a6   :  { %4809 = vmatpush.msra.mxu2 %v12357_v16  ;;  %4494 = vmatpush.msrb.mxu0 %v12284_v60  ;;  %v12502_v54 = vand.u32 4294901760, %v4355_v1  ;;  %v15602_v41 = vand.u32 4294901760, %v12485_v8 }
 0x3a7   :  { %4694 = vmatpush.msrb.mxu3 %v12311_v36  ;;  %4776 = vmatpush.msra.mxu1 %v12105_v17  ;;  %v4876_v44 = vsub.f32 %v12433_v11, %v15900_v4  ;;  %v4354_v17 = vld [vmem:[%s15463_s6 + $0xa0] sm:$0xff]  ;;  %v4503_v4 = vand.u32 4294901760, %v4502_v55  ;;  %v15901_v11 = vand.u32 4294901760, %v12449_v23  ;;  %v4448_v55 = vadd.f32 %v4447_v38, %v4446_v2 }
 0x3a8   :  { %4698 = vmatmul.f32.vlgmr.msrb.gmra.mxu3 %v4501_v56  ;;  %4811 = vmatpush.msra.mxu2 %v12366_v27  ;;  %v4865_v56 = vand.u32 4294901760, %v4864_v47  ;;  %v4871_v47 = vand.u32 4294901760, %v4870_v18  ;;  %v4899_v18 = vand.u32 4294901760, %v12500_v33  ;;  %v12530_v2 = vsub.f32 %v4355_v1, %v12502_v54 }
 0x3a9   :  { %4854 = vmatpush.msra.mxu3 %v4853_v51  ;;  %4496 = vmatpush.msrb.mxu0 %v12299_v22  ;;  %v4415_v51 = vrot.slane %v4414_v39, 1  ;;  %v4882_v14 = vsub.f32 %v12449_v23, %v15901_v11  ;;  %v4877_v11 = vand.u32 4294901760, %v4876_v44  ;;  %v4352_v23 = vld [vmem:[%s15463_s6 + $0x90] sm:$0xff]  ;;  %v15603_v1 = vand.u32 4294901760, %v12515_v0 }
 0x3aa   :  { %4778 = vmatpush.msra.mxu1 %v12120_v58  ;;  %4813 = vmatpush.msra.mxu2 %v12388_v40  ;;  %v4353_v58 = vld [vmem:[%s15463_s6 + $0x98] sm:$0xff] }
 0x3ab   :  { %4860 = vmatpush.msra.mxu3 %v4859_v46  ;;  %4498 = vmatpush.msrb.mxu0 %v12311_v36  ;;  %v12517_v46 = vand.u32 4294901760, %v4354_v17  ;;  %v12532_v38 = vand.u32 4294901760, %v4353_v58  ;;  %v4416_v44 = vadd.f32 %v4415_v51, %v4414_v39  ;;  %v12545_v39 = vand.u32 4294901760, %v4352_v23 }
 0x3ac   :  { %4780 = vmatpush.msra.mxu1 %v12131_v42  ;;  %4504 = vmatmul.f32.vlgmr.msrb.gmra.mxu0 %v4503_v4  ;;  %v15903_v42 = vand.u32 4294901760, %v12470_v25  ;;  %v4883_v4 = vand.u32 4294901760, %v4882_v14  ;;  %v3109_v14 = vpop.f32.mrf.mxu1  ;;  %v15905_v51 = vand.u32 4294901760, %v12129_v35 }
 0x3ad   :  { %4815 = vmatpush.msra.mxu2 %v12401_v10  ;;  %4705 = vmatpush.msra.mxu0 %v15902_v50  ;;  %v15904_v50 = vand.u32 4294901760, %v12118_v5  ;;  %v4464_v5 = vsel %vm434_vm2, %v4416_v44, %v4448_v55  ;;  %v3110_v55 = vadd.f32 %v3109_v14, %v3008_v59 }
 0x3ae   :  { %4866 = vmatpush.msra.mxu3 %v4865_v56  ;;  %v4888_v43 = vsub.f32 %v12470_v25, %v15903_v42  ;;  %4782 = vmatpush.msra.mxu1 %v12153_v30  ;;  %v4894_v56 = vsub.f32 %v12485_v8, %v15602_v41  ;;  %v12543_v42 = vsub.f32 %v4354_v17, %v12517_v46  ;;  %v4351_v30 = vld [vmem:[%s15463_s6 + $0x88] sm:$0xff]  ;;  %v12582_v59 = vand.u32 4294901760, %v4464_v5 }
 0x3af   :  { %4817 = vmatpush.msra.mxu2 %v12408_v7  ;;  %4709 = vmatpush.msra.mxu0 %v15904_v50  ;;  %v4900_v17 = vsub.f32 %v12500_v33, %v4899_v18  ;;  %v4911_v50 = vand.u32 4294901760, %v12530_v2  ;;  %v12560_v41 = vsub.f32 %v4353_v58, %v12532_v38  ;;  %v12567_v35 = vand.u32 4294901760, %v4351_v30 }
 0x3b0   :  { %4872 = vmatpush.msra.mxu3 %v4871_v47  ;;  %4784 = vmatpush.msra.mxu1 %v12167_v34  ;;  %v4889_v47 = vand.u32 4294901760, %v4888_v43  ;;  %v4350_v34 = vld [vmem:[%s15463_s6 + $0x80] sm:$0xff]  ;;  %v4895_v43 = vand.u32 4294901760, %v4894_v56  ;;  %v4906_v58 = vsub.f32 %v12515_v0, %v15603_v1  ;;  %v4917_v44 = vand.u32 4294901760, %v12543_v42 }
 0x3b1   :  { %4819 = vmatpush.msra.mxu2 %v12418_v9  ;;  %4713 = vmatpush.msra.mxu0 %v15905_v51  ;;  %v12576_v51 = vsub.f32 %v4352_v23, %v12545_v39  ;;  %v4901_v56 = vand.u32 4294901760, %v4900_v17  ;;  %v4912_v14 = vsub.f32 %v12530_v2, %v4911_v50  ;;  %v4923_v23 = vand.u32 4294901760, %v12560_v41 }
 0x3b2   :  { %4878 = vmatpush.msra.mxu3 %v4877_v11  ;;  %4786 = vmatpush.msra.mxu1 %v12179_v45  ;;  %v15906_v11 = vand.u32 4294901760, %v12148_v15  ;;  %v12580_v45 = vand.u32 4294901760, %v4350_v34  ;;  %v3163_v15 = vpop.f32.mrf.mxu2  ;;  %v15908_v1 = vand.u32 4294901760, %v12190_v31  ;;  %v3202_v31 = vpop.f32.mrf.mxu3 }
 0x3b3   :  { %4821 = vmatpush.msra.mxu2 %v12441_v12  ;;  %v4929_v17 = vand.u32 4294901760, %v12576_v51 }
 0x3b4   :  { %4717 = vmatpush.msra.mxu0 %v15906_v11  ;;  %4884 = vmatpush.msra.mxu3 %v4883_v4  ;;  %v15907_v4 = vand.u32 4294901760, %v12165_v48  ;;  %v3164_v11 = vadd.f32 %v3163_v15, %v3110_v55  ;;  %v4907_v48 = vand.u32 4294901760, %v4906_v58  ;;  %v15909_v55 = vand.u32 4294901760, %v12199_v62 }
 0x3b5   :  { %4788 = vmatpush.msra.mxu1 %v12207_v37  ;;  %4823 = vmatpush.msra.mxu2 %v12457_v57  ;;  %v12593_v37 = vsub.f32 %v4351_v30, %v12567_v35  ;;  %v12607_v30 = vsub.f32 %v4350_v34, %v12580_v45  ;;  %v4924_v58 = vsub.f32 %v12560_v41, %v4923_v23  ;;  %v15910_v34 = vand.u32 4294901760, %v12215_v49 }
 0x3b6   :  { %4721 = vmatpush.msra.mxu0 %v15907_v4  ;;  %4890 = vmatpush.msra.mxu3 %v4889_v47  ;;  %v4918_v47 = vsub.f32 %v12543_v42, %v4917_v44  ;;  %v4930_v62 = vsub.f32 %v12576_v51, %v4929_v17 }
 0x3b7   :  { %4790 = vmatpush.msra.mxu1 %v12224_v6  ;;  %4825 = vmatpush.msra.mxu2 %v12472_v3  ;;  %v12604_v6 = vsub.f32 %v4464_v5, %v12582_v59  ;;  %v4935_v5 = vand.u32 4294901760, %v12593_v37  ;;  %v4925_v49 = vand.u32 4294901760, %v4924_v58 }
 0x3b8   :  { %4725 = vmatpush.msra.mxu0 %v15908_v1  ;;  %4896 = vmatpush.msra.mxu3 %v4895_v43  ;;  %v3271_v1 = vpop.f32.mrf.mxu0  ;;  %v4913_v43 = vand.u32 4294901760, %v4912_v14  ;;  %v4919_v15 = vand.u32 4294901760, %v4918_v47  ;;  %v15911_v14 = vand.u32 4294901760, %v12237_v20  ;;  %v4931_v47 = vand.u32 4294901760, %v4930_v62 }
 0x3b9   :  { %4792 = vmatpush.msra.mxu1 %v12239_v53  ;;  %4827 = vmatpush.msra.mxu2 %v12487_v28  ;;  %v3203_v53 = vadd.f32 %v3202_v31, %v3164_v11  ;;  %v4936_v11 = vsub.f32 %v12593_v37, %v4935_v5  ;;  %v15917_v62 = vand.u32 4294901760, %v12309_v21 }
 0x3ba   :  { %4729 = vmatpush.msra.mxu0 %v15909_v55  ;;  %4902 = vmatpush.msra.mxu3 %v4901_v56  ;;  %v4941_v56 = vand.u32 4294901760, %v12607_v30  ;;  %v15914_v55 = vand.u32 4294901760, %v12282_v61  ;;  %v15916_v61 = vand.u32 4294901760, %v12381_v63 }
 0x3bb   :  { %4794 = vmatpush.msra.mxu1 %v12254_v32  ;;  %4829 = vmatpush.msra.mxu2 %v12502_v54  ;;  %v3272_v4 = vadd.f32 %v3271_v1, %v3203_v53  ;;  %v4842_v32 = vand.u32 4294901760, %v12604_v6  ;;  %v15913_v1 = vand.u32 4294901760, %v12267_v13  ;;  %v15915_v13 = vand.u32 4294901760, %v12297_v26 }
 0x3bc   :  { %4733 = vmatpush.msra.mxu0 %v15910_v34  ;;  %4908 = vmatpush.msra.mxu3 %v4907_v48  ;;  %v15912_v48 = vand.u32 4294901760, %v12252_v19  ;;  %v4937_v19 = vand.u32 4294901760, %v4936_v11  ;;  %v15921_v11 = vld [vmem:[#allocation14_spill] sm:$0xff] }
 0x3bd   :  { %4796 = vmatpush.msra.mxu1 %v12269_v24  ;;  %4831 = vmatpush.msra.mxu2 %v12517_v46  ;;  %v3308_v24 = vpop.f32.mrf.mxu1  ;;  %v4843_v20 = vsub.f32 %v12604_v6, %v4842_v32 }
 0x3be   :  { %4737 = vmatpush.msra.mxu0 %v15911_v14  ;;  %4914 = vmatpush.msra.mxu3 %v4913_v43  ;;  %v3309_v31 = vadd.f32 %v3308_v24, %v3272_v4  ;;  %v15918_v4 = vand.u32 4294901760, %v12397_v52  ;;  %v15919_v14 = vld [vmem:[#allocation10_spill] sm:$0xff]  ;;  %v15922_v24 = vand.u32 4294901760, %v15921_v11 }
 0x3bf   :  { %4798 = vmatpush.msra.mxu1 %v12284_v60  ;;  %4833 = vmatpush.msra.mxu2 %v12532_v38  ;;  %v4942_v60 = vsub.f32 %v12607_v30, %v4941_v56  ;;  %v4844_v58 = vand.u32 4294901760, %v4843_v20 }
 0x3c0   :  { %4741 = vmatpush.msra.mxu0 %v15912_v48  ;;  %4920 = vmatpush.msra.mxu3 %v4919_v15  ;;  %v3504_v34 = vpop.f32.mrf.mxu0  ;;  %v15923_v48 = vld [vmem:[#allocation13_spill] sm:$0xff] }
 0x3c1   :  { %4800 = vmatpush.msra.mxu1 %v12299_v22  ;;  %4835 = vmatpush.msra.mxu2 %v12545_v39  ;;  %v3349_v22 = vpop.f32.mrf.mxu2  ;;  %v4943_v53 = vand.u32 4294901760, %v4942_v60  ;;  %v15927_v60 = vld [vmem:[#allocation16_spill] sm:$0xff] }
 0x3c2   :  { %4745 = vmatpush.msra.mxu0 %v15913_v1  ;;  %4926 = vmatpush.msra.mxu3 %v4925_v49  ;;  %v3350_v43 = vadd.f32 %v3349_v22, %v3309_v31  ;;  %v15920_v49 = vand.u32 4294901760, %v15919_v14  ;;  %v4381_v1 = vld [vmem:[%s15463_s6 + $0x178] sm:$0xff] }
 0x3c3   :  { %4802 = vmatpush.msra.mxu1 %v12311_v36  ;;  %4837 = vmatpush.msra.mxu2 %v12567_v35  ;;  %v3450_v36 = vpop.f32.mrf.mxu3 }
 0x3c4   :  { %4749 = vmatpush.msra.mxu0 %v15914_v55  ;;  %4932 = vmatpush.msra.mxu3 %v4931_v47  ;;  %v3451_v15 = vadd.f32 %v3450_v36, %v3350_v43  ;;  %v15924_v47 = vand.u32 4294901760, %v15923_v48  ;;  %v12694_v55 = vand.u32 4294901760, %v4381_v1  ;;  %v4373_v48 = vld [vmem:[%s15463_s6 + $0x138] sm:$0xff] }
 0x3c5   :  { %4804 = vmatmul.f32.vlgmr.msra.gmra.mxu1 %v12394_v29  ;;  %4839 = vmatpush.msra.mxu2 %v12580_v45  ;;  %v3543_v21 = vpop.f32.mrf.mxu1 }
 0x3c6   :  { %5005 = vmatpush.msrb.mxu1 %v12357_v16  ;;  %4753 = vmatpush.msra.mxu0 %v15915_v13  ;;  %v3505_v26 = vadd.f32 %v3504_v34, %v3451_v15  ;;  %v4378_v13 = vld [vmem:[%s15463_s6 + $0x160] sm:$0xff]  ;;  %v12717_v36 = vsub.f32 %v4381_v1, %v12694_v55  ;;  %v4377_v34 = vld [vmem:[%s15463_s6 + $0x158] sm:$0xff] }
 0x3c7   :  { %4938 = vmatpush.msra.mxu3 %v4937_v19  ;;  %4845 = vmatmul.f32.vlgmr.msra.gmra.mxu2 %v4844_v58 }
 0x3c8   :  { %5007 = vmatpush.msrb.mxu1 %v12366_v27  ;;  %5046 = vmatpush.msrb.mxu2 %v15916_v61  ;;  %v3544_v31 = vadd.f32 %v3543_v21, %v3505_v26  ;;  %v12732_v61 = vand.u32 4294901760, %v4378_v13  ;;  %v12745_v26 = vand.u32 4294901760, %v4377_v34 }
 0x3c9   :  { %4757 = vmatpush.msra.mxu0 %v15917_v62  ;;  %4944 = vmatpush.msra.mxu3 %v4943_v53  ;;  %v3612_v19 = vpop.f32.mrf.mxu2  ;;  %v15620_v62 = vand.u32 4294901760, %v12717_v36 }
 0x3ca   :  { %4946 = vmatmul.f32.vlgmr.msra.gmra.mxu3 %v12582_v59  ;;  %5009 = vmatpush.msrb.mxu1 %v12388_v40  ;;  %v12760_v14 = vsub.f32 %v4378_v13, %v12732_v61 }
 0x3cb   :  { %5050 = vmatpush.msrb.mxu2 %v15918_v4  ;;  %5113 = vmatpush.msrb.mxu3 %v12357_v16  ;;  %v15925_v16 = vld [vmem:[#allocation15_spill] sm:$0xff]  ;;  %v3649_v43 = vpop.f32.mrf.mxu3  ;;  %v4376_v4 = vld [vmem:[%s15463_s6 + $0x150] sm:$0xff] }
 0x3cc   :  { %4761 = vmatpush.msra.mxu0 %v15920_v49  ;;  %5011 = vmatpush.msrb.mxu1 %v12401_v10  ;;  %v15926_v20 = vand.u32 4294901760, %v15925_v16 }
 0x3cd   :  { %5054 = vmatpush.msrb.mxu2 %v15922_v24  ;;  %5115 = vmatpush.msrb.mxu3 %v12366_v27  ;;  %v15928_v27 = vand.u32 4294901760, %v15927_v60  ;;  %v12778_v24 = vsub.f32 %v4377_v34, %v12745_v26 }
 0x3ce   :  { %4765 = vmatpush.msra.mxu0 %v15924_v47  ;;  %5013 = vmatpush.msrb.mxu1 %v12408_v7 }
 0x3cf   :  { %4767 = vmatmul.f32.vlgmr.msra.gmra.mxu0 %v12394_v29  ;;  %5058 = vmatpush.msrb.mxu2 %v15926_v20  ;;  %v3613_v29 = vadd.f32 %v3612_v19, %v3544_v31  ;;  %v4371_v19 = vld [vmem:[%s15463_s6 + $0x128] sm:$0xff] }
 0x3d0   :  { %4952 = vmatpush.msrb.mxu0 %v12381_v63  ;;  %5117 = vmatpush.msrb.mxu3 %v12388_v40  ;;  %v15929_v63 = vld [vmem:[#allocation12_spill] sm:$0xff]  ;;  %v4380_v40 = vld [vmem:[%s15463_s6 + $0x170] sm:$0xff] }
 0x3d1   :  { %5015 = vmatpush.msrb.mxu1 %v12418_v9  ;;  %5062 = vmatpush.msrb.mxu2 %v15928_v27  ;;  %v15930_v22 = vand.u32 4294901760, %v15929_v63  ;;  %v12704_v58 = vand.u32 4294901760, %v4380_v40  ;;  %v12706_v53 = vadd.f32 %v3649_v43, %v3613_v29  ;;  %v4369_v43 = vld [vmem:[%s15463_s6 + $0x118] sm:$0xff] }
 0x3d2   :  { %4955 = vmatpush.msrb.mxu0 %v12397_v52  ;;  %5119 = vmatpush.msrb.mxu3 %v12401_v10  ;;  %v15931_v10 = vand.u32 4294901760, %v12470_v25  ;;  %v4379_v52 = vld [vmem:[%s15463_s6 + $0x168] sm:$0xff] }
 0x3d3   :  { %5017 = vmatpush.msrb.mxu1 %v12441_v12  ;;  %5066 = vmatpush.msrb.mxu2 %v15930_v22  ;;  %15932 = vst [vmem:[#allocation11_spill] sm:$0xff] %v12706_v53  ;;  %v4433_v15 = vmul.f32 %v12706_v53, %v12706_v53  ;;  %v4417_v47 = vsel %vm403_vm1, %v12706_v53, 0.0 }
 0x3d4   :  { %4958 = vmatpush.msrb.mxu0 %v15921_v11  ;;  %5121 = vmatpush.msrb.mxu3 %v12408_v7  ;;  %v15933_v7 = vand.u32 4294901760, %v12485_v8 }
 0x3d5   :  { %5019 = vmatpush.msrb.mxu1 %v12457_v57  ;;  %5070 = vmatpush.msrb.mxu2 %v15931_v10  ;;  %v4449_v49 = vsel %vm403_vm1, %v4433_v15, 0.0 }
 0x3d6   :  { %4961 = vmatpush.msrb.mxu0 %v15925_v16  ;;  %5123 = vmatpush.msrb.mxu3 %v12418_v9  ;;  %v12719_v9 = vand.u32 4294901760, %v4379_v52  ;;  %v15616_v16 = vand.u32 4294901760, %v12778_v24 }
 0x3d7   :  { %5021 = vmatpush.msrb.mxu1 %v12472_v3  ;;  %5074 = vmatpush.msrb.mxu2 %v15933_v7 }
 0x3d8   :  { %4964 = vmatpush.msrb.mxu0 %v15927_v60  ;;  %5125 = vmatpush.msrb.mxu3 %v12441_v12  ;;  %v12730_v12 = vsub.f32 %v4380_v40, %v12704_v58  ;;  %v12852_v40 = vand.u32 4294901760, %v4371_v19 }
 0x3d9   :  { %5023 = vmatpush.msrb.mxu1 %v12487_v28  ;;  %5078 = vmatpush.msrb.mxu2 %v4899_v18  ;;  %v15934_v18 = vand.u32 4294901760, %v12515_v0 }
 0x3da   :  { %4967 = vmatpush.msrb.mxu0 %v15929_v63  ;;  %5127 = vmatpush.msrb.mxu3 %v12457_v57  ;;  %v12743_v57 = vsub.f32 %v4379_v52, %v12719_v9  ;;  %v5217_v63 = vsub.f32 %v12778_v24, %v15616_v16 }
 0x3db   :  { %5025 = vmatpush.msrb.mxu1 %v12502_v54  ;;  %5082 = vmatpush.msrb.mxu2 %v15934_v18  ;;  %v3690_v18 = vpop.f32.mrf.mxu0 }
 0x3dc   :  { %4970 = vmatpush.msrb.mxu0 %v12470_v25  ;;  %5129 = vmatpush.msrb.mxu3 %v12472_v3  ;;  %v4375_v25 = vld [vmem:[%s15463_s6 + $0x148] sm:$0xff]  ;;  %v15619_v3 = vand.u32 4294901760, %v12730_v12  ;;  %v15618_v11 = vand.u32 4294901760, %v12743_v57  ;;  %v5218_v15 = vand.u32 4294901760, %v5217_v63 }
 0x3dd   :  { %5027 = vmatpush.msrb.mxu1 %v12517_v46  ;;  %5086 = vmatpush.msrb.mxu2 %v4911_v50  ;;  %v12766_v50 = vand.u32 4294901760, %v4376_v4 }
 0x3de   :  { %4973 = vmatpush.msrb.mxu0 %v12485_v8  ;;  %5131 = vmatpush.msrb.mxu3 %v12487_v28  ;;  %v4374_v8 = vld [vmem:[%s15463_s6 + $0x140] sm:$0xff]  ;;  %v5193_v28 = vsub.f32 %v12717_v36, %v15620_v62  ;;  %v5205_v31 = vsub.f32 %v12743_v57, %v15618_v11  ;;  %v4388_v62 = vld [vmem:[%s15463_s6 + $0x1b0] sm:$0xff] }
 0x3df   :  { %5029 = vmatpush.msrb.mxu1 %v12532_v38  ;;  %5090 = vmatpush.msrb.mxu2 %v4917_v44  ;;  %v12780_v44 = vand.u32 4294901760, %v4375_v25  ;;  %v12791_v21 = vand.u32 4294901760, %v4374_v8 }
 0x3e0   :  { %4976 = vmatpush.msrb.mxu0 %v12500_v33  ;;  %5133 = vmatpush.msrb.mxu3 %v12502_v54  ;;  %v5199_v54 = vsub.f32 %v12730_v12, %v15619_v3  ;;  %v15617_v33 = vand.u32 4294901760, %v12760_v14  ;;  %v5206_v29 = vand.u32 4294901760, %v5205_v31 }
 0x3e1   :  { %5031 = vmatpush.msrb.mxu1 %v12545_v39  ;;  %5094 = vmatpush.msrb.mxu2 %v4923_v23  ;;  %v4450_v23 = vrot.slane %v4449_v49, 4  ;;  %v12811_v20 = vsub.f32 %v4375_v25, %v12780_v44  ;;  %v12827_v1 = vsub.f32 %v4374_v8, %v12791_v21  ;;  %v12880_v25 = vsub.f32 %v4371_v19, %v12852_v40 }
 0x3e2   :  { %4979 = vmatpush.msrb.mxu0 %v12515_v0  ;;  %5135 = vmatpush.msrb.mxu3 %v12517_v46  ;;  %v12802_v0 = vsub.f32 %v4376_v4, %v12766_v50  ;;  %v5194_v46 = vand.u32 4294901760, %v5193_v28  ;;  %v5200_v60 = vand.u32 4294901760, %v5199_v54  ;;  %v5211_v27 = vsub.f32 %v12760_v14, %v15617_v33  ;;  %v4367_v28 = vld [vmem:[%s15463_s6 + $0x108] sm:$0xff]  ;;  %v3791_v54 = vpop.f32.mrf.mxu1 }
 0x3e3   :  { %5033 = vmatpush.msrb.mxu1 %v12567_v35  ;;  %5098 = vmatpush.msrb.mxu2 %v4929_v17  ;;  %v4372_v17 = vld [vmem:[%s15463_s6 + $0x130] sm:$0xff]  ;;  %v15613_v22 = vand.u32 4294901760, %v12811_v20  ;;  %v15612_v52 = vand.u32 4294901760, %v12827_v1  ;;  %v3792_v31 = vadd.f32 %v3791_v54, %v3690_v18 }
 0x3e4   :  { %4982 = vmatpush.msrb.mxu0 %v12530_v2  ;;  %5137 = vmatpush.msrb.mxu3 %v12532_v38  ;;  %v12819_v2 = vand.u32 4294901760, %v4373_v48  ;;  %v4418_v38 = vrot.slane %v4417_v47, 4  ;;  %v5212_v10 = vand.u32 4294901760, %v5211_v27  ;;  %v15609_v27 = vand.u32 4294901760, %v12880_v25 }
 0x3e5   :  { %5035 = vmatpush.msrb.mxu1 %v12580_v45  ;;  %5102 = vmatpush.msrb.mxu2 %v4935_v5  ;;  %v4451_v5 = vadd.f32 %v4450_v23, %v4449_v49  ;;  %v5235_v8 = vsub.f32 %v12827_v1, %v15612_v52 }
 0x3e6   :  { %4985 = vmatpush.msrb.mxu0 %v12543_v42  ;;  %5139 = vmatpush.msrb.mxu3 %v12545_v39  ;;  %v15614_v42 = vand.u32 4294901760, %v12802_v0  ;;  %v12837_v39 = vand.u32 4294901760, %v4372_v17 }
 0x3e7   :  { %5039 = vmatmul.f32.vlgmr.msrb.gmra.mxu1 %v4842_v32  ;;  %5106 = vmatpush.msrb.mxu2 %v4941_v56  ;;  %v4370_v32 = vld [vmem:[%s15463_s6 + $0x120] sm:$0xff]  ;;  %v12850_v56 = vsub.f32 %v4373_v48, %v12819_v2  ;;  %v4452_v34 = vrot.slane %v4451_v5, 2 }
 0x3e8   :  { %5195 = vmatpush.msra.mxu1 %v5194_v46  ;;  %4988 = vmatpush.msrb.mxu0 %v12560_v41  ;;  %v4419_v41 = vadd.f32 %v4418_v38, %v4417_v47  ;;  %v12865_v7 = vsub.f32 %v4372_v17, %v12837_v39  ;;  %v12867_v13 = vand.u32 4294901760, %v4370_v32  ;;  %v4366_v38 = vld [vmem:[%s15463_s6 + $0x100] sm:$0xff] }
 0x3e9   :  { %5141 = vmatpush.msrb.mxu3 %v12567_v35  ;;  %5108 = vmatmul.f32.vlgmr.msrb.gmra.mxu2 %v12582_v59  ;;  %v5223_v35 = vsub.f32 %v12802_v0, %v15614_v42  ;;  %v15611_v4 = vand.u32 4294901760, %v12850_v56  ;;  %v4453_v46 = vadd.f32 %v4452_v34, %v4451_v5 }
 0x3ea   :  { %5201 = vmatpush.msra.mxu1 %v5200_v60  ;;  %5293 = vmatpush.msra.mxu2 %v12717_v36  ;;  %v4420_v49 = vrot.slane %v4419_v41, 2  ;;  %v15610_v47 = vand.u32 4294901760, %v12865_v7  ;;  %v12895_v23 = vsub.f32 %v4370_v32, %v12867_v13 }
 0x3eb   :  { %4991 = vmatpush.msrb.mxu0 %v12576_v51  ;;  %5143 = vmatpush.msrb.mxu3 %v12580_v45  ;;  %v5229_v51 = vsub.f32 %v12811_v20, %v15613_v22  ;;  %v4368_v45 = vld [vmem:[%s15463_s6 + $0x110] sm:$0xff]  ;;  %v5224_v48 = vand.u32 4294901760, %v5223_v35  ;;  %v5241_v60 = vsub.f32 %v12850_v56, %v15611_v4 }
 0x3ec   :  { %5145 = vmatmul.f32.vlgmr.msrb.gmra.mxu3 %v12582_v59  ;;  %5207 = vmatpush.msra.mxu1 %v5206_v29  ;;  %v12882_v59 = vand.u32 4294901760, %v4369_v43  ;;  %v4421_v5 = vadd.f32 %v4420_v49, %v4419_v41  ;;  %v5236_v29 = vand.u32 4294901760, %v5235_v8  ;;  %v5247_v63 = vsub.f32 %v12865_v7, %v15610_v47 }
 0x3ed   :  { %5296 = vmatpush.msra.mxu2 %v12730_v12  ;;  %5346 = vmatpush.msra.mxu3 %v12694_v55  ;;  %v5230_v17 = vand.u32 4294901760, %v5229_v51  ;;  %v15604_v32 = vand.u32 4294901760, %v12895_v23  ;;  %v4454_v41 = vrot.slane %v4453_v46, 1  ;;  %v5242_v34 = vand.u32 4294901760, %v5241_v60  ;;  %v3953_v60 = vpop.f32.mrf.mxu0 }
 0x3ee   :  { %4994 = vmatpush.msrb.mxu0 %v12593_v37  ;;  %5213 = vmatpush.msra.mxu1 %v5212_v10  ;;  %v12897_v37 = vand.u32 4294901760, %v4368_v45  ;;  %v12910_v19 = vsub.f32 %v4369_v43, %v12882_v59  ;;  %v12924_v43 = vand.u32 4294901760, %v4366_v38  ;;  %v4422_v18 = vrot.slane %v4421_v5, 1 }
 0x3ef   :  { %5299 = vmatpush.msra.mxu2 %v12743_v57  ;;  %5348 = vmatpush.msra.mxu3 %v12704_v58  ;;  %v5248_v49 = vand.u32 4294901760, %v5247_v63  ;;  %v5259_v8 = vsub.f32 %v12895_v23, %v15604_v32 }
 0x3f0   :  { %4997 = vmatpush.msrb.mxu0 %v12607_v30  ;;  %5219 = vmatpush.msra.mxu1 %v5218_v15  ;;  %v12912_v30 = vand.u32 4294901760, %v4367_v28  ;;  %v12922_v10 = vsub.f32 %v4368_v45, %v12897_v37  ;;  %v5253_v15 = vsub.f32 %v12880_v25, %v15609_v27  ;;  %v15608_v51 = vand.u32 4294901760, %v12910_v19 }
 0x3f1   :  { %5000 = vmatmul.f32.vlgmr.msrb.gmra.mxu0 %v12604_v6  ;;  %5302 = vmatpush.msra.mxu2 %v12760_v14  ;;  %v3845_v6 = vpop.f32.mrf.mxu2  ;;  %v4423_v32 = vadd.f32 %v4422_v18, %v4421_v5 }
 0x3f2   :  { %5150 = vmatpush.msra.mxu0 %v12694_v55  ;;  %5350 = vmatpush.msra.mxu3 %v12719_v9  ;;  %v3846_v35 = vadd.f32 %v3845_v6, %v3792_v31  ;;  %v12934_v45 = vsub.f32 %v4367_v28, %v12912_v30  ;;  %v15606_v54 = vand.u32 4294901760, %v12922_v10  ;;  %v4397_v28 = vld [vmem:[%s15463_s6 + $0x1f8] sm:$0xff]  ;;  %v4455_v31 = vadd.f32 %v4454_v41, %v4453_v46  ;;  %v4396_v41 = vld [vmem:[%s15463_s6 + $0x1f0] sm:$0xff] }
 0x3f3   :  { %5225 = vmatpush.msra.mxu1 %v5224_v48  ;;  %5305 = vmatpush.msra.mxu2 %v12778_v24  ;;  %v12944_v48 = vsub.f32 %v4366_v38, %v12924_v43  ;;  %v5254_v6 = vand.u32 4294901760, %v5253_v15  ;;  %v5265_v38 = vsub.f32 %v12910_v19, %v15608_v51  ;;  %v12958_v46 = vand.u32 4294901760, %v4397_v28 }
 0x3f4   :  { %5152 = vmatpush.msra.mxu0 %v12704_v58  ;;  %5352 = vmatpush.msra.mxu3 %v12732_v61  ;;  %v15605_v63 = vand.u32 4294901760, %v12934_v45  ;;  %v5271_v15 = vsub.f32 %v12922_v10, %v15606_v54 }
 0x3f5   :  { %5231 = vmatpush.msra.mxu1 %v5230_v17  ;;  %5308 = vmatpush.msra.mxu2 %v12802_v0  ;;  %15935 = vst [vmem:[#allocation10_spill] sm:$0xff] %v12944_v48  ;;  %v3884_v17 = vpop.f32.mrf.mxu3  ;;  %v15607_v5 = vand.u32 4294901760, %v12944_v48  ;;  %v5266_v18 = vand.u32 4294901760, %v5265_v38 }
 0x3f6   :  { %5154 = vmatpush.msra.mxu0 %v12719_v9  ;;  %5354 = vmatpush.msra.mxu3 %v12745_v26 }
 0x3f7   :  { %5237 = vmatpush.msra.mxu1 %v5236_v29  ;;  %5311 = vmatpush.msra.mxu2 %v12811_v20  ;;  %v3885_v29 = vadd.f32 %v3884_v17, %v3846_v35  ;;  %v12975_v17 = vand.u32 4294901760, %v4396_v41 }
 0x3f8   :  { %5156 = vmatpush.msra.mxu0 %v12732_v61  ;;  %5356 = vmatpush.msra.mxu3 %v12766_v50 }
 0x3f9   :  { %5243 = vmatpush.msra.mxu1 %v5242_v34  ;;  %5314 = vmatpush.msra.mxu2 %v12827_v1  ;;  %v3954_v35 = vadd.f32 %v3953_v60, %v3885_v29  ;;  %v5260_v34 = vand.u32 4294901760, %v5259_v8  ;;  %v4465_v8 = vsel %vm434_vm2, %v4423_v32, %v4455_v31  ;;  %v4395_v60 = vld [vmem:[%s15463_s6 + $0x1e8] sm:$0xff]  ;;  %v3990_v29 = vpop.f32.mrf.mxu1  ;;  %v5283_v32 = vsub.f32 %v12944_v48, %v15607_v5  ;;  %v4394_v31 = vld [vmem:[%s15463_s6 + $0x1e0] sm:$0xff]  ;;  %v4031_v5 = vpop.f32.mrf.mxu2 }
 0x3fa   :  { %5158 = vmatpush.msra.mxu0 %v12745_v26  ;;  %5358 = vmatpush.msra.mxu3 %v12780_v44  ;;  %v12994_v54 = vand.u32 4294901760, %v4465_v8  ;;  %v13011_v27 = vand.u32 4294901760, %v4394_v31 }
 0x3fb   :  { %5249 = vmatpush.msra.mxu1 %v5248_v49  ;;  %5317 = vmatpush.msra.mxu2 %v12850_v56  ;;  %v5277_v49 = vsub.f32 %v12934_v45, %v15605_v63  ;;  %v3991_v38 = vadd.f32 %v3990_v29, %v3954_v35  ;;  %v5272_v63 = vand.u32 4294901760, %v5271_v15  ;;  %v4393_v35 = vld [vmem:[%s15463_s6 + $0x1d8] sm:$0xff]  ;;  %v13003_v15 = vsub.f32 %v4396_v41, %v12975_v17  ;;  %v4392_v29 = vld [vmem:[%s15463_s6 + $0x1d0] sm:$0xff] }
 0x3fc   :  { %5160 = vmatpush.msra.mxu0 %v12766_v50  ;;  %5360 = vmatpush.msra.mxu3 %v12791_v21  ;;  %15936 = vst [vmem:[#allocation14_spill] sm:$0xff] %v13011_v27  ;;  %v13014_v41 = vand.u32 4294901760, %v4393_v35  ;;  %v5182_v47 = vsub.f32 %v4465_v8, %v12994_v54  ;;  %v13022_v52 = vand.u32 4294901760, %v4392_v29 }
 0x3fd   :  { %5255 = vmatpush.msra.mxu1 %v5254_v6  ;;  %5320 = vmatpush.msra.mxu2 %v12865_v7  ;;  %v12983_v6 = vsub.f32 %v4397_v28, %v12958_v46  ;;  %v12996_v28 = vand.u32 4294901760, %v4395_v60 }
 0x3fe   :  { %5162 = vmatpush.msra.mxu0 %v12780_v44  ;;  %5362 = vmatpush.msra.mxu3 %v12819_v2  ;;  %v13042_v22 = vsub.f32 %v4393_v35, %v13014_v41  ;;  %v13050_v33 = vsub.f32 %v4392_v29, %v13022_v52 }
 0x3ff   :  { %5261 = vmatpush.msra.mxu1 %v5260_v34  ;;  %5323 = vmatpush.msra.mxu2 %v12880_v25  ;;  %v5278_v34 = vand.u32 4294901760, %v5277_v49  ;;  %v15615_v51 = vand.u32 4294901760, %v12983_v6  ;;  %v5284_v49 = vand.u32 4294901760, %v5283_v32  ;;  %v13020_v4 = vsub.f32 %v4395_v60, %v12996_v28  ;;  %v4390_v32 = vld [vmem:[%s15463_s6 + $0x1c0] sm:$0xff] }
 0x400   :  { %5164 = vmatpush.msra.mxu0 %v12791_v21  ;;  %5364 = vmatpush.msra.mxu3 %v12837_v39  ;;  %v13035_v60 = vsub.f32 %v4394_v31, %v13011_v27  ;;  %15939 = vst [vmem:[#allocation16_spill] sm:$0xff] %v13042_v22 }
 0x401   :  { %5267 = vmatpush.msra.mxu1 %v5266_v18  ;;  %5326 = vmatpush.msra.mxu2 %v12895_v23  ;;  %v4032_v18 = vadd.f32 %v4031_v5, %v3991_v38  ;;  %15937 = vst [vmem:[#allocation13_spill] sm:$0xff] %v13020_v4  ;;  %v15621_v5 = vand.u32 4294901760, %v13003_v15  ;;  %v4132_v38 = vpop.f32.mrf.mxu3  ;;  %v5534_v8 = vsub.f32 %v12983_v6, %v15615_v51  ;;  %v5183_v51 = vand.u32 4294901760, %v5182_v47  ;;  %v4225_v11 = vpop.f32.mrf.mxu1 }
 0x402   :  { %5166 = vmatpush.msra.mxu0 %v12819_v2  ;;  %5366 = vmatpush.msra.mxu3 %v12852_v40  ;;  %15938 = vst [vmem:[#allocation15_spill] sm:$0xff] %v13035_v60 }
 0x403   :  { %5273 = vmatpush.msra.mxu1 %v5272_v63  ;;  %5329 = vmatpush.msra.mxu2 %v12910_v19  ;;  %v4391_v63 = vld [vmem:[%s15463_s6 + $0x1c8] sm:$0xff]  ;;  %15940 = vst [vmem:[#allocation12_spill] sm:$0xff] %v13050_v33  ;;  %v5540_v35 = vsub.f32 %v13003_v15, %v15621_v5  ;;  %v5535_v29 = vand.u32 4294901760, %v5534_v8  ;;  %v5184_v8 = vsub.f32 %v5182_v47, %v5183_v51  ;;  %v15941_v5 = vand.u32 4294901760, %v13020_v4 }
 0x404   :  { %5168 = vmatpush.msra.mxu0 %v12837_v39  ;;  %5368 = vmatpush.msra.mxu3 %v12867_v13  ;;  %v13044_v42 = vand.u32 4294901760, %v4391_v63 }
 0x405   :  { %5279 = vmatpush.msra.mxu1 %v5278_v34  ;;  %5332 = vmatpush.msra.mxu2 %v12922_v10  ;;  %v4133_v34 = vadd.f32 %v4132_v38, %v4032_v18  ;;  %v4389_v18 = vld [vmem:[%s15463_s6 + $0x1b8] sm:$0xff]  ;;  %v13060_v38 = vand.u32 4294901760, %v4390_v32  ;;  %v5546_v3 = vsub.f32 %v13020_v4, %v15941_v5  ;;  %v15942_v5 = vand.u32 4294901760, %v13035_v60 }
 0x406   :  { %5170 = vmatpush.msra.mxu0 %v12852_v40  ;;  %5370 = vmatpush.msra.mxu3 %v12882_v59  ;;  %v4294_v53 = vpop.f32.mrf.mxu2 }
 0x407   :  { %5285 = vmatpush.msra.mxu1 %v5284_v49  ;;  %5335 = vmatpush.msra.mxu2 %v12934_v45  ;;  %v4186_v16 = vpop.f32.mrf.mxu0 }
 0x408   :  { %5172 = vmatpush.msra.mxu0 %v12867_v13  ;;  %5372 = vmatpush.msra.mxu3 %v12897_v37  ;;  %v4187_v49 = vadd.f32 %v4186_v16, %v4133_v34  ;;  %v13071_v34 = vsub.f32 %v4391_v63, %v13044_v42 }
 0x409   :  { %5287 = vmatmul.f32.vlgmr.msra.gmra.mxu1 %v12994_v54  ;;  %5338 = vmatpush.msra.mxu2 %v12944_v48  ;;  %v5552_v48 = vsub.f32 %v13035_v60, %v15942_v5  ;;  %v4331_v16 = vpop.f32.mrf.mxu3 }
 0x40a   :  { %5454 = vmatpush.msrb.mxu1 %v12694_v55  ;;  %5174 = vmatpush.msra.mxu0 %v12882_v59  ;;  %v4226_v31 = vadd.f32 %v4225_v11, %v4187_v49  ;;  %v13073_v55 = vand.u32 4294901760, %v4389_v18  ;;  %v5541_v11 = vand.u32 4294901760, %v5540_v35  ;;  %v13084_v49 = vsub.f32 %v4390_v32, %v13060_v38 }
 0x40b   :  { %5374 = vmatpush.msra.mxu3 %v12912_v30  ;;  %5341 = vmatmul.f32.vlgmr.msra.gmra.mxu2 %v5182_v47  ;;  %v4387_v47 = vld [vmem:[%s15463_s6 + $0x1a8] sm:$0xff]  ;;  %v15944_v32 = vand.u32 4294901760, %v13042_v22 }
 0x40c   :  { %5456 = vmatpush.msrb.mxu1 %v12704_v58  ;;  %5491 = vmatpush.msrb.mxu2 %v12958_v46  ;;  %v4295_v63 = vadd.f32 %v4294_v53, %v4226_v31  ;;  %v13086_v58 = vand.u32 4294901760, %v4388_v62 }
 0x40d   :  { %5176 = vmatpush.msra.mxu0 %v12897_v37  ;;  %5376 = vmatpush.msra.mxu3 %v12924_v43  ;;  %v5558_v31 = vsub.f32 %v13042_v22, %v15944_v32  ;;  %v13113_v32 = vand.u32 4294901760, %v4387_v47 }
 0x40e   :  { %5380 = vmatmul.f32.vlgmr.msra.gmra.mxu3 %v5183_v51  ;;  %5458 = vmatpush.msrb.mxu1 %v12719_v9  ;;  %v13096_v53 = vadd.f32 %v4331_v16, %v4295_v63  ;;  %v13103_v51 = vsub.f32 %v4389_v18, %v13073_v55  ;;  %v4386_v9 = vld [vmem:[%s15463_s6 + $0x1a0] sm:$0xff]  ;;  %v5547_v16 = vand.u32 4294901760, %v5546_v3  ;;  %v15945_v63 = vand.u32 4294901760, %v13050_v33  ;;  %v4385_v3 = vld [vmem:[%s15463_s6 + $0x198] sm:$0xff] }
 0x40f   :  { %5493 = vmatpush.msrb.mxu2 %v12975_v17  ;;  %5536 = vmatpush.msrb.mxu3 %v5535_v29  ;;  %v5185_v29 = vand.u32 4294901760, %v5184_v8  ;;  %v5553_v8 = vand.u32 4294901760, %v5552_v48  ;;  %v15947_v48 = vand.u32 4294901760, %v12717_v36 }
 0x410   :  { %15943 = vst [vmem:[#allocation17_spill] sm:$0xff] %v13096_v53  ;;  %5178 = vmatpush.msra.mxu0 %v12912_v30  ;;  %5460 = vmatpush.msrb.mxu1 %v12732_v61  ;;  %v5564_v5 = vsub.f32 %v13050_v33, %v15945_v63  ;;  %v4424_v18 = vsel %vm403_vm1, %v13096_v53, 0.0  ;;  %v4434_v35 = vmul.f32 %v13096_v53, %v13096_v53  ;;  %v13129_v63 = vand.u32 4294901760, %v4386_v9 }
 0x411   :  { %5495 = vmatpush.msrb.mxu2 %v12996_v28  ;;  %5542 = vmatpush.msrb.mxu3 %v5541_v11  ;;  %v13122_v61 = vsub.f32 %v4388_v62, %v13086_v58  ;;  %v4425_v11 = vrot.slane %v4424_v18, 4  ;;  %v5559_v53 = vand.u32 4294901760, %v5558_v31  ;;  %v15946_v62 = vand.u32 4294901760, %v13071_v34 }
 0x412   :  { %5180 = vmatpush.msra.mxu0 %v12924_v43  ;;  %5462 = vmatpush.msrb.mxu1 %v12745_v26  ;;  %v4456_v22 = vsel %vm403_vm1, %v4434_v35, 0.0  ;;  %v4384_v26 = vld [vmem:[%s15463_s6 + $0x190] sm:$0xff]  ;;  %v13145_v31 = vand.u32 4294901760, %v4385_v3  ;;  %v5565_v35 = vand.u32 4294901760, %v5564_v5 }
 0x413   :  { %5186 = vmatmul.f32.vlgmr.msra.gmra.mxu0 %v5185_v29  ;;  %5497 = vmatpush.msrb.mxu2 %v13011_v27  ;;  %v5570_v33 = vsub.f32 %v13071_v34, %v15946_v62  ;;  %v4426_v29 = vadd.f32 %v4425_v11, %v4424_v18  ;;  %v4457_v4 = vrot.slane %v4456_v22, 4  ;;  %v13143_v27 = vsub.f32 %v4387_v47, %v13113_v32 }
 0x414   :  { %5387 = vmatpush.msrb.mxu0 %v15947_v48  ;;  %5548 = vmatpush.msrb.mxu3 %v5547_v16  ;;  %v15948_v62 = vand.u32 4294901760, %v13084_v49  ;;  %v5587_v36 = vand.u32 4294901760, %v13122_v61  ;;  %v15949_v16 = vand.u32 4294901760, %v12730_v12  ;;  %v13156_v11 = vsub.f32 %v4386_v9, %v13129_v63 }
 0x415   :  { %5464 = vmatpush.msrb.mxu1 %v12766_v50  ;;  %5499 = vmatpush.msrb.mxu2 %v13014_v41  ;;  %v4427_v18 = vrot.slane %v4426_v29, 2  ;;  %v4458_v47 = vadd.f32 %v4457_v4, %v4456_v22  ;;  %v13158_v48 = vand.u32 4294901760, %v4384_v26  ;;  %v4383_v50 = vld [vmem:[%s15463_s6 + $0x188] sm:$0xff]  ;;  %v5571_v5 = vand.u32 4294901760, %v5570_v33 }
 0x416   :  { %v5576_v60 = vsub.f32 %v13084_v49, %v15948_v62  ;;  %5391 = vmatpush.msrb.mxu0 %v15949_v16  ;;  %5554 = vmatpush.msrb.mxu3 %v5553_v8  ;;  %v15950_v12 = vand.u32 4294901760, %v12743_v57  ;;  %v15951_v22 = vand.u32 4294901760, %v13103_v51  ;;  %v5593_v9 = vand.u32 4294901760, %v13143_v27 }
 0x417   :  { %5466 = vmatpush.msrb.mxu1 %v12780_v44  ;;  %5501 = vmatpush.msrb.mxu2 %v13022_v52  ;;  %v4459_v62 = vrot.slane %v4458_v47, 2  ;;  %v13172_v8 = vsub.f32 %v4385_v3, %v13145_v31  ;;  %v4382_v44 = vld [vmem:[%s15463_s6 + $0x180] sm:$0xff]  ;;  %v4428_v16 = vadd.f32 %v4427_v18, %v4426_v29  ;;  %v13179_v33 = vand.u32 4294901760, %v4383_v50 }
 0x418   :  { %5395 = vmatpush.msrb.mxu0 %v15950_v12  ;;  %5560 = vmatpush.msrb.mxu3 %v5559_v53  ;;  %v5582_v4 = vsub.f32 %v13103_v51, %v15951_v22  ;;  %v5577_v57 = vand.u32 4294901760, %v5576_v60  ;;  %v15952_v12 = vand.u32 4294901760, %v12760_v14  ;;  %v5588_v3 = vsub.f32 %v13122_v61, %v5587_v36 }
 0x419   :  { %5468 = vmatpush.msrb.mxu1 %v12791_v21  ;;  %5503 = vmatpush.msrb.mxu2 %v13044_v42  ;;  %v4460_v53 = vadd.f32 %v4459_v62, %v4458_v47  ;;  %v5599_v22 = vand.u32 4294901760, %v13156_v11  ;;  %v13188_v29 = vsub.f32 %v4384_v26, %v13158_v48  ;;  %v13192_v21 = vand.u32 4294901760, %v4382_v44 }
 0x41a   :  { %5399 = vmatpush.msrb.mxu0 %v15952_v12  ;;  %5566 = vmatpush.msrb.mxu3 %v5565_v35  ;;  %v15953_v14 = vand.u32 4294901760, %v12778_v24  ;;  %v5583_v35 = vand.u32 4294901760, %v5582_v4  ;;  %v5594_v18 = vsub.f32 %v13143_v27, %v5593_v9  ;;  %v5605_v47 = vand.u32 4294901760, %v13172_v8 }
 0x41b   :  { %5470 = vmatpush.msrb.mxu1 %v12819_v2  ;;  %5505 = vmatpush.msrb.mxu2 %v13060_v38  ;;  %v4461_v60 = vrot.slane %v4460_v53, 1  ;;  %v4429_v26 = vrot.slane %v4428_v16, 1  ;;  %v13203_v2 = vsub.f32 %v4383_v50, %v13179_v33  ;;  %v15954_v62 = vand.u32 4294901760, %v12802_v0 }
 0x41c   :  { %5403 = vmatpush.msrb.mxu0 %v15953_v14  ;;  %5572 = vmatpush.msrb.mxu3 %v5571_v5  ;;  %v5589_v24 = vand.u32 4294901760, %v5588_v3  ;;  %v5600_v5 = vsub.f32 %v13156_v11, %v5599_v22  ;;  %v5611_v4 = vand.u32 4294901760, %v13188_v29  ;;  %v15955_v50 = vand.u32 4294901760, %v12811_v20 }
 0x41d   :  { %5472 = vmatpush.msrb.mxu1 %v12837_v39  ;;  %5507 = vmatpush.msrb.mxu2 %v13073_v55  ;;  %v4462_v12 = vadd.f32 %v4461_v60, %v4460_v53  ;;  %v13214_v39 = vsub.f32 %v4382_v44, %v13192_v21  ;;  %v5595_v0 = vand.u32 4294901760, %v5594_v18  ;;  %v4430_v3 = vadd.f32 %v4429_v26, %v4428_v16 }
 0x41e   :  { %5407 = vmatpush.msrb.mxu0 %v15954_v62  ;;  %5578 = vmatpush.msrb.mxu3 %v5577_v57  ;;  %v5606_v57 = vsub.f32 %v13172_v8, %v5605_v47  ;;  %v15956_v53 = vand.u32 4294901760, %v12827_v1  ;;  %v5601_v44 = vand.u32 4294901760, %v5600_v5  ;;  %v5612_v20 = vsub.f32 %v13188_v29, %v5611_v4 }
 0x41f   :  { %5474 = vmatpush.msrb.mxu1 %v12852_v40  ;;  %5509 = vmatpush.msrb.mxu2 %v13086_v58  ;;  %v5617_v40 = vand.u32 4294901760, %v13203_v2  ;;  %v5623_v16 = vand.u32 4294901760, %v13214_v39  ;;  %v15957_v60 = vand.u32 4294901760, %v12850_v56  ;;  %v15960_v26 = vand.u32 4294901760, %v12895_v23 }
 0x420   :  { %5411 = vmatpush.msrb.mxu0 %v15955_v50  ;;  %5584 = vmatpush.msrb.mxu3 %v5583_v35  ;;  %v5607_v1 = vand.u32 4294901760, %v5606_v57  ;;  %v5613_v35 = vand.u32 4294901760, %v5612_v20  ;;  %v15963_v23 = vand.u32 4294901760, %v12922_v10  ;;  %v15964_v5 = vand.u32 4294901760, %v13003_v15  ;;  %v15967_v50 = vld [vmem:[#allocation13_spill] sm:$0xff]  ;;  %v15969_v57 = vld [vmem:[#allocation10_spill] sm:$0xff] }
 0x421   :  { %5476 = vmatpush.msrb.mxu1 %v12867_v13  ;;  %5511 = vmatpush.msrb.mxu2 %v13113_v32  ;;  %v4466_v13 = vsel %vm434_vm2, %v4430_v3, %v4462_v12  ;;  %v5618_v14 = vsub.f32 %v13203_v2, %v5617_v40  ;;  %v5624_v56 = vsub.f32 %v13214_v39, %v5623_v16  ;;  %v15966_v12 = vld [vmem:[#allocation14_spill] sm:$0xff]  ;;  %v15968_v10 = vand.u32 4294901760, %v15967_v50 }
 0x422   :  { %5415 = vmatpush.msrb.mxu0 %v15956_v53  ;;  %5590 = vmatpush.msrb.mxu3 %v5589_v24  ;;  %v13242_v18 = vand.u32 4294901760, %v4466_v13  ;;  %v15970_v3 = vand.u32 4294901760, %v15969_v57 }
 0x423   :  { %5478 = vmatpush.msrb.mxu1 %v12882_v59  ;;  %5513 = vmatpush.msrb.mxu2 %v13129_v63  ;;  %v15958_v59 = vand.u32 4294901760, %v12865_v7  ;;  %v5619_v7 = vand.u32 4294901760, %v5618_v14  ;;  %v5625_v62 = vand.u32 4294901760, %v5624_v56 }
 0x424   :  { %5419 = vmatpush.msrb.mxu0 %v15957_v60  ;;  %5596 = vmatpush.msrb.mxu3 %v5595_v0 }
 0x425   :  { %5480 = vmatpush.msrb.mxu1 %v12897_v37  ;;  %5515 = vmatpush.msrb.mxu2 %v13145_v31  ;;  %v15959_v37 = vand.u32 4294901760, %v12880_v25  ;;  %v15961_v25 = vand.u32 4294901760, %v12910_v19  ;;  %v15965_v19 = vand.u32 4294901760, %v12934_v45  ;;  %v15971_v45 = vld [vmem:[#allocation15_spill] sm:$0xff] }
 0x426   :  { %5423 = vmatpush.msrb.mxu0 %v15958_v59  ;;  %5602 = vmatpush.msrb.mxu3 %v5601_v44 }
 0x427   :  { %5482 = vmatpush.msrb.mxu1 %v12912_v30  ;;  %5517 = vmatpush.msrb.mxu2 %v13158_v48  ;;  %v13256_v30 = vsub.f32 %v4466_v13, %v13242_v18 }
 0x428   :  { %5427 = vmatpush.msrb.mxu0 %v15959_v37  ;;  %5608 = vmatpush.msrb.mxu3 %v5607_v1 }
 0x429   :  { %5484 = vmatpush.msrb.mxu1 %v12924_v43  ;;  %5519 = vmatpush.msrb.mxu2 %v13179_v33  ;;  %v15962_v43 = vand.u32 4294901760, %v12983_v6  ;;  %v5524_v24 = vand.u32 4294901760, %v13256_v30 }
 0x42a   :  { %5431 = vmatpush.msrb.mxu0 %v15960_v26  ;;  %5614 = vmatpush.msrb.mxu3 %v5613_v35 }
 0x42b   :  { %5486 = vmatmul.f32.vlgmr.msrb.gmra.mxu1 %v12994_v54  ;;  %5521 = vmatpush.msrb.mxu2 %v13192_v21  ;;  %v5525_v0 = vsub.f32 %v13256_v30, %v5524_v24 }
 0x42c   :  { %5687 = vmatpush.msra.mxu1 %v12958_v46  ;;  %5435 = vmatpush.msrb.mxu0 %v15961_v25 }
 0x42d   :  { %5620 = vmatpush.msrb.mxu3 %v5619_v7  ;;  %5728 = vmatpush.msra.mxu2 %v15962_v43  ;;  %v5526_v53 = vand.u32 4294901760, %v5525_v0 }
 0x42e   :  { %5689 = vmatpush.msra.mxu1 %v12975_v17  ;;  %5439 = vmatpush.msrb.mxu0 %v15963_v23 }
 0x42f   :  { %5626 = vmatpush.msrb.mxu3 %v5625_v62  ;;  %5732 = vmatpush.msra.mxu2 %v15964_v5 }
 0x430   :  { %5691 = vmatpush.msra.mxu1 %v12996_v28  ;;  %5443 = vmatpush.msrb.mxu0 %v15965_v19  ;;  %v4398_v19 = vld [vmem:[%s15464_s7] sm:$0xff] }
 0x431   :  { %5795 = vmatpush.msra.mxu3 %v12958_v46  ;;  %5736 = vmatpush.msra.mxu2 %v15968_v10  ;;  %v15972_v46 = vand.u32 4294901760, %v15971_v45 }
 0x432   :  { %5628 = vmatmul.f32.vlgmr.msrb.gmra.mxu3 %v13242_v18  ;;  %5693 = vmatpush.msra.mxu1 %v15966_v12 }
 0x433   :  { %5797 = vmatpush.msra.mxu3 %v12975_v17  ;;  %5447 = vmatpush.msrb.mxu0 %v15970_v3  ;;  %v15973_v17 = vld [vmem:[#allocation16_spill] sm:$0xff] }
 0x434   :  { %5449 = vmatmul.f32.vlgmr.msrb.gmra.mxu0 %v12994_v54  ;;  %5695 = vmatpush.msra.mxu1 %v13014_v41  ;;  %v15974_v44 = vand.u32 4294901760, %v15973_v17  ;;  %v15975_v54 = vld [vmem:[#allocation12_spill] sm:$0xff] }
 0x435   :  { %5634 = vmatpush.msra.mxu0 %v12983_v6  ;;  %5740 = vmatpush.msra.mxu2 %v15972_v46  ;;  %v15976_v6 = vand.u32 4294901760, %v15975_v54 }
 0x436   :  { %5799 = vmatpush.msra.mxu3 %v12996_v28  ;;  %5697 = vmatpush.msra.mxu1 %v13022_v52  ;;  %v15977_v28 = vand.u32 4294901760, %v13071_v34 }
 0x437   :  { %5637 = vmatpush.msra.mxu0 %v13003_v15  ;;  %5744 = vmatpush.msra.mxu2 %v15974_v44  ;;  %v15978_v15 = vand.u32 4294901760, %v13084_v49  ;;  %v4399_v44 = vld [vmem:[%s15464_s7 + $0x8] sm:$0xff] }
 0x438   :  { %5801 = vmatpush.msra.mxu3 %v15966_v12  ;;  %5699 = vmatpush.msra.mxu1 %v13044_v42 }
 0x439   :  { %5640 = vmatpush.msra.mxu0 %v15967_v50  ;;  %5748 = vmatpush.msra.mxu2 %v15976_v6  ;;  %v5876_v50 = vand.u32 4294901760, %v4398_v19 }
 0x43a   :  { %5803 = vmatpush.msra.mxu3 %v13014_v41  ;;  %5527 = vmatmul.f32.vlgmr.msrb.gmra.mxu2 %v5526_v53  ;;  %v15979_v41 = vand.u32 4294901760, %v13103_v51 }
 0x43b   :  { %5643 = vmatpush.msra.mxu0 %v15971_v45  ;;  %5701 = vmatpush.msra.mxu1 %v13060_v38  ;;  %v5903_v0 = vsub.f32 %v4398_v19, %v5876_v50 }
 0x43c   :  { %5752 = vmatpush.msra.mxu2 %v15977_v28  ;;  %5805 = vmatpush.msra.mxu3 %v13022_v52  ;;  %v4606_v52 = vpop.f32.mrf.mxu1 }
 0x43d   :  { %5646 = vmatpush.msra.mxu0 %v15973_v17  ;;  %5703 = vmatpush.msra.mxu1 %v13073_v55  ;;  %v5904_v3 = vand.u32 4294901760, %v5903_v0 }
 0x43e   :  { %5756 = vmatpush.msra.mxu2 %v15978_v15  ;;  %5807 = vmatpush.msra.mxu3 %v13044_v42  ;;  %v4505_v42 = vpop.f32.mrf.mxu0 }
 0x43f   :  { %5649 = vmatpush.msra.mxu0 %v15975_v54  ;;  %5705 = vmatpush.msra.mxu1 %v13086_v58  ;;  %v5905_v46 = vsub.f32 %v5903_v0, %v5904_v3  ;;  %v6022_v54 = vand.u32 4294901760, %v4399_v44 }
 0x440   :  { %5760 = vmatpush.msra.mxu2 %v15979_v41  ;;  %5809 = vmatpush.msra.mxu3 %v13060_v38  ;;  %v4660_v38 = vpop.f32.mrf.mxu2 }
 0x441   :  { %5652 = vmatpush.msra.mxu0 %v13071_v34  ;;  %5707 = vmatpush.msra.mxu1 %v13113_v32  ;;  %v5906_v17 = vand.u32 4294901760, %v5905_v46  ;;  %v6049_v6 = vsub.f32 %v4399_v44, %v6022_v54 }
 0x442   :  { %5764 = vmatpush.msra.mxu2 %v5587_v36  ;;  %5811 = vmatpush.msra.mxu3 %v13073_v55  ;;  %v4699_v55 = vpop.f32.mrf.mxu3 }
 0x443   :  { %5655 = vmatpush.msra.mxu0 %v13084_v49  ;;  %5709 = vmatpush.msra.mxu1 %v13129_v63  ;;  %v6050_v15 = vand.u32 4294901760, %v6049_v6 }
 0x444   :  { %5768 = vmatpush.msra.mxu2 %v5593_v9  ;;  %5813 = vmatpush.msra.mxu3 %v13086_v58 }
 0x445   :  { %5658 = vmatpush.msra.mxu0 %v13103_v51  ;;  %5711 = vmatpush.msra.mxu1 %v13145_v31 }
 0x446   :  { %5772 = vmatpush.msra.mxu2 %v5599_v22  ;;  %5815 = vmatpush.msra.mxu3 %v13113_v32  ;;  %v4805_v32 = vpop.f32.mrf.mxu1 }
 0x447   :  { %5661 = vmatpush.msra.mxu0 %v13122_v61  ;;  %5713 = vmatpush.msra.mxu1 %v13158_v48 }
 0x448   :  { %5776 = vmatpush.msra.mxu2 %v5605_v47  ;;  %5817 = vmatpush.msra.mxu3 %v13129_v63 }
 0x449   :  { %5664 = vmatpush.msra.mxu0 %v13143_v27  ;;  %5715 = vmatpush.msra.mxu1 %v13179_v33  ;;  %v4607_v27 = vadd.f32 %v4606_v52, %v4505_v42  ;;  %v6051_v42 = vsub.f32 %v6049_v6, %v6050_v15 }
 0x44a   :  { %5780 = vmatpush.msra.mxu2 %v5611_v4  ;;  %5819 = vmatpush.msra.mxu3 %v13145_v31  ;;  %v4846_v63 = vpop.f32.mrf.mxu2 }
 0x44b   :  { %5667 = vmatpush.msra.mxu0 %v13156_v11  ;;  %5717 = vmatpush.msra.mxu1 %v13192_v21  ;;  %v4661_v34 = vadd.f32 %v4660_v38, %v4607_v27  ;;  %v6052_v27 = vand.u32 4294901760, %v6051_v42 }
 0x44c   :  { %5784 = vmatpush.msra.mxu2 %v5617_v40  ;;  %5821 = vmatpush.msra.mxu3 %v13158_v48  ;;  %v4768_v49 = vpop.f32.mrf.mxu0 }
 0x44d   :  { %5721 = vmatmul.f32.vlgmr.msra.gmra.mxu1 %v5524_v24  ;;  %5670 = vmatpush.msra.mxu0 %v13172_v8  ;;  %v4700_v58 = vadd.f32 %v4699_v55, %v4661_v34  ;;  %v4947_v36 = vpop.f32.mrf.mxu3 }
 0x44e   :  { %5788 = vmatpush.msra.mxu2 %v5623_v16  ;;  %5823 = vmatpush.msra.mxu3 %v13179_v33 }
 0x44f   :  { %5790 = vmatmul.f32.vlgmr.msra.gmra.mxu2 %v13242_v18  ;;  %5673 = vmatpush.msra.mxu0 %v13188_v29  ;;  %v4769_v51 = vadd.f32 %v4768_v49, %v4700_v58  ;;  %v4402_v49 = vld [vmem:[%s15465_s8] sm:$0x3] }
 0x450   :  { %5825 = vmatpush.msra.mxu3 %v13192_v21  ;;  %5930 = vmatpush.msrb.mxu2 %v5903_v0 }
 0x451   :  { %5827 = vmatmul.f32.vlgmr.msra.gmra.mxu3 %v13242_v18  ;;  %5676 = vmatpush.msra.mxu0 %v13203_v2  ;;  %v4806_v61 = vadd.f32 %v4805_v32, %v4769_v51  ;;  %v4400_v32 = vld [vmem:[%s15464_s7 + $0x10] sm:$0xff] }
 0x452   :  { %5953 = vmatpush.msrb.mxu3 %v5876_v50  ;;  %5907 = vmatpush.msrb.mxu1 %v5906_v17 }
 0x453   :  { %5679 = vmatpush.msra.mxu0 %v13214_v39  ;;  %v4847_v31 = vadd.f32 %v4846_v63, %v4806_v61  ;;  %6023 = vmatpush.msra.mxu2 %v6022_v54  ;;  %v6168_v63 = vand.u32 4294901760, %v4400_v32 }
 0x454   :  { %5682 = vmatmul.f32.vlgmr.msra.gmra.mxu0 %v13256_v30  ;;  %6001 = vmatpush.msra.mxu1 %v5876_v50 }
 0x455   :  { %v4948_v48 = vadd.f32 %v4947_v36, %v4847_v31  ;;  %5877 = vmatpush.msrb.mxu0 %v5876_v50  ;;  %6053 = vmatpush.msra.mxu3 %v6052_v27  ;;  %v6483_v50 = vld [vmem:[#allocation4 + $0x90] sm:$0xff] }
 0x456   :  { %v13440_v46 = vand.u32 4294901760, %v6483_v50 }
 0x457   :  { %5979 = vmatpush.msra.mxu0 %v5904_v3  ;;  %v6481_v3 = vld [vmem:[#allocation4 + $0x80] sm:$0xff] }
 0x458   :  { %v13447_v44 = vand.u32 4294901760, %v6481_v3  ;;  %v13458_v42 = vsub.f32 %v6483_v50, %v13440_v46 }
 0x464   :  { %v5040_v8 = vpop.f32.mrf.mxu1 }
 0x46c   :  { %v5109_v22 = vpop.f32.mrf.mxu2 }
 0x46e   :  { %v5001_v11 = vpop.f32.mrf.mxu0 }
 0x46f   :  { %v5002_v9 = vadd.f32 %v5001_v11, %v4948_v48  ;;  %v5146_v21 = vpop.f32.mrf.mxu3  ;;  %v6195_v11 = vsub.f32 %v4400_v32, %v6168_v63 }
 0x471   :  { %v5041_v33 = vadd.f32 %v5040_v8, %v5002_v9 }
 0x473   :  { %v5110_v29 = vadd.f32 %v5109_v22, %v5041_v33  ;;  %v6196_v33 = vand.u32 4294901760, %v6195_v11 }
 0x475   :  { %v5147_v2 = vadd.f32 %v5146_v21, %v5110_v29  ;;  %v4401_v29 = vld [vmem:[%s15464_s7 + $0x18] sm:$0xff] }
 0x486   :  { %v5288_v39 = vpop.f32.mrf.mxu1 }
 0x48e   :  { %v5342_v20 = vpop.f32.mrf.mxu2 }
 0x490   :  { %v5187_v47 = vpop.f32.mrf.mxu0 }
 0x491   :  { %v5188_v4 = vadd.f32 %v5187_v47, %v5147_v2  ;;  %v5381_v13 = vpop.f32.mrf.mxu3  ;;  %v6197_v47 = vsub.f32 %v6195_v11, %v6196_v33  ;;  %v13378_v2 = vand.u32 4294901760, %v4401_v29 }
 0x493   :  { %v5289_v40 = vadd.f32 %v5288_v39, %v5188_v4 }
 0x495   :  { %v5343_v16 = vadd.f32 %v5342_v20, %v5289_v40  ;;  %v6198_v40 = vand.u32 4294901760, %v6197_v47  ;;  %v13388_v20 = vsub.f32 %v4401_v29, %v13378_v2 }
 0x497   :  { %v5382_v1 = vadd.f32 %v5381_v13, %v5343_v16  ;;  %v6342_v13 = vand.u32 4294901760, %v13388_v20 }
 0x4a8   :  { %v5487_v59 = vpop.f32.mrf.mxu1 }
 0x4b1   :  { %v5450_v60 = vpop.f32.mrf.mxu0 }
 0x4b2   :  { %v5451_v14 = vadd.f32 %v5450_v60, %v5382_v1  ;;  %v6343_v60 = vsub.f32 %v13388_v20, %v6342_v13  ;;  %v6495_v1 = vld [vmem:[#allocation4 + $0xf0] sm:$0xff] }
 0x4b4   :  { %v5488_v18 = vadd.f32 %v5487_v59, %v5451_v14  ;;  %v6493_v14 = vld [vmem:[#allocation4 + $0xe0] sm:$0xff]  ;;  %v6491_v59 = vld [vmem:[#allocation4 + $0xd0] sm:$0xff] }
 0x4b5   :  { %v5629_v37 = vpop.f32.mrf.mxu3 }
 0x4bd   :  { %v5528_v35 = vpop.f32.mrf.mxu2 }
 0x4be   :  { %v5529_v56 = vadd.f32 %v5528_v35, %v5488_v18  ;;  %v6344_v35 = vand.u32 4294901760, %v6343_v60  ;;  %v13400_v18 = vand.u32 4294901760, %v6495_v1 }
 0x4c0   :  { %v5630_v7 = vadd.f32 %v5629_v37, %v5529_v56  ;;  %v13402_v56 = vand.u32 4294901760, %v6493_v14  ;;  %v13404_v37 = vand.u32 4294901760, %v6491_v59 }
 0x4ca   :  { %v5722_v62 = vpop.f32.mrf.mxu1 }
 0x4d1   :  { %v5683_v26 = vpop.f32.mrf.mxu0 }
 0x4d2   :  { %v5684_v30 = vadd.f32 %v5683_v26, %v5630_v7  ;;  %v5791_v43 = vpop.f32.mrf.mxu2  ;;  %v6489_v7 = vld [vmem:[#allocation4 + $0xc0] sm:$0xff]  ;;  %v13409_v26 = vsub.f32 %v6495_v1, %v13400_v18  ;;  %v6467_v1 = vld [vmem:[#allocation4 + $0x10] sm:$0xff] }
 0x4d4   :  { %v5723_v25 = vadd.f32 %v5722_v62, %v5684_v30  ;;  %v5828_v24 = vpop.f32.mrf.mxu3  ;;  %v13412_v30 = vsub.f32 %v6493_v14, %v13402_v56  ;;  %v13414_v62 = vand.u32 4294901760, %v6489_v7 }
 0x4d6   :  { %v5792_v23 = vadd.f32 %v5791_v43, %v5723_v25  ;;  %v6487_v25 = vld [vmem:[#allocation4 + $0xb0] sm:$0xff]  ;;  %v6636_v43 = vand.u32 4294901760, %v13409_v26  ;;  %v6642_v19 = vand.u32 4294901760, %v13412_v30 }
 0x4d8   :  { %v5829_v5 = vadd.f32 %v5828_v24, %v5792_v23  ;;  %v13419_v23 = vsub.f32 %v6491_v59, %v13404_v37  ;;  %v13421_v24 = vand.u32 4294901760, %v6487_v25 }
 0x4da   :  { %v5831_v12 = vmul.f32 0.0078125, %v5829_v5  ;;  %v6485_v5 = vld [vmem:[#allocation4 + $0xa0] sm:$0xff]  ;;  %v6648_v0 = vand.u32 4294901760, %v13419_v23 }
 0x4dc   :  { %v5832_v10 = vmul.f32 %v5831_v12, %v5831_v12 }
 0x4de   :  { %v5834_v57 = vrot.slane %v5832_v10, 7  ;;  %v6637_v10 = vsub.f32 %v13409_v26, %v6636_v43 }
 0x4e0   :  { %v5836_v45 = vsub.f32 %v5831_v12, %v5834_v57  ;;  %v13434_v57 = vand.u32 4294901760, %v6485_v5 }
 0x4e2   :  { %v5837_v53 = vadd.f32 1e-05, %v5836_v45  ;;  %v13438_v45 = vsub.f32 %v6487_v25, %v13421_v24  ;;  %v6465_v25 = vld [vmem:[#allocation4] sm:$0xff] }
 0x4e4   :  { %9343 = vrsqrt.f32 %v5837_v53  ;;  %vm5844_vm8 = vweird.f32 %v5837_v53 }
 0x4ea   :  { %v9344_v28 = vpop.eup %9343 }
 0x4eb   :  { %v5839_v41 = vmul.f32 %v9344_v28, %v5837_v53  ;;  %vm5845_vm7 = vweird.f32 %v9344_v28  ;;  %v6643_v53 = vsub.f32 %v13412_v30, %v6642_v19 }
 0x4ec   :  { %vm5846_vm9 = vmor %vm5844_vm8, %vm5845_vm7 }
 0x4ed   :  { %v5840_v52 = vmul.f32 %v9344_v28, %v5839_v41  ;;  %v6660_v41 = vand.u32 4294901760, %v13438_v45  ;;  %v6644_v27 = vand.u32 4294901760, %v6643_v53 }
 0x4ef   :  { %v5841_v38 = vmul.f32 0.5, %v5840_v52  ;;  %v6477_v52 = vld [vmem:[#allocation4 + $0x60] sm:$0xff] }
 0x4f0   :  { %v13472_v32 = vand.u32 4294901760, %v6477_v52 }
 0x4f1   :  { %v5842_v34 = vsub.f32 1.5, %v5841_v38 }
 0x4f2   :  { %v13492_v29 = vsub.f32 %v6477_v52, %v13472_v32  ;;  %v13542_v52 = vand.u32 4294901760, %v6465_v25 }
 0x4f3   :  { %v5843_v55 = vmul.f32 %v9344_v28, %v5842_v34 }
 0x4f4   :  { %v6690_v59 = vand.u32 4294901760, %v13492_v29 }
 0x4f5   :  { %v5847_v58 = vsel %vm5846_vm9, %v9344_v28, %v5843_v55  ;;  %v6649_v28 = vsub.f32 %v13419_v23, %v6648_v0  ;;  %v13468_v55 = vsub.f32 %v6481_v3, %v13447_v44  ;;  %v13530_v3 = vand.u32 4294901760, %v6467_v1 }
 0x4f6   :  { %v5849_v51 = vrot.slane %v5847_v58, 1 }
 0x4f7   :  { %v6650_v58 = vand.u32 4294901760, %v6649_v28 }
 0x4f8   :  { %v5851_v61 = vmul.f32 %v5849_v51, %v4402_v49 }
 0x4fa   :  { %v5852_v31 = vmul.f32 %v5851_v61, %v5831_v12  ;;  %v13425_v12 = vsub.f32 %v6489_v7, %v13414_v62 }
 0x4fc   :  { %v5854_v36 = vrot.slane %v5852_v31, 7  ;;  %v6654_v17 = vand.u32 4294901760, %v13425_v12  ;;  %v6473_v31 = vld [vmem:[#allocation4 + $0x40] sm:$0xff] }
 0x4fd   :  { %v13494_v47 = vand.u32 4294901760, %v6473_v31 }
 0x4fe   :  { %v5856_v48 = vsub.f32 %v4402_v49, %v5854_v36  ;;  %v6655_v38 = vsub.f32 %v13425_v12, %v6654_v17  ;;  %v6475_v49 = vld [vmem:[#allocation4 + $0x50] sm:$0xff] }
 0x500   :  { %v5857_v9 = vsel %vm434_vm2, %v5851_v61, %v5856_v48  ;;  %v6661_v61 = vsub.f32 %v13438_v45, %v6660_v41  ;;  %v6656_v36 = vand.u32 4294901760, %v6655_v38  ;;  %v13483_v48 = vand.u32 4294901760, %v6475_v49 }
 0x501   :  { %v5859_v8 = vsel %vm70_vm0, %v5857_v9, 0  ;;  %v6678_v9 = vand.u32 4294901760, %v13468_v55 }
 0x502   :  { %v13369_v22 = vand.u32 4294901760, %v5859_v8 }
 0x503   :  { %v6679_v60 = vsub.f32 %v13468_v55, %v6678_v9 }
 0x504   :  { %v13375_v21 = vsub.f32 %v5859_v8, %v13369_v22  ;;  %5909 = vmatmul.f32.vlgmr.msrb.gmra.mxu1 %v13369_v22  ;;  %v6471_v8 = vld [vmem:[#allocation4 + $0x30] sm:$0xff] }
 0x505   :  { %6099 = vmatpush.msrb.mxu1 %v6022_v54  ;;  %v6680_v53 = vand.u32 4294901760, %v6679_v60 }
 0x506   :  { %5933 = vmatmul.f32.vlgmr.msrb.gmra.mxu2 %v13375_v21  ;;  %v13382_v4 = vand.u32 4294901760, %v13375_v21 }
 0x507   :  { %6125 = vmatpush.msrb.mxu2 %v6050_v15  ;;  %v13454_v15 = vsub.f32 %v6485_v5, %v13434_v57 }
 0x508   :  { %5957 = vmatmul.f32.vlgmr.msrb.gmra.mxu3 %v13382_v4  ;;  %v5881_v39 = vsub.f32 %v13375_v21, %v13382_v4 }
 0x509   :  { %6147 = vmatpush.msrb.mxu3 %v6022_v54  ;;  %v6479_v54 = vld [vmem:[#allocation4 + $0x70] sm:$0xff]  ;;  %v6666_v51 = vand.u32 4294901760, %v13454_v15 }
 0x50a   :  { %v13390_v16 = vand.u32 4294901760, %v5881_v39  ;;  %v13463_v34 = vand.u32 4294901760, %v6479_v54 }
 0x50c   :  { %5883 = vmatmul.f32.vlgmr.msrb.gmra.mxu0 %v13390_v16  ;;  %6003 = vmatmul.f32.vlgmr.msra.gmra.mxu1 %v13369_v22 }
 0x50d   :  { %6076 = vmatpush.msrb.mxu0 %v6049_v6  ;;  %6199 = vmatpush.msra.mxu1 %v6198_v40  ;;  %v6638_v6 = vand.u32 4294901760, %v6637_v10  ;;  %v6469_v40 = vld [vmem:[#allocation4 + $0x20] sm:$0xff] }
 0x50e   :  { %6029 = vmatmul.f32.vlgmr.msra.gmra.mxu2 %v13390_v16  ;;  %v13518_v7 = vand.u32 4294901760, %v6469_v40 }
 0x50f   :  { %6222 = vmatpush.msra.mxu2 %v6195_v11  ;;  %v13481_v11 = vsub.f32 %v6479_v54, %v13463_v34  ;;  %v6691_v54 = vsub.f32 %v13492_v29, %v6690_v59 }
 0x510   :  { %6055 = vmatmul.f32.vlgmr.msra.gmra.mxu3 %v13369_v22  ;;  %v13540_v28 = vsub.f32 %v6469_v40, %v13518_v7 }
 0x511   :  { %6245 = vmatpush.msra.mxu3 %v6168_v63 }
 0x514   :  { %5981 = vmatmul.f32.vlgmr.msra.gmra.mxu0 %v13369_v22  ;;  %6103 = vmatmul.f32.vlgmr.msrb.gmra.mxu1 %v13382_v4 }
 0x515   :  { %6169 = vmatpush.msra.mxu0 %v6168_v63  ;;  %6293 = vmatpush.msrb.mxu1 %v6168_v63  ;;  %v6672_v63 = vand.u32 4294901760, %v13458_v42 }
 0x516   :  { %6127 = vmatmul.f32.vlgmr.msrb.gmra.mxu2 %v13369_v22 }
 0x517   :  { %6315 = vmatpush.msrb.mxu2 %v13378_v2  ;;  %v6673_v39 = vsub.f32 %v13458_v42, %v6672_v63 }
 0x518   :  { %6149 = vmatmul.f32.vlgmr.msrb.gmra.mxu3 %v13369_v22 }
 0x519   :  { %6345 = vmatpush.msrb.mxu3 %v6344_v35  ;;  %v13516_v35 = vsub.f32 %v6473_v31, %v13494_v47  ;;  %v6714_v31 = vand.u32 4294901760, %v13540_v28 }
 0x51c   :  { %6079 = vmatmul.f32.vlgmr.msrb.gmra.mxu0 %v13375_v21  ;;  %6201 = vmatmul.f32.vlgmr.msra.gmra.mxu1 %v13369_v22 }
 0x51d   :  { %6271 = vmatpush.msrb.mxu0 %v6196_v33  ;;  %6391 = vmatpush.msra.mxu1 %v13378_v2  ;;  %v6667_v33 = vsub.f32 %v13454_v15, %v6666_v51 }
 0x51e   :  { %6225 = vmatmul.f32.vlgmr.msra.gmra.mxu2 %v13375_v21 }
 0x51f   :  { %6417 = vmatpush.msra.mxu2 %v6342_v13  ;;  %v13505_v13 = vand.u32 4294901760, %v6471_v8  ;;  %v6668_v14 = vand.u32 4294901760, %v6667_v33 }
 0x520   :  { %6249 = vmatmul.f32.vlgmr.msra.gmra.mxu3 %v13382_v4 }
 0x521   :  { %6439 = vmatpush.msra.mxu3 %v13378_v2  ;;  %v6662_v2 = vand.u32 4294901760, %v6661_v61  ;;  %v13528_v10 = vsub.f32 %v6471_v8, %v13505_v13 }
 0x523   :  { %v6708_v38 = vand.u32 4294901760, %v13528_v10 }
 0x524   :  { %6175 = vmatmul.f32.vlgmr.msra.gmra.mxu0 %v13390_v16  ;;  %6295 = vmatmul.f32.vlgmr.msrb.gmra.mxu1 %v13369_v22 }
 0x525   :  { %6368 = vmatpush.msra.mxu0 %v13388_v20  ;;  %6639 = vmatpush.msrb.mxu1 %v6638_v6  ;;  %v6684_v20 = vand.u32 4294901760, %v13481_v11  ;;  %v6702_v6 = vand.u32 4294901760, %v13516_v35  ;;  %v6709_v8 = vsub.f32 %v13528_v10, %v6708_v38 }
 0x526   :  { %6321 = vmatmul.f32.vlgmr.msrb.gmra.mxu2 %v13390_v16  ;;  %v13503_v16 = vsub.f32 %v6475_v49, %v13483_v48  ;;  %v13552_v49 = vsub.f32 %v6467_v1, %v13530_v3 }
 0x527   :  { %6645 = vmatpush.msrb.mxu1 %v6644_v27  ;;  %6737 = vmatpush.msrb.mxu2 %v13409_v26  ;;  %v6685_v5 = vsub.f32 %v13481_v11, %v6684_v20  ;;  %v6703_v61 = vsub.f32 %v13516_v35, %v6702_v6  ;;  %v6710_v60 = vand.u32 4294901760, %v6709_v8 }
 0x528   :  { %6347 = vmatmul.f32.vlgmr.msrb.gmra.mxu3 %v13369_v22  ;;  %v6696_v50 = vand.u32 4294901760, %v13503_v16  ;;  %v6720_v33 = vand.u32 4294901760, %v13552_v49 }
 0x529   :  { %6651 = vmatpush.msrb.mxu1 %v6650_v58  ;;  %6740 = vmatpush.msrb.mxu2 %v13412_v30  ;;  %v6692_v58 = vand.u32 4294901760, %v6691_v54 }
 0x52a   :  { %6790 = vmatpush.msrb.mxu3 %v13400_v18  ;;  %v6697_v27 = vsub.f32 %v13503_v16, %v6696_v50  ;;  %v6721_v1 = vsub.f32 %v13552_v49, %v6720_v33 }
 0x52b   :  { %6657 = vmatpush.msrb.mxu1 %v6656_v36  ;;  %6743 = vmatpush.msrb.mxu2 %v13419_v23  ;;  %v13562_v36 = vsub.f32 %v6465_v25, %v13542_v52 }
 0x52c   :  { %6273 = vmatmul.f32.vlgmr.msrb.gmra.mxu0 %v13369_v22  ;;  %6395 = vmatmul.f32.vlgmr.msra.gmra.mxu1 %v13382_v4  ;;  %v6674_v4 = vand.u32 4294901760, %v6673_v39  ;;  %v6715_v39 = vsub.f32 %v13540_v28, %v6714_v31  ;;  %v6722_v25 = vand.u32 4294901760, %v6721_v1 }
 0x52d   :  { %6792 = vmatpush.msrb.mxu3 %v13402_v56  ;;  %6594 = vmatpush.msrb.mxu0 %v13400_v18  ;;  %v6726_v40 = vand.u32 4294901760, %v13562_v36 }
 0x52e   :  { %6419 = vmatmul.f32.vlgmr.msra.gmra.mxu2 %v13369_v22  ;;  %6663 = vmatpush.msrb.mxu1 %v6662_v2  ;;  %v6704_v2 = vand.u32 4294901760, %v6703_v61 }
 0x52f   :  { %6746 = vmatpush.msrb.mxu2 %v13425_v12  ;;  %6794 = vmatpush.msrb.mxu3 %v13404_v37 }
 0x530   :  { %6441 = vmatmul.f32.vlgmr.msra.gmra.mxu3 %v13369_v22  ;;  %6596 = vmatpush.msrb.mxu0 %v13402_v56  ;;  %v6686_v22 = vand.u32 4294901760, %v6685_v5 }
 0x531   :  { %6669 = vmatpush.msrb.mxu1 %v6668_v14  ;;  %6749 = vmatpush.msrb.mxu2 %v13438_v45  ;;  %v6716_v14 = vand.u32 4294901760, %v6715_v39  ;;  %v6505_v39 = vld [vmem:[#allocation4 + $0x140] sm:$0xff] }
 0x532   :  { %6796 = vmatpush.msrb.mxu3 %v13414_v62  ;;  %6598 = vmatpush.msrb.mxu0 %v13404_v37  ;;  %v13759_v1 = vand.u32 4294901760, %v6505_v39 }
 0x533   :  { %6675 = vmatpush.msrb.mxu1 %v6674_v4  ;;  %6752 = vmatpush.msrb.mxu2 %v13454_v15  ;;  %v6727_v4 = vsub.f32 %v13562_v36, %v6726_v40 }
 0x534   :  { %6371 = vmatmul.f32.vlgmr.msra.gmra.mxu0 %v13375_v21  ;;  %6798 = vmatpush.msrb.mxu3 %v13421_v24  ;;  %v6698_v21 = vand.u32 4294901760, %v6697_v27 }
 0x535   :  { %6600 = vmatpush.msrb.mxu0 %v13414_v62  ;;  %6681 = vmatpush.msrb.mxu1 %v6680_v53  ;;  %v6728_v5 = vand.u32 4294901760, %v6727_v4 }
 0x536   :  { %6755 = vmatpush.msrb.mxu2 %v13458_v42  ;;  %6800 = vmatpush.msrb.mxu3 %v13434_v57 }
 0x537   :  { %6602 = vmatpush.msrb.mxu0 %v13421_v24  ;;  %6687 = vmatpush.msrb.mxu1 %v6686_v22  ;;  %v6509_v22 = vld [vmem:[#allocation4 + $0x160] sm:$0xff] }
 0x538   :  { %6758 = vmatpush.msrb.mxu2 %v13468_v55  ;;  %6802 = vmatpush.msrb.mxu3 %v13440_v46 }
 0x539   :  { %6604 = vmatpush.msrb.mxu0 %v13434_v57  ;;  %6693 = vmatpush.msrb.mxu1 %v6692_v58 }
 0x53a   :  { %6761 = vmatpush.msrb.mxu2 %v13481_v11  ;;  %6804 = vmatpush.msrb.mxu3 %v13447_v44 }
 0x53b   :  { %6606 = vmatpush.msrb.mxu0 %v13440_v46  ;;  %6699 = vmatpush.msrb.mxu1 %v6698_v21 }
 0x53c   :  { %6764 = vmatpush.msrb.mxu2 %v13492_v29  ;;  %6806 = vmatpush.msrb.mxu3 %v13463_v34 }
 0x53d   :  { %6608 = vmatpush.msrb.mxu0 %v13447_v44  ;;  %6705 = vmatpush.msrb.mxu1 %v6704_v2 }
 0x53e   :  { %6767 = vmatpush.msrb.mxu2 %v13503_v16  ;;  %6808 = vmatpush.msrb.mxu3 %v13472_v32 }
 0x53f   :  { %6610 = vmatpush.msrb.mxu0 %v13463_v34  ;;  %6711 = vmatpush.msrb.mxu1 %v6710_v60 }
 0x540   :  { %6770 = vmatpush.msrb.mxu2 %v13516_v35  ;;  %6810 = vmatpush.msrb.mxu3 %v13483_v48 }
 0x541   :  { %6612 = vmatpush.msrb.mxu0 %v13472_v32  ;;  %6717 = vmatpush.msrb.mxu1 %v6716_v14 }
 0x542   :  { %6773 = vmatpush.msrb.mxu2 %v13528_v10  ;;  %6812 = vmatpush.msrb.mxu3 %v13494_v47 }
 0x543   :  { %6614 = vmatpush.msrb.mxu0 %v13483_v48  ;;  %6723 = vmatpush.msrb.mxu1 %v6722_v25  ;;  %v6503_v25 = vld [vmem:[#allocation4 + $0x130] sm:$0xff] }
 0x544   :  { %6776 = vmatpush.msrb.mxu2 %v13540_v28  ;;  %6814 = vmatpush.msrb.mxu3 %v13505_v13 }
 0x545   :  { %6616 = vmatpush.msrb.mxu0 %v13494_v47  ;;  %6729 = vmatpush.msrb.mxu1 %v6728_v5 }
 0x546   :  { %6779 = vmatpush.msrb.mxu2 %v13552_v49  ;;  %6816 = vmatpush.msrb.mxu3 %v13518_v7  ;;  %v13738_v49 = vand.u32 4294901760, %v6509_v22 }
 0x547   :  { %6898 = vmatpush.msra.mxu1 %v13400_v18  ;;  %6618 = vmatpush.msrb.mxu0 %v13505_v13  ;;  %v6527_v18 = vld [vmem:[#allocation4 + $0x1f0] sm:$0xff] }
 0x548   :  { %6782 = vmatpush.msrb.mxu2 %v13562_v36  ;;  %6818 = vmatpush.msrb.mxu3 %v13530_v3 }
 0x549   :  { %6900 = vmatpush.msra.mxu1 %v13402_v56  ;;  %6620 = vmatpush.msrb.mxu0 %v13518_v7  ;;  %v13636_v56 = vand.u32 4294901760, %v6527_v18 }
 0x54a   :  { %6820 = vmatpush.msrb.mxu3 %v13542_v52 }
 0x54b   :  { %6902 = vmatpush.msra.mxu1 %v13404_v37  ;;  %6622 = vmatpush.msrb.mxu0 %v13530_v3  ;;  %v6525_v37 = vld [vmem:[#allocation4 + $0x1e0] sm:$0xff]  ;;  %v13643_v26 = vsub.f32 %v6527_v18, %v13636_v56 }
 0x54c   :  { %6935 = vmatpush.msra.mxu2 %v13636_v56  ;;  %v13645_v30 = vand.u32 4294901760, %v6525_v37 }
 0x54d   :  { %6904 = vmatpush.msra.mxu1 %v13414_v62  ;;  %6624 = vmatpush.msrb.mxu0 %v13542_v52  ;;  %v6523_v62 = vld [vmem:[#allocation4 + $0x1d0] sm:$0xff] }
 0x54e   :  { %6937 = vmatpush.msra.mxu2 %v13645_v30  ;;  %v13652_v23 = vand.u32 4294901760, %v6523_v62 }
 0x54f   :  { %6831 = vmatpush.msra.mxu0 %v6636_v43  ;;  %6906 = vmatpush.msra.mxu1 %v13421_v24  ;;  %v6977_v43 = vand.u32 4294901760, %v13643_v26  ;;  %v13655_v24 = vsub.f32 %v6525_v37, %v13645_v30 }
 0x550   :  { %6939 = vmatpush.msra.mxu2 %v13652_v23  ;;  %v13668_v45 = vsub.f32 %v6523_v62, %v13652_v23  ;;  %v13769_v62 = vand.u32 4294901760, %v6503_v25 }
 0x551   :  { %6835 = vmatpush.msra.mxu0 %v6642_v19  ;;  %6908 = vmatpush.msra.mxu1 %v13434_v57  ;;  %v6521_v19 = vld [vmem:[#allocation4 + $0x1c0] sm:$0xff]  ;;  %v6978_v12 = vsub.f32 %v13643_v26, %v6977_v43 }
 0x552   :  { %v13665_v57 = vand.u32 4294901760, %v6521_v19  ;;  %v6989_v15 = vand.u32 4294901760, %v13668_v45 }
 0x553   :  { %6839 = vmatpush.msra.mxu0 %v6648_v0  ;;  %6910 = vmatpush.msra.mxu1 %v13440_v46  ;;  %v6983_v0 = vand.u32 4294901760, %v13655_v24  ;;  %v6519_v46 = vld [vmem:[#allocation4 + $0x1b0] sm:$0xff] }
 0x554   :  { %6941 = vmatpush.msra.mxu2 %v13665_v57  ;;  %v13683_v42 = vsub.f32 %v6521_v19, %v13665_v57  ;;  %v13772_v19 = vsub.f32 %v6505_v39, %v13759_v1 }
 0x555   :  { %6843 = vmatpush.msra.mxu0 %v6654_v17  ;;  %6912 = vmatpush.msra.mxu1 %v13447_v44  ;;  %v6979_v17 = vand.u32 4294901760, %v6978_v12  ;;  %v6984_v44 = vsub.f32 %v13655_v24, %v6983_v0  ;;  %v6501_v12 = vld [vmem:[#allocation4 + $0x120] sm:$0xff] }
 0x556   :  { %v6995_v11 = vand.u32 4294901760, %v13683_v42 }
 0x557   :  { %6847 = vmatpush.msra.mxu0 %v6660_v41  ;;  %6914 = vmatpush.msra.mxu1 %v13463_v34  ;;  %v13678_v41 = vand.u32 4294901760, %v6519_v46  ;;  %v6517_v34 = vld [vmem:[#allocation4 + $0x1a0] sm:$0xff]  ;;  %v6985_v55 = vand.u32 4294901760, %v6984_v44  ;;  %v13778_v44 = vand.u32 4294901760, %v6501_v12 }
 0x558   :  { %6980 = vmatpush.msra.mxu3 %v6979_v17  ;;  %v6996_v16 = vsub.f32 %v13683_v42, %v6995_v11 }
 0x559   :  { %6851 = vmatpush.msra.mxu0 %v6666_v51  ;;  %6916 = vmatpush.msra.mxu1 %v13472_v32  ;;  %v6990_v51 = vsub.f32 %v13668_v45, %v6989_v15  ;;  %v13690_v32 = vand.u32 4294901760, %v6517_v34 }
 0x55a   :  { %6943 = vmatpush.msra.mxu2 %v13678_v41  ;;  %6986 = vmatpush.msra.mxu3 %v6985_v55  ;;  %v6997_v10 = vand.u32 4294901760, %v6996_v16  ;;  %v15639_v55 = vand.u32 4294901760, %v13772_v19 }
 0x55b   :  { %6855 = vmatpush.msra.mxu0 %v6672_v63  ;;  %6918 = vmatpush.msra.mxu1 %v13483_v48  ;;  %v13693_v63 = vsub.f32 %v6519_v46, %v13678_v41  ;;  %v6515_v48 = vld [vmem:[#allocation4 + $0x190] sm:$0xff] }
 0x55c   :  { %6945 = vmatpush.msra.mxu2 %v13690_v32 }
 0x55d   :  { %6859 = vmatpush.msra.mxu0 %v6678_v9  ;;  %6920 = vmatpush.msra.mxu1 %v13494_v47  ;;  %v6991_v9 = vand.u32 4294901760, %v6990_v51  ;;  %v7001_v29 = vand.u32 4294901760, %v13693_v63  ;;  %v13700_v47 = vand.u32 4294901760, %v6515_v48  ;;  %v6499_v51 = vld [vmem:[#allocation4 + $0x110] sm:$0xff] }
 0x55e   :  { %v13786_v16 = vand.u32 4294901760, %v6499_v51 }
 0x55f   :  { %6863 = vmatpush.msra.mxu0 %v6684_v20  ;;  %6922 = vmatpush.msra.mxu1 %v13505_v13  ;;  %v13703_v20 = vsub.f32 %v6517_v34, %v13690_v32  ;;  %v6513_v13 = vld [vmem:[#allocation4 + $0x180] sm:$0xff]  ;;  %v13781_v34 = vsub.f32 %v6503_v25, %v13769_v62 }
 0x560   :  { %6992 = vmatpush.msra.mxu3 %v6991_v9  ;;  %6947 = vmatpush.msra.mxu2 %v13700_v47 }
 0x561   :  { %6867 = vmatpush.msra.mxu0 %v6690_v59  ;;  %6924 = vmatpush.msra.mxu1 %v13518_v7  ;;  %v7002_v59 = vsub.f32 %v13693_v63, %v7001_v29  ;;  %v7007_v35 = vand.u32 4294901760, %v13703_v20  ;;  %v13715_v7 = vand.u32 4294901760, %v6513_v13  ;;  %v15637_v9 = vand.u32 4294901760, %v13781_v34 }
 0x562   :  { %6998 = vmatpush.msra.mxu3 %v6997_v10  ;;  %v6497_v10 = vld [vmem:[#allocation4 + $0x100] sm:$0xff] }
 0x563   :  { %6871 = vmatpush.msra.mxu0 %v6696_v50  ;;  %6926 = vmatpush.msra.mxu1 %v13530_v3  ;;  %v13718_v50 = vsub.f32 %v6515_v48, %v13700_v47  ;;  %v6511_v3 = vld [vmem:[#allocation4 + $0x170] sm:$0xff]  ;;  %v7003_v53 = vand.u32 4294901760, %v7002_v59  ;;  %v7008_v54 = vsub.f32 %v13703_v20, %v7007_v35  ;;  %v7044_v59 = vsub.f32 %v13772_v19, %v15639_v55 }
 0x564   :  { %6949 = vmatpush.msra.mxu2 %v13715_v7  ;;  %v13727_v28 = vand.u32 4294901760, %v6511_v3 }
 0x565   :  { %6875 = vmatpush.msra.mxu0 %v6702_v6  ;;  %6928 = vmatpush.msra.mxu1 %v13542_v52  ;;  %v7013_v6 = vand.u32 4294901760, %v13718_v50  ;;  %v13730_v52 = vsub.f32 %v6513_v13, %v13715_v7  ;;  %v7009_v27 = vand.u32 4294901760, %v7008_v54  ;;  %v13789_v13 = vsub.f32 %v6501_v12, %v13778_v44 }
 0x566   :  { %6951 = vmatpush.msra.mxu2 %v13727_v28  ;;  %v13741_v58 = vsub.f32 %v6511_v3, %v13727_v28  ;;  %7004 = vmatpush.msra.mxu3 %v7003_v53  ;;  %v7050_v3 = vsub.f32 %v13781_v34, %v15637_v9  ;;  %v13799_v54 = vand.u32 4294901760, %v6497_v10  ;;  %v15980_v9 = vld [vmem:[#allocation8_spill] sm:$0xff] }
 0x567   :  { %6879 = vmatpush.msra.mxu0 %v6708_v38  ;;  %v7014_v38 = vsub.f32 %v13718_v50, %v7013_v6  ;;  %v7019_v61 = vand.u32 4294901760, %v13730_v52  ;;  %v15636_v53 = vand.u32 4294901760, %v13789_v13 }
 0x568   :  { %6953 = vmatpush.msra.mxu2 %v13738_v49  ;;  %v7025_v36 = vand.u32 4294901760, %v13741_v58  ;;  %7010 = vmatpush.msra.mxu3 %v7009_v27  ;;  %v7045_v27 = vand.u32 4294901760, %v7044_v59 }
 0x569   :  { %6883 = vmatpush.msra.mxu0 %v6714_v31  ;;  %v6507_v31 = vld [vmem:[#allocation4 + $0x150] sm:$0xff]  ;;  %v7015_v21 = vand.u32 4294901760, %v7014_v38  ;;  %v7020_v2 = vsub.f32 %v13730_v52, %v7019_v61  ;;  %v7051_v38 = vand.u32 4294901760, %v7050_v3 }
 0x56a   :  { %v13746_v8 = vand.u32 4294901760, %v6507_v31 }
 0x56b   :  { %6887 = vmatpush.msra.mxu0 %v6720_v33  ;;  %v13749_v33 = vsub.f32 %v6509_v22, %v13738_v49  ;;  %7016 = vmatpush.msra.mxu3 %v7015_v21  ;;  %v7021_v4 = vand.u32 4294901760, %v7020_v2  ;;  %v13802_v22 = vsub.f32 %v6499_v51, %v13786_v16  ;;  %v13810_v2 = vsub.f32 %v6497_v10, %v13799_v54 }
 0x56c   :  { %6955 = vmatpush.msra.mxu2 %v13746_v8  ;;  %v13762_v14 = vsub.f32 %v6507_v31, %v13746_v8  ;;  %v7056_v31 = vsub.f32 %v13789_v13, %v15636_v53 }
 0x56d   :  { %6891 = vmatpush.msra.mxu0 %v6726_v40  ;;  %v7026_v40 = vsub.f32 %v13741_v58, %v7025_v36  ;;  %v15641_v60 = vand.u32 4294901760, %v13749_v33  ;;  %7022 = vmatpush.msra.mxu3 %v7021_v4  ;;  %v15635_v21 = vand.u32 4294901760, %v13802_v22  ;;  %v15638_v4 = vand.u32 4294901760, %v13810_v2 }
 0x56e   :  { %6957 = vmatpush.msra.mxu2 %v13759_v1  ;;  %v15640_v37 = vand.u32 4294901760, %v13762_v14  ;;  %v7057_v39 = vand.u32 4294901760, %v7056_v31 }
 0x56f   :  { %v7027_v5 = vand.u32 4294901760, %v7026_v40  ;;  %v7032_v18 = vsub.f32 %v13749_v33, %v15641_v60  ;;  %v7062_v40 = vsub.f32 %v13802_v22, %v15635_v21 }
 0x570   :  { %v7038_v17 = vsub.f32 %v13762_v14, %v15640_v37  ;;  %6959 = vmatpush.msra.mxu2 %v13769_v62 }
 0x571   :  { %v7033_v46 = vand.u32 4294901760, %v7032_v18  ;;  %7028 = vmatpush.msra.mxu3 %v7027_v5  ;;  %v7063_v25 = vand.u32 4294901760, %v7062_v40  ;;  %v7068_v5 = vsub.f32 %v13810_v2, %v15638_v4 }
 0x572   :  { %v7039_v48 = vand.u32 4294901760, %v7038_v17  ;;  %6961 = vmatpush.msra.mxu2 %v13778_v44 }
 0x573   :  { %7034 = vmatpush.msra.mxu3 %v7033_v46  ;;  %v7069_v18 = vand.u32 4294901760, %v7068_v5 }
 0x574   :  { %6963 = vmatpush.msra.mxu2 %v13786_v16 }
 0x575   :  { %7040 = vmatpush.msra.mxu3 %v7039_v48 }
 0x576   :  { %6965 = vmatpush.msra.mxu2 %v13799_v54 }
 0x577   :  { %7046 = vmatpush.msra.mxu3 %v7045_v27 }
 0x579   :  { %7052 = vmatpush.msra.mxu3 %v7051_v38 }
 0x57b   :  { %7058 = vmatpush.msra.mxu3 %v7057_v39 }
 0x57d   :  { %7064 = vmatpush.msra.mxu3 %v7063_v25 }
 0x57f   :  { %7070 = vmatpush.msra.mxu3 %v7069_v18 }
 0x581   :  { %v5910_v12 = vpop.f32.mrf.mxu1 }
 0x589   :  { %v5884_v46 = vpop.f32.mrf.mxu0  ;;  %v5934_v17 = vpop.f32.mrf.mxu2 }
 0x58a   :  { %v5911_v51 = vadd.f32 %v5910_v12, %v5884_v46  ;;  %v6004_v3 = vpop.f32.mrf.mxu1 }
 0x58b   :  { %v5958_v48 = vpop.f32.mrf.mxu3 }
 0x58c   :  { %v5935_v59 = vadd.f32 %v5934_v17, %v5911_v51 }
 0x58e   :  { %v5959_v10 = vadd.f32 %v5958_v48, %v5935_v59 }
 0x591   :  { %v5982_v27 = vpop.f32.mrf.mxu0  ;;  %v6030_v38 = vpop.f32.mrf.mxu2 }
 0x592   :  { %v5983_v31 = vadd.f32 %v5982_v27, %v5959_v10  ;;  %v6104_v37 = vpop.f32.mrf.mxu1 }
 0x593   :  { %v6056_v21 = vpop.f32.mrf.mxu3 }
 0x594   :  { %v6005_v40 = vadd.f32 %v6004_v3, %v5983_v31  ;;  %v6057_v5 = vadd.f32 %v6056_v21, %v6030_v38  ;;  %v15991_v38 = vand.u32 4294901760, %v13762_v14 }
 0x596   :  { %v6445_v53 = vperm.slane %v6005_v40, 0  ;;  %v6453_v39 = vperm.slane %v6005_v40, 1 }
 0x598   :  { %v6449_v4 = vmul.f32 %v6445_v53, %v15980_v9 }
 0x599   :  { %v6080_v25 = vpop.f32.mrf.mxu0  ;;  %v6128_v46 = vpop.f32.mrf.mxu2 }
 0x59a   :  { %v6457_v18 = vadd.f32 %v6453_v39, %v6449_v4  ;;  %v6081_v55 = vadd.f32 %v6080_v25, %v6057_v5  ;;  %v6202_v27 = vpop.f32.mrf.mxu1  ;;  %v15992_v5 = vand.u32 4294901760, %v13772_v19 }
 0x59b   :  { %v6150_v48 = vpop.f32.mrf.mxu3 }
 0x59c   :  { %v6461_v60 = vmax.f32 %v6457_v18, 0.0  ;;  %v6105_v12 = vadd.f32 %v6104_v37, %v6081_v55  ;;  %v15984_v37 = vld [vmem:[#allocation9_spill] sm:$0xff] }
 0x59e   :  { %v13820_v17 = vand.u32 4294901760, %v6461_v60  ;;  %v6129_v51 = vadd.f32 %v6128_v46, %v6105_v12 }
 0x5a0   :  { %15981 = vst [vmem:[#allocation14_spill] sm:$0xff] %v13820_v17  ;;  %v13823_v59 = vsub.f32 %v6461_v60, %v13820_v17  ;;  %v6151_v10 = vadd.f32 %v6150_v48, %v6129_v51  ;;  %6731 = vmatmul.f32.vlgmr.msrb.gmra.mxu1 %v13820_v17  ;;  %v15993_v51 = vand.u32 4294901760, %v13781_v34 }
 0x5a1   :  { %7131 = vmatpush.msrb.mxu1 %v13636_v56  ;;  %v6226_v12 = vpop.f32.mrf.mxu2 }
 0x5a2   :  { %15982 = vst [vmem:[#allocation13_spill] sm:$0xff] %v13823_v59  ;;  %v6446_v9 = vperm.slane %v6151_v10, 0  ;;  %6785 = vmatmul.f32.vlgmr.msrb.gmra.mxu2 %v13823_v59  ;;  %v13829_v53 = vand.u32 4294901760, %v13823_v59  ;;  %v6454_v60 = vperm.slane %v6151_v10, 1 }
 0x5a3   :  { %7133 = vmatpush.msrb.mxu1 %v13645_v30  ;;  %7172 = vmatpush.msrb.mxu2 %v6977_v43 }
 0x5a4   :  { %15983 = vst [vmem:[#allocation10_spill] sm:$0xff] %v13829_v53  ;;  %v6450_v55 = vmul.f32 %v6446_v9, %v15984_v37  ;;  %6824 = vmatmul.f32.vlgmr.msrb.gmra.mxu3 %v13829_v53  ;;  %v6628_v21 = vsub.f32 %v13823_v59, %v13829_v53  ;;  %v6543_v9 = vld [vmem:[#allocation4 + $0x270] sm:$0xff]  ;;  %v15994_v37 = vand.u32 4294901760, %v13789_v13 }
 0x5a5   :  { %7135 = vmatpush.msrb.mxu1 %v13652_v23  ;;  %7176 = vmatpush.msrb.mxu2 %v6983_v0  ;;  %v6571_v59 = vld [vmem:[#allocation4 + $0x350] sm:$0xff] }
 0x5a6   :  { %v6458_v4 = vadd.f32 %v6454_v60, %v6450_v55  ;;  %7239 = vmatpush.msrb.mxu3 %v13636_v56  ;;  %v13842_v3 = vand.u32 4294901760, %v6628_v21 }
 0x5a7   :  { %7137 = vmatpush.msrb.mxu1 %v13665_v57  ;;  %7180 = vmatpush.msrb.mxu2 %v6989_v15 }
 0x5a8   :  { %15985 = vst [vmem:[#allocation15_spill] sm:$0xff] %v13842_v3  ;;  %v6462_v43 = vmax.f32 %v6458_v4, 0.0  ;;  %7241 = vmatpush.msrb.mxu3 %v13645_v30  ;;  %6630 = vmatmul.f32.vlgmr.msrb.gmra.mxu0 %v13842_v3  ;;  %v6250_v4 = vpop.f32.mrf.mxu3 }
 0x5a9   :  { %6930 = vmatmul.f32.vlgmr.msra.gmra.mxu1 %v13820_v17  ;;  %7078 = vmatpush.msrb.mxu0 %v13643_v26  ;;  %v6559_v26 = vld [vmem:[#allocation4 + $0x2f0] sm:$0xff] }
 0x5aa   :  { %v13851_v0 = vand.u32 4294901760, %v6462_v43  ;;  %7139 = vmatpush.msrb.mxu1 %v13678_v41  ;;  %7184 = vmatpush.msrb.mxu2 %v6995_v11 }
 0x5ab   :  { %7243 = vmatpush.msrb.mxu3 %v13652_v23  ;;  %7081 = vmatpush.msrb.mxu0 %v13655_v24  ;;  %v6557_v23 = vld [vmem:[#allocation4 + $0x2e0] sm:$0xff] }
 0x5ac   :  { %15986 = vst [vmem:[#allocation16_spill] sm:$0xff] %v13851_v0  ;;  %v13859_v56 = vsub.f32 %v6462_v43, %v13851_v0  ;;  %7141 = vmatpush.msrb.mxu1 %v13690_v32  ;;  %7188 = vmatpush.msrb.mxu2 %v7001_v29  ;;  %v6551_v29 = vld [vmem:[#allocation4 + $0x2b0] sm:$0xff] }
 0x5ad   :  { %7245 = vmatpush.msrb.mxu3 %v13665_v57  ;;  %7084 = vmatpush.msrb.mxu0 %v13668_v45  ;;  %v13878_v57 = vand.u32 4294901760, %v6559_v26  ;;  %v6555_v45 = vld [vmem:[#allocation4 + $0x2d0] sm:$0xff] }
 0x5ae   :  { %15987 = vst [vmem:[#allocation12_spill] sm:$0xff] %v13859_v56  ;;  %v13867_v30 = vand.u32 4294901760, %v13859_v56  ;;  %7072 = vmatmul.f32.vlgmr.msra.gmra.mxu3 %v13851_v0  ;;  %7143 = vmatpush.msrb.mxu1 %v13700_v47  ;;  %v13897_v11 = vand.u32 4294901760, %v6555_v45 }
 0x5af   :  { %7192 = vmatpush.msrb.mxu2 %v7007_v35  ;;  %7247 = vmatpush.msrb.mxu3 %v13678_v41  ;;  %v13887_v41 = vand.u32 4294901760, %v6557_v23  ;;  %v6176_v35 = vpop.f32.mrf.mxu0 }
 0x5b0   :  { %15988 = vst [vmem:[#allocation8_spill] sm:$0xff] %v13867_v30  ;;  %7087 = vmatpush.msrb.mxu0 %v13683_v42  ;;  %7145 = vmatpush.msrb.mxu1 %v13715_v7  ;;  %v6969_v24 = vsub.f32 %v13859_v56, %v13867_v30  ;;  %v6553_v42 = vld [vmem:[#allocation4 + $0x2c0] sm:$0xff]  ;;  %v6203_v31 = vadd.f32 %v6202_v27, %v6176_v35 }
 0x5b1   :  { %7196 = vmatpush.msrb.mxu2 %v7013_v6  ;;  %7249 = vmatpush.msrb.mxu3 %v13690_v32  ;;  %v13895_v32 = vsub.f32 %v6559_v26, %v13878_v57  ;;  %v13973_v26 = vand.u32 4294901760, %v6543_v9 }
 0x5b2   :  { %6893 = vmatmul.f32.vlgmr.msra.gmra.mxu0 %v13820_v17  ;;  %7147 = vmatpush.msrb.mxu1 %v13727_v28  ;;  %v13885_v15 = vand.u32 4294901760, %v6969_v24  ;;  %v6227_v46 = vadd.f32 %v6226_v12, %v6203_v31  ;;  %v6537_v31 = vld [vmem:[#allocation4 + $0x240] sm:$0xff]  ;;  %v6296_v12 = vpop.f32.mrf.mxu1 }
 0x5b3   :  { %7090 = vmatpush.msrb.mxu0 %v13693_v63  ;;  %7200 = vmatpush.msrb.mxu2 %v7019_v61  ;;  %v13905_v63 = vsub.f32 %v6557_v23, %v13887_v41  ;;  %v15657_v6 = vand.u32 4294901760, %v13895_v32  ;;  %v13918_v61 = vand.u32 4294901760, %v6551_v29  ;;  %v15995_v23 = vand.u32 4294901760, %v13802_v22 }
 0x5b4   :  { %15989 = vst [vmem:[#allocation9_spill] sm:$0xff] %v13885_v15  ;;  %7251 = vmatpush.msrb.mxu3 %v13700_v47  ;;  %7149 = vmatpush.msrb.mxu1 %v13738_v49  ;;  %v13907_v47 = vand.u32 4294901760, %v6553_v42 }
 0x5b5   :  { %7093 = vmatpush.msrb.mxu0 %v13703_v20  ;;  %7204 = vmatpush.msrb.mxu2 %v7025_v36  ;;  %v15990_v20 = vand.u32 4294901760, %v13749_v33  ;;  %v6549_v36 = vld [vmem:[#allocation4 + $0x2a0] sm:$0xff]  ;;  %v13941_v18 = vsub.f32 %v6551_v29, %v13918_v61  ;;  %v6539_v29 = vld [vmem:[#allocation4 + $0x250] sm:$0xff] }
 0x5b6   :  { %7253 = vmatpush.msrb.mxu3 %v13715_v7  ;;  %6971 = vmatmul.f32.vlgmr.msra.gmra.mxu2 %v13885_v15  ;;  %v13916_v7 = vsub.f32 %v6555_v45, %v13897_v11  ;;  %v13927_v40 = vsub.f32 %v6553_v42, %v13907_v47  ;;  %v13931_v39 = vand.u32 4294901760, %v6549_v36 }
 0x5b7   :  { %7096 = vmatpush.msrb.mxu0 %v13718_v50  ;;  %7151 = vmatpush.msrb.mxu1 %v13746_v8  ;;  %v6547_v50 = vld [vmem:[#allocation4 + $0x290] sm:$0xff]  ;;  %v15652_v60 = vand.u32 4294901760, %v13941_v18  ;;  %v6274_v43 = vpop.f32.mrf.mxu0 }
 0x5b8   :  { %7208 = vmatpush.msrb.mxu2 %v15990_v20  ;;  %7255 = vmatpush.msrb.mxu3 %v13727_v28  ;;  %v15656_v28 = vand.u32 4294901760, %v13905_v63  ;;  %v15655_v25 = vand.u32 4294901760, %v13916_v7  ;;  %v15654_v48 = vand.u32 4294901760, %v13927_v40 }
 0x5b9   :  { %7099 = vmatpush.msrb.mxu0 %v13730_v52  ;;  %7153 = vmatpush.msrb.mxu1 %v13759_v1  ;;  %v6545_v52 = vld [vmem:[#allocation4 + $0x280] sm:$0xff]  ;;  %v7343_v27 = vsub.f32 %v13941_v18, %v15652_v60  ;;  %v6583_v60 = vld [vmem:[#allocation4 + $0x3b0] sm:$0xff] }
 0x5ba   :  { %7212 = vmatpush.msrb.mxu2 %v15991_v38  ;;  %7257 = vmatpush.msrb.mxu3 %v13738_v49  ;;  %v7319_v49 = vsub.f32 %v13895_v32, %v15657_v6  ;;  %v13954_v10 = vand.u32 4294901760, %v6545_v52  ;;  %v7331_v55 = vsub.f32 %v13916_v7, %v15655_v25  ;;  %v7337_v45 = vsub.f32 %v13927_v40, %v15654_v48 }
 0x5bb   :  { %7102 = vmatpush.msrb.mxu0 %v13741_v58  ;;  %7155 = vmatpush.msrb.mxu1 %v13769_v62  ;;  %v13943_v58 = vand.u32 4294901760, %v6547_v50  ;;  %v14000_v38 = vand.u32 4294901760, %v6539_v29 }
 0x5bc   :  { %7216 = vmatpush.msrb.mxu2 %v15992_v5  ;;  %7259 = vmatpush.msrb.mxu3 %v13746_v8  ;;  %v7325_v8 = vsub.f32 %v13905_v63, %v15656_v28  ;;  %v13982_v42 = vsub.f32 %v6545_v52, %v13954_v10  ;;  %v7338_v52 = vand.u32 4294901760, %v7337_v45  ;;  %v14136_v28 = vand.u32 4294901760, %v6583_v60 }
 0x5bd   :  { %7105 = vmatpush.msrb.mxu0 %v13749_v33  ;;  %7157 = vmatpush.msrb.mxu1 %v13778_v44  ;;  %v13959_v33 = vsub.f32 %v6549_v36, %v13931_v39  ;;  %v13969_v21 = vsub.f32 %v6547_v50, %v13943_v58  ;;  %v7332_v36 = vand.u32 4294901760, %v7331_v55 }
 0x5be   :  { %7220 = vmatpush.msrb.mxu2 %v15993_v51  ;;  %7261 = vmatpush.msrb.mxu3 %v13759_v1  ;;  %v7320_v1 = vand.u32 4294901760, %v7319_v49  ;;  %v7326_v24 = vand.u32 4294901760, %v7325_v8  ;;  %v15645_v5 = vand.u32 4294901760, %v13982_v42  ;;  %v6535_v49 = vld [vmem:[#allocation4 + $0x230] sm:$0xff]  ;;  %v14012_v51 = vand.u32 4294901760, %v6537_v31 }
 0x5bf   :  { %7108 = vmatpush.msrb.mxu0 %v13762_v14  ;;  %7159 = vmatpush.msrb.mxu1 %v13786_v16  ;;  %v6541_v14 = vld [vmem:[#allocation4 + $0x260] sm:$0xff]  ;;  %v15646_v50 = vand.u32 4294901760, %v13969_v21  ;;  %v14026_v55 = vand.u32 4294901760, %v6535_v49 }
 0x5c0   :  { %7224 = vmatpush.msrb.mxu2 %v15994_v37  ;;  %7263 = vmatpush.msrb.mxu3 %v13769_v62  ;;  %v6251_v62 = vadd.f32 %v6250_v4, %v6227_v46  ;;  %v13987_v35 = vand.u32 4294901760, %v6541_v14  ;;  %v6531_v4 = vld [vmem:[#allocation4 + $0x210] sm:$0xff] }
 0x5c1   :  { %7111 = vmatpush.msrb.mxu0 %v13772_v19  ;;  %7161 = vmatpush.msrb.mxu1 %v13799_v54  ;;  %v15648_v19 = vand.u32 4294901760, %v13959_v33 }
 0x5c2   :  { %7228 = vmatpush.msrb.mxu2 %v15995_v23  ;;  %7265 = vmatpush.msrb.mxu3 %v13778_v44  ;;  %v6275_v20 = vadd.f32 %v6274_v43, %v6251_v62  ;;  %v15996_v44 = vand.u32 4294901760, %v13810_v2  ;;  %v14010_v46 = vsub.f32 %v6541_v14, %v13987_v35  ;;  %v7361_v14 = vsub.f32 %v13982_v42, %v15645_v5  ;;  %v6591_v5 = vld [vmem:[#allocation4 + $0x3f0] sm:$0xff] }
 0x5c3   :  { %7165 = vmatmul.f32.vlgmr.msrb.gmra.mxu1 %v13867_v30  ;;  %7114 = vmatpush.msrb.mxu0 %v13781_v34  ;;  %v13998_v34 = vsub.f32 %v6543_v9, %v13973_v26  ;;  %v7344_v9 = vand.u32 4294901760, %v7343_v27  ;;  %v14036_v23 = vsub.f32 %v6537_v31, %v14012_v51  ;;  %v14051_v27 = vand.u32 4294901760, %v6531_v4 }
 0x5c4   :  { %7321 = vmatpush.msra.mxu1 %v7320_v1  ;;  %7232 = vmatpush.msrb.mxu2 %v15996_v44  ;;  %v14014_v8 = vadd.f32 %v6296_v12, %v6275_v20  ;;  %v14024_v1 = vsub.f32 %v6539_v29, %v14000_v38  ;;  %v15642_v62 = vand.u32 4294901760, %v14010_v46  ;;  %v6529_v29 = vld [vmem:[#allocation4 + $0x200] sm:$0xff] }
 0x5c5   :  { %7267 = vmatpush.msrb.mxu3 %v13786_v16  ;;  %7234 = vmatmul.f32.vlgmr.msrb.gmra.mxu2 %v13851_v0  ;;  %v7349_v16 = vsub.f32 %v13959_v33, %v15648_v19  ;;  %v15644_v37 = vand.u32 4294901760, %v13998_v34 }
 0x5c6   :  { %7327 = vmatpush.msra.mxu1 %v7326_v24  ;;  %7419 = vmatpush.msra.mxu2 %v13895_v32  ;;  %v15643_v44 = vand.u32 4294901760, %v14024_v1  ;;  %v7373_v31 = vsub.f32 %v14010_v46, %v15642_v62  ;;  %v14074_v62 = vsub.f32 %v6531_v4, %v14051_v27 }
 0x5c7   :  { %7117 = vmatpush.msrb.mxu0 %v13789_v13  ;;  %7269 = vmatpush.msrb.mxu3 %v13799_v54  ;;  %v7355_v13 = vsub.f32 %v13969_v21, %v15646_v50  ;;  %v6533_v54 = vld [vmem:[#allocation4 + $0x220] sm:$0xff]  ;;  %v7350_v43 = vand.u32 4294901760, %v7349_v16  ;;  %v7367_v20 = vsub.f32 %v13998_v34, %v15644_v37  ;;  %v15997_v16 = vld [vmem:[#allocation11_spill] sm:$0xff] }
 0x5c8   :  { %7271 = vmatmul.f32.vlgmr.msrb.gmra.mxu3 %v13851_v0  ;;  %7333 = vmatpush.msra.mxu1 %v7332_v36  ;;  %v14038_v24 = vand.u32 4294901760, %v6533_v54  ;;  %v14049_v36 = vsub.f32 %v6535_v49, %v14026_v55  ;;  %v14063_v49 = vand.u32 4294901760, %v6529_v29 }
 0x5c9   :  { %7422 = vmatpush.msra.mxu2 %v13905_v63  ;;  %7472 = vmatpush.msra.mxu3 %v13878_v57  ;;  %v7356_v45 = vand.u32 4294901760, %v7355_v13  ;;  %v6348_v13 = vpop.f32.mrf.mxu3 }
 0x5ca   :  { %7120 = vmatpush.msrb.mxu0 %v13802_v22  ;;  %7339 = vmatpush.msra.mxu1 %v7338_v52  ;;  %v6447_v22 = vperm.slane %v14014_v8, 0  ;;  %v15647_v52 = vand.u32 4294901760, %v14036_v23  ;;  %v14061_v12 = vsub.f32 %v6533_v54, %v14038_v24  ;;  %v15651_v54 = vand.u32 4294901760, %v14049_v36 }
 0x5cb   :  { %7425 = vmatpush.msra.mxu2 %v13916_v7  ;;  %7474 = vmatpush.msra.mxu3 %v13887_v41  ;;  %v14085_v4 = vsub.f32 %v6529_v29, %v14063_v49  ;;  %v6589_v29 = vld [vmem:[#allocation4 + $0x3e0] sm:$0xff] }
 0x5cc   :  { %7123 = vmatpush.msrb.mxu0 %v13810_v2  ;;  %7345 = vmatpush.msra.mxu1 %v7344_v9  ;;  %v7362_v2 = vand.u32 4294901760, %v7361_v14  ;;  %v6451_v9 = vmul.f32 %v6447_v22, %v15997_v16  ;;  %v7368_v14 = vand.u32 4294901760, %v7367_v20  ;;  %v6455_v22 = vperm.slane %v14014_v8, 1  ;;  %v6322_v16 = vpop.f32.mrf.mxu2 }
 0x5cd   :  { %7126 = vmatmul.f32.vlgmr.msrb.gmra.mxu0 %v13859_v56  ;;  %7428 = vmatpush.msra.mxu2 %v13927_v40  ;;  %v7374_v20 = vand.u32 4294901760, %v7373_v31  ;;  %v15649_v37 = vand.u32 4294901760, %v14061_v12  ;;  %15998 = vst [vmem:[#allocation11_spill] sm:$0xff] %v14085_v4  ;;  %v6349_v8 = vadd.f32 %v6348_v13, %v6322_v16  ;;  %v7391_v31 = vsub.f32 %v14049_v36, %v15651_v54 }
 0x5ce   :  { %7276 = vmatpush.msra.mxu0 %v13878_v57  ;;  %7476 = vmatpush.msra.mxu3 %v13897_v11  ;;  %v6459_v50 = vadd.f32 %v6455_v22, %v6451_v9 }
 0x5cf   :  { %7351 = vmatpush.msra.mxu1 %v7350_v43  ;;  %7431 = vmatpush.msra.mxu2 %v13941_v18  ;;  %v7379_v43 = vsub.f32 %v14024_v1, %v15643_v44  ;;  %v7385_v44 = vsub.f32 %v14036_v23, %v15647_v52  ;;  %v15650_v52 = vand.u32 4294901760, %v14074_v62  ;;  %v7397_v13 = vsub.f32 %v14061_v12, %v15649_v37 }
 0x5d0   :  { %7278 = vmatpush.msra.mxu0 %v13887_v41  ;;  %7478 = vmatpush.msra.mxu3 %v13907_v47  ;;  %v6463_v22 = vmax.f32 %v6459_v50, 0.0  ;;  %v7392_v16 = vand.u32 4294901760, %v7391_v31 }
 0x5d1   :  { %7357 = vmatpush.msra.mxu1 %v7356_v45  ;;  %7434 = vmatpush.msra.mxu2 %v13959_v33  ;;  %v6372_v45 = vpop.f32.mrf.mxu0  ;;  %v7386_v9 = vand.u32 4294901760, %v7385_v44  ;;  %v7403_v44 = vsub.f32 %v14074_v62, %v15650_v52  ;;  %v7398_v50 = vand.u32 4294901760, %v7397_v13  ;;  %v6585_v52 = vld [vmem:[#allocation4 + $0x3c0] sm:$0xff] }
 0x5d2   :  { %7280 = vmatpush.msra.mxu0 %v13897_v11  ;;  %7480 = vmatpush.msra.mxu3 %v13918_v61  ;;  %v6373_v19 = vadd.f32 %v6372_v45, %v6349_v8  ;;  %v14109_v45 = vand.u32 4294901760, %v6589_v29  ;;  %v6396_v8 = vpop.f32.mrf.mxu1 }
 0x5d3   :  { %7363 = vmatpush.msra.mxu1 %v7362_v2  ;;  %7437 = vmatpush.msra.mxu2 %v13969_v21  ;;  %v7380_v2 = vand.u32 4294901760, %v7379_v43  ;;  %v14101_v43 = vand.u32 4294901760, %v6591_v5 }
 0x5d4   :  { %7282 = vmatpush.msra.mxu0 %v13907_v47  ;;  %7482 = vmatpush.msra.mxu3 %v13931_v39  ;;  %v6397_v37 = vadd.f32 %v6396_v8, %v6373_v19  ;;  %v14124_v19 = vand.u32 4294901760, %v6463_v22  ;;  %v14128_v13 = vsub.f32 %v6589_v29, %v14109_v45  ;;  %v6420_v8 = vpop.f32.mrf.mxu2 }
 0x5d5   :  { %7369 = vmatpush.msra.mxu1 %v7368_v14  ;;  %7440 = vmatpush.msra.mxu2 %v13982_v42  ;;  %v15653_v14 = vand.u32 4294901760, %v14085_v4  ;;  %v14118_v31 = vsub.f32 %v6591_v5, %v14101_v43  ;;  %v14132_v5 = vand.u32 4294901760, %v6585_v52 }
 0x5d6   :  { %7284 = vmatpush.msra.mxu0 %v13918_v61  ;;  %7484 = vmatpush.msra.mxu3 %v13943_v58  ;;  %15999 = vst [vmem:[#allocation18_spill] sm:$0xff] %v14124_v19  ;;  %v6421_v48 = vadd.f32 %v6420_v8, %v6397_v37  ;;  %v6442_v8 = vpop.f32.mrf.mxu3  ;;  %v6577_v37 = vld [vmem:[#allocation4 + $0x380] sm:$0xff] }
 0x5d7   :  { %7375 = vmatpush.msra.mxu1 %v7374_v20  ;;  %7443 = vmatpush.msra.mxu2 %v13998_v34  ;;  %v6587_v20 = vld [vmem:[#allocation4 + $0x3d0] sm:$0xff]  ;;  %v14153_v6 = vsub.f32 %v6585_v52, %v14132_v5  ;;  %v14183_v30 = vand.u32 4294901760, %v6577_v37 }
 0x5d8   :  { %7286 = vmatpush.msra.mxu0 %v13931_v39  ;;  %7486 = vmatpush.msra.mxu3 %v13954_v10  ;;  %v14122_v54 = vand.u32 4294901760, %v6587_v20 }
 0x5d9   :  { %7381 = vmatpush.msra.mxu1 %v7380_v2  ;;  %7446 = vmatpush.msra.mxu2 %v14010_v46  ;;  %v7409_v2 = vsub.f32 %v14085_v4, %v15653_v14  ;;  %v6581_v14 = vld [vmem:[#allocation4 + $0x3a0] sm:$0xff]  ;;  %16002 = vst [vmem:[#allocation21_spill] sm:$0xff] %v14153_v6  ;;  %v14210_v17 = vsub.f32 %v6577_v37, %v14183_v30 }
 0x5da   :  { %7288 = vmatpush.msra.mxu0 %v13943_v58  ;;  %7488 = vmatpush.msra.mxu3 %v13973_v26  ;;  %v14141_v29 = vsub.f32 %v6587_v20, %v14122_v54  ;;  %v14155_v20 = vadd.f32 %v6442_v8, %v6421_v48  ;;  %v16004_v48 = vand.u32 4294901760, %v14128_v13 }
 0x5db   :  { %7387 = vmatpush.msra.mxu1 %v7386_v9  ;;  %7449 = vmatpush.msra.mxu2 %v14024_v1  ;;  %v7404_v9 = vand.u32 4294901760, %v7403_v44  ;;  %v7410_v25 = vand.u32 4294901760, %v7409_v2  ;;  %v14144_v44 = vsub.f32 %v6463_v22, %v14124_v19  ;;  %v6579_v2 = vld [vmem:[#allocation4 + $0x390] sm:$0xff] }
 0x5dc   :  { %7290 = vmatpush.msra.mxu0 %v13954_v10  ;;  %7490 = vmatpush.msra.mxu3 %v13987_v35  ;;  %16000 = vst [vmem:[#allocation19_spill] sm:$0xff] %v14141_v29  ;;  %v14167_v56 = vand.u32 4294901760, %v6579_v2  ;;  %v6448_v0 = vperm.slane %v14155_v20, 0 }
 0x5dd   :  { %7393 = vmatpush.msra.mxu1 %v7392_v16  ;;  %7452 = vmatpush.msra.mxu2 %v14036_v23  ;;  %v15659_v16 = vand.u32 4294901760, %v14118_v31  ;;  %16001 = vst [vmem:[#allocation20_spill] sm:$0xff] %v14144_v44 }
 0x5de   :  { %7292 = vmatpush.msra.mxu0 %v13973_v26  ;;  %7492 = vmatpush.msra.mxu3 %v14000_v38  ;;  %v14195_v3 = vsub.f32 %v6579_v2, %v14167_v56  ;;  %v16007_v2 = vand.u32 4294901760, %v14153_v6 }
 0x5df   :  { %7399 = vmatpush.msra.mxu1 %v7398_v50  ;;  %7455 = vmatpush.msra.mxu2 %v14049_v36  ;;  %v14148_v50 = vand.u32 4294901760, %v6581_v14  ;;  %v7660_v22 = vsub.f32 %v14118_v31, %v15659_v16  ;;  %v6575_v16 = vld [vmem:[#allocation4 + $0x370] sm:$0xff] }
 0x5e0   :  { %7294 = vmatpush.msra.mxu0 %v13987_v35  ;;  %7494 = vmatpush.msra.mxu3 %v14012_v51  ;;  %v14197_v53 = vand.u32 4294901760, %v6575_v16 }
 0x5e1   :  { %7405 = vmatpush.msra.mxu1 %v7404_v9  ;;  %7458 = vmatpush.msra.mxu2 %v14061_v12  ;;  %v14162_v9 = vsub.f32 %v6583_v60, %v14136_v28  ;;  %v7666_v60 = vsub.f32 %v14128_v13, %v16004_v48  ;;  %v14178_v8 = vsub.f32 %v6581_v14, %v14148_v50  ;;  %v7661_v15 = vand.u32 4294901760, %v7660_v22  ;;  %v6573_v14 = vld [vmem:[#allocation4 + $0x360] sm:$0xff] }
 0x5e2   :  { %7296 = vmatpush.msra.mxu0 %v14000_v38  ;;  %7496 = vmatpush.msra.mxu3 %v14026_v55 }
 0x5e3   :  { %7411 = vmatpush.msra.mxu1 %v7410_v25  ;;  %7461 = vmatpush.msra.mxu2 %v14074_v62  ;;  %v14172_v25 = vand.u32 4294901760, %v14144_v44  ;;  %16005 = vst [vmem:[#allocation23_spill] sm:$0xff] %v14178_v8  ;;  %v7667_v22 = vand.u32 4294901760, %v7666_v60  ;;  %v16008_v60 = vld [vmem:[#allocation17_spill] sm:$0xff] }
 0x5e4   :  { %7298 = vmatpush.msra.mxu0 %v14012_v51  ;;  %7498 = vmatpush.msra.mxu3 %v14038_v24 }
 0x5e5   :  { %7413 = vmatmul.f32.vlgmr.msra.gmra.mxu1 %v14124_v19  ;;  %7464 = vmatpush.msra.mxu2 %v14085_v4  ;;  %16003 = vst [vmem:[#allocation22_spill] sm:$0xff] %v14172_v25  ;;  %v7310_v48 = vsub.f32 %v14144_v44, %v14172_v25  ;;  %v14212_v4 = vand.u32 4294901760, %v6573_v14 }
 0x5e6   :  { %7580 = vmatpush.msrb.mxu1 %v13878_v57  ;;  %7300 = vmatpush.msra.mxu0 %v14026_v55  ;;  %v16006_v57 = vand.u32 4294901760, %v14141_v29 }
 0x5e7   :  { %7500 = vmatpush.msra.mxu3 %v14051_v27  ;;  %7467 = vmatmul.f32.vlgmr.msra.gmra.mxu2 %v14144_v44  ;;  %v6569_v44 = vld [vmem:[#allocation4 + $0x340] sm:$0xff]  ;;  %v14238_v37 = vsub.f32 %v6573_v14, %v14212_v4  ;;  %v6563_v14 = vld [vmem:[#allocation4 + $0x310] sm:$0xff] }
 0x5e8   :  { %7582 = vmatpush.msrb.mxu1 %v13887_v41  ;;  %7617 = vmatpush.msrb.mxu2 %v14101_v43  ;;  %v7672_v52 = vsub.f32 %v14141_v29, %v16006_v57  ;;  %v7678_v57 = vsub.f32 %v14153_v6, %v16007_v2  ;;  %v6452_v29 = vmul.f32 %v6448_v0, %v16008_v60  ;;  %v16009_v41 = vand.u32 4294901760, %v14162_v9 }
 0x5e9   :  { %7302 = vmatpush.msra.mxu0 %v14038_v24  ;;  %7502 = vmatpush.msra.mxu3 %v14063_v49  ;;  %v14223_v2 = vsub.f32 %v6575_v16, %v14197_v53  ;;  %v14225_v6 = vand.u32 4294901760, %v6571_v59  ;;  %v6456_v0 = vperm.slane %v14155_v20, 1  ;;  %v14240_v20 = vand.u32 4294901760, %v6569_v44 }
 0x5ea   :  { %7506 = vmatmul.f32.vlgmr.msra.gmra.mxu3 %v14172_v25  ;;  %7584 = vmatpush.msrb.mxu1 %v13897_v11  ;;  %v7684_v25 = vsub.f32 %v14162_v9, %v16009_v41  ;;  %v7673_v11 = vand.u32 4294901760, %v7672_v52  ;;  %v16011_v41 = vand.u32 4294901760, %v14178_v8  ;;  %v7679_v16 = vand.u32 4294901760, %v7678_v57 }
 0x5eb   :  { %7619 = vmatpush.msrb.mxu2 %v14109_v45  ;;  %7662 = vmatpush.msrb.mxu3 %v7661_v15  ;;  %v14229_v15 = vand.u32 4294901760, %v7310_v48  ;;  %v14251_v52 = vsub.f32 %v6571_v59, %v14225_v6  ;;  %v14264_v59 = vsub.f32 %v6569_v44, %v14240_v20 }
 0x5ec   :  { %7304 = vmatpush.msra.mxu0 %v14051_v27  ;;  %7586 = vmatpush.msrb.mxu1 %v13907_v47  ;;  %v7690_v60 = vsub.f32 %v14178_v8, %v16011_v41  ;;  %v6567_v47 = vld [vmem:[#allocation4 + $0x330] sm:$0xff]  ;;  %v7685_v48 = vand.u32 4294901760, %v7684_v25  ;;  %v6565_v41 = vld [vmem:[#allocation4 + $0x320] sm:$0xff]  ;;  %v16012_v8 = vand.u32 4294901760, %v13895_v32  ;;  %v16014_v32 = vand.u32 4294901760, %v13905_v63 }
 0x5ed   :  { %7621 = vmatpush.msrb.mxu2 %v14122_v54  ;;  %7668 = vmatpush.msrb.mxu3 %v7667_v22  ;;  %16010 = vst [vmem:[#allocation17_spill] sm:$0xff] %v14229_v15  ;;  %v6460_v22 = vadd.f32 %v6456_v0, %v6452_v29  ;;  %v14253_v29 = vand.u32 4294901760, %v6567_v47  ;;  %v16016_v63 = vand.u32 4294901760, %v13916_v7  ;;  %v7719_v44 = vand.u32 4294901760, %v14251_v52  ;;  %v6561_v0 = vld [vmem:[#allocation4 + $0x300] sm:$0xff] }
 0x5ee   :  { %7306 = vmatpush.msra.mxu0 %v14063_v49  ;;  %7588 = vmatpush.msrb.mxu1 %v13918_v61  ;;  %v16013_v61 = vand.u32 4294901760, %v14195_v3  ;;  %v7691_v25 = vand.u32 4294901760, %v7690_v60  ;;  %v16018_v7 = vand.u32 4294901760, %v13927_v40  ;;  %v16021_v40 = vand.u32 4294901760, %v13941_v18 }
 0x5ef   :  { %7312 = vmatmul.f32.vlgmr.msra.gmra.mxu0 %v14229_v15  ;;  %7623 = vmatpush.msrb.mxu2 %v14132_v5  ;;  %v6504_v15 = vld [vmem:[#allocation4 + $0x138] sm:$0xff] }
 0x5f0   :  { %7513 = vmatpush.msrb.mxu0 %v16012_v8  ;;  %7674 = vmatpush.msrb.mxu3 %v7673_v11  ;;  %v7696_v57 = vsub.f32 %v14195_v3, %v16013_v61  ;;  %v16015_v8 = vand.u32 4294901760, %v14210_v17  ;;  %v14266_v61 = vand.u32 4294901760, %v6565_v41 }
 0x5f1   :  { %7590 = vmatpush.msrb.mxu1 %v13931_v39  ;;  %7625 = vmatpush.msrb.mxu2 %v14136_v28  ;;  %v6464_v39 = vmax.f32 %v6460_v22, 0.0 }
 0x5f2   :  { %7517 = vmatpush.msrb.mxu0 %v16014_v32  ;;  %7680 = vmatpush.msrb.mxu3 %v7679_v16  ;;  %v7702_v11 = vsub.f32 %v14210_v17, %v16015_v8  ;;  %v7697_v60 = vand.u32 4294901760, %v7696_v57  ;;  %v16017_v16 = vand.u32 4294901760, %v14223_v2  ;;  %v14277_v8 = vsub.f32 %v6567_v47, %v14253_v29 }
 0x5f3   :  { %7592 = vmatpush.msrb.mxu1 %v13943_v58  ;;  %7627 = vmatpush.msrb.mxu2 %v14148_v50  ;;  %v14281_v58 = vand.u32 4294901760, %v6563_v14  ;;  %v14290_v47 = vsub.f32 %v6565_v41, %v14266_v61 }
 0x5f4   :  { %7521 = vmatpush.msrb.mxu0 %v16016_v63  ;;  %7686 = vmatpush.msrb.mxu3 %v7685_v48  ;;  %v7708_v32 = vsub.f32 %v14223_v2, %v16017_v16  ;;  %v7703_v22 = vand.u32 4294901760, %v7702_v11  ;;  %v16019_v48 = vand.u32 4294901760, %v14238_v37  ;;  %v7725_v63 = vand.u32 4294901760, %v14264_v59 }
 0x5f5   :  { %7594 = vmatpush.msrb.mxu1 %v13954_v10  ;;  %7629 = vmatpush.msrb.mxu2 %v14167_v56  ;;  %v14292_v16 = vand.u32 4294901760, %v6464_v39  ;;  %v14296_v10 = vand.u32 4294901760, %v6561_v0  ;;  %v7720_v11 = vsub.f32 %v14251_v52, %v7719_v44  ;;  %v7731_v41 = vand.u32 4294901760, %v14277_v8 }
 0x5f6   :  { %7525 = vmatpush.msrb.mxu0 %v16018_v7  ;;  %7692 = vmatpush.msrb.mxu3 %v7691_v25  ;;  %v7714_v57 = vsub.f32 %v14238_v37, %v16019_v48  ;;  %v7709_v25 = vand.u32 4294901760, %v7708_v32  ;;  %v16022_v7 = vand.u32 4294901760, %v13959_v33  ;;  %v7737_v32 = vand.u32 4294901760, %v14290_v47 }
 0x5f7   :  { %16020 = vst [vmem:[#allocation24_spill] sm:$0xff] %v14292_v16  ;;  %7596 = vmatpush.msrb.mxu1 %v13973_v26  ;;  %7631 = vmatpush.msrb.mxu2 %v14183_v30  ;;  %v14307_v26 = vsub.f32 %v6563_v14, %v14281_v58  ;;  %v14316_v48 = vsub.f32 %v6464_v39, %v14292_v16  ;;  %v16024_v33 = vand.u32 4294901760, %v13969_v21  ;;  %v7721_v14 = vand.u32 4294901760, %v7720_v11 }
 0x5f8   :  { %7529 = vmatpush.msrb.mxu0 %v16021_v40  ;;  %7698 = vmatpush.msrb.mxu3 %v7697_v60  ;;  %v7715_v18 = vand.u32 4294901760, %v7714_v57  ;;  %v7726_v60 = vsub.f32 %v14264_v59, %v7725_v63  ;;  %v16025_v39 = vand.u32 4294901760, %v13982_v42  ;;  %v7738_v21 = vsub.f32 %v14290_v47, %v7737_v32 }
 0x5f9   :  { %7598 = vmatpush.msrb.mxu1 %v13987_v35  ;;  %7633 = vmatpush.msrb.mxu2 %v14197_v53  ;;  %16023 = vst [vmem:[#allocation25_spill] sm:$0xff] %v14316_v48  ;;  %v14321_v35 = vsub.f32 %v6561_v0, %v14296_v10  ;;  %v14337_v57 = vand.u32 4294901760, %v14316_v48  ;;  %v16027_v40 = vand.u32 4294901760, %v13998_v34  ;;  %v16028_v11 = vand.u32 4294901760, %v14010_v46 }
 0x5fa   :  { %7533 = vmatpush.msrb.mxu0 %v16022_v7  ;;  %7704 = vmatpush.msrb.mxu3 %v7703_v22  ;;  %v7732_v22 = vsub.f32 %v14277_v8, %v7731_v41  ;;  %v7727_v0 = vand.u32 4294901760, %v7726_v60  ;;  %v16029_v7 = vand.u32 4294901760, %v14024_v1  ;;  %v16032_v1 = vand.u32 4294901760, %v14049_v36 }
 0x5fb   :  { %7600 = vmatpush.msrb.mxu1 %v14000_v38  ;;  %7635 = vmatpush.msrb.mxu2 %v14212_v4  ;;  %v7743_v38 = vand.u32 4294901760, %v14307_v26  ;;  %16026 = vst [vmem:[#allocation26_spill] sm:$0xff] %v14337_v57  ;;  %v7651_v34 = vsub.f32 %v14316_v48, %v14337_v57  ;;  %v16036_v36 = vand.u32 4294901760, %v14074_v62  ;;  %v16043_v62 = vand.u32 4294901760, %v14162_v9 }
 0x5fc   :  { %7537 = vmatpush.msrb.mxu0 %v16024_v33  ;;  %7710 = vmatpush.msrb.mxu3 %v7709_v25  ;;  %v7733_v42 = vand.u32 4294901760, %v7732_v22  ;;  %v16035_v33 = vand.u32 4294901760, %v14128_v13 }
 0x5fd   :  { %7602 = vmatpush.msrb.mxu1 %v14012_v51  ;;  %7637 = vmatpush.msrb.mxu2 %v14225_v6  ;;  %v7749_v51 = vand.u32 4294901760, %v14321_v35  ;;  %v7744_v25 = vsub.f32 %v14307_v26, %v7743_v38 }
 0x5fe   :  { %7541 = vmatpush.msrb.mxu0 %v16025_v39  ;;  %7716 = vmatpush.msrb.mxu3 %v7715_v18  ;;  %v14366_v18 = vand.u32 4294901760, %v7651_v34  ;;  %v6488_v34 = vld [vmem:[#allocation4 + $0xb8] sm:$0xff] }
 0x5ff   :  { %7604 = vmatpush.msrb.mxu1 %v14026_v55  ;;  %7639 = vmatpush.msrb.mxu2 %v14240_v20  ;;  %v7739_v55 = vand.u32 4294901760, %v7738_v21  ;;  %v7745_v46 = vand.u32 4294901760, %v7744_v25  ;;  %v16047_v25 = vand.u32 4294901760, %v14210_v17 }
 0x600   :  { %7545 = vmatpush.msrb.mxu0 %v16027_v40  ;;  %7722 = vmatpush.msrb.mxu3 %v7721_v14  ;;  %16031 = vst [vmem:[#allocation27_spill] sm:$0xff] %v14366_v18  ;;  %v16037_v14 = vld [vmem:[#allocation19_spill] sm:$0xff] }
 0x601   :  { %7606 = vmatpush.msrb.mxu1 %v14038_v24  ;;  %7641 = vmatpush.msrb.mxu2 %v14253_v29  ;;  %v7750_v24 = vsub.f32 %v14321_v35, %v7749_v51  ;;  %v16038_v22 = vand.u32 4294901760, %v16037_v14 }
 0x602   :  { %7549 = vmatpush.msrb.mxu0 %v16028_v11  ;;  %7728 = vmatpush.msrb.mxu3 %v7727_v0  ;;  %v16041_v0 = vld [vmem:[#allocation21_spill] sm:$0xff] }
 0x603   :  { %7608 = vmatpush.msrb.mxu1 %v14051_v27  ;;  %7643 = vmatpush.msrb.mxu2 %v14266_v61  ;;  %v16030_v27 = vand.u32 4294901760, %v14036_v23  ;;  %v7751_v60 = vand.u32 4294901760, %v7750_v24  ;;  %v16033_v23 = vand.u32 4294901760, %v14118_v31  ;;  %v16042_v21 = vand.u32 4294901760, %v16041_v0 }
 0x604   :  { %7553 = vmatpush.msrb.mxu0 %v16029_v7  ;;  %7734 = vmatpush.msrb.mxu3 %v7733_v42  ;;  %v6494_v42 = vld [vmem:[#allocation4 + $0xe8] sm:$0xff] }
 0x605   :  { %7610 = vmatpush.msrb.mxu1 %v14063_v49  ;;  %7645 = vmatpush.msrb.mxu2 %v14281_v58  ;;  %v16034_v49 = vand.u32 4294901760, %v14061_v12  ;;  %v16039_v12 = vld [vmem:[#allocation11_spill] sm:$0xff] }
 0x606   :  { %7557 = vmatpush.msrb.mxu0 %v16030_v27  ;;  %7740 = vmatpush.msrb.mxu3 %v7739_v55  ;;  %v16040_v39 = vand.u32 4294901760, %v16039_v12  ;;  %v6486_v27 = vld [vmem:[#allocation4 + $0xa8] sm:$0xff] }
 0x607   :  { %7612 = vmatmul.f32.vlgmr.msrb.gmra.mxu1 %v14124_v19  ;;  %7647 = vmatpush.msrb.mxu2 %v14296_v10 }
 0x608   :  { %7813 = vmatpush.msra.mxu1 %v14101_v43  ;;  %7561 = vmatpush.msrb.mxu0 %v16032_v1  ;;  %v14458_v1 = vand.u32 4294901760, %v6486_v27 }
 0x609   :  { %7746 = vmatpush.msrb.mxu3 %v7745_v46  ;;  %7653 = vmatmul.f32.vlgmr.msrb.gmra.mxu2 %v14366_v18  ;;  %v6506_v18 = vld [vmem:[#allocation4 + $0x148] sm:$0xff] }
 0x60a   :  { %7815 = vmatpush.msra.mxu1 %v14109_v45  ;;  %7854 = vmatpush.msra.mxu2 %v16033_v23  ;;  %v6482_v23 = vld [vmem:[#allocation4 + $0x88] sm:$0xff] }
 0x60b   :  { %7565 = vmatpush.msrb.mxu0 %v16034_v49  ;;  %7752 = vmatpush.msrb.mxu3 %v7751_v60  ;;  %v6484_v60 = vld [vmem:[#allocation4 + $0x98] sm:$0xff] }
 0x60c   :  { %7754 = vmatmul.f32.vlgmr.msrb.gmra.mxu3 %v14292_v16  ;;  %7817 = vmatpush.msra.mxu1 %v14122_v54  ;;  %v14469_v49 = vand.u32 4294901760, %v6484_v60 }
 0x60d   :  { %7858 = vmatpush.msra.mxu2 %v16035_v33  ;;  %7921 = vmatpush.msra.mxu3 %v14101_v43  ;;  %v6496_v43 = vld [vmem:[#allocation4 + $0xf8] sm:$0xff] }
 0x60e   :  { %7569 = vmatpush.msrb.mxu0 %v16036_v36  ;;  %7819 = vmatpush.msra.mxu1 %v14132_v5  ;;  %v6480_v33 = vld [vmem:[#allocation4 + $0x78] sm:$0xff] }
 0x60f   :  { %7862 = vmatpush.msra.mxu2 %v16038_v22  ;;  %7923 = vmatpush.msra.mxu3 %v14109_v45  ;;  %v16044_v45 = vld [vmem:[#allocation23_spill] sm:$0xff]  ;;  %v6478_v22 = vld [vmem:[#allocation4 + $0x68] sm:$0xff] }
 0x610   :  { %7573 = vmatpush.msrb.mxu0 %v16040_v39  ;;  %7821 = vmatpush.msra.mxu1 %v14136_v28  ;;  %v16045_v40 = vand.u32 4294901760, %v16044_v45  ;;  %v6476_v39 = vld [vmem:[#allocation4 + $0x58] sm:$0xff] }
 0x611   :  { %7575 = vmatmul.f32.vlgmr.msrb.gmra.mxu0 %v14124_v19  ;;  %7866 = vmatpush.msra.mxu2 %v16042_v21  ;;  %v16059_v19 = vld [vmem:[#allocation15_spill] sm:$0xff] }
 0x612   :  { %7760 = vmatpush.msra.mxu0 %v14118_v31  ;;  %7925 = vmatpush.msra.mxu3 %v14122_v54  ;;  %v14406_v54 = vand.u32 4294901760, %v6496_v43  ;;  %v16046_v31 = vand.u32 4294901760, %v14195_v3 }
 0x613   :  { %7823 = vmatpush.msra.mxu1 %v14148_v50  ;;  %7870 = vmatpush.msra.mxu2 %v16043_v62  ;;  %v6474_v62 = vld [vmem:[#allocation4 + $0x48] sm:$0xff] }
 0x614   :  { %7763 = vmatpush.msra.mxu0 %v14128_v13  ;;  %7927 = vmatpush.msra.mxu3 %v14132_v5  ;;  %v6492_v13 = vld [vmem:[#allocation4 + $0xd8] sm:$0xff]  ;;  %v14413_v5 = vand.u32 4294901760, %v6494_v42  ;;  %v14421_v11 = vsub.f32 %v6496_v43, %v14406_v54  ;;  %v14526_v43 = vand.u32 4294901760, %v6476_v39 }
 0x615   :  { %7825 = vmatpush.msra.mxu1 %v14167_v56  ;;  %7874 = vmatpush.msra.mxu2 %v16045_v40  ;;  %v14423_v55 = vand.u32 4294901760, %v6492_v13  ;;  %v6472_v40 = vld [vmem:[#allocation4 + $0x38] sm:$0xff] }
 0x616   :  { %7766 = vmatpush.msra.mxu0 %v16037_v14  ;;  %7929 = vmatpush.msra.mxu3 %v14136_v28  ;;  %v6490_v28 = vld [vmem:[#allocation4 + $0xc8] sm:$0xff]  ;;  %v14431_v24 = vsub.f32 %v6494_v42, %v14413_v5  ;;  %v15694_v7 = vand.u32 4294901760, %v14421_v11  ;;  %v14495_v14 = vsub.f32 %v6484_v60, %v14469_v49 }
 0x617   :  { %7827 = vmatpush.msra.mxu1 %v14183_v30  ;;  %7878 = vmatpush.msra.mxu2 %v16046_v31  ;;  %v14442_v46 = vsub.f32 %v6492_v13, %v14423_v55  ;;  %v14538_v31 = vand.u32 4294901760, %v6474_v62 }
 0x618   :  { %7769 = vmatpush.msra.mxu0 %v16041_v0  ;;  %7931 = vmatpush.msra.mxu3 %v14148_v50  ;;  %v16048_v50 = vand.u32 4294901760, %v14223_v2  ;;  %v14514_v0 = vand.u32 4294901760, %v6478_v22  ;;  %v15687_v21 = vand.u32 4294901760, %v14495_v14 }
 0x619   :  { %7829 = vmatpush.msra.mxu1 %v14197_v53  ;;  %7882 = vmatpush.msra.mxu2 %v16047_v25 }
 0x61a   :  { %7772 = vmatpush.msra.mxu0 %v14162_v9  ;;  %7933 = vmatpush.msra.mxu3 %v14167_v56  ;;  %v14433_v9 = vand.u32 4294901760, %v6490_v28  ;;  %v16049_v56 = vand.u32 4294901760, %v14238_v37  ;;  %v14536_v42 = vsub.f32 %v6478_v22, %v14514_v0  ;;  %v8037_v25 = vsub.f32 %v14495_v14, %v15687_v21  ;;  %v6514_v21 = vld [vmem:[#allocation4 + $0x188] sm:$0xff] }
 0x61b   :  { %7831 = vmatpush.msra.mxu1 %v14212_v4  ;;  %7886 = vmatpush.msra.mxu2 %v16048_v50  ;;  %v14550_v50 = vand.u32 4294901760, %v6472_v40 }
 0x61c   :  { %7775 = vmatpush.msra.mxu0 %v16044_v45  ;;  %7935 = vmatpush.msra.mxu3 %v14183_v30  ;;  %v14444_v30 = vand.u32 4294901760, %v6488_v34  ;;  %v15684_v60 = vand.u32 4294901760, %v14536_v42 }
 0x61d   :  { %7833 = vmatpush.msra.mxu1 %v14225_v6  ;;  %7890 = vmatpush.msra.mxu2 %v16049_v56  ;;  %v6468_v56 = vld [vmem:[#allocation4 + $0x18] sm:$0xff] }
 0x61e   :  { %7778 = vmatpush.msra.mxu0 %v14195_v3  ;;  %7937 = vmatpush.msra.mxu3 %v14197_v53  ;;  %v15693_v53 = vand.u32 4294901760, %v14431_v24  ;;  %v14453_v3 = vsub.f32 %v6490_v28, %v14433_v9  ;;  %v14548_v28 = vsub.f32 %v6476_v39, %v14526_v43  ;;  %v14574_v22 = vand.u32 4294901760, %v6468_v56 }
 0x61f   :  { %7835 = vmatpush.msra.mxu1 %v14240_v20  ;;  %7894 = vmatpush.msra.mxu2 %v7719_v44  ;;  %v14467_v44 = vsub.f32 %v6488_v34, %v14444_v30 }
 0x620   :  { %7781 = vmatpush.msra.mxu0 %v14210_v17  ;;  %7939 = vmatpush.msra.mxu3 %v14212_v4  ;;  %v8001_v17 = vsub.f32 %v14421_v11, %v15694_v7  ;;  %v15692_v4 = vand.u32 4294901760, %v14442_v46 }
 0x621   :  { %7837 = vmatpush.msra.mxu1 %v14253_v29  ;;  %7898 = vmatpush.msra.mxu2 %v7725_v63  ;;  %v14480_v63 = vand.u32 4294901760, %v6482_v23  ;;  %v15689_v36 = vand.u32 4294901760, %v14467_v44 }
 0x622   :  { %7784 = vmatpush.msra.mxu0 %v14223_v2  ;;  %7941 = vmatpush.msra.mxu3 %v14225_v6  ;;  %v8007_v6 = vsub.f32 %v14431_v24, %v15693_v53  ;;  %v15691_v2 = vand.u32 4294901760, %v14453_v3  ;;  %v16053_v53 = vld [vmem:[#allocation13_spill] sm:$0xff] }
 0x623   :  { %7839 = vmatpush.msra.mxu1 %v14266_v61  ;;  %7902 = vmatpush.msra.mxu2 %v7731_v41  ;;  %v14486_v41 = vsub.f32 %v6486_v27, %v14458_v1  ;;  %v14508_v12 = vsub.f32 %v6482_v23, %v14480_v63  ;;  %v14560_v23 = vsub.f32 %v6474_v62, %v14538_v31 }
 0x624   :  { %7787 = vmatpush.msra.mxu0 %v14238_v37  ;;  %7943 = vmatpush.msra.mxu3 %v14240_v20  ;;  %v8002_v37 = vand.u32 4294901760, %v8001_v17  ;;  %v8013_v20 = vsub.f32 %v14442_v46, %v15692_v4  ;;  %v14694_v4 = vand.u32 4294901760, %v6514_v21 }
 0x625   :  { %7841 = vmatpush.msra.mxu1 %v14281_v58  ;;  %7906 = vmatpush.msra.mxu2 %v7737_v32  ;;  %v14500_v32 = vand.u32 4294901760, %v6480_v33  ;;  %v15686_v45 = vand.u32 4294901760, %v14508_v12 }
 0x626   :  { %7790 = vmatpush.msra.mxu0 %v14251_v52  ;;  %7945 = vmatpush.msra.mxu3 %v14253_v29  ;;  %v8008_v52 = vand.u32 4294901760, %v8007_v6  ;;  %v8019_v29 = vsub.f32 %v14453_v3, %v15691_v2  ;;  %v6466_v6 = vld [vmem:[#allocation4 + $0x8] sm:$0xff] }
 0x627   :  { %7843 = vmatpush.msra.mxu1 %v14296_v10  ;;  %7910 = vmatpush.msra.mxu2 %v7743_v38  ;;  %v15688_v38 = vand.u32 4294901760, %v14486_v41  ;;  %v8043_v34 = vsub.f32 %v14508_v12, %v15686_v45  ;;  %v6516_v45 = vld [vmem:[#allocation4 + $0x198] sm:$0xff] }
 0x628   :  { %7793 = vmatpush.msra.mxu0 %v14264_v59  ;;  %7947 = vmatpush.msra.mxu3 %v14266_v61  ;;  %v8014_v59 = vand.u32 4294901760, %v8013_v20  ;;  %v8025_v61 = vsub.f32 %v14467_v44, %v15689_v36  ;;  %v14572_v20 = vsub.f32 %v6472_v40, %v14550_v50  ;;  %v14596_v40 = vsub.f32 %v6468_v56, %v14574_v22 }
 0x629   :  { %7847 = vmatmul.f32.vlgmr.msra.gmra.mxu1 %v14337_v57  ;;  %7914 = vmatpush.msra.mxu2 %v7749_v51  ;;  %v14524_v51 = vsub.f32 %v6480_v33, %v14500_v32  ;;  %v14681_v36 = vand.u32 4294901760, %v6516_v45 }
 0x62a   :  { %8003 = vmatpush.msrb.mxu1 %v8002_v37  ;;  %7796 = vmatpush.msra.mxu0 %v14277_v8  ;;  %v8020_v8 = vand.u32 4294901760, %v8019_v29  ;;  %v8026_v13 = vand.u32 4294901760, %v8025_v61  ;;  %v15682_v37 = vand.u32 4294901760, %v14548_v28  ;;  %v15680_v29 = vand.u32 4294901760, %v14560_v23 }
 0x62b   :  { %7949 = vmatpush.msra.mxu3 %v14281_v58  ;;  %7916 = vmatmul.f32.vlgmr.msra.gmra.mxu2 %v14292_v16  ;;  %v8031_v58 = vsub.f32 %v14486_v41, %v15688_v38  ;;  %v14705_v2 = vsub.f32 %v6516_v45, %v14681_v36  ;;  %v6508_v38 = vld [vmem:[#allocation4 + $0x158] sm:$0xff]  ;;  %v14718_v45 = vsub.f32 %v6514_v21, %v14694_v4 }
 0x62c   :  { %8009 = vmatpush.msrb.mxu1 %v8008_v52  ;;  %8101 = vmatpush.msrb.mxu2 %v14421_v11  ;;  %v8055_v52 = vsub.f32 %v14536_v42, %v15684_v60  ;;  %v8061_v62 = vsub.f32 %v14548_v28, %v15682_v37  ;;  %v6520_v37 = vld [vmem:[#allocation4 + $0x1b8] sm:$0xff] }
 0x62d   :  { %7799 = vmatpush.msra.mxu0 %v14290_v47  ;;  %7951 = vmatpush.msra.mxu3 %v14296_v10  ;;  %v6470_v47 = vld [vmem:[#allocation4 + $0x28] sm:$0xff]  ;;  %v15685_v10 = vand.u32 4294901760, %v14524_v51  ;;  %v8032_v27 = vand.u32 4294901760, %v8031_v58 }
 0x62e   :  { %7953 = vmatmul.f32.vlgmr.msra.gmra.mxu3 %v14292_v16  ;;  %8015 = vmatpush.msrb.mxu1 %v8014_v59  ;;  %v14562_v17 = vand.u32 4294901760, %v6470_v47  ;;  %v14586_v59 = vand.u32 4294901760, %v6466_v6  ;;  %v8056_v58 = vand.u32 4294901760, %v8055_v52  ;;  %v8062_v56 = vand.u32 4294901760, %v8061_v62 }
 0x62f   :  { %8104 = vmatpush.msrb.mxu2 %v14431_v24  ;;  %8154 = vmatpush.msrb.mxu3 %v14406_v54  ;;  %v8049_v33 = vsub.f32 %v14524_v51, %v15685_v10 }
 0x630   :  { %7802 = vmatpush.msra.mxu0 %v14307_v26  ;;  %8021 = vmatpush.msrb.mxu1 %v8020_v8  ;;  %v8038_v26 = vand.u32 4294901760, %v8037_v25  ;;  %v14584_v39 = vsub.f32 %v6470_v47, %v14562_v17  ;;  %v15678_v8 = vand.u32 4294901760, %v14572_v20  ;;  %v14606_v47 = vsub.f32 %v6466_v6, %v14586_v59  ;;  %v6526_v6 = vld [vmem:[#allocation4 + $0x1e8] sm:$0xff] }
 0x631   :  { %8107 = vmatpush.msrb.mxu2 %v14442_v46  ;;  %8156 = vmatpush.msrb.mxu3 %v14413_v5  ;;  %v8050_v61 = vand.u32 4294901760, %v8049_v33 }
 0x632   :  { %7805 = vmatpush.msra.mxu0 %v14321_v35  ;;  %8027 = vmatpush.msrb.mxu1 %v8026_v13  ;;  %v8044_v35 = vand.u32 4294901760, %v8043_v34  ;;  %v8067_v13 = vsub.f32 %v14560_v23, %v15680_v29  ;;  %v15679_v25 = vand.u32 4294901760, %v14584_v39  ;;  %v6528_v34 = vld [vmem:[#allocation4 + $0x1f8] sm:$0xff]  ;;  %v15683_v52 = vand.u32 4294901760, %v14606_v47  ;;  %v6522_v29 = vld [vmem:[#allocation4 + $0x1c8] sm:$0xff] }
 0x633   :  { %7808 = vmatmul.f32.vlgmr.msra.gmra.mxu0 %v14316_v48  ;;  %8110 = vmatpush.msrb.mxu2 %v14453_v3 }
 0x634   :  { %7958 = vmatpush.msrb.mxu0 %v14406_v54  ;;  %8158 = vmatpush.msrb.mxu3 %v14423_v55  ;;  %v8068_v33 = vand.u32 4294901760, %v8067_v13  ;;  %v14630_v13 = vand.u32 4294901760, %v6526_v6 }
 0x635   :  { %8033 = vmatpush.msrb.mxu1 %v8032_v27  ;;  %8113 = vmatpush.msrb.mxu2 %v14467_v44  ;;  %v8073_v27 = vsub.f32 %v14572_v20, %v15678_v8  ;;  %v6524_v8 = vld [vmem:[#allocation4 + $0x1d8] sm:$0xff] }
 0x636   :  { %7960 = vmatpush.msrb.mxu0 %v14413_v5  ;;  %8160 = vmatpush.msrb.mxu3 %v14433_v9 }
 0x637   :  { %8039 = vmatpush.msrb.mxu1 %v8038_v26  ;;  %8116 = vmatpush.msrb.mxu2 %v14486_v41  ;;  %v15681_v26 = vand.u32 4294901760, %v14596_v40  ;;  %v8074_v62 = vand.u32 4294901760, %v8073_v27 }
 0x638   :  { %7962 = vmatpush.msrb.mxu0 %v14423_v55  ;;  %8162 = vmatpush.msrb.mxu3 %v14444_v30 }
 0x639   :  { %8045 = vmatpush.msrb.mxu1 %v8044_v35  ;;  %8119 = vmatpush.msrb.mxu2 %v14495_v14  ;;  %v8079_v35 = vsub.f32 %v14584_v39, %v15679_v25 }
 0x63a   :  { %7964 = vmatpush.msrb.mxu0 %v14433_v9  ;;  %8164 = vmatpush.msrb.mxu3 %v14458_v1 }
 0x63b   :  { %8051 = vmatpush.msrb.mxu1 %v8050_v61  ;;  %8122 = vmatpush.msrb.mxu2 %v14508_v12  ;;  %v14622_v61 = vand.u32 4294901760, %v6528_v34  ;;  %v8080_v25 = vand.u32 4294901760, %v8079_v35  ;;  %v14647_v35 = vsub.f32 %v6526_v6, %v14630_v13 }
 0x63c   :  { %7966 = vmatpush.msrb.mxu0 %v14444_v30  ;;  %8166 = vmatpush.msrb.mxu3 %v14469_v49 }
 0x63d   :  { %8057 = vmatpush.msrb.mxu1 %v8056_v58  ;;  %8125 = vmatpush.msrb.mxu2 %v14524_v51  ;;  %v8085_v58 = vsub.f32 %v14596_v40, %v15681_v26  ;;  %v14639_v27 = vsub.f32 %v6528_v34, %v14622_v61  ;;  %v14643_v26 = vand.u32 4294901760, %v6524_v8  ;;  %v14651_v34 = vand.u32 4294901760, %v6522_v29 }
 0x63e   :  { %7968 = vmatpush.msrb.mxu0 %v14458_v1  ;;  %8168 = vmatpush.msrb.mxu3 %v14480_v63 }
 0x63f   :  { %8063 = vmatpush.msrb.mxu1 %v8062_v56  ;;  %8128 = vmatpush.msrb.mxu2 %v14536_v42  ;;  %v8091_v56 = vsub.f32 %v14606_v47, %v15683_v52  ;;  %v6518_v52 = vld [vmem:[#allocation4 + $0x1a8] sm:$0xff]  ;;  %v15690_v10 = vand.u32 4294901760, %v14639_v27  ;;  %v14660_v6 = vsub.f32 %v6524_v8, %v14643_v26 }
 0x640   :  { %7970 = vmatpush.msrb.mxu0 %v14469_v49  ;;  %8170 = vmatpush.msrb.mxu3 %v14500_v32 }
 0x641   :  { %8069 = vmatpush.msrb.mxu1 %v8068_v33  ;;  %8131 = vmatpush.msrb.mxu2 %v14548_v28  ;;  %v8086_v33 = vand.u32 4294901760, %v8085_v58  ;;  %v8092_v60 = vand.u32 4294901760, %v8091_v56  ;;  %v15695_v58 = vand.u32 4294901760, %v14647_v35  ;;  %v14669_v56 = vsub.f32 %v6522_v29, %v14651_v34  ;;  %v16051_v29 = vld [vmem:[#allocation14_spill] sm:$0xff] }
 0x642   :  { %7972 = vmatpush.msrb.mxu0 %v14480_v63  ;;  %8172 = vmatpush.msrb.mxu3 %v14514_v0  ;;  %v8342_v8 = vsub.f32 %v14639_v27, %v15690_v10  ;;  %v6512_v10 = vld [vmem:[#allocation4 + $0x178] sm:$0xff] }
 0x643   :  { %8075 = vmatpush.msrb.mxu1 %v8074_v62  ;;  %8134 = vmatpush.msrb.mxu2 %v14560_v23  ;;  %v14655_v62 = vand.u32 4294901760, %v6520_v37  ;;  %v14707_v48 = vand.u32 4294901760, %v6512_v10  ;;  %v16056_v57 = vand.u32 4294901760, %v14669_v56 }
 0x644   :  { %7974 = vmatpush.msrb.mxu0 %v14500_v32  ;;  %8174 = vmatpush.msrb.mxu3 %v14526_v43  ;;  %v8343_v7 = vand.u32 4294901760, %v8342_v8 }
 0x645   :  { %8081 = vmatpush.msrb.mxu1 %v8080_v25  ;;  %8137 = vmatpush.msrb.mxu2 %v14572_v20  ;;  %v14664_v25 = vand.u32 4294901760, %v6518_v52  ;;  %v14730_v21 = vsub.f32 %v6512_v10, %v14707_v48 }
 0x646   :  { %7976 = vmatpush.msrb.mxu0 %v14514_v0  ;;  %8176 = vmatpush.msrb.mxu3 %v14538_v31 }
 0x647   :  { %8087 = vmatpush.msrb.mxu1 %v8086_v33  ;;  %8140 = vmatpush.msrb.mxu2 %v14584_v39  ;;  %v14676_v33 = vsub.f32 %v6520_v37, %v14655_v62  ;;  %v14689_v37 = vsub.f32 %v6518_v52, %v14664_v25 }
 0x648   :  { %7978 = vmatpush.msrb.mxu0 %v14526_v43  ;;  %8178 = vmatpush.msrb.mxu3 %v14550_v50 }
 0x649   :  { %8093 = vmatpush.msrb.mxu1 %v8092_v60  ;;  %8143 = vmatpush.msrb.mxu2 %v14596_v40  ;;  %16050 = vst [vmem:[#allocation19_spill] sm:$0xff] %v14676_v33  ;;  %v8348_v60 = vsub.f32 %v14647_v35, %v15695_v58  ;;  %v6510_v58 = vld [vmem:[#allocation4 + $0x168] sm:$0xff] }
 0x64a   :  { %7980 = vmatpush.msrb.mxu0 %v14538_v31  ;;  %8180 = vmatpush.msrb.mxu3 %v14562_v17  ;;  %16052 = vst [vmem:[#allocation11_spill] sm:$0xff] %v14689_v37  ;;  %v14720_v16 = vand.u32 4294901760, %v6510_v58 }
 0x64b   :  { %8095 = vmatmul.f32.vlgmr.msrb.gmra.mxu1 %v16051_v29  ;;  %8146 = vmatpush.msrb.mxu2 %v14606_v47 }
 0x64c   :  { %8262 = vmatpush.msra.mxu1 %v14406_v54  ;;  %7982 = vmatpush.msrb.mxu0 %v14550_v50  ;;  %v16054_v54 = vand.u32 4294901760, %v14660_v6  ;;  %v14742_v10 = vsub.f32 %v6510_v58, %v14720_v16 }
 0x64d   :  { %8182 = vmatpush.msrb.mxu3 %v14574_v22  ;;  %8149 = vmatmul.f32.vlgmr.msrb.gmra.mxu2 %v16053_v53  ;;  %v8349_v53 = vand.u32 4294901760, %v8348_v60  ;;  %v16057_v60 = vand.u32 4294901760, %v14676_v33 }
 0x64e   :  { %8264 = vmatpush.msra.mxu1 %v14413_v5  ;;  %8299 = vmatpush.msra.mxu2 %v14622_v61  ;;  %v8354_v52 = vsub.f32 %v14660_v6, %v16054_v54  ;;  %v16055_v5 = vld [vmem:[#allocation10_spill] sm:$0xff]  ;;  %v8360_v54 = vsub.f32 %v14669_v56, %v16056_v57  ;;  %v14744_v57 = vand.u32 4294901760, %v6506_v18 }
 0x64f   :  { %7984 = vmatpush.msrb.mxu0 %v14562_v17  ;;  %8184 = vmatpush.msrb.mxu3 %v14586_v59  ;;  %v8366_v8 = vsub.f32 %v14676_v33, %v16057_v60  ;;  %v6502_v33 = vld [vmem:[#allocation4 + $0x128] sm:$0xff] }
 0x650   :  { %8188 = vmatmul.f32.vlgmr.msrb.gmra.mxu3 %v16055_v5  ;;  %8266 = vmatpush.msra.mxu1 %v14423_v55  ;;  %v8355_v55 = vand.u32 4294901760, %v8354_v52  ;;  %v14732_v5 = vand.u32 4294901760, %v6508_v38  ;;  %v6500_v52 = vld [vmem:[#allocation4 + $0x118] sm:$0xff] }
 0x651   :  { %8301 = vmatpush.msra.mxu2 %v14630_v13  ;;  %8344 = vmatpush.msra.mxu3 %v8343_v7  ;;  %v16058_v7 = vand.u32 4294901760, %v14689_v37 }
 0x652   :  { %7986 = vmatpush.msrb.mxu0 %v14574_v22  ;;  %8268 = vmatpush.msra.mxu1 %v14433_v9  ;;  %v8361_v9 = vand.u32 4294901760, %v8360_v54  ;;  %v14755_v58 = vsub.f32 %v6508_v38, %v14732_v5  ;;  %v14768_v38 = vsub.f32 %v6506_v18, %v14744_v57 }
 0x653   :  { %8303 = vmatpush.msra.mxu2 %v14643_v26  ;;  %8350 = vmatpush.msra.mxu3 %v8349_v53  ;;  %v8372_v60 = vsub.f32 %v14689_v37, %v16058_v7  ;;  %v8367_v53 = vand.u32 4294901760, %v8366_v8  ;;  %v16060_v7 = vand.u32 4294901760, %v14421_v11  ;;  %v14757_v37 = vand.u32 4294901760, %v6504_v15 }
 0x654   :  { %7988 = vmatpush.msrb.mxu0 %v14586_v59  ;;  %8270 = vmatpush.msra.mxu1 %v14444_v30  ;;  %v16061_v30 = vand.u32 4294901760, %v14705_v2  ;;  %v16062_v11 = vand.u32 4294901760, %v14431_v24  ;;  %v16063_v8 = vand.u32 4294901760, %v14718_v45  ;;  %v16064_v24 = vand.u32 4294901760, %v14442_v46 }
 0x655   :  { %7994 = vmatmul.f32.vlgmr.msrb.gmra.mxu0 %v16059_v19  ;;  %8305 = vmatpush.msra.mxu2 %v14651_v34  ;;  %v8373_v19 = vand.u32 4294901760, %v8372_v60  ;;  %v16065_v60 = vand.u32 4294901760, %v14730_v21  ;;  %v14781_v18 = vsub.f32 %v6504_v15, %v14757_v37  ;;  %v16066_v46 = vand.u32 4294901760, %v14453_v3 }
 0x656   :  { %8195 = vmatpush.msra.mxu0 %v16060_v7  ;;  %8356 = vmatpush.msra.mxu3 %v8355_v55  ;;  %v8378_v54 = vsub.f32 %v14705_v2, %v16061_v30  ;;  %v8384_v55 = vsub.f32 %v14718_v45, %v16063_v8  ;;  %v8395_v7 = vand.u32 4294901760, %v14742_v10  ;;  %v14770_v30 = vand.u32 4294901760, %v6502_v33  ;;  %v6498_v8 = vld [vmem:[#allocation4 + $0x108] sm:$0xff] }
 0x657   :  { %8272 = vmatpush.msra.mxu1 %v14458_v1  ;;  %8307 = vmatpush.msra.mxu2 %v14655_v62  ;;  %v16067_v3 = vand.u32 4294901760, %v14467_v44 }
 0x658   :  { %8199 = vmatpush.msra.mxu0 %v16062_v11  ;;  %8362 = vmatpush.msra.mxu3 %v8361_v9  ;;  %v8379_v1 = vand.u32 4294901760, %v8378_v54  ;;  %v8390_v9 = vsub.f32 %v14730_v21, %v16065_v60  ;;  %v8401_v11 = vand.u32 4294901760, %v14755_v58  ;;  %v8396_v54 = vsub.f32 %v14742_v10, %v8395_v7 }
 0x659   :  { %8274 = vmatpush.msra.mxu1 %v14469_v49  ;;  %8309 = vmatpush.msra.mxu2 %v14664_v25  ;;  %v14785_v49 = vand.u32 4294901760, %v6500_v52  ;;  %v14794_v15 = vsub.f32 %v6502_v33, %v14770_v30  ;;  %v8413_v60 = vand.u32 4294901760, %v14781_v18  ;;  %v16068_v33 = vand.u32 4294901760, %v14486_v41 }
 0x65a   :  { %8203 = vmatpush.msra.mxu0 %v16064_v24  ;;  %8368 = vmatpush.msra.mxu3 %v8367_v53  ;;  %v8385_v53 = vand.u32 4294901760, %v8384_v55  ;;  %v8407_v24 = vand.u32 4294901760, %v14768_v38  ;;  %v8402_v55 = vsub.f32 %v14755_v58, %v8401_v11  ;;  %v8397_v44 = vand.u32 4294901760, %v8396_v54 }
 0x65b   :  { %8276 = vmatpush.msra.mxu1 %v14480_v63  ;;  %8311 = vmatpush.msra.mxu2 %v14681_v36  ;;  %v14798_v63 = vand.u32 4294901760, %v6498_v8 }
 0x65c   :  { %8207 = vmatpush.msra.mxu0 %v16066_v46  ;;  %8374 = vmatpush.msra.mxu3 %v8373_v19  ;;  %v8391_v19 = vand.u32 4294901760, %v8390_v9  ;;  %v8419_v9 = vand.u32 4294901760, %v14794_v15  ;;  %v8403_v41 = vand.u32 4294901760, %v8402_v55  ;;  %v8414_v46 = vsub.f32 %v14781_v18, %v8413_v60 }
 0x65d   :  { %8278 = vmatpush.msra.mxu1 %v14500_v32  ;;  %8313 = vmatpush.msra.mxu2 %v14694_v4  ;;  %v14809_v32 = vsub.f32 %v6500_v52, %v14785_v49  ;;  %v16069_v52 = vand.u32 4294901760, %v14495_v14  ;;  %v16074_v55 = vand.u32 4294901760, %v14560_v23  ;;  %v16078_v23 = vand.u32 4294901760, %v14584_v39 }
 0x65e   :  { %8211 = vmatpush.msra.mxu0 %v16067_v3  ;;  %8380 = vmatpush.msra.mxu3 %v8379_v1  ;;  %v8408_v1 = vsub.f32 %v14768_v38, %v8407_v24  ;;  %v8420_v14 = vsub.f32 %v14794_v15, %v8419_v9  ;;  %v8415_v3 = vand.u32 4294901760, %v8414_v46  ;;  %v16083_v39 = vand.u32 4294901760, %v14606_v47  ;;  %v16087_v47 = vld [vmem:[#allocation11_spill] sm:$0xff]  ;;  %v6558_v46 = vld [vmem:[#allocation4 + $0x2e8] sm:$0xff] }
 0x65f   :  { %8280 = vmatpush.msra.mxu1 %v14514_v0  ;;  %8315 = vmatpush.msra.mxu2 %v14707_v48  ;;  %v14820_v0 = vsub.f32 %v6498_v8, %v14798_v63 }
 0x660   :  { %8215 = vmatpush.msra.mxu0 %v16068_v33  ;;  %8386 = vmatpush.msra.mxu3 %v8385_v53  ;;  %v16070_v53 = vand.u32 4294901760, %v14508_v12  ;;  %v8409_v8 = vand.u32 4294901760, %v8408_v1  ;;  %v16076_v33 = vld [vmem:[#allocation9_spill] sm:$0xff]  ;;  %v16080_v1 = vand.u32 4294901760, %v14647_v35 }
 0x661   :  { %8282 = vmatpush.msra.mxu1 %v14526_v43  ;;  %8317 = vmatpush.msra.mxu2 %v14720_v16  ;;  %v8425_v43 = vand.u32 4294901760, %v14809_v32  ;;  %v8431_v54 = vand.u32 4294901760, %v14820_v0 }
 0x662   :  { %8219 = vmatpush.msra.mxu0 %v16069_v52  ;;  %8392 = vmatpush.msra.mxu3 %v8391_v19  ;;  %v16072_v19 = vand.u32 4294901760, %v14536_v42  ;;  %v16082_v52 = vand.u32 4294901760, %v14660_v6 }
 0x663   :  { %8284 = vmatpush.msra.mxu1 %v14538_v31  ;;  %8319 = vmatpush.msra.mxu2 %v14732_v5  ;;  %v16071_v31 = vand.u32 4294901760, %v14524_v51  ;;  %v8426_v12 = vsub.f32 %v14809_v32, %v8425_v43  ;;  %v8432_v51 = vsub.f32 %v14820_v0, %v8431_v54 }
 0x664   :  { %8223 = vmatpush.msra.mxu0 %v16070_v53  ;;  %8398 = vmatpush.msra.mxu3 %v8397_v44  ;;  %v16079_v44 = vld [vmem:[#allocation16_spill] sm:$0xff] }
 0x665   :  { %8286 = vmatpush.msra.mxu1 %v14550_v50  ;;  %8321 = vmatpush.msra.mxu2 %v14744_v57  ;;  %v8421_v50 = vand.u32 4294901760, %v8420_v14  ;;  %v8427_v42 = vand.u32 4294901760, %v8426_v12  ;;  %v6550_v12 = vld [vmem:[#allocation4 + $0x2a8] sm:$0xff] }
 0x666   :  { %8227 = vmatpush.msra.mxu0 %v16071_v31  ;;  %8404 = vmatpush.msra.mxu3 %v8403_v41  ;;  %v16084_v41 = vand.u32 4294901760, %v14669_v56 }
 0x667   :  { %8288 = vmatpush.msra.mxu1 %v14562_v17  ;;  %8323 = vmatpush.msra.mxu2 %v14757_v37  ;;  %v16073_v17 = vand.u32 4294901760, %v14548_v28  ;;  %v16075_v28 = vand.u32 4294901760, %v14572_v20  ;;  %v16081_v20 = vand.u32 4294901760, %v14596_v40  ;;  %v16085_v40 = vld [vmem:[#allocation19_spill] sm:$0xff] }
 0x668   :  { %8231 = vmatpush.msra.mxu0 %v16072_v19  ;;  %8410 = vmatpush.msra.mxu3 %v8409_v8  ;;  %v6548_v19 = vld [vmem:[#allocation4 + $0x298] sm:$0xff] }
 0x669   :  { %8290 = vmatpush.msra.mxu1 %v14574_v22  ;;  %8325 = vmatpush.msra.mxu2 %v14770_v30  ;;  %v8433_v22 = vand.u32 4294901760, %v8432_v51  ;;  %v14961_v51 = vand.u32 4294901760, %v6548_v19 }
 0x66a   :  { %8235 = vmatpush.msra.mxu0 %v16073_v17  ;;  %8416 = vmatpush.msra.mxu3 %v8415_v3  ;;  %v6544_v17 = vld [vmem:[#allocation4 + $0x278] sm:$0xff] }
 0x66b   :  { %8292 = vmatpush.msra.mxu1 %v14586_v59  ;;  %8327 = vmatpush.msra.mxu2 %v14785_v49  ;;  %v16077_v59 = vand.u32 4294901760, %v14639_v27 }
 0x66c   :  { %8239 = vmatpush.msra.mxu0 %v16074_v55  ;;  %8422 = vmatpush.msra.mxu3 %v8421_v50  ;;  %v6546_v50 = vld [vmem:[#allocation4 + $0x288] sm:$0xff]  ;;  %v14987_v55 = vsub.f32 %v6548_v19, %v14961_v51 }
 0x66d   :  { %8294 = vmatmul.f32.vlgmr.msra.gmra.mxu1 %v16051_v29  ;;  %8329 = vmatpush.msra.mxu2 %v14798_v63 }
 0x66e   :  { %8495 = vmatpush.msrb.mxu1 %v14622_v61  ;;  %8243 = vmatpush.msra.mxu0 %v16075_v28 }
 0x66f   :  { %8428 = vmatpush.msra.mxu3 %v8427_v42  ;;  %8335 = vmatmul.f32.vlgmr.msra.gmra.mxu2 %v16076_v33  ;;  %v6540_v33 = vld [vmem:[#allocation4 + $0x258] sm:$0xff] }
 0x670   :  { %8497 = vmatpush.msrb.mxu1 %v14630_v13  ;;  %8536 = vmatpush.msrb.mxu2 %v16077_v59  ;;  %v16092_v59 = vld [vmem:[#allocation8_spill] sm:$0xff] }
 0x671   :  { %8247 = vmatpush.msra.mxu0 %v16078_v23  ;;  %8434 = vmatpush.msra.mxu3 %v8433_v22  ;;  %v6542_v22 = vld [vmem:[#allocation4 + $0x268] sm:$0xff] }
 0x672   :  { %8436 = vmatmul.f32.vlgmr.msra.gmra.mxu3 %v16079_v44  ;;  %8499 = vmatpush.msrb.mxu1 %v14643_v26  ;;  %v15006_v23 = vand.u32 4294901760, %v6542_v22 }
 0x673   :  { %8540 = vmatpush.msrb.mxu2 %v16080_v1  ;;  %8603 = vmatpush.msrb.mxu3 %v14622_v61  ;;  %v16086_v61 = vand.u32 4294901760, %v16085_v40  ;;  %v15718_v1 = vand.u32 4294901760, %v14987_v55 }
 0x674   :  { %8251 = vmatpush.msra.mxu0 %v16081_v20  ;;  %8501 = vmatpush.msrb.mxu1 %v14651_v34  ;;  %v6538_v20 = vld [vmem:[#allocation4 + $0x248] sm:$0xff] }
 0x675   :  { %8544 = vmatpush.msrb.mxu2 %v16082_v52  ;;  %8605 = vmatpush.msrb.mxu3 %v14630_v13  ;;  %v6560_v13 = vld [vmem:[#allocation4 + $0x2f8] sm:$0xff]  ;;  %v15018_v52 = vand.u32 4294901760, %v6540_v33 }
 0x676   :  { %8255 = vmatpush.msra.mxu0 %v16083_v39  ;;  %8503 = vmatpush.msrb.mxu1 %v14655_v62 }
 0x677   :  { %8257 = vmatmul.f32.vlgmr.msra.gmra.mxu0 %v16051_v29  ;;  %8548 = vmatpush.msrb.mxu2 %v16084_v41  ;;  %v16088_v29 = vand.u32 4294901760, %v16087_v47  ;;  %v6536_v41 = vld [vmem:[#allocation4 + $0x238] sm:$0xff] }
 0x678   :  { %8442 = vmatpush.msrb.mxu0 %v14639_v27  ;;  %8607 = vmatpush.msrb.mxu3 %v14643_v26  ;;  %v14898_v26 = vand.u32 4294901760, %v6560_v13  ;;  %v16089_v27 = vand.u32 4294901760, %v14705_v2 }
 0x679   :  { %8505 = vmatpush.msrb.mxu1 %v14664_v25  ;;  %8552 = vmatpush.msrb.mxu2 %v16086_v61  ;;  %v15030_v61 = vand.u32 4294901760, %v6538_v20 }
 0x67a   :  { %8445 = vmatpush.msrb.mxu0 %v14647_v35  ;;  %8609 = vmatpush.msrb.mxu3 %v14651_v34  ;;  %v6556_v35 = vld [vmem:[#allocation4 + $0x2d8] sm:$0xff]  ;;  %v14905_v34 = vand.u32 4294901760, %v6558_v46  ;;  %v14913_v53 = vsub.f32 %v6560_v13, %v14898_v26 }
 0x67b   :  { %8507 = vmatpush.msrb.mxu1 %v14681_v36  ;;  %8556 = vmatpush.msrb.mxu2 %v16088_v29  ;;  %v14915_v8 = vand.u32 4294901760, %v6556_v35  ;;  %v15040_v29 = vsub.f32 %v6540_v33, %v15018_v52 }
 0x67c   :  { %8448 = vmatpush.msrb.mxu0 %v14660_v6  ;;  %8611 = vmatpush.msrb.mxu3 %v14655_v62  ;;  %v16090_v6 = vand.u32 4294901760, %v14718_v45  ;;  %v6554_v62 = vld [vmem:[#allocation4 + $0x2c8] sm:$0xff]  ;;  %v14923_v14 = vsub.f32 %v6558_v46, %v14905_v34  ;;  %v15042_v46 = vand.u32 4294901760, %v6536_v41 }
 0x67d   :  { %8509 = vmatpush.msrb.mxu1 %v14694_v4  ;;  %8560 = vmatpush.msrb.mxu2 %v16089_v27  ;;  %v14925_v31 = vand.u32 4294901760, %v6554_v62  ;;  %v14934_v3 = vsub.f32 %v6556_v35, %v14915_v8  ;;  %v6532_v27 = vld [vmem:[#allocation4 + $0x218] sm:$0xff] }
 0x67e   :  { %8451 = vmatpush.msrb.mxu0 %v14669_v56  ;;  %8613 = vmatpush.msrb.mxu3 %v14664_v25  ;;  %v16091_v25 = vand.u32 4294901760, %v14730_v21  ;;  %v6552_v56 = vld [vmem:[#allocation4 + $0x2b8] sm:$0xff] }
 0x67f   :  { %8511 = vmatpush.msrb.mxu1 %v14707_v48  ;;  %8564 = vmatpush.msrb.mxu2 %v16090_v6 }
 0x680   :  { %8454 = vmatpush.msrb.mxu0 %v16085_v40  ;;  %8615 = vmatpush.msrb.mxu3 %v14681_v36  ;;  %v15728_v36 = vand.u32 4294901760, %v14913_v53  ;;  %v15028_v40 = vsub.f32 %v6542_v22, %v15006_v23 }
 0x681   :  { %8513 = vmatpush.msrb.mxu1 %v14720_v16  ;;  %8568 = vmatpush.msrb.mxu2 %v16091_v25 }
 0x682   :  { %8457 = vmatpush.msrb.mxu0 %v16087_v47  ;;  %8617 = vmatpush.msrb.mxu3 %v14694_v4  ;;  %v14936_v4 = vand.u32 4294901760, %v6552_v56  ;;  %v8719_v47 = vsub.f32 %v14987_v55, %v15718_v1  ;;  %v15715_v6 = vand.u32 4294901760, %v15028_v40 }
 0x683   :  { %8515 = vmatpush.msrb.mxu1 %v14732_v5  ;;  %8572 = vmatpush.msrb.mxu2 %v8395_v7  ;;  %v14950_v7 = vand.u32 4294901760, %v6550_v12 }
 0x684   :  { %8460 = vmatpush.msrb.mxu0 %v14705_v2  ;;  %8619 = vmatpush.msrb.mxu3 %v14707_v48  ;;  %v15725_v48 = vand.u32 4294901760, %v14923_v14  ;;  %v14945_v2 = vsub.f32 %v6554_v62, %v14925_v31  ;;  %v15052_v62 = vsub.f32 %v6538_v20, %v15030_v61 }
 0x685   :  { %8517 = vmatpush.msrb.mxu1 %v14744_v57  ;;  %8576 = vmatpush.msrb.mxu2 %v8401_v11  ;;  %v14959_v11 = vsub.f32 %v6552_v56, %v14936_v4  ;;  %v6530_v56 = vld [vmem:[#allocation4 + $0x208] sm:$0xff] }
 0x686   :  { %8463 = vmatpush.msrb.mxu0 %v14718_v45  ;;  %8621 = vmatpush.msrb.mxu3 %v14720_v16  ;;  %v8683_v16 = vsub.f32 %v14913_v53, %v15728_v36  ;;  %v15724_v45 = vand.u32 4294901760, %v14934_v3  ;;  %v15078_v22 = vand.u32 4294901760, %v6530_v56  ;;  %v16099_v36 = vld [vmem:[#allocation17_spill] sm:$0xff] }
 0x687   :  { %8519 = vmatpush.msrb.mxu1 %v14757_v37  ;;  %8580 = vmatpush.msrb.mxu2 %v8407_v24  ;;  %v14972_v24 = vand.u32 4294901760, %v6546_v50  ;;  %v15721_v42 = vand.u32 4294901760, %v14959_v11 }
 0x688   :  { %8466 = vmatpush.msrb.mxu0 %v14730_v21  ;;  %8623 = vmatpush.msrb.mxu3 %v14732_v5  ;;  %v8689_v21 = vsub.f32 %v14923_v14, %v15725_v48  ;;  %v15722_v5 = vand.u32 4294901760, %v14945_v2  ;;  %v6570_v48 = vld [vmem:[#allocation4 + $0x348] sm:$0xff] }
 0x689   :  { %8521 = vmatpush.msrb.mxu1 %v14770_v30  ;;  %8584 = vmatpush.msrb.mxu2 %v8413_v60  ;;  %v14978_v60 = vsub.f32 %v6550_v12, %v14950_v7  ;;  %v15000_v28 = vsub.f32 %v6546_v50, %v14972_v24  ;;  %v16093_v12 = vld [vmem:[#allocation12_spill] sm:$0xff]  ;;  %v15713_v50 = vand.u32 4294901760, %v15040_v29 }
 0x68a   :  { %8469 = vmatpush.msrb.mxu0 %v14742_v10  ;;  %8625 = vmatpush.msrb.mxu3 %v14744_v57  ;;  %v8684_v57 = vand.u32 4294901760, %v8683_v16  ;;  %v8695_v10 = vsub.f32 %v14934_v3, %v15724_v45  ;;  %v15064_v16 = vsub.f32 %v6536_v41, %v15042_v46  ;;  %v6592_v41 = vld [vmem:[#allocation4 + $0x3f8] sm:$0xff] }
 0x68b   :  { %8523 = vmatpush.msrb.mxu1 %v14785_v49  ;;  %8588 = vmatpush.msrb.mxu2 %v8419_v9  ;;  %v14992_v9 = vand.u32 4294901760, %v6544_v17  ;;  %v15717_v39 = vand.u32 4294901760, %v15000_v28 }
 0x68c   :  { %8472 = vmatpush.msrb.mxu0 %v14755_v58  ;;  %8627 = vmatpush.msrb.mxu3 %v14757_v37  ;;  %v8690_v37 = vand.u32 4294901760, %v8689_v21  ;;  %v8701_v58 = vsub.f32 %v14945_v2, %v15722_v5  ;;  %v15066_v21 = vand.u32 4294901760, %v6532_v27  ;;  %v15711_v33 = vand.u32 4294901760, %v15064_v16  ;;  %v6572_v5 = vld [vmem:[#allocation4 + $0x358] sm:$0xff] }
 0x68d   :  { %8525 = vmatpush.msrb.mxu1 %v14798_v63  ;;  %8592 = vmatpush.msrb.mxu2 %v8425_v43  ;;  %v15719_v43 = vand.u32 4294901760, %v14978_v60 }
 0x68e   :  { %8475 = vmatpush.msrb.mxu0 %v14768_v38  ;;  %8629 = vmatpush.msrb.mxu3 %v14770_v30  ;;  %v8696_v38 = vand.u32 4294901760, %v8695_v10  ;;  %v8707_v30 = vsub.f32 %v14959_v11, %v15721_v42 }
 0x68f   :  { %8529 = vmatmul.f32.vlgmr.msrb.gmra.mxu1 %v16092_v59  ;;  %8596 = vmatpush.msrb.mxu2 %v8431_v54  ;;  %v15016_v54 = vsub.f32 %v6544_v17, %v14992_v9  ;;  %v8737_v17 = vsub.f32 %v15028_v40, %v15715_v6  ;;  %v15088_v59 = vsub.f32 %v6532_v27, %v15066_v21 }
 0x690   :  { %8685 = vmatpush.msra.mxu1 %v8684_v57  ;;  %8478 = vmatpush.msrb.mxu0 %v14781_v18  ;;  %v8702_v18 = vand.u32 4294901760, %v8701_v58  ;;  %v8708_v13 = vand.u32 4294901760, %v8707_v30  ;;  %v15712_v57 = vand.u32 4294901760, %v15052_v62  ;;  %v8743_v58 = vsub.f32 %v15040_v29, %v15713_v50 }
 0x691   :  { %8631 = vmatpush.msrb.mxu3 %v14785_v49  ;;  %8598 = vmatmul.f32.vlgmr.msrb.gmra.mxu2 %v16079_v44  ;;  %v8713_v49 = vsub.f32 %v14978_v60, %v15719_v43 }
 0x692   :  { %8691 = vmatpush.msra.mxu1 %v8690_v37  ;;  %8783 = vmatpush.msra.mxu2 %v14913_v53  ;;  %v8749_v30 = vsub.f32 %v15052_v62, %v15712_v57 }
 0x693   :  { %8481 = vmatpush.msrb.mxu0 %v14794_v15  ;;  %8633 = vmatpush.msrb.mxu3 %v14798_v63  ;;  %v6534_v15 = vld [vmem:[#allocation4 + $0x228] sm:$0xff]  ;;  %v15716_v63 = vand.u32 4294901760, %v15016_v54  ;;  %v8714_v35 = vand.u32 4294901760, %v8713_v49  ;;  %v8744_v49 = vand.u32 4294901760, %v8743_v58 }
 0x694   :  { %8635 = vmatmul.f32.vlgmr.msrb.gmra.mxu3 %v16079_v44  ;;  %8697 = vmatpush.msra.mxu1 %v8696_v38  ;;  %v8725_v44 = vsub.f32 %v15000_v28, %v15717_v39  ;;  %v15054_v25 = vand.u32 4294901760, %v6534_v15  ;;  %v8738_v38 = vand.u32 4294901760, %v8737_v17  ;;  %v16097_v39 = vld [vmem:[#allocation20_spill] sm:$0xff] }
 0x695   :  { %8786 = vmatpush.msra.mxu2 %v14923_v14  ;;  %8836 = vmatpush.msra.mxu3 %v14898_v26  ;;  %v8731_v19 = vsub.f32 %v15016_v54, %v15716_v63 }
 0x696   :  { %8484 = vmatpush.msrb.mxu0 %v14809_v32  ;;  %8703 = vmatpush.msra.mxu1 %v8702_v18  ;;  %v8720_v32 = vand.u32 4294901760, %v8719_v47  ;;  %v15076_v10 = vsub.f32 %v6534_v15, %v15054_v25  ;;  %v15098_v18 = vsub.f32 %v6530_v56, %v15078_v22  ;;  %v15709_v47 = vand.u32 4294901760, %v15088_v59  ;;  %v6590_v15 = vld [vmem:[#allocation4 + $0x3e8] sm:$0xff] }
 0x697   :  { %8789 = vmatpush.msra.mxu2 %v14934_v3  ;;  %8838 = vmatpush.msra.mxu3 %v14905_v34  ;;  %v8732_v37 = vand.u32 4294901760, %v8731_v19  ;;  %v15122_v19 = vand.u32 4294901760, %v6590_v15 }
 0x698   :  { %8487 = vmatpush.msrb.mxu0 %v14820_v0  ;;  %8709 = vmatpush.msra.mxu1 %v8708_v13  ;;  %v8726_v0 = vand.u32 4294901760, %v8725_v44  ;;  %v15710_v20 = vand.u32 4294901760, %v15076_v10  ;;  %v8755_v13 = vsub.f32 %v15064_v16, %v15711_v33  ;;  %v8750_v44 = vand.u32 4294901760, %v8749_v30  ;;  %v6578_v33 = vld [vmem:[#allocation4 + $0x388] sm:$0xff] }
 0x699   :  { %8490 = vmatmul.f32.vlgmr.msrb.gmra.mxu0 %v16093_v12  ;;  %8792 = vmatpush.msra.mxu2 %v14945_v2  ;;  %v8767_v12 = vsub.f32 %v15088_v59, %v15709_v47  ;;  %v15186_v63 = vand.u32 4294901760, %v6578_v33 }
 0x69a   :  { %8640 = vmatpush.msra.mxu0 %v14898_v26  ;;  %8840 = vmatpush.msra.mxu3 %v14915_v8  ;;  %v8761_v27 = vsub.f32 %v15076_v10, %v15710_v20  ;;  %v8756_v56 = vand.u32 4294901760, %v8755_v13  ;;  %v6580_v20 = vld [vmem:[#allocation4 + $0x398] sm:$0xff] }
 0x69b   :  { %8715 = vmatpush.msra.mxu1 %v8714_v35  ;;  %8795 = vmatpush.msra.mxu2 %v14959_v11  ;;  %v15708_v35 = vand.u32 4294901760, %v15098_v18  ;;  %v8768_v13 = vand.u32 4294901760, %v8767_v12  ;;  %v15173_v50 = vand.u32 4294901760, %v6580_v20 }
 0x69c   :  { %8642 = vmatpush.msra.mxu0 %v14905_v34  ;;  %8842 = vmatpush.msra.mxu3 %v14925_v31  ;;  %v8762_v17 = vand.u32 4294901760, %v8761_v27  ;;  %v6582_v27 = vld [vmem:[#allocation4 + $0x3a8] sm:$0xff] }
 0x69d   :  { %8721 = vmatpush.msra.mxu1 %v8720_v32  ;;  %8798 = vmatpush.msra.mxu2 %v14978_v60  ;;  %v15114_v32 = vand.u32 4294901760, %v6592_v41 }
 0x69e   :  { %8644 = vmatpush.msra.mxu0 %v14915_v8  ;;  %8844 = vmatpush.msra.mxu3 %v14936_v4 }
 0x69f   :  { %8727 = vmatpush.msra.mxu1 %v8726_v0  ;;  %8801 = vmatpush.msra.mxu2 %v14987_v55  ;;  %v6588_v0 = vld [vmem:[#allocation4 + $0x3d8] sm:$0xff]  ;;  %v15131_v58 = vsub.f32 %v6592_v41, %v15114_v32 }
 0x6a0   :  { %8646 = vmatpush.msra.mxu0 %v14925_v31  ;;  %8846 = vmatpush.msra.mxu3 %v14950_v7  ;;  %v15135_v30 = vand.u32 4294901760, %v6588_v0 }
 0x6a1   :  { %8733 = vmatpush.msra.mxu1 %v8732_v37  ;;  %8804 = vmatpush.msra.mxu2 %v15000_v28  ;;  %v8773_v37 = vsub.f32 %v15098_v18, %v15708_v35  ;;  %v15714_v47 = vand.u32 4294901760, %v15131_v58 }
 0x6a2   :  { %8648 = vmatpush.msra.mxu0 %v14936_v4  ;;  %8848 = vmatpush.msra.mxu3 %v14961_v51 }
 0x6a3   :  { %8739 = vmatpush.msra.mxu1 %v8738_v38  ;;  %8807 = vmatpush.msra.mxu2 %v15016_v54  ;;  %v6586_v38 = vld [vmem:[#allocation4 + $0x3c8] sm:$0xff]  ;;  %v8774_v35 = vand.u32 4294901760, %v8773_v37 }
 0x6a4   :  { %8650 = vmatpush.msra.mxu0 %v14950_v7  ;;  %8850 = vmatpush.msra.mxu3 %v14972_v24  ;;  %v15143_v41 = vand.u32 4294901760, %v6586_v38 }
 0x6a5   :  { %8745 = vmatpush.msra.mxu1 %v8744_v49  ;;  %8810 = vmatpush.msra.mxu2 %v15028_v40  ;;  %v6584_v49 = vld [vmem:[#allocation4 + $0x3b8] sm:$0xff] }
 0x6a6   :  { %8652 = vmatpush.msra.mxu0 %v14961_v51  ;;  %8852 = vmatpush.msra.mxu3 %v14992_v9  ;;  %v15161_v37 = vsub.f32 %v6586_v38, %v15143_v41  ;;  %v16095_v38 = vld [vmem:[#allocation18_spill] sm:$0xff] }
 0x6a7   :  { %8751 = vmatpush.msra.mxu1 %v8750_v44  ;;  %8813 = vmatpush.msra.mxu2 %v15040_v29  ;;  %v15139_v44 = vsub.f32 %v6590_v15, %v15122_v19  ;;  %v15152_v15 = vsub.f32 %v6588_v0, %v15135_v30  ;;  %v9024_v0 = vsub.f32 %v15131_v58, %v15714_v47  ;;  %v6576_v47 = vld [vmem:[#allocation4 + $0x378] sm:$0xff] }
 0x6a8   :  { %8654 = vmatpush.msra.mxu0 %v14972_v24  ;;  %8854 = vmatpush.msra.mxu3 %v15006_v23  ;;  %v15726_v6 = vand.u32 4294901760, %v15161_v37  ;;  %v15199_v42 = vand.u32 4294901760, %v6576_v47 }
 0x6a9   :  { %8757 = vmatpush.msra.mxu1 %v8756_v56  ;;  %8816 = vmatpush.msra.mxu2 %v15052_v62  ;;  %v15147_v56 = vand.u32 4294901760, %v6584_v49  ;;  %v15720_v12 = vand.u32 4294901760, %v15139_v44  ;;  %v15723_v57 = vand.u32 4294901760, %v15152_v15  ;;  %v9025_v1 = vand.u32 4294901760, %v9024_v0 }
 0x6aa   :  { %8656 = vmatpush.msra.mxu0 %v14992_v9  ;;  %8856 = vmatpush.msra.mxu3 %v15018_v52 }
 0x6ab   :  { %8763 = vmatpush.msra.mxu1 %v8762_v17  ;;  %8819 = vmatpush.msra.mxu2 %v15064_v16  ;;  %v15156_v17 = vand.u32 4294901760, %v6582_v27 }
 0x6ac   :  { %8658 = vmatpush.msra.mxu0 %v15006_v23  ;;  %8858 = vmatpush.msra.mxu3 %v15030_v61 }
 0x6ad   :  { %8769 = vmatpush.msra.mxu1 %v8768_v13  ;;  %8822 = vmatpush.msra.mxu2 %v15076_v10  ;;  %v15168_v13 = vsub.f32 %v6584_v49, %v15147_v56  ;;  %v15181_v49 = vsub.f32 %v6582_v27, %v15156_v17  ;;  %v15197_v27 = vsub.f32 %v6580_v20, %v15173_v50 }
 0x6ae   :  { %8660 = vmatpush.msra.mxu0 %v15018_v52  ;;  %8860 = vmatpush.msra.mxu3 %v15042_v46  ;;  %v15210_v20 = vsub.f32 %v6578_v33, %v15186_v63  ;;  %v15222_v33 = vsub.f32 %v6576_v47, %v15199_v42 }
 0x6af   :  { %8775 = vmatpush.msra.mxu1 %v8774_v35  ;;  %8825 = vmatpush.msra.mxu2 %v15088_v59  ;;  %16094 = vst [vmem:[#allocation21_spill] sm:$0xff] %v15168_v13  ;;  %v9030_v35 = vsub.f32 %v15139_v44, %v15720_v12  ;;  %v15727_v43 = vand.u32 4294901760, %v15168_v13  ;;  %v6574_v12 = vld [vmem:[#allocation4 + $0x368] sm:$0xff]  ;;  %v15731_v0 = vand.u32 4294901760, %v15181_v49 }
 0x6b0   :  { %8662 = vmatpush.msra.mxu0 %v15030_v61  ;;  %8862 = vmatpush.msra.mxu3 %v15054_v25  ;;  %16096 = vst [vmem:[#allocation23_spill] sm:$0xff] %v15181_v49  ;;  %v15212_v45 = vand.u32 4294901760, %v6574_v12 }
 0x6b1   :  { %8777 = vmatmul.f32.vlgmr.msra.gmra.mxu1 %v16095_v38  ;;  %8828 = vmatpush.msra.mxu2 %v15098_v18 }
 0x6b2   :  { %8944 = vmatpush.msrb.mxu1 %v14898_v26  ;;  %8664 = vmatpush.msra.mxu0 %v15042_v46  ;;  %v9036_v26 = vsub.f32 %v15152_v15, %v15723_v57  ;;  %v9042_v57 = vsub.f32 %v15161_v37, %v15726_v6  ;;  %v15224_v6 = vand.u32 4294901760, %v6572_v5  ;;  %v15234_v47 = vsub.f32 %v6574_v12, %v15212_v45 }
 0x6b3   :  { %8864 = vmatpush.msra.mxu3 %v15066_v21  ;;  %8831 = vmatmul.f32.vlgmr.msra.gmra.mxu2 %v16097_v39  ;;  %v9031_v39 = vand.u32 4294901760, %v9030_v35  ;;  %v9048_v35 = vsub.f32 %v15168_v13, %v15727_v43  ;;  %v6568_v43 = vld [vmem:[#allocation4 + $0x338] sm:$0xff]  ;;  %v6566_v13 = vld [vmem:[#allocation4 + $0x328] sm:$0xff] }
 0x6b4   :  { %8946 = vmatpush.msrb.mxu1 %v14905_v34  ;;  %8981 = vmatpush.msrb.mxu2 %v15114_v32  ;;  %v16098_v34 = vld [vmem:[#allocation22_spill] sm:$0xff]  ;;  %v15247_v12 = vsub.f32 %v6572_v5, %v15224_v6 }
 0x6b5   :  { %8666 = vmatpush.msra.mxu0 %v15054_v25  ;;  %8866 = vmatpush.msra.mxu3 %v15078_v22 }
 0x6b6   :  { %8870 = vmatmul.f32.vlgmr.msra.gmra.mxu3 %v16098_v34  ;;  %8948 = vmatpush.msrb.mxu1 %v14915_v8  ;;  %v9037_v8 = vand.u32 4294901760, %v9036_v26  ;;  %v15236_v34 = vand.u32 4294901760, %v6570_v48  ;;  %v6564_v26 = vld [vmem:[#allocation4 + $0x318] sm:$0xff] }
 0x6b7   :  { %8983 = vmatpush.msrb.mxu2 %v15122_v19  ;;  %9026 = vmatpush.msrb.mxu3 %v9025_v1  ;;  %v9054_v1 = vsub.f32 %v15181_v49, %v15731_v0  ;;  %v16100_v0 = vand.u32 4294901760, %v14913_v53  ;;  %v15249_v49 = vand.u32 4294901760, %v6568_v43  ;;  %v16102_v53 = vand.u32 4294901760, %v14923_v14 }
 0x6b8   :  { %8668 = vmatpush.msra.mxu0 %v15066_v21  ;;  %8950 = vmatpush.msrb.mxu1 %v14925_v31  ;;  %v9043_v31 = vand.u32 4294901760, %v9042_v57  ;;  %v15260_v5 = vsub.f32 %v6570_v48, %v15236_v34  ;;  %v16104_v14 = vand.u32 4294901760, %v14934_v3  ;;  %v16106_v3 = vand.u32 4294901760, %v14945_v2 }
 0x6b9   :  { %8985 = vmatpush.msrb.mxu2 %v15135_v30  ;;  %9032 = vmatpush.msrb.mxu3 %v9031_v39  ;;  %v9049_v39 = vand.u32 4294901760, %v9048_v35  ;;  %v15273_v48 = vsub.f32 %v6568_v43, %v15249_v49  ;;  %v16107_v2 = vand.u32 4294901760, %v14959_v11 }
 0x6ba   :  { %8670 = vmatpush.msra.mxu0 %v15078_v22  ;;  %8952 = vmatpush.msrb.mxu1 %v14936_v4  ;;  %v16101_v4 = vand.u32 4294901760, %v15197_v27 }
 0x6bb   :  { %8676 = vmatmul.f32.vlgmr.msra.gmra.mxu0 %v16099_v36  ;;  %8987 = vmatpush.msrb.mxu2 %v15143_v41  ;;  %v9055_v36 = vand.u32 4294901760, %v9054_v1  ;;  %v16105_v1 = vand.u32 4294901760, %v15222_v33 }
 0x6bc   :  { %8877 = vmatpush.msrb.mxu0 %v16100_v0  ;;  %9038 = vmatpush.msrb.mxu3 %v9037_v8  ;;  %v9060_v57 = vsub.f32 %v15197_v27, %v16101_v4  ;;  %v16103_v0 = vand.u32 4294901760, %v15210_v20  ;;  %v9077_v8 = vand.u32 4294901760, %v15234_v47  ;;  %v15262_v4 = vand.u32 4294901760, %v6566_v13 }
 0x6bd   :  { %8954 = vmatpush.msrb.mxu1 %v14950_v7  ;;  %8989 = vmatpush.msrb.mxu2 %v15147_v56 }
 0x6be   :  { %8881 = vmatpush.msrb.mxu0 %v16102_v53  ;;  %9044 = vmatpush.msrb.mxu3 %v9043_v31  ;;  %v9066_v35 = vsub.f32 %v15210_v20, %v16103_v0  ;;  %v9061_v7 = vand.u32 4294901760, %v9060_v57  ;;  %v9072_v31 = vsub.f32 %v15222_v33, %v16105_v1  ;;  %v9083_v53 = vand.u32 4294901760, %v15247_v12  ;;  %v6562_v0 = vld [vmem:[#allocation4 + $0x308] sm:$0xff] }
 0x6bf   :  { %8956 = vmatpush.msrb.mxu1 %v14961_v51  ;;  %8991 = vmatpush.msrb.mxu2 %v15156_v17  ;;  %v15277_v51 = vand.u32 4294901760, %v6564_v26  ;;  %v9078_v57 = vsub.f32 %v15234_v47, %v9077_v8  ;;  %v15286_v43 = vsub.f32 %v6566_v13, %v15262_v4  ;;  %v9095_v1 = vand.u32 4294901760, %v15273_v48 }
 0x6c0   :  { %8885 = vmatpush.msrb.mxu0 %v16104_v14  ;;  %9050 = vmatpush.msrb.mxu3 %v9049_v39  ;;  %v9067_v39 = vand.u32 4294901760, %v9066_v35  ;;  %v9089_v14 = vand.u32 4294901760, %v15260_v5  ;;  %v9084_v35 = vsub.f32 %v15247_v12, %v9083_v53  ;;  %v16108_v13 = vand.u32 4294901760, %v14978_v60 }
 0x6c1   :  { %8958 = vmatpush.msrb.mxu1 %v14972_v24  ;;  %8993 = vmatpush.msrb.mxu2 %v15173_v50  ;;  %v15290_v24 = vand.u32 4294901760, %v6562_v0  ;;  %v9079_v11 = vand.u32 4294901760, %v9078_v57 }
 0x6c2   :  { %8889 = vmatpush.msrb.mxu0 %v16106_v3  ;;  %9056 = vmatpush.msrb.mxu3 %v9055_v36  ;;  %v9073_v36 = vand.u32 4294901760, %v9072_v31  ;;  %v9101_v31 = vand.u32 4294901760, %v15286_v43  ;;  %v9085_v60 = vand.u32 4294901760, %v9084_v35  ;;  %v9096_v3 = vsub.f32 %v15273_v48, %v9095_v1 }
 0x6c3   :  { %8960 = vmatpush.msrb.mxu1 %v14992_v9  ;;  %8995 = vmatpush.msrb.mxu2 %v15186_v63  ;;  %v15301_v9 = vsub.f32 %v6564_v26, %v15277_v51  ;;  %v16109_v26 = vand.u32 4294901760, %v14987_v55  ;;  %v16114_v35 = vand.u32 4294901760, %v15052_v62  ;;  %v16118_v62 = vand.u32 4294901760, %v15076_v10 }
 0x6c4   :  { %8893 = vmatpush.msrb.mxu0 %v16107_v2  ;;  %9062 = vmatpush.msrb.mxu3 %v9061_v7  ;;  %v9090_v7 = vsub.f32 %v15260_v5, %v9089_v14  ;;  %v9102_v55 = vsub.f32 %v15286_v43, %v9101_v31  ;;  %v9097_v2 = vand.u32 4294901760, %v9096_v3  ;;  %v16123_v10 = vand.u32 4294901760, %v15098_v18  ;;  %v16127_v18 = vld [vmem:[#allocation23_spill] sm:$0xff] }
 0x6c5   :  { %8962 = vmatpush.msrb.mxu1 %v15006_v23  ;;  %8997 = vmatpush.msrb.mxu2 %v15199_v42  ;;  %v15312_v23 = vsub.f32 %v6562_v0, %v15290_v24 }
 0x6c6   :  { %8897 = vmatpush.msrb.mxu0 %v16108_v13  ;;  %9068 = vmatpush.msrb.mxu3 %v9067_v39  ;;  %v16110_v39 = vand.u32 4294901760, %v15000_v28  ;;  %v9091_v0 = vand.u32 4294901760, %v9090_v7  ;;  %v16116_v13 = vld [vmem:[#allocation27_spill] sm:$0xff]  ;;  %v16120_v7 = vand.u32 4294901760, %v15139_v44 }
 0x6c7   :  { %8964 = vmatpush.msrb.mxu1 %v15018_v52  ;;  %8999 = vmatpush.msrb.mxu2 %v15212_v45  ;;  %v9107_v52 = vand.u32 4294901760, %v15301_v9  ;;  %v9113_v57 = vand.u32 4294901760, %v15312_v23 }
 0x6c8   :  { %8901 = vmatpush.msrb.mxu0 %v16109_v26  ;;  %9074 = vmatpush.msrb.mxu3 %v9073_v36  ;;  %v16112_v36 = vand.u32 4294901760, %v15028_v40  ;;  %v16122_v26 = vand.u32 4294901760, %v15152_v15 }
 0x6c9   :  { %8966 = vmatpush.msrb.mxu1 %v15030_v61  ;;  %9001 = vmatpush.msrb.mxu2 %v15224_v6  ;;  %v16111_v61 = vand.u32 4294901760, %v15016_v54  ;;  %v9108_v28 = vsub.f32 %v15301_v9, %v9107_v52  ;;  %v9114_v54 = vsub.f32 %v15312_v23, %v9113_v57 }
 0x6ca   :  { %8905 = vmatpush.msrb.mxu0 %v16110_v39  ;;  %9080 = vmatpush.msrb.mxu3 %v9079_v11  ;;  %v16119_v11 = vld [vmem:[#allocation24_spill] sm:$0xff] }
 0x6cb   :  { %8968 = vmatpush.msrb.mxu1 %v15042_v46  ;;  %9003 = vmatpush.msrb.mxu2 %v15236_v34  ;;  %v9103_v46 = vand.u32 4294901760, %v9102_v55  ;;  %v9109_v40 = vand.u32 4294901760, %v9108_v28 }
 0x6cc   :  { %8909 = vmatpush.msrb.mxu0 %v16111_v61  ;;  %9086 = vmatpush.msrb.mxu3 %v9085_v60  ;;  %v16124_v60 = vand.u32 4294901760, %v15161_v37 }
 0x6cd   :  { %8970 = vmatpush.msrb.mxu1 %v15054_v25  ;;  %9005 = vmatpush.msrb.mxu2 %v15249_v49  ;;  %v16113_v25 = vand.u32 4294901760, %v15040_v29  ;;  %v16115_v29 = vand.u32 4294901760, %v15064_v16  ;;  %v16121_v16 = vand.u32 4294901760, %v15088_v59  ;;  %v16125_v59 = vld [vmem:[#allocation21_spill] sm:$0xff] }
 0x6ce   :  { %8913 = vmatpush.msrb.mxu0 %v16112_v36  ;;  %9092 = vmatpush.msrb.mxu3 %v9091_v0 }
 0x6cf   :  { %8972 = vmatpush.msrb.mxu1 %v15066_v21  ;;  %9007 = vmatpush.msrb.mxu2 %v15262_v4  ;;  %v9115_v21 = vand.u32 4294901760, %v9114_v54 }
 0x6d0   :  { %8917 = vmatpush.msrb.mxu0 %v16113_v25  ;;  %9098 = vmatpush.msrb.mxu3 %v9097_v2 }
 0x6d1   :  { %8974 = vmatpush.msrb.mxu1 %v15078_v22  ;;  %9009 = vmatpush.msrb.mxu2 %v15277_v51  ;;  %v16117_v22 = vand.u32 4294901760, %v15131_v58 }
 0x6d2   :  { %8921 = vmatpush.msrb.mxu0 %v16114_v35  ;;  %9104 = vmatpush.msrb.mxu3 %v9103_v46 }
 0x6d3   :  { %8976 = vmatmul.f32.vlgmr.msrb.gmra.mxu1 %v16095_v38  ;;  %9011 = vmatpush.msrb.mxu2 %v15290_v24 }
 0x6d4   :  { %9177 = vmatpush.msra.mxu1 %v15114_v32  ;;  %8925 = vmatpush.msrb.mxu0 %v16115_v29 }
 0x6d5   :  { %9110 = vmatpush.msrb.mxu3 %v9109_v40  ;;  %9017 = vmatmul.f32.vlgmr.msrb.gmra.mxu2 %v16116_v13 }
 0x6d6   :  { %9179 = vmatpush.msra.mxu1 %v15122_v19  ;;  %9218 = vmatpush.msra.mxu2 %v16117_v22 }
 0x6d7   :  { %8929 = vmatpush.msrb.mxu0 %v16118_v62  ;;  %9116 = vmatpush.msrb.mxu3 %v9115_v21 }
 0x6d8   :  { %9118 = vmatmul.f32.vlgmr.msrb.gmra.mxu3 %v16119_v11  ;;  %9181 = vmatpush.msra.mxu1 %v15135_v30 }
 0x6d9   :  { %9222 = vmatpush.msra.mxu2 %v16120_v7  ;;  %9285 = vmatpush.msra.mxu3 %v15114_v32  ;;  %v16126_v32 = vand.u32 4294901760, %v16125_v59 }
 0x6da   :  { %8933 = vmatpush.msrb.mxu0 %v16121_v16  ;;  %9183 = vmatpush.msra.mxu1 %v15143_v41 }
 0x6db   :  { %9226 = vmatpush.msra.mxu2 %v16122_v26  ;;  %9287 = vmatpush.msra.mxu3 %v15122_v19  ;;  %v16128_v19 = vand.u32 4294901760, %v16127_v18 }
 0x6dc   :  { %8937 = vmatpush.msrb.mxu0 %v16123_v10  ;;  %9185 = vmatpush.msra.mxu1 %v15147_v56 }
 0x6dd   :  { %8939 = vmatmul.f32.vlgmr.msrb.gmra.mxu0 %v16095_v38  ;;  %9230 = vmatpush.msra.mxu2 %v16124_v60 }
 0x6de   :  { %9124 = vmatpush.msra.mxu0 %v15131_v58  ;;  %9289 = vmatpush.msra.mxu3 %v15135_v30  ;;  %v16129_v58 = vand.u32 4294901760, %v15197_v27  ;;  %v16130_v30 = vand.u32 4294901760, %v15210_v20 }
 0x6df   :  { %9187 = vmatpush.msra.mxu1 %v15156_v17  ;;  %9234 = vmatpush.msra.mxu2 %v16126_v32 }
 0x6e0   :  { %9127 = vmatpush.msra.mxu0 %v15139_v44  ;;  %9291 = vmatpush.msra.mxu3 %v15143_v41  ;;  %v16131_v44 = vand.u32 4294901760, %v15222_v33  ;;  %v6825_v41 = vpop.f32.mrf.mxu3 }
 0x6e1   :  { %9189 = vmatpush.msra.mxu1 %v15173_v50  ;;  %9238 = vmatpush.msra.mxu2 %v16128_v19 }
 0x6e2   :  { %9130 = vmatpush.msra.mxu0 %v15152_v15  ;;  %9293 = vmatpush.msra.mxu3 %v15147_v56 }
 0x6e3   :  { %9191 = vmatpush.msra.mxu1 %v15186_v63  ;;  %9242 = vmatpush.msra.mxu2 %v16129_v58 }
 0x6e4   :  { %9133 = vmatpush.msra.mxu0 %v15161_v37  ;;  %9295 = vmatpush.msra.mxu3 %v15156_v17 }
 0x6e5   :  { %9193 = vmatpush.msra.mxu1 %v15199_v42  ;;  %9246 = vmatpush.msra.mxu2 %v16130_v30 }
 0x6e6   :  { %9136 = vmatpush.msra.mxu0 %v16125_v59  ;;  %9297 = vmatpush.msra.mxu3 %v15173_v50  ;;  %v6786_v50 = vpop.f32.mrf.mxu2 }
 0x6e7   :  { %9195 = vmatpush.msra.mxu1 %v15212_v45  ;;  %9250 = vmatpush.msra.mxu2 %v16131_v44 }
 0x6e8   :  { %9139 = vmatpush.msra.mxu0 %v16127_v18  ;;  %9299 = vmatpush.msra.mxu3 %v15186_v63  ;;  %v6631_v63 = vpop.f32.mrf.mxu0  ;;  %v7073_v38 = vpop.f32.mrf.mxu3 }
 0x6e9   :  { %9197 = vmatpush.msra.mxu1 %v15224_v6  ;;  %9254 = vmatpush.msra.mxu2 %v9077_v8 }
 0x6ea   :  { %9142 = vmatpush.msra.mxu0 %v15197_v27  ;;  %9301 = vmatpush.msra.mxu3 %v15199_v42  ;;  %v16133_v42 = vld [vmem:[#allocation25_spill] sm:$0xff] }
 0x6eb   :  { %9199 = vmatpush.msra.mxu1 %v15236_v34  ;;  %9258 = vmatpush.msra.mxu2 %v9083_v53 }
 0x6ec   :  { %9145 = vmatpush.msra.mxu0 %v15210_v20  ;;  %9303 = vmatpush.msra.mxu3 %v15212_v45  ;;  %v16132_v45 = vld [vmem:[#allocation26_spill] sm:$0xff] }
 0x6ed   :  { %9201 = vmatpush.msra.mxu1 %v15249_v49  ;;  %9262 = vmatpush.msra.mxu2 %v9089_v14 }
 0x6ee   :  { %9148 = vmatpush.msra.mxu0 %v15222_v33  ;;  %9305 = vmatpush.msra.mxu3 %v15224_v6  ;;  %v6732_v6 = vpop.f32.mrf.mxu1  ;;  %v6972_v17 = vpop.f32.mrf.mxu2 }
 0x6ef   :  { %9203 = vmatpush.msra.mxu1 %v15262_v4  ;;  %9266 = vmatpush.msra.mxu2 %v9095_v1 }
 0x6f0   :  { %9151 = vmatpush.msra.mxu0 %v15234_v47  ;;  %9307 = vmatpush.msra.mxu3 %v15236_v34  ;;  %v6894_v56 = vpop.f32.mrf.mxu0  ;;  %v7272_v34 = vpop.f32.mrf.mxu3 }
 0x6f1   :  { %9205 = vmatpush.msra.mxu1 %v15277_v51  ;;  %9270 = vmatpush.msra.mxu2 %v9101_v31 }
 0x6f2   :  { %9154 = vmatpush.msra.mxu0 %v15247_v12  ;;  %9309 = vmatpush.msra.mxu3 %v15249_v49 }
 0x6f3   :  { %9207 = vmatpush.msra.mxu1 %v15290_v24  ;;  %9274 = vmatpush.msra.mxu2 %v9107_v52 }
 0x6f4   :  { %9157 = vmatpush.msra.mxu0 %v15260_v5  ;;  %9311 = vmatpush.msra.mxu3 %v15262_v4 }
 0x6f5   :  { %9211 = vmatmul.f32.vlgmr.msra.gmra.mxu1 %v16132_v45  ;;  %9278 = vmatpush.msra.mxu2 %v9113_v57 }
 0x6f6   :  { %9160 = vmatpush.msra.mxu0 %v15273_v48  ;;  %9313 = vmatpush.msra.mxu3 %v15277_v51  ;;  %v6931_v15 = vpop.f32.mrf.mxu1  ;;  %v7235_v27 = vpop.f32.mrf.mxu2 }
 0x6f7   :  { %9280 = vmatmul.f32.vlgmr.msra.gmra.mxu2 %v16119_v11 }
 0x6f8   :  { %9163 = vmatpush.msra.mxu0 %v15286_v43  ;;  %9315 = vmatpush.msra.mxu3 %v15290_v24  ;;  %v7127_v37 = vpop.f32.mrf.mxu0  ;;  %v7507_v8 = vpop.f32.mrf.mxu3  ;;  %v6733_v43 = vadd.f32 %v6732_v6, %v6631_v63 }
 0x6f9   :  { %9317 = vmatmul.f32.vlgmr.msra.gmra.mxu3 %v16119_v11 }
 0x6fa   :  { %9166 = vmatpush.msra.mxu0 %v15301_v9  ;;  %v6787_v31 = vadd.f32 %v6786_v50, %v6733_v43 }
 0x6fc   :  { %9169 = vmatpush.msra.mxu0 %v15312_v23  ;;  %v6826_v52 = vadd.f32 %v6825_v41, %v6787_v31 }
 0x6fd   :  { %9172 = vmatmul.f32.vlgmr.msra.gmra.mxu0 %v16133_v42 }
 0x6fe   :  { %v7166_v49 = vpop.f32.mrf.mxu1  ;;  %v7468_v47 = vpop.f32.mrf.mxu2  ;;  %v6895_v0 = vadd.f32 %v6894_v56, %v6826_v52 }
 0x700   :  { %v7313_v20 = vpop.f32.mrf.mxu0  ;;  %v7755_v48 = vpop.f32.mrf.mxu3  ;;  %v6932_v2 = vadd.f32 %v6931_v15, %v6895_v0 }
 0x702   :  { %v6973_v36 = vadd.f32 %v6972_v17, %v6932_v2 }
 0x704   :  { %v7074_v25 = vadd.f32 %v7073_v38, %v6973_v36 }
 0x706   :  { %v7414_v33 = vpop.f32.mrf.mxu1  ;;  %v7654_v4 = vpop.f32.mrf.mxu2  ;;  %v7128_v35 = vadd.f32 %v7127_v37, %v7074_v25 }
 0x708   :  { %v7576_v12 = vpop.f32.mrf.mxu0  ;;  %v15449_v1 = vpop.f32.mrf.mxu3  ;;  %v7167_v22 = vadd.f32 %v7166_v49, %v7128_v35 }
 0x70a   :  { %v7236_v7 = vadd.f32 %v7235_v27, %v7167_v22 }
 0x70c   :  { %v7273_v10 = vadd.f32 %v7272_v34, %v7236_v7 }
 0x70e   :  { %v7613_v5 = vpop.f32.mrf.mxu1  ;;  %v15447_v14 = vpop.f32.mrf.mxu2  ;;  %v7314_v59 = vadd.f32 %v7313_v20, %v7273_v10 }
 0x710   :  { %v7809_v53 = vpop.f32.mrf.mxu0  ;;  %v8189_v55 = vpop.f32.mrf.mxu3  ;;  %v7415_v58 = vadd.f32 %v7414_v33, %v7314_v59 }
 0x712   :  { %v7469_v45 = vadd.f32 %v7468_v47, %v7415_v58 }
 0x714   :  { %v7508_v6 = vadd.f32 %v7507_v8, %v7469_v45 }
 0x716   :  { %v7848_v51 = vpop.f32.mrf.mxu1  ;;  %v8150_v3 = vpop.f32.mrf.mxu2  ;;  %v7577_v41 = vadd.f32 %v7576_v12, %v7508_v6 }
 0x718   :  { %v7995_v24 = vpop.f32.mrf.mxu0  ;;  %v8437_v29 = vpop.f32.mrf.mxu3  ;;  %v7614_v37 = vadd.f32 %v7613_v5, %v7577_v41 }
 0x71a   :  { %v7655_v27 = vadd.f32 %v7654_v4, %v7614_v37 }
 0x71c   :  { %v7756_v43 = vadd.f32 %v7755_v48, %v7655_v27 }
 0x71e   :  { %v8096_v9 = vpop.f32.mrf.mxu1  ;;  %v8336_v40 = vpop.f32.mrf.mxu2  ;;  %v7810_v33 = vadd.f32 %v7809_v53, %v7756_v43 }
 0x71f   :  { %v8097_v23 = vadd.f32 %v8096_v9, %v7995_v24 }
 0x720   :  { %v8258_v57 = vpop.f32.mrf.mxu0  ;;  %v8636_v18 = vpop.f32.mrf.mxu3  ;;  %v7849_v47 = vadd.f32 %v7848_v51, %v7810_v33 }
 0x721   :  { %v8151_v39 = vadd.f32 %v8150_v3, %v8097_v23 }
 0x722   :  { %v7918_v12 = vadd.f32 %v15447_v14, %v7849_v47 }
 0x723   :  { %v8190_v61 = vadd.f32 %v8189_v55, %v8151_v39 }
 0x724   :  { %v7955_v4 = vadd.f32 %v15449_v1, %v7918_v12 }
 0x725   :  { %v8259_v28 = vadd.f32 %v8258_v57, %v8190_v61 }
 0x726   :  { %v8295_v46 = vpop.f32.mrf.mxu1  ;;  %v8599_v60 = vpop.f32.mrf.mxu2 }
 0x727   :  { %v8296_v54 = vadd.f32 %v8295_v46, %v8259_v28 }
 0x728   :  { %v8491_v13 = vpop.f32.mrf.mxu0 }
 0x729   :  { %v8337_v21 = vadd.f32 %v8336_v40, %v8296_v54 }
 0x72b   :  { %v8438_v62 = vadd.f32 %v8437_v29, %v8337_v21 }
 0x72d   :  { %v8492_v11 = vadd.f32 %v8491_v13, %v8438_v62 }
 0x72e   :  { %v8530_v16 = vpop.f32.mrf.mxu1 }
 0x72f   :  { %v8531_v26 = vadd.f32 %v8530_v16, %v8492_v11 }
 0x731   :  { %v8600_v32 = vadd.f32 %v8599_v60, %v8531_v26 }
 0x733   :  { %v8637_v30 = vadd.f32 %v8636_v18, %v8600_v32 }
 0x736   :  { %v8778_v42 = vpop.f32.mrf.mxu1  ;;  %v8832_v50 = vpop.f32.mrf.mxu2 }
 0x738   :  { %v8677_v19 = vpop.f32.mrf.mxu0 }
 0x739   :  { %v8678_v44 = vadd.f32 %v8677_v19, %v8637_v30  ;;  %v8871_v15 = vpop.f32.mrf.mxu3 }
 0x73b   :  { %v8779_v63 = vadd.f32 %v8778_v42, %v8678_v44 }
 0x73d   :  { %v8833_v56 = vadd.f32 %v8832_v50, %v8779_v63 }
 0x73f   :  { %v8872_v38 = vadd.f32 %v8871_v15, %v8833_v56 }
 0x750   :  { %v8977_v20 = vpop.f32.mrf.mxu1 }
 0x758   :  { %v9018_v24 = vpop.f32.mrf.mxu2 }
 0x75a   :  { %v8940_v17 = vpop.f32.mrf.mxu0 }
 0x75b   :  { %v8941_v49 = vadd.f32 %v8940_v17, %v8872_v38  ;;  %v9119_v31 = vpop.f32.mrf.mxu3 }
 0x75d   :  { %v8978_v34 = vadd.f32 %v8977_v20, %v8941_v49 }
 0x75f   :  { %v9019_v9 = vadd.f32 %v9018_v24, %v8978_v34 }
 0x761   :  { %v9120_v23 = vadd.f32 %v9119_v31, %v9019_v9 }
 0x772   :  { %v9212_v52 = vpop.f32.mrf.mxu1 }
 0x77a   :  { %v9173_v3 = vpop.f32.mrf.mxu0  ;;  %v9281_v0 = vpop.f32.mrf.mxu2 }
 0x77b   :  { %v9174_v8 = vadd.f32 %v9173_v3, %v9120_v23 }
 0x77c   :  { %v9318_v55 = vpop.f32.mrf.mxu3 }
 0x77d   :  { %v9213_v39 = vadd.f32 %v9212_v52, %v9174_v8 }
 0x77f   :  { %v9282_v5 = vadd.f32 %v9281_v0, %v9213_v39 }
 0x781   :  { %v9319_v57 = vadd.f32 %v9318_v55, %v9282_v5 }
 0x783   :  { %9345 = vtanh.f32 %v9319_v57 }
 0x784   :  { %9347 = vtanh.f32 %v7955_v4 }
 0x789   :  { %v9346_v48 = vpop.eup %9345 }
 0x78a   :  { %v9325_v53 = vrot.slane %v9346_v48, 6  ;;  %v9348_v61 = vpop.eup %9347 }
 0x78c   :  { %v9326_v51 = vsel %vm403_vm1, %v9348_v61, %v9325_v53 }
 0x78d   :  { %9328 = vst [vmem:[%s15467_s10] sm:$0xf] %v9326_v51 }
 0x78e   :  { %9333 = vsyncpa [#allocation3], 1 }
 0x78f   :  { %9334 = vsyncpa [#allocation5], 1 }

</bundles_post_ra>
